<compile_context>
chip_gen: v7x
topology: tpu7x:2x2x1
jax: 0.10.0
libtpu: 0.0.40
codegen_flags: <defaults>
</compile_context>

<pallas_src>
import functools

import jax
import jax.numpy as jnp
from jax.experimental import pallas as pl
from jax.experimental.pallas import tpu as pltpu

# ----------------------------- config ---------------------------------------
EMBED_DIM = 32
NUM_HEADS = 4
HEAD_DIM = EMBED_DIM // NUM_HEADS
NUM_LAYERS = 2
N_CLASSES = 10
CLS_PAD = 128                                   # lane-dense classifier output width
PATCH_SIZE = 4
IMG_SIZE = 16
IN_CHANNELS = 3
NUM_PATCHES = (IMG_SIZE // PATCH_SIZE) ** 2     # 16
SEQ_LEN = NUM_PATCHES + 1                       # 17 = cls token + patches
PATCH_DIM = IN_CHANNELS * PATCH_SIZE * PATCH_SIZE   # 48
MLP_DIM = EMBED_DIM                             # ReducedTransformer passes mlp_dim=embed_dim
LN_EPS = 1e-5


# ----------------------------- in-kernel helpers -----------------------------
def _layer_norm(x, gamma, beta, eps):
    mu = jnp.mean(x, axis=-1, keepdims=True)
    var = jnp.mean((x - mu) ** 2, axis=-1, keepdims=True)
    return (x - mu) * jax.lax.rsqrt(var + eps) * gamma + beta


def _gelu_exact(x):
    # PyTorch nn.GELU() default = exact erf GELU.  erf implemented with the
    # Abramowitz-Stegun 7.1.26 rational approximation (|err| < 1.5e-7, i.e. at
    # f32 epsilon), built only from exp / mul / add / where which all have
    # guaranteed Mosaic lowerings.
    a1, a2, a3, a4, a5 = 0.254829592, -0.284496736, 1.421413741, -1.453152027, 1.061405429
    p = 0.3275911
    z = x * (2.0 ** -0.5)
    az = jnp.abs(z)
    t = 1.0 / (1.0 + p * az)
    poly = ((((a5 * t + a4) * t + a3) * t + a2) * t + a1) * t
    erf_abs = 1.0 - poly * jnp.exp(-az * az)
    erf_z = jnp.where(z >= 0, erf_abs, -erf_abs)
    return 0.5 * x * (1.0 + erf_z)


# ----------------------------- fused kernel ----------------------------------
def vit_forward_kernel(
    tok_ref,                                   # (B, S, PATCH_DIM); row 0 per batch = zeros (CLS slot)
    convw_ref,                                 # (PATCH_DIM, E)
    embias_ref,                                # (S, E)  row0 = cls+pos[0], rows 1.. = conv_b+pos[1:]
    wqkv_ref, bqkv_ref,                        # (L, E, 3E), (L, 1, 3E)   (Q part pre-scaled by 1/sqrt(Dh))
    wo_ref, bo_ref,                            # (L, E, E), (L, 1, E)
    g1_ref, be1_ref,                           # (L, 1, E)
    w1_ref, b1_ref,                            # (L, E, M), (L, 1, M)
    w2_ref, b2_ref,                            # (L, M, E), (L, 1, E)
    g2_ref, be2_ref,                           # (L, 1, E)
    clsw_ref, clsb_ref,                        # (E, CLS_PAD), (1, CLS_PAD)
    out_ref,                                   # (B, CLS_PAD)
    *, num_layers, num_heads, head_dim,
):
    B, S, P = tok_ref.shape
    E = num_heads * head_dim
    Dh = head_dim

    # ---- patch embedding: conv(k=s=patch) as one 2-D matmul + fused bias ----
    tok2d = tok_ref[...].reshape(B * S, P)
    emb = jnp.dot(tok2d, convw_ref[...], preferred_element_type=jnp.float32)   # (B*S, E)
    x2d = (emb.reshape(B, S, E) + embias_ref[...]).reshape(B * S, E)           # (B*S, E)
    # TODO(synk): embedding / attention / residual dropout are identity (eval mode).

    for l in range(num_layers):                # NUM_LAYERS=2: unrolled at trace time
        # -------- fused QKV projection: one (B*S,E) @ (E,3E) matmul ----------
        qkv = jnp.dot(x2d, wqkv_ref[l], preferred_element_type=jnp.float32) + bqkv_ref[l]
        q3 = qkv[:, :E].reshape(B, S, E)       # (B, S, E)  1/sqrt(Dh) already folded in
        k3 = qkv[:, E:2 * E].reshape(B, S, E)
        v3 = qkv[:, 2 * E:].reshape(B, S, E)

        # -------- per-head attention (heads = contiguous lane slices) --------
        # Only the genuinely per-head part (S x S scores) is batched; no weight
        # broadcasting and no activation replication.  H=4 unrolled at trace time.
        ctx_heads = []
        for h in range(num_heads):
            sl = slice(h * Dh, (h + 1) * Dh)
            qh, kh, vh = q3[..., sl], k3[..., sl], v3[..., sl]                 # (B, S, Dh)
            s_h = jnp.einsum("bqd,bkd->bqk", qh, kh,
                             preferred_element_type=jnp.float32)               # (B, S, S)
            s_h = s_h - jnp.max(s_h, axis=-1, keepdims=True)
            e_h = jnp.exp(s_h)
            a_h = e_h * pl.reciprocal(jnp.sum(e_h, axis=-1, keepdims=True),
                                      approx=True)                             # EUP vrcp
            ctx_heads.append(jnp.einsum("bqk,bkd->bqd", a_h, vh,
                                        preferred_element_type=jnp.float32))   # (B, S, Dh)
        ctx2d = jnp.concatenate(ctx_heads, axis=-1).reshape(B * S, E)          # concat heads

        # -------- output projection: single lane-dense (B*S,E)@(E,E) ---------
        proj = jnp.dot(ctx2d, wo_ref[l], preferred_element_type=jnp.float32) + bo_ref[l]

        # residual + LayerNorm 1 (post-norm)
        x2d = _layer_norm(x2d + proj, g1_ref[l], be1_ref[l], LN_EPS)

        # -------- MLP: Linear -> GELU(exact) -> Linear ------------------------
        h1 = _gelu_exact(jnp.dot(x2d, w1_ref[l], preferred_element_type=jnp.float32)
                         + b1_ref[l])
        h2 = jnp.dot(h1, w2_ref[l], preferred_element_type=jnp.float32) + b2_ref[l]

        # residual + LayerNorm 2
        x2d = _layer_norm(x2d + h2, g2_ref[l], be2_ref[l], LN_EPS)

    # -------- classifier on the CLS token (2-D matmul, lane-padded to 128) ----
    x_cls = x2d.reshape(B, S, E)[:, 0, :]                                      # (B, E)
    logits = jnp.dot(x_cls, clsw_ref[...], preferred_element_type=jnp.float32) + clsb_ref[...]
    out_ref[...] = logits.astype(out_ref.dtype)


# ----------------------------- wrapper ----------------------------------------
def reduced_transformer_forward(x_img, params, *, batch_parallel=None):
    """Full ReducedTransformer forward in ONE pallas_call."""
    B, C, Himg, Wimg = x_img.shape
    ps = PATCH_SIZE
    nh, nw = Himg // ps, Wimg // ps
    # im2col: (B,C,H,W) -> (B, P, C*ps*ps); patch order row-major (h, w),
    # per-patch flatten order (C, ph, pw) to match the PyTorch conv weight layout.
    patches = (
        x_img.reshape(B, C, nh, ps, nw, ps)
        .transpose(0, 2, 4, 1, 3, 5)
        .reshape(B, nh * nw, C * ps * ps)
    )
    # Prepend a zero row per batch for the CLS slot; its embedding (cls token +
    # pos[0], no conv bias) is added inside the kernel via the fused bias.
    tok = jnp.pad(patches, ((0, 0), (1, 0), (0, 0)))                            # (B, S, PATCH_DIM)

    kernel = functools.partial(
        vit_forward_kernel,
        num_layers=NUM_LAYERS, num_heads=NUM_HEADS, head_dim=HEAD_DIM)

    args = (
        tok,
        params["conv_w2d"], params["embias"],
        params["wqkv"], params["bqkv"], params["wo"], params["bo"],
        params["g1"], params["be1"],
        params["w1"], params["b1"], params["w2"], params["b2"],
        params["g2"], params["be2"],
        params["cls_w_pad"], params["cls_b_pad"],
    )
    out_shape = jax.ShapeDtypeStruct((B, CLS_PAD), jnp.float32)

    if batch_parallel is None:
        # v7x has 2 TensorCores per chip; shard independent batch elements
        # across them.  No effect on v5e/v6e (single TC) -> keep gridless there.
        kind = jax.devices()[0].device_kind.lower()
        batch_parallel = ("v7" in kind) and (B > 1)

    if not batch_parallel:
        # Single fused call, no grid: every operand is a whole-array VMEM ref
        # (total weights + activations << 1 MiB, so VMEM is not a concern).
        out = pl.pallas_call(kernel, out_shape=out_shape)(*args)
    else:
        def whole(a):
            n = a.ndim
            def idx(b):
                return (0,) * n
            return pl.BlockSpec(a.shape, idx)

        in_specs = [pl.BlockSpec((1, SEQ_LEN, PATCH_DIM), lambda b: (b, 0, 0))]
        in_specs += [whole(a) for a in args[1:]]
        out = pl.pallas_call(
            kernel,
            out_shape=out_shape,
            grid=(B,),
            in_specs=in_specs,
            out_specs=pl.BlockSpec((1, CLS_PAD), lambda b: (b, 0)),
            compiler_params=pltpu.CompilerParams(dimension_semantics=("parallel",)),
        )(*args)

    return out[:, :N_CLASSES]                                                   # (B, n_classes)


# ----------------------------- params ------------------------------------------
def init_params(key):
    """Kernel-ready parameter layouts (prepared once at init, not per call)."""
    ks = iter(jax.random.split(key, 64))

    def nrm(shape, scale=0.02):
        return scale * jax.random.normal(next(ks), shape, dtype=jnp.float32)

    E, H, Dh, M, L = EMBED_DIM, NUM_HEADS, HEAD_DIM, MLP_DIM, NUM_LAYERS

    conv_w = nrm((E, IN_CHANNELS, PATCH_SIZE, PATCH_SIZE))   # PyTorch conv layout
    conv_b = nrm((1, E))
    cls_token = nrm((1, E), scale=1.0)
    pos_emb = nrm((SEQ_LEN, E), scale=1.0)
    # Fused additive embedding bias: row0 = cls_token + pos[0]; rows 1.. = conv_b + pos[1:].
    embias = jnp.concatenate([cls_token + pos_emb[0:1], conv_b + pos_emb[1:]], axis=0)

    cls_w = nrm((E, N_CLASSES))
    cls_b = nrm((1, N_CLASSES))

    params = {
        "conv_w2d": conv_w.reshape(E, PATCH_DIM).T,          # (PATCH_DIM, E)
        "embias": embias,                                    # (S, E)
        # classifier padded to lane-dense (..., 128); padding sliced off in wrapper
        "cls_w_pad": jnp.pad(cls_w, ((0, 0), (0, CLS_PAD - N_CLASSES))),
        "cls_b_pad": jnp.pad(cls_b, ((0, 0), (0, CLS_PAD - N_CLASSES))),
    }

    qscale = 1.0 / (Dh ** 0.5)                               # folded into Wq / bq
    stacks = {k: [] for k in ("wqkv", "bqkv", "wo", "bo",
                              "g1", "be1", "w1", "b1", "w2", "b2", "g2", "be2")}
    for _ in range(L):
        # weights stored in (in, out) layout (== torch weight.T); head split is
        # over contiguous chunks of the projection OUTPUT dim (torch MHA convention).
        wq, wk, wv = nrm((E, E)), nrm((E, E)), nrm((E, E))
        bq, bk, bv = nrm((1, E)), nrm((1, E)), nrm((1, E))
        layer = dict(
            wqkv=jnp.concatenate([wq * qscale, wk, wv], axis=1),   # (E, 3E)
            bqkv=jnp.concatenate([bq * qscale, bk, bv], axis=1),   # (1, 3E)
            wo=nrm((E, E)), bo=nrm((1, E)),
            g1=jnp.ones((1, E), jnp.float32), be1=jnp.zeros((1, E), jnp.float32),
            w1=nrm((E, M)), b1=nrm((1, M)),
            w2=nrm((M, E)), b2=nrm((1, E)),
            g2=jnp.ones((1, E), jnp.float32), be2=jnp.zeros((1, E), jnp.float32),
        )
        for k2, v2 in layer.items():
            stacks[k2].append(v2)
    params.update({k: jnp.stack(v) for k, v in stacks.items()})   # leading layer axis (L, ...)
    return params


# ----------------------------- main ---------------------------------------------
if __name__ == "__main__":
    key = jax.random.PRNGKey(0)
    kp, kx = jax.random.split(key)
    params = init_params(kp)

    # NCHW input, like PyTorch
    x_img = jax.random.normal(kx, (2, IN_CHANNELS, IMG_SIZE, IMG_SIZE), jnp.float32)

    logits = reduced_transformer_forward(x_img, params)
    logits = jax.block_until_ready(logits)
    assert logits.shape == (2, N_CLASSES)
    assert bool(jnp.all(jnp.isfinite(logits)))
    print("KERNEL_OK")
</pallas_src>

<mosaic_0001>
module attributes {stable_mosaic.version = 11 : i64} {
  func.func @vit_forward_kernel(%arg0: memref<2x17x48xf32, #tpu.memory_space<vmem>>, %arg1: memref<48x32xf32, #tpu.memory_space<vmem>>, %arg2: memref<17x32xf32, #tpu.memory_space<vmem>>, %arg3: memref<2x32x96xf32, #tpu.memory_space<vmem>>, %arg4: memref<2x1x96xf32, #tpu.memory_space<vmem>>, %arg5: memref<2x32x32xf32, #tpu.memory_space<vmem>>, %arg6: memref<2x1x32xf32, #tpu.memory_space<vmem>>, %arg7: memref<2x1x32xf32, #tpu.memory_space<vmem>>, %arg8: memref<2x1x32xf32, #tpu.memory_space<vmem>>, %arg9: memref<2x32x32xf32, #tpu.memory_space<vmem>>, %arg10: memref<2x1x32xf32, #tpu.memory_space<vmem>>, %arg11: memref<2x32x32xf32, #tpu.memory_space<vmem>>, %arg12: memref<2x1x32xf32, #tpu.memory_space<vmem>>, %arg13: memref<2x1x32xf32, #tpu.memory_space<vmem>>, %arg14: memref<2x1x32xf32, #tpu.memory_space<vmem>>, %arg15: memref<32x128xf32, #tpu.memory_space<vmem>>, %arg16: memref<1x128xf32, #tpu.memory_space<vmem>>, %arg17: memref<2x128xf32, #tpu.memory_space<vmem>>) attributes {dimension_semantics = [], scalar_prefetch = 0 : i64, scratch_operands = 0 : i64, tpu.core_type = #tpu.core_type<tc>} {
    %c0 = arith.constant 0 : index
    %c0_0 = arith.constant 0 : index
    %c0_1 = arith.constant 0 : index
    %0 = vector.load %arg0[%c0, %c0_0, %c0_1] : memref<2x17x48xf32, #tpu.memory_space<vmem>>, vector<2x17x48xf32>
    %1 = vector.shape_cast %0 : vector<2x17x48xf32> to vector<34x48xf32>
    %c0_2 = arith.constant 0 : index
    %c0_3 = arith.constant 0 : index
    %2 = vector.load %arg1[%c0_2, %c0_3] : memref<48x32xf32, #tpu.memory_space<vmem>>, vector<48x32xf32>
    %cst = arith.constant dense<0.000000e+00> : vector<34x32xf32>
    %3 = tpu.matmul %1, %2, %cst {dimension_numbers = #tpu.dot_dimension_numbers<[1], [0], [0], [1], [0, 0, 1, 1], [], []>} : vector<34x48xf32>, vector<48x32xf32>, vector<34x32xf32> -> vector<34x32xf32>
    %4 = vector.shape_cast %3 : vector<34x32xf32> to vector<2x17x32xf32>
    %c0_4 = arith.constant 0 : index
    %c0_5 = arith.constant 0 : index
    %5 = vector.load %arg2[%c0_4, %c0_5] : memref<17x32xf32, #tpu.memory_space<vmem>>, vector<17x32xf32>
    %6 = vector.shape_cast %5 : vector<17x32xf32> to vector<1x17x32xf32>
    %7 = vector.broadcast %6 : vector<1x17x32xf32> to vector<2x17x32xf32>
    %8 = arith.addf %4, %7 : vector<2x17x32xf32>
    %9 = vector.shape_cast %8 : vector<2x17x32xf32> to vector<34x32xf32>
    %c0_6 = arith.constant 0 : index
    %c0_7 = arith.constant 0 : index
    %c0_8 = arith.constant 0 : index
    %10 = vector.load %arg3[%c0_6, %c0_7, %c0_8] : memref<2x32x96xf32, #tpu.memory_space<vmem>>, vector<1x32x96xf32>
    %11 = vector.shape_cast %10 : vector<1x32x96xf32> to vector<32x96xf32>
    %cst_9 = arith.constant dense<0.000000e+00> : vector<34x96xf32>
    %12 = tpu.matmul %9, %11, %cst_9 {dimension_numbers = #tpu.dot_dimension_numbers<[1], [0], [0], [1], [0, 0, 1, 1], [], []>} : vector<34x32xf32>, vector<32x96xf32>, vector<34x96xf32> -> vector<34x96xf32>
    %c0_10 = arith.constant 0 : index
    %c0_11 = arith.constant 0 : index
    %c0_12 = arith.constant 0 : index
    %13 = vector.load %arg4[%c0_10, %c0_11, %c0_12] : memref<2x1x96xf32, #tpu.memory_space<vmem>>, vector<1x1x96xf32>
    %14 = vector.shape_cast %13 : vector<1x1x96xf32> to vector<1x96xf32>
    %15 = vector.broadcast %14 : vector<1x96xf32> to vector<34x96xf32>
    %16 = arith.addf %12, %15 : vector<34x96xf32>
    %17 = vector.extract_strided_slice %16 {offsets = [0, 0], sizes = [34, 32], strides = [1, 1]} : vector<34x96xf32> to vector<34x32xf32>
    %18 = vector.shape_cast %17 : vector<34x32xf32> to vector<2x17x32xf32>
    %19 = vector.extract_strided_slice %16 {offsets = [0, 32], sizes = [34, 32], strides = [1, 1]} : vector<34x96xf32> to vector<34x32xf32>
    %20 = vector.shape_cast %19 : vector<34x32xf32> to vector<2x17x32xf32>
    %21 = vector.extract_strided_slice %16 {offsets = [0, 64], sizes = [34, 32], strides = [1, 1]} : vector<34x96xf32> to vector<34x32xf32>
    %22 = vector.shape_cast %21 : vector<34x32xf32> to vector<2x17x32xf32>
    %23 = vector.extract_strided_slice %18 {offsets = [0, 0, 0], sizes = [2, 17, 8], strides = [1, 1, 1]} : vector<2x17x32xf32> to vector<2x17x8xf32>
    %24 = vector.extract_strided_slice %20 {offsets = [0, 0, 0], sizes = [2, 17, 8], strides = [1, 1, 1]} : vector<2x17x32xf32> to vector<2x17x8xf32>
    %25 = vector.extract_strided_slice %22 {offsets = [0, 0, 0], sizes = [2, 17, 8], strides = [1, 1, 1]} : vector<2x17x32xf32> to vector<2x17x8xf32>
    "tpu.trace_start"() <{level = 10 : i32, message = "bqd,bkd->bqk"}> : () -> ()
    %cst_13 = arith.constant dense<0.000000e+00> : vector<2x17x17xf32>
    %26 = tpu.matmul %23, %24, %cst_13 {dimension_numbers = #tpu.dot_dimension_numbers<[2], [2], [1], [1], [0, 0, 0, 1, 1, 1], [0], [0]>} : vector<2x17x8xf32>, vector<2x17x8xf32>, vector<2x17x17xf32> -> vector<2x17x17xf32>
    "tpu.trace_stop"() : () -> ()
    %cst_14 = arith.constant dense<0xFF800000> : vector<2x17xf32>
    %27 = vector.multi_reduction <maximumf>, %26, %cst_14 [2] : vector<2x17x17xf32> to vector<2x17xf32>
    %28 = vector.shape_cast %27 : vector<2x17xf32> to vector<2x17x1xf32>
    %29 = vector.broadcast %28 : vector<2x17x1xf32> to vector<2x17x17xf32>
    %30 = arith.subf %26, %29 : vector<2x17x17xf32>
    %31 = math.exp %30 : vector<2x17x17xf32>
    %cst_15 = arith.constant dense<0.000000e+00> : vector<2x17xf32>
    %32 = vector.multi_reduction <add>, %31, %cst_15 [2] : vector<2x17x17xf32> to vector<2x17xf32>
    %33 = vector.shape_cast %32 : vector<2x17xf32> to vector<2x17x1xf32>
    %34 = tpu.reciprocal %33 {approx = true} : vector<2x17x1xf32> -> vector<2x17x1xf32>
    %35 = vector.broadcast %34 : vector<2x17x1xf32> to vector<2x17x17xf32>
    %36 = arith.mulf %31, %35 : vector<2x17x17xf32>
    "tpu.trace_start"() <{level = 10 : i32, message = "bqk,bkd->bqd"}> : () -> ()
    %cst_16 = arith.constant dense<0.000000e+00> : vector<2x17x8xf32>
    %37 = tpu.matmul %36, %25, %cst_16 {dimension_numbers = #tpu.dot_dimension_numbers<[2], [1], [1], [2], [0, 0, 0, 1, 1, 2], [0], [0]>} : vector<2x17x17xf32>, vector<2x17x8xf32>, vector<2x17x8xf32> -> vector<2x17x8xf32>
    "tpu.trace_stop"() : () -> ()
    %38 = vector.extract_strided_slice %18 {offsets = [0, 0, 8], sizes = [2, 17, 8], strides = [1, 1, 1]} : vector<2x17x32xf32> to vector<2x17x8xf32>
    %39 = vector.extract_strided_slice %20 {offsets = [0, 0, 8], sizes = [2, 17, 8], strides = [1, 1, 1]} : vector<2x17x32xf32> to vector<2x17x8xf32>
    %40 = vector.extract_strided_slice %22 {offsets = [0, 0, 8], sizes = [2, 17, 8], strides = [1, 1, 1]} : vector<2x17x32xf32> to vector<2x17x8xf32>
    "tpu.trace_start"() <{level = 10 : i32, message = "bqd,bkd->bqk"}> : () -> ()
    %cst_17 = arith.constant dense<0.000000e+00> : vector<2x17x17xf32>
    %41 = tpu.matmul %38, %39, %cst_17 {dimension_numbers = #tpu.dot_dimension_numbers<[2], [2], [1], [1], [0, 0, 0, 1, 1, 1], [0], [0]>} : vector<2x17x8xf32>, vector<2x17x8xf32>, vector<2x17x17xf32> -> vector<2x17x17xf32>
    "tpu.trace_stop"() : () -> ()
    %cst_18 = arith.constant dense<0xFF800000> : vector<2x17xf32>
    %42 = vector.multi_reduction <maximumf>, %41, %cst_18 [2] : vector<2x17x17xf32> to vector<2x17xf32>
    %43 = vector.shape_cast %42 : vector<2x17xf32> to vector<2x17x1xf32>
    %44 = vector.broadcast %43 : vector<2x17x1xf32> to vector<2x17x17xf32>
    %45 = arith.subf %41, %44 : vector<2x17x17xf32>
    %46 = math.exp %45 : vector<2x17x17xf32>
    %cst_19 = arith.constant dense<0.000000e+00> : vector<2x17xf32>
    %47 = vector.multi_reduction <add>, %46, %cst_19 [2] : vector<2x17x17xf32> to vector<2x17xf32>
    %48 = vector.shape_cast %47 : vector<2x17xf32> to vector<2x17x1xf32>
    %49 = tpu.reciprocal %48 {approx = true} : vector<2x17x1xf32> -> vector<2x17x1xf32>
    %50 = vector.broadcast %49 : vector<2x17x1xf32> to vector<2x17x17xf32>
    %51 = arith.mulf %46, %50 : vector<2x17x17xf32>
    "tpu.trace_start"() <{level = 10 : i32, message = "bqk,bkd->bqd"}> : () -> ()
    %cst_20 = arith.constant dense<0.000000e+00> : vector<2x17x8xf32>
    %52 = tpu.matmul %51, %40, %cst_20 {dimension_numbers = #tpu.dot_dimension_numbers<[2], [1], [1], [2], [0, 0, 0, 1, 1, 2], [0], [0]>} : vector<2x17x17xf32>, vector<2x17x8xf32>, vector<2x17x8xf32> -> vector<2x17x8xf32>
    "tpu.trace_stop"() : () -> ()
    %53 = vector.extract_strided_slice %18 {offsets = [0, 0, 16], sizes = [2, 17, 8], strides = [1, 1, 1]} : vector<2x17x32xf32> to vector<2x17x8xf32>
    %54 = vector.extract_strided_slice %20 {offsets = [0, 0, 16], sizes = [2, 17, 8], strides = [1, 1, 1]} : vector<2x17x32xf32> to vector<2x17x8xf32>
    %55 = vector.extract_strided_slice %22 {offsets = [0, 0, 16], sizes = [2, 17, 8], strides = [1, 1, 1]} : vector<2x17x32xf32> to vector<2x17x8xf32>
    "tpu.trace_start"() <{level = 10 : i32, message = "bqd,bkd->bqk"}> : () -> ()
    %cst_21 = arith.constant dense<0.000000e+00> : vector<2x17x17xf32>
    %56 = tpu.matmul %53, %54, %cst_21 {dimension_numbers = #tpu.dot_dimension_numbers<[2], [2], [1], [1], [0, 0, 0, 1, 1, 1], [0], [0]>} : vector<2x17x8xf32>, vector<2x17x8xf32>, vector<2x17x17xf32> -> vector<2x17x17xf32>
    "tpu.trace_stop"() : () -> ()
    %cst_22 = arith.constant dense<0xFF800000> : vector<2x17xf32>
    %57 = vector.multi_reduction <maximumf>, %56, %cst_22 [2] : vector<2x17x17xf32> to vector<2x17xf32>
    %58 = vector.shape_cast %57 : vector<2x17xf32> to vector<2x17x1xf32>
    %59 = vector.broadcast %58 : vector<2x17x1xf32> to vector<2x17x17xf32>
    %60 = arith.subf %56, %59 : vector<2x17x17xf32>
    %61 = math.exp %60 : vector<2x17x17xf32>
    %cst_23 = arith.constant dense<0.000000e+00> : vector<2x17xf32>
    %62 = vector.multi_reduction <add>, %61, %cst_23 [2] : vector<2x17x17xf32> to vector<2x17xf32>
    %63 = vector.shape_cast %62 : vector<2x17xf32> to vector<2x17x1xf32>
    %64 = tpu.reciprocal %63 {approx = true} : vector<2x17x1xf32> -> vector<2x17x1xf32>
    %65 = vector.broadcast %64 : vector<2x17x1xf32> to vector<2x17x17xf32>
    %66 = arith.mulf %61, %65 : vector<2x17x17xf32>
    "tpu.trace_start"() <{level = 10 : i32, message = "bqk,bkd->bqd"}> : () -> ()
    %cst_24 = arith.constant dense<0.000000e+00> : vector<2x17x8xf32>
    %67 = tpu.matmul %66, %55, %cst_24 {dimension_numbers = #tpu.dot_dimension_numbers<[2], [1], [1], [2], [0, 0, 0, 1, 1, 2], [0], [0]>} : vector<2x17x17xf32>, vector<2x17x8xf32>, vector<2x17x8xf32> -> vector<2x17x8xf32>
    "tpu.trace_stop"() : () -> ()
    %68 = vector.extract_strided_slice %18 {offsets = [0, 0, 24], sizes = [2, 17, 8], strides = [1, 1, 1]} : vector<2x17x32xf32> to vector<2x17x8xf32>
    %69 = vector.extract_strided_slice %20 {offsets = [0, 0, 24], sizes = [2, 17, 8], strides = [1, 1, 1]} : vector<2x17x32xf32> to vector<2x17x8xf32>
    %70 = vector.extract_strided_slice %22 {offsets = [0, 0, 24], sizes = [2, 17, 8], strides = [1, 1, 1]} : vector<2x17x32xf32> to vector<2x17x8xf32>
    "tpu.trace_start"() <{level = 10 : i32, message = "bqd,bkd->bqk"}> : () -> ()
    %cst_25 = arith.constant dense<0.000000e+00> : vector<2x17x17xf32>
    %71 = tpu.matmul %68, %69, %cst_25 {dimension_numbers = #tpu.dot_dimension_numbers<[2], [2], [1], [1], [0, 0, 0, 1, 1, 1], [0], [0]>} : vector<2x17x8xf32>, vector<2x17x8xf32>, vector<2x17x17xf32> -> vector<2x17x17xf32>
    "tpu.trace_stop"() : () -> ()
    %cst_26 = arith.constant dense<0xFF800000> : vector<2x17xf32>
    %72 = vector.multi_reduction <maximumf>, %71, %cst_26 [2] : vector<2x17x17xf32> to vector<2x17xf32>
    %73 = vector.shape_cast %72 : vector<2x17xf32> to vector<2x17x1xf32>
    %74 = vector.broadcast %73 : vector<2x17x1xf32> to vector<2x17x17xf32>
    %75 = arith.subf %71, %74 : vector<2x17x17xf32>
    %76 = math.exp %75 : vector<2x17x17xf32>
    %cst_27 = arith.constant dense<0.000000e+00> : vector<2x17xf32>
    %77 = vector.multi_reduction <add>, %76, %cst_27 [2] : vector<2x17x17xf32> to vector<2x17xf32>
    %78 = vector.shape_cast %77 : vector<2x17xf32> to vector<2x17x1xf32>
    %79 = tpu.reciprocal %78 {approx = true} : vector<2x17x1xf32> -> vector<2x17x1xf32>
    %80 = vector.broadcast %79 : vector<2x17x1xf32> to vector<2x17x17xf32>
    %81 = arith.mulf %76, %80 : vector<2x17x17xf32>
    "tpu.trace_start"() <{level = 10 : i32, message = "bqk,bkd->bqd"}> : () -> ()
    %cst_28 = arith.constant dense<0.000000e+00> : vector<2x17x8xf32>
    %82 = tpu.matmul %81, %70, %cst_28 {dimension_numbers = #tpu.dot_dimension_numbers<[2], [1], [1], [2], [0, 0, 0, 1, 1, 2], [0], [0]>} : vector<2x17x17xf32>, vector<2x17x8xf32>, vector<2x17x8xf32> -> vector<2x17x8xf32>
    "tpu.trace_stop"() : () -> ()
    %83 = tpu.concatenate %37, %52, %67, %82 in 2 : vector<2x17x8xf32>, vector<2x17x8xf32>, vector<2x17x8xf32>, vector<2x17x8xf32> -> vector<2x17x32xf32>
    %84 = vector.shape_cast %83 : vector<2x17x32xf32> to vector<34x32xf32>
    %c0_29 = arith.constant 0 : index
    %c0_30 = arith.constant 0 : index
    %c0_31 = arith.constant 0 : index
    %85 = vector.load %arg5[%c0_29, %c0_30, %c0_31] : memref<2x32x32xf32, #tpu.memory_space<vmem>>, vector<1x32x32xf32>
    %86 = vector.shape_cast %85 : vector<1x32x32xf32> to vector<32x32xf32>
    %cst_32 = arith.constant dense<0.000000e+00> : vector<34x32xf32>
    %87 = tpu.matmul %84, %86, %cst_32 {dimension_numbers = #tpu.dot_dimension_numbers<[1], [0], [0], [1], [0, 0, 1, 1], [], []>} : vector<34x32xf32>, vector<32x32xf32>, vector<34x32xf32> -> vector<34x32xf32>
    %c0_33 = arith.constant 0 : index
    %c0_34 = arith.constant 0 : index
    %c0_35 = arith.constant 0 : index
    %88 = vector.load %arg6[%c0_33, %c0_34, %c0_35] : memref<2x1x32xf32, #tpu.memory_space<vmem>>, vector<1x1x32xf32>
    %89 = vector.shape_cast %88 : vector<1x1x32xf32> to vector<1x32xf32>
    %90 = vector.broadcast %89 : vector<1x32xf32> to vector<34x32xf32>
    %91 = arith.addf %87, %90 : vector<34x32xf32>
    %92 = arith.addf %9, %91 : vector<34x32xf32>
    %c0_36 = arith.constant 0 : index
    %c0_37 = arith.constant 0 : index
    %c0_38 = arith.constant 0 : index
    %93 = vector.load %arg7[%c0_36, %c0_37, %c0_38] : memref<2x1x32xf32, #tpu.memory_space<vmem>>, vector<1x1x32xf32>
    %94 = vector.shape_cast %93 : vector<1x1x32xf32> to vector<1x32xf32>
    %c0_39 = arith.constant 0 : index
    %c0_40 = arith.constant 0 : index
    %c0_41 = arith.constant 0 : index
    %95 = vector.load %arg8[%c0_39, %c0_40, %c0_41] : memref<2x1x32xf32, #tpu.memory_space<vmem>>, vector<1x1x32xf32>
    %96 = vector.shape_cast %95 : vector<1x1x32xf32> to vector<1x32xf32>
    %cst_42 = arith.constant dense<0.000000e+00> : vector<34xf32>
    %97 = vector.multi_reduction <add>, %92, %cst_42 [1] : vector<34x32xf32> to vector<34xf32>
    %98 = vector.shape_cast %97 : vector<34xf32> to vector<34x1xf32>
    %cst_43 = arith.constant 3.200000e+01 : f32
    %99 = vector.broadcast %cst_43 : f32 to vector<34x1xf32>
    %100 = arith.divf %98, %99 : vector<34x1xf32>
    %101 = vector.broadcast %100 : vector<34x1xf32> to vector<34x32xf32>
    %102 = arith.subf %92, %101 : vector<34x32xf32>
    %103 = arith.mulf %102, %102 : vector<34x32xf32>
    %cst_44 = arith.constant dense<0.000000e+00> : vector<34xf32>
    %104 = vector.multi_reduction <add>, %103, %cst_44 [1] : vector<34x32xf32> to vector<34xf32>
    %105 = vector.shape_cast %104 : vector<34xf32> to vector<34x1xf32>
    %cst_45 = arith.constant 3.200000e+01 : f32
    %106 = vector.broadcast %cst_45 : f32 to vector<34x1xf32>
    %107 = arith.divf %105, %106 : vector<34x1xf32>
    %108 = vector.broadcast %100 : vector<34x1xf32> to vector<34x32xf32>
    %109 = arith.subf %92, %108 : vector<34x32xf32>
    %cst_46 = arith.constant 9.99999974E-6 : f32
    %110 = vector.broadcast %cst_46 : f32 to vector<34x1xf32>
    %111 = arith.addf %107, %110 : vector<34x1xf32>
    %112 = math.rsqrt %111 : vector<34x1xf32>
    %113 = vector.broadcast %112 : vector<34x1xf32> to vector<34x32xf32>
    %114 = arith.mulf %109, %113 : vector<34x32xf32>
    %115 = vector.broadcast %94 : vector<1x32xf32> to vector<34x32xf32>
    %116 = arith.mulf %114, %115 : vector<34x32xf32>
    %117 = vector.broadcast %96 : vector<1x32xf32> to vector<34x32xf32>
    %118 = arith.addf %116, %117 : vector<34x32xf32>
    %c0_47 = arith.constant 0 : index
    %c0_48 = arith.constant 0 : index
    %c0_49 = arith.constant 0 : index
    %119 = vector.load %arg9[%c0_47, %c0_48, %c0_49] : memref<2x32x32xf32, #tpu.memory_space<vmem>>, vector<1x32x32xf32>
    %120 = vector.shape_cast %119 : vector<1x32x32xf32> to vector<32x32xf32>
    %cst_50 = arith.constant dense<0.000000e+00> : vector<34x32xf32>
    %121 = tpu.matmul %118, %120, %cst_50 {dimension_numbers = #tpu.dot_dimension_numbers<[1], [0], [0], [1], [0, 0, 1, 1], [], []>} : vector<34x32xf32>, vector<32x32xf32>, vector<34x32xf32> -> vector<34x32xf32>
    %c0_51 = arith.constant 0 : index
    %c0_52 = arith.constant 0 : index
    %c0_53 = arith.constant 0 : index
    %122 = vector.load %arg10[%c0_51, %c0_52, %c0_53] : memref<2x1x32xf32, #tpu.memory_space<vmem>>, vector<1x1x32xf32>
    %123 = vector.shape_cast %122 : vector<1x1x32xf32> to vector<1x32xf32>
    %124 = vector.broadcast %123 : vector<1x32xf32> to vector<34x32xf32>
    %125 = arith.addf %121, %124 : vector<34x32xf32>
    %cst_54 = arith.constant 0.707106769 : f32
    %126 = vector.broadcast %cst_54 : f32 to vector<34x32xf32>
    %127 = arith.mulf %125, %126 : vector<34x32xf32>
    %128 = math.absf %127 : vector<34x32xf32>
    %cst_55 = arith.constant 0.327591091 : f32
    %129 = vector.broadcast %cst_55 : f32 to vector<34x32xf32>
    %130 = arith.mulf %129, %128 : vector<34x32xf32>
    %cst_56 = arith.constant 1.000000e+00 : f32
    %131 = vector.broadcast %cst_56 : f32 to vector<34x32xf32>
    %132 = arith.addf %131, %130 : vector<34x32xf32>
    %cst_57 = arith.constant 1.000000e+00 : f32
    %133 = vector.broadcast %cst_57 : f32 to vector<34x32xf32>
    %134 = arith.divf %133, %132 : vector<34x32xf32>
    %cst_58 = arith.constant 1.06140542 : f32
    %135 = vector.broadcast %cst_58 : f32 to vector<34x32xf32>
    %136 = arith.mulf %135, %134 : vector<34x32xf32>
    %cst_59 = arith.constant -1.45315206 : f32
    %137 = vector.broadcast %cst_59 : f32 to vector<34x32xf32>
    %138 = arith.addf %136, %137 : vector<34x32xf32>
    %139 = arith.mulf %138, %134 : vector<34x32xf32>
    %cst_60 = arith.constant 1.42141378 : f32
    %140 = vector.broadcast %cst_60 : f32 to vector<34x32xf32>
    %141 = arith.addf %139, %140 : vector<34x32xf32>
    %142 = arith.mulf %141, %134 : vector<34x32xf32>
    %cst_61 = arith.constant -0.284496725 : f32
    %143 = vector.broadcast %cst_61 : f32 to vector<34x32xf32>
    %144 = arith.addf %142, %143 : vector<34x32xf32>
    %145 = arith.mulf %144, %134 : vector<34x32xf32>
    %cst_62 = arith.constant 0.254829586 : f32
    %146 = vector.broadcast %cst_62 : f32 to vector<34x32xf32>
    %147 = arith.addf %145, %146 : vector<34x32xf32>
    %148 = arith.mulf %147, %134 : vector<34x32xf32>
    %cst_63 = arith.constant 0.000000e+00 : f32
    %149 = vector.broadcast %cst_63 : f32 to vector<34x32xf32>
    %150 = arith.subf %149, %128 : vector<34x32xf32>
    %151 = arith.mulf %150, %128 : vector<34x32xf32>
    %152 = math.exp %151 : vector<34x32xf32>
    %153 = arith.mulf %148, %152 : vector<34x32xf32>
    %cst_64 = arith.constant 1.000000e+00 : f32
    %154 = vector.broadcast %cst_64 : f32 to vector<34x32xf32>
    %155 = arith.subf %154, %153 : vector<34x32xf32>
    %cst_65 = arith.constant 0.000000e+00 : f32
    %156 = vector.broadcast %cst_65 : f32 to vector<34x32xf32>
    %157 = arith.cmpf oge, %127, %156 : vector<34x32xf32>
    %cst_66 = arith.constant 0.000000e+00 : f32
    %158 = vector.broadcast %cst_66 : f32 to vector<34x32xf32>
    %159 = arith.subf %158, %155 : vector<34x32xf32>
    %160 = arith.select %157, %155, %159 : vector<34x32xi1>, vector<34x32xf32>
    %cst_67 = arith.constant 5.000000e-01 : f32
    %161 = vector.broadcast %cst_67 : f32 to vector<34x32xf32>
    %162 = arith.mulf %161, %125 : vector<34x32xf32>
    %cst_68 = arith.constant 1.000000e+00 : f32
    %163 = vector.broadcast %cst_68 : f32 to vector<34x32xf32>
    %164 = arith.addf %163, %160 : vector<34x32xf32>
    %165 = arith.mulf %162, %164 : vector<34x32xf32>
    %c0_69 = arith.constant 0 : index
    %c0_70 = arith.constant 0 : index
    %c0_71 = arith.constant 0 : index
    %166 = vector.load %arg11[%c0_69, %c0_70, %c0_71] : memref<2x32x32xf32, #tpu.memory_space<vmem>>, vector<1x32x32xf32>
    %167 = vector.shape_cast %166 : vector<1x32x32xf32> to vector<32x32xf32>
    %cst_72 = arith.constant dense<0.000000e+00> : vector<34x32xf32>
    %168 = tpu.matmul %165, %167, %cst_72 {dimension_numbers = #tpu.dot_dimension_numbers<[1], [0], [0], [1], [0, 0, 1, 1], [], []>} : vector<34x32xf32>, vector<32x32xf32>, vector<34x32xf32> -> vector<34x32xf32>
    %c0_73 = arith.constant 0 : index
    %c0_74 = arith.constant 0 : index
    %c0_75 = arith.constant 0 : index
    %169 = vector.load %arg12[%c0_73, %c0_74, %c0_75] : memref<2x1x32xf32, #tpu.memory_space<vmem>>, vector<1x1x32xf32>
    %170 = vector.shape_cast %169 : vector<1x1x32xf32> to vector<1x32xf32>
    %171 = vector.broadcast %170 : vector<1x32xf32> to vector<34x32xf32>
    %172 = arith.addf %168, %171 : vector<34x32xf32>
    %173 = arith.addf %118, %172 : vector<34x32xf32>
    %c0_76 = arith.constant 0 : index
    %c0_77 = arith.constant 0 : index
    %c0_78 = arith.constant 0 : index
    %174 = vector.load %arg13[%c0_76, %c0_77, %c0_78] : memref<2x1x32xf32, #tpu.memory_space<vmem>>, vector<1x1x32xf32>
    %175 = vector.shape_cast %174 : vector<1x1x32xf32> to vector<1x32xf32>
    %c0_79 = arith.constant 0 : index
    %c0_80 = arith.constant 0 : index
    %c0_81 = arith.constant 0 : index
    %176 = vector.load %arg14[%c0_79, %c0_80, %c0_81] : memref<2x1x32xf32, #tpu.memory_space<vmem>>, vector<1x1x32xf32>
    %177 = vector.shape_cast %176 : vector<1x1x32xf32> to vector<1x32xf32>
    %cst_82 = arith.constant dense<0.000000e+00> : vector<34xf32>
    %178 = vector.multi_reduction <add>, %173, %cst_82 [1] : vector<34x32xf32> to vector<34xf32>
    %179 = vector.shape_cast %178 : vector<34xf32> to vector<34x1xf32>
    %cst_83 = arith.constant 3.200000e+01 : f32
    %180 = vector.broadcast %cst_83 : f32 to vector<34x1xf32>
    %181 = arith.divf %179, %180 : vector<34x1xf32>
    %182 = vector.broadcast %181 : vector<34x1xf32> to vector<34x32xf32>
    %183 = arith.subf %173, %182 : vector<34x32xf32>
    %184 = arith.mulf %183, %183 : vector<34x32xf32>
    %cst_84 = arith.constant dense<0.000000e+00> : vector<34xf32>
    %185 = vector.multi_reduction <add>, %184, %cst_84 [1] : vector<34x32xf32> to vector<34xf32>
    %186 = vector.shape_cast %185 : vector<34xf32> to vector<34x1xf32>
    %cst_85 = arith.constant 3.200000e+01 : f32
    %187 = vector.broadcast %cst_85 : f32 to vector<34x1xf32>
    %188 = arith.divf %186, %187 : vector<34x1xf32>
    %189 = vector.broadcast %181 : vector<34x1xf32> to vector<34x32xf32>
    %190 = arith.subf %173, %189 : vector<34x32xf32>
    %cst_86 = arith.constant 9.99999974E-6 : f32
    %191 = vector.broadcast %cst_86 : f32 to vector<34x1xf32>
    %192 = arith.addf %188, %191 : vector<34x1xf32>
    %193 = math.rsqrt %192 : vector<34x1xf32>
    %194 = vector.broadcast %193 : vector<34x1xf32> to vector<34x32xf32>
    %195 = arith.mulf %190, %194 : vector<34x32xf32>
    %196 = vector.broadcast %175 : vector<1x32xf32> to vector<34x32xf32>
    %197 = arith.mulf %195, %196 : vector<34x32xf32>
    %198 = vector.broadcast %177 : vector<1x32xf32> to vector<34x32xf32>
    %199 = arith.addf %197, %198 : vector<34x32xf32>
    %c1 = arith.constant 1 : index
    %c0_87 = arith.constant 0 : index
    %c0_88 = arith.constant 0 : index
    %200 = vector.load %arg3[%c1, %c0_87, %c0_88] : memref<2x32x96xf32, #tpu.memory_space<vmem>>, vector<1x32x96xf32>
    %201 = vector.shape_cast %200 : vector<1x32x96xf32> to vector<32x96xf32>
    %cst_89 = arith.constant dense<0.000000e+00> : vector<34x96xf32>
    %202 = tpu.matmul %199, %201, %cst_89 {dimension_numbers = #tpu.dot_dimension_numbers<[1], [0], [0], [1], [0, 0, 1, 1], [], []>} : vector<34x32xf32>, vector<32x96xf32>, vector<34x96xf32> -> vector<34x96xf32>
    %c1_90 = arith.constant 1 : index
    %c0_91 = arith.constant 0 : index
    %c0_92 = arith.constant 0 : index
    %203 = vector.load %arg4[%c1_90, %c0_91, %c0_92] : memref<2x1x96xf32, #tpu.memory_space<vmem>>, vector<1x1x96xf32>
    %204 = vector.shape_cast %203 : vector<1x1x96xf32> to vector<1x96xf32>
    %205 = vector.broadcast %204 : vector<1x96xf32> to vector<34x96xf32>
    %206 = arith.addf %202, %205 : vector<34x96xf32>
    %207 = vector.extract_strided_slice %206 {offsets = [0, 0], sizes = [34, 32], strides = [1, 1]} : vector<34x96xf32> to vector<34x32xf32>
    %208 = vector.shape_cast %207 : vector<34x32xf32> to vector<2x17x32xf32>
    %209 = vector.extract_strided_slice %206 {offsets = [0, 32], sizes = [34, 32], strides = [1, 1]} : vector<34x96xf32> to vector<34x32xf32>
    %210 = vector.shape_cast %209 : vector<34x32xf32> to vector<2x17x32xf32>
    %211 = vector.extract_strided_slice %206 {offsets = [0, 64], sizes = [34, 32], strides = [1, 1]} : vector<34x96xf32> to vector<34x32xf32>
    %212 = vector.shape_cast %211 : vector<34x32xf32> to vector<2x17x32xf32>
    %213 = vector.extract_strided_slice %208 {offsets = [0, 0, 0], sizes = [2, 17, 8], strides = [1, 1, 1]} : vector<2x17x32xf32> to vector<2x17x8xf32>
    %214 = vector.extract_strided_slice %210 {offsets = [0, 0, 0], sizes = [2, 17, 8], strides = [1, 1, 1]} : vector<2x17x32xf32> to vector<2x17x8xf32>
    %215 = vector.extract_strided_slice %212 {offsets = [0, 0, 0], sizes = [2, 17, 8], strides = [1, 1, 1]} : vector<2x17x32xf32> to vector<2x17x8xf32>
    "tpu.trace_start"() <{level = 10 : i32, message = "bqd,bkd->bqk"}> : () -> ()
    %cst_93 = arith.constant dense<0.000000e+00> : vector<2x17x17xf32>
    %216 = tpu.matmul %213, %214, %cst_93 {dimension_numbers = #tpu.dot_dimension_numbers<[2], [2], [1], [1], [0, 0, 0, 1, 1, 1], [0], [0]>} : vector<2x17x8xf32>, vector<2x17x8xf32>, vector<2x17x17xf32> -> vector<2x17x17xf32>
    "tpu.trace_stop"() : () -> ()
    %cst_94 = arith.constant dense<0xFF800000> : vector<2x17xf32>
    %217 = vector.multi_reduction <maximumf>, %216, %cst_94 [2] : vector<2x17x17xf32> to vector<2x17xf32>
    %218 = vector.shape_cast %217 : vector<2x17xf32> to vector<2x17x1xf32>
    %219 = vector.broadcast %218 : vector<2x17x1xf32> to vector<2x17x17xf32>
    %220 = arith.subf %216, %219 : vector<2x17x17xf32>
    %221 = math.exp %220 : vector<2x17x17xf32>
    %cst_95 = arith.constant dense<0.000000e+00> : vector<2x17xf32>
    %222 = vector.multi_reduction <add>, %221, %cst_95 [2] : vector<2x17x17xf32> to vector<2x17xf32>
    %223 = vector.shape_cast %222 : vector<2x17xf32> to vector<2x17x1xf32>
    %224 = tpu.reciprocal %223 {approx = true} : vector<2x17x1xf32> -> vector<2x17x1xf32>
    %225 = vector.broadcast %224 : vector<2x17x1xf32> to vector<2x17x17xf32>
    %226 = arith.mulf %221, %225 : vector<2x17x17xf32>
    "tpu.trace_start"() <{level = 10 : i32, message = "bqk,bkd->bqd"}> : () -> ()
    %cst_96 = arith.constant dense<0.000000e+00> : vector<2x17x8xf32>
    %227 = tpu.matmul %226, %215, %cst_96 {dimension_numbers = #tpu.dot_dimension_numbers<[2], [1], [1], [2], [0, 0, 0, 1, 1, 2], [0], [0]>} : vector<2x17x17xf32>, vector<2x17x8xf32>, vector<2x17x8xf32> -> vector<2x17x8xf32>
    "tpu.trace_stop"() : () -> ()
    %228 = vector.extract_strided_slice %208 {offsets = [0, 0, 8], sizes = [2, 17, 8], strides = [1, 1, 1]} : vector<2x17x32xf32> to vector<2x17x8xf32>
    %229 = vector.extract_strided_slice %210 {offsets = [0, 0, 8], sizes = [2, 17, 8], strides = [1, 1, 1]} : vector<2x17x32xf32> to vector<2x17x8xf32>
    %230 = vector.extract_strided_slice %212 {offsets = [0, 0, 8], sizes = [2, 17, 8], strides = [1, 1, 1]} : vector<2x17x32xf32> to vector<2x17x8xf32>
    "tpu.trace_start"() <{level = 10 : i32, message = "bqd,bkd->bqk"}> : () -> ()
    %cst_97 = arith.constant dense<0.000000e+00> : vector<2x17x17xf32>
    %231 = tpu.matmul %228, %229, %cst_97 {dimension_numbers = #tpu.dot_dimension_numbers<[2], [2], [1], [1], [0, 0, 0, 1, 1, 1], [0], [0]>} : vector<2x17x8xf32>, vector<2x17x8xf32>, vector<2x17x17xf32> -> vector<2x17x17xf32>
    "tpu.trace_stop"() : () -> ()
    %cst_98 = arith.constant dense<0xFF800000> : vector<2x17xf32>
    %232 = vector.multi_reduction <maximumf>, %231, %cst_98 [2] : vector<2x17x17xf32> to vector<2x17xf32>
    %233 = vector.shape_cast %232 : vector<2x17xf32> to vector<2x17x1xf32>
    %234 = vector.broadcast %233 : vector<2x17x1xf32> to vector<2x17x17xf32>
    %235 = arith.subf %231, %234 : vector<2x17x17xf32>
    %236 = math.exp %235 : vector<2x17x17xf32>
    %cst_99 = arith.constant dense<0.000000e+00> : vector<2x17xf32>
    %237 = vector.multi_reduction <add>, %236, %cst_99 [2] : vector<2x17x17xf32> to vector<2x17xf32>
    %238 = vector.shape_cast %237 : vector<2x17xf32> to vector<2x17x1xf32>
    %239 = tpu.reciprocal %238 {approx = true} : vector<2x17x1xf32> -> vector<2x17x1xf32>
    %240 = vector.broadcast %239 : vector<2x17x1xf32> to vector<2x17x17xf32>
    %241 = arith.mulf %236, %240 : vector<2x17x17xf32>
    "tpu.trace_start"() <{level = 10 : i32, message = "bqk,bkd->bqd"}> : () -> ()
    %cst_100 = arith.constant dense<0.000000e+00> : vector<2x17x8xf32>
    %242 = tpu.matmul %241, %230, %cst_100 {dimension_numbers = #tpu.dot_dimension_numbers<[2], [1], [1], [2], [0, 0, 0, 1, 1, 2], [0], [0]>} : vector<2x17x17xf32>, vector<2x17x8xf32>, vector<2x17x8xf32> -> vector<2x17x8xf32>
    "tpu.trace_stop"() : () -> ()
    %243 = vector.extract_strided_slice %208 {offsets = [0, 0, 16], sizes = [2, 17, 8], strides = [1, 1, 1]} : vector<2x17x32xf32> to vector<2x17x8xf32>
    %244 = vector.extract_strided_slice %210 {offsets = [0, 0, 16], sizes = [2, 17, 8], strides = [1, 1, 1]} : vector<2x17x32xf32> to vector<2x17x8xf32>
    %245 = vector.extract_strided_slice %212 {offsets = [0, 0, 16], sizes = [2, 17, 8], strides = [1, 1, 1]} : vector<2x17x32xf32> to vector<2x17x8xf32>
    "tpu.trace_start"() <{level = 10 : i32, message = "bqd,bkd->bqk"}> : () -> ()
    %cst_101 = arith.constant dense<0.000000e+00> : vector<2x17x17xf32>
    %246 = tpu.matmul %243, %244, %cst_101 {dimension_numbers = #tpu.dot_dimension_numbers<[2], [2], [1], [1], [0, 0, 0, 1, 1, 1], [0], [0]>} : vector<2x17x8xf32>, vector<2x17x8xf32>, vector<2x17x17xf32> -> vector<2x17x17xf32>
    "tpu.trace_stop"() : () -> ()
    %cst_102 = arith.constant dense<0xFF800000> : vector<2x17xf32>
    %247 = vector.multi_reduction <maximumf>, %246, %cst_102 [2] : vector<2x17x17xf32> to vector<2x17xf32>
    %248 = vector.shape_cast %247 : vector<2x17xf32> to vector<2x17x1xf32>
    %249 = vector.broadcast %248 : vector<2x17x1xf32> to vector<2x17x17xf32>
    %250 = arith.subf %246, %249 : vector<2x17x17xf32>
    %251 = math.exp %250 : vector<2x17x17xf32>
    %cst_103 = arith.constant dense<0.000000e+00> : vector<2x17xf32>
    %252 = vector.multi_reduction <add>, %251, %cst_103 [2] : vector<2x17x17xf32> to vector<2x17xf32>
    %253 = vector.shape_cast %252 : vector<2x17xf32> to vector<2x17x1xf32>
    %254 = tpu.reciprocal %253 {approx = true} : vector<2x17x1xf32> -> vector<2x17x1xf32>
    %255 = vector.broadcast %254 : vector<2x17x1xf32> to vector<2x17x17xf32>
    %256 = arith.mulf %251, %255 : vector<2x17x17xf32>
    "tpu.trace_start"() <{level = 10 : i32, message = "bqk,bkd->bqd"}> : () -> ()
    %cst_104 = arith.constant dense<0.000000e+00> : vector<2x17x8xf32>
    %257 = tpu.matmul %256, %245, %cst_104 {dimension_numbers = #tpu.dot_dimension_numbers<[2], [1], [1], [2], [0, 0, 0, 1, 1, 2], [0], [0]>} : vector<2x17x17xf32>, vector<2x17x8xf32>, vector<2x17x8xf32> -> vector<2x17x8xf32>
    "tpu.trace_stop"() : () -> ()
    %258 = vector.extract_strided_slice %208 {offsets = [0, 0, 24], sizes = [2, 17, 8], strides = [1, 1, 1]} : vector<2x17x32xf32> to vector<2x17x8xf32>
    %259 = vector.extract_strided_slice %210 {offsets = [0, 0, 24], sizes = [2, 17, 8], strides = [1, 1, 1]} : vector<2x17x32xf32> to vector<2x17x8xf32>
    %260 = vector.extract_strided_slice %212 {offsets = [0, 0, 24], sizes = [2, 17, 8], strides = [1, 1, 1]} : vector<2x17x32xf32> to vector<2x17x8xf32>
    "tpu.trace_start"() <{level = 10 : i32, message = "bqd,bkd->bqk"}> : () -> ()
    %cst_105 = arith.constant dense<0.000000e+00> : vector<2x17x17xf32>
    %261 = tpu.matmul %258, %259, %cst_105 {dimension_numbers = #tpu.dot_dimension_numbers<[2], [2], [1], [1], [0, 0, 0, 1, 1, 1], [0], [0]>} : vector<2x17x8xf32>, vector<2x17x8xf32>, vector<2x17x17xf32> -> vector<2x17x17xf32>
    "tpu.trace_stop"() : () -> ()
    %cst_106 = arith.constant dense<0xFF800000> : vector<2x17xf32>
    %262 = vector.multi_reduction <maximumf>, %261, %cst_106 [2] : vector<2x17x17xf32> to vector<2x17xf32>
    %263 = vector.shape_cast %262 : vector<2x17xf32> to vector<2x17x1xf32>
    %264 = vector.broadcast %263 : vector<2x17x1xf32> to vector<2x17x17xf32>
    %265 = arith.subf %261, %264 : vector<2x17x17xf32>
    %266 = math.exp %265 : vector<2x17x17xf32>
    %cst_107 = arith.constant dense<0.000000e+00> : vector<2x17xf32>
    %267 = vector.multi_reduction <add>, %266, %cst_107 [2] : vector<2x17x17xf32> to vector<2x17xf32>
    %268 = vector.shape_cast %267 : vector<2x17xf32> to vector<2x17x1xf32>
    %269 = tpu.reciprocal %268 {approx = true} : vector<2x17x1xf32> -> vector<2x17x1xf32>
    %270 = vector.broadcast %269 : vector<2x17x1xf32> to vector<2x17x17xf32>
    %271 = arith.mulf %266, %270 : vector<2x17x17xf32>
    "tpu.trace_start"() <{level = 10 : i32, message = "bqk,bkd->bqd"}> : () -> ()
    %cst_108 = arith.constant dense<0.000000e+00> : vector<2x17x8xf32>
    %272 = tpu.matmul %271, %260, %cst_108 {dimension_numbers = #tpu.dot_dimension_numbers<[2], [1], [1], [2], [0, 0, 0, 1, 1, 2], [0], [0]>} : vector<2x17x17xf32>, vector<2x17x8xf32>, vector<2x17x8xf32> -> vector<2x17x8xf32>
    "tpu.trace_stop"() : () -> ()
    %273 = tpu.concatenate %227, %242, %257, %272 in 2 : vector<2x17x8xf32>, vector<2x17x8xf32>, vector<2x17x8xf32>, vector<2x17x8xf32> -> vector<2x17x32xf32>
    %274 = vector.shape_cast %273 : vector<2x17x32xf32> to vector<34x32xf32>
    %c1_109 = arith.constant 1 : index
    %c0_110 = arith.constant 0 : index
    %c0_111 = arith.constant 0 : index
    %275 = vector.load %arg5[%c1_109, %c0_110, %c0_111] : memref<2x32x32xf32, #tpu.memory_space<vmem>>, vector<1x32x32xf32>
    %276 = vector.shape_cast %275 : vector<1x32x32xf32> to vector<32x32xf32>
    %cst_112 = arith.constant dense<0.000000e+00> : vector<34x32xf32>
    %277 = tpu.matmul %274, %276, %cst_112 {dimension_numbers = #tpu.dot_dimension_numbers<[1], [0], [0], [1], [0, 0, 1, 1], [], []>} : vector<34x32xf32>, vector<32x32xf32>, vector<34x32xf32> -> vector<34x32xf32>
    %c1_113 = arith.constant 1 : index
    %c0_114 = arith.constant 0 : index
    %c0_115 = arith.constant 0 : index
    %278 = vector.load %arg6[%c1_113, %c0_114, %c0_115] : memref<2x1x32xf32, #tpu.memory_space<vmem>>, vector<1x1x32xf32>
    %279 = vector.shape_cast %278 : vector<1x1x32xf32> to vector<1x32xf32>
    %280 = vector.broadcast %279 : vector<1x32xf32> to vector<34x32xf32>
    %281 = arith.addf %277, %280 : vector<34x32xf32>
    %282 = arith.addf %199, %281 : vector<34x32xf32>
    %c1_116 = arith.constant 1 : index
    %c0_117 = arith.constant 0 : index
    %c0_118 = arith.constant 0 : index
    %283 = vector.load %arg7[%c1_116, %c0_117, %c0_118] : memref<2x1x32xf32, #tpu.memory_space<vmem>>, vector<1x1x32xf32>
    %284 = vector.shape_cast %283 : vector<1x1x32xf32> to vector<1x32xf32>
    %c1_119 = arith.constant 1 : index
    %c0_120 = arith.constant 0 : index
    %c0_121 = arith.constant 0 : index
    %285 = vector.load %arg8[%c1_119, %c0_120, %c0_121] : memref<2x1x32xf32, #tpu.memory_space<vmem>>, vector<1x1x32xf32>
    %286 = vector.shape_cast %285 : vector<1x1x32xf32> to vector<1x32xf32>
    %cst_122 = arith.constant dense<0.000000e+00> : vector<34xf32>
    %287 = vector.multi_reduction <add>, %282, %cst_122 [1] : vector<34x32xf32> to vector<34xf32>
    %288 = vector.shape_cast %287 : vector<34xf32> to vector<34x1xf32>
    %cst_123 = arith.constant 3.200000e+01 : f32
    %289 = vector.broadcast %cst_123 : f32 to vector<34x1xf32>
    %290 = arith.divf %288, %289 : vector<34x1xf32>
    %291 = vector.broadcast %290 : vector<34x1xf32> to vector<34x32xf32>
    %292 = arith.subf %282, %291 : vector<34x32xf32>
    %293 = arith.mulf %292, %292 : vector<34x32xf32>
    %cst_124 = arith.constant dense<0.000000e+00> : vector<34xf32>
    %294 = vector.multi_reduction <add>, %293, %cst_124 [1] : vector<34x32xf32> to vector<34xf32>
    %295 = vector.shape_cast %294 : vector<34xf32> to vector<34x1xf32>
    %cst_125 = arith.constant 3.200000e+01 : f32
    %296 = vector.broadcast %cst_125 : f32 to vector<34x1xf32>
    %297 = arith.divf %295, %296 : vector<34x1xf32>
    %298 = vector.broadcast %290 : vector<34x1xf32> to vector<34x32xf32>
    %299 = arith.subf %282, %298 : vector<34x32xf32>
    %cst_126 = arith.constant 9.99999974E-6 : f32
    %300 = vector.broadcast %cst_126 : f32 to vector<34x1xf32>
    %301 = arith.addf %297, %300 : vector<34x1xf32>
    %302 = math.rsqrt %301 : vector<34x1xf32>
    %303 = vector.broadcast %302 : vector<34x1xf32> to vector<34x32xf32>
    %304 = arith.mulf %299, %303 : vector<34x32xf32>
    %305 = vector.broadcast %284 : vector<1x32xf32> to vector<34x32xf32>
    %306 = arith.mulf %304, %305 : vector<34x32xf32>
    %307 = vector.broadcast %286 : vector<1x32xf32> to vector<34x32xf32>
    %308 = arith.addf %306, %307 : vector<34x32xf32>
    %c1_127 = arith.constant 1 : index
    %c0_128 = arith.constant 0 : index
    %c0_129 = arith.constant 0 : index
    %309 = vector.load %arg9[%c1_127, %c0_128, %c0_129] : memref<2x32x32xf32, #tpu.memory_space<vmem>>, vector<1x32x32xf32>
    %310 = vector.shape_cast %309 : vector<1x32x32xf32> to vector<32x32xf32>
    %cst_130 = arith.constant dense<0.000000e+00> : vector<34x32xf32>
    %311 = tpu.matmul %308, %310, %cst_130 {dimension_numbers = #tpu.dot_dimension_numbers<[1], [0], [0], [1], [0, 0, 1, 1], [], []>} : vector<34x32xf32>, vector<32x32xf32>, vector<34x32xf32> -> vector<34x32xf32>
    %c1_131 = arith.constant 1 : index
    %c0_132 = arith.constant 0 : index
    %c0_133 = arith.constant 0 : index
    %312 = vector.load %arg10[%c1_131, %c0_132, %c0_133] : memref<2x1x32xf32, #tpu.memory_space<vmem>>, vector<1x1x32xf32>
    %313 = vector.shape_cast %312 : vector<1x1x32xf32> to vector<1x32xf32>
    %314 = vector.broadcast %313 : vector<1x32xf32> to vector<34x32xf32>
    %315 = arith.addf %311, %314 : vector<34x32xf32>
    %cst_134 = arith.constant 0.707106769 : f32
    %316 = vector.broadcast %cst_134 : f32 to vector<34x32xf32>
    %317 = arith.mulf %315, %316 : vector<34x32xf32>
    %318 = math.absf %317 : vector<34x32xf32>
    %cst_135 = arith.constant 0.327591091 : f32
    %319 = vector.broadcast %cst_135 : f32 to vector<34x32xf32>
    %320 = arith.mulf %319, %318 : vector<34x32xf32>
    %cst_136 = arith.constant 1.000000e+00 : f32
    %321 = vector.broadcast %cst_136 : f32 to vector<34x32xf32>
    %322 = arith.addf %321, %320 : vector<34x32xf32>
    %cst_137 = arith.constant 1.000000e+00 : f32
    %323 = vector.broadcast %cst_137 : f32 to vector<34x32xf32>
    %324 = arith.divf %323, %322 : vector<34x32xf32>
    %cst_138 = arith.constant 1.06140542 : f32
    %325 = vector.broadcast %cst_138 : f32 to vector<34x32xf32>
    %326 = arith.mulf %325, %324 : vector<34x32xf32>
    %cst_139 = arith.constant -1.45315206 : f32
    %327 = vector.broadcast %cst_139 : f32 to vector<34x32xf32>
    %328 = arith.addf %326, %327 : vector<34x32xf32>
    %329 = arith.mulf %328, %324 : vector<34x32xf32>
    %cst_140 = arith.constant 1.42141378 : f32
    %330 = vector.broadcast %cst_140 : f32 to vector<34x32xf32>
    %331 = arith.addf %329, %330 : vector<34x32xf32>
    %332 = arith.mulf %331, %324 : vector<34x32xf32>
    %cst_141 = arith.constant -0.284496725 : f32
    %333 = vector.broadcast %cst_141 : f32 to vector<34x32xf32>
    %334 = arith.addf %332, %333 : vector<34x32xf32>
    %335 = arith.mulf %334, %324 : vector<34x32xf32>
    %cst_142 = arith.constant 0.254829586 : f32
    %336 = vector.broadcast %cst_142 : f32 to vector<34x32xf32>
    %337 = arith.addf %335, %336 : vector<34x32xf32>
    %338 = arith.mulf %337, %324 : vector<34x32xf32>
    %cst_143 = arith.constant 0.000000e+00 : f32
    %339 = vector.broadcast %cst_143 : f32 to vector<34x32xf32>
    %340 = arith.subf %339, %318 : vector<34x32xf32>
    %341 = arith.mulf %340, %318 : vector<34x32xf32>
    %342 = math.exp %341 : vector<34x32xf32>
    %343 = arith.mulf %338, %342 : vector<34x32xf32>
    %cst_144 = arith.constant 1.000000e+00 : f32
    %344 = vector.broadcast %cst_144 : f32 to vector<34x32xf32>
    %345 = arith.subf %344, %343 : vector<34x32xf32>
    %cst_145 = arith.constant 0.000000e+00 : f32
    %346 = vector.broadcast %cst_145 : f32 to vector<34x32xf32>
    %347 = arith.cmpf oge, %317, %346 : vector<34x32xf32>
    %cst_146 = arith.constant 0.000000e+00 : f32
    %348 = vector.broadcast %cst_146 : f32 to vector<34x32xf32>
    %349 = arith.subf %348, %345 : vector<34x32xf32>
    %350 = arith.select %347, %345, %349 : vector<34x32xi1>, vector<34x32xf32>
    %cst_147 = arith.constant 5.000000e-01 : f32
    %351 = vector.broadcast %cst_147 : f32 to vector<34x32xf32>
    %352 = arith.mulf %351, %315 : vector<34x32xf32>
    %cst_148 = arith.constant 1.000000e+00 : f32
    %353 = vector.broadcast %cst_148 : f32 to vector<34x32xf32>
    %354 = arith.addf %353, %350 : vector<34x32xf32>
    %355 = arith.mulf %352, %354 : vector<34x32xf32>
    %c1_149 = arith.constant 1 : index
    %c0_150 = arith.constant 0 : index
    %c0_151 = arith.constant 0 : index
    %356 = vector.load %arg11[%c1_149, %c0_150, %c0_151] : memref<2x32x32xf32, #tpu.memory_space<vmem>>, vector<1x32x32xf32>
    %357 = vector.shape_cast %356 : vector<1x32x32xf32> to vector<32x32xf32>
    %cst_152 = arith.constant dense<0.000000e+00> : vector<34x32xf32>
    %358 = tpu.matmul %355, %357, %cst_152 {dimension_numbers = #tpu.dot_dimension_numbers<[1], [0], [0], [1], [0, 0, 1, 1], [], []>} : vector<34x32xf32>, vector<32x32xf32>, vector<34x32xf32> -> vector<34x32xf32>
    %c1_153 = arith.constant 1 : index
    %c0_154 = arith.constant 0 : index
    %c0_155 = arith.constant 0 : index
    %359 = vector.load %arg12[%c1_153, %c0_154, %c0_155] : memref<2x1x32xf32, #tpu.memory_space<vmem>>, vector<1x1x32xf32>
    %360 = vector.shape_cast %359 : vector<1x1x32xf32> to vector<1x32xf32>
    %361 = vector.broadcast %360 : vector<1x32xf32> to vector<34x32xf32>
    %362 = arith.addf %358, %361 : vector<34x32xf32>
    %363 = arith.addf %308, %362 : vector<34x32xf32>
    %c1_156 = arith.constant 1 : index
    %c0_157 = arith.constant 0 : index
    %c0_158 = arith.constant 0 : index
    %364 = vector.load %arg13[%c1_156, %c0_157, %c0_158] : memref<2x1x32xf32, #tpu.memory_space<vmem>>, vector<1x1x32xf32>
    %365 = vector.shape_cast %364 : vector<1x1x32xf32> to vector<1x32xf32>
    %c1_159 = arith.constant 1 : index
    %c0_160 = arith.constant 0 : index
    %c0_161 = arith.constant 0 : index
    %366 = vector.load %arg14[%c1_159, %c0_160, %c0_161] : memref<2x1x32xf32, #tpu.memory_space<vmem>>, vector<1x1x32xf32>
    %367 = vector.shape_cast %366 : vector<1x1x32xf32> to vector<1x32xf32>
    %cst_162 = arith.constant dense<0.000000e+00> : vector<34xf32>
    %368 = vector.multi_reduction <add>, %363, %cst_162 [1] : vector<34x32xf32> to vector<34xf32>
    %369 = vector.shape_cast %368 : vector<34xf32> to vector<34x1xf32>
    %cst_163 = arith.constant 3.200000e+01 : f32
    %370 = vector.broadcast %cst_163 : f32 to vector<34x1xf32>
    %371 = arith.divf %369, %370 : vector<34x1xf32>
    %372 = vector.broadcast %371 : vector<34x1xf32> to vector<34x32xf32>
    %373 = arith.subf %363, %372 : vector<34x32xf32>
    %374 = arith.mulf %373, %373 : vector<34x32xf32>
    %cst_164 = arith.constant dense<0.000000e+00> : vector<34xf32>
    %375 = vector.multi_reduction <add>, %374, %cst_164 [1] : vector<34x32xf32> to vector<34xf32>
    %376 = vector.shape_cast %375 : vector<34xf32> to vector<34x1xf32>
    %cst_165 = arith.constant 3.200000e+01 : f32
    %377 = vector.broadcast %cst_165 : f32 to vector<34x1xf32>
    %378 = arith.divf %376, %377 : vector<34x1xf32>
    %379 = vector.broadcast %371 : vector<34x1xf32> to vector<34x32xf32>
    %380 = arith.subf %363, %379 : vector<34x32xf32>
    %cst_166 = arith.constant 9.99999974E-6 : f32
    %381 = vector.broadcast %cst_166 : f32 to vector<34x1xf32>
    %382 = arith.addf %378, %381 : vector<34x1xf32>
    %383 = math.rsqrt %382 : vector<34x1xf32>
    %384 = vector.broadcast %383 : vector<34x1xf32> to vector<34x32xf32>
    %385 = arith.mulf %380, %384 : vector<34x32xf32>
    %386 = vector.broadcast %365 : vector<1x32xf32> to vector<34x32xf32>
    %387 = arith.mulf %385, %386 : vector<34x32xf32>
    %388 = vector.broadcast %367 : vector<1x32xf32> to vector<34x32xf32>
    %389 = arith.addf %387, %388 : vector<34x32xf32>
    %390 = vector.shape_cast %389 : vector<34x32xf32> to vector<2x17x32xf32>
    %391 = vector.extract_strided_slice %390 {offsets = [0, 0, 0], sizes = [2, 1, 32], strides = [1, 1, 1]} : vector<2x17x32xf32> to vector<2x1x32xf32>
    %392 = vector.shape_cast %391 : vector<2x1x32xf32> to vector<2x32xf32>
    %c0_167 = arith.constant 0 : index
    %c0_168 = arith.constant 0 : index
    %393 = vector.load %arg15[%c0_167, %c0_168] : memref<32x128xf32, #tpu.memory_space<vmem>>, vector<32x128xf32>
    %cst_169 = arith.constant dense<0.000000e+00> : vector<2x128xf32>
    %394 = tpu.matmul %392, %393, %cst_169 {dimension_numbers = #tpu.dot_dimension_numbers<[1], [0], [0], [1], [0, 0, 1, 1], [], []>} : vector<2x32xf32>, vector<32x128xf32>, vector<2x128xf32> -> vector<2x128xf32>
    %c0_170 = arith.constant 0 : index
    %c0_171 = arith.constant 0 : index
    %395 = vector.load %arg16[%c0_170, %c0_171] : memref<1x128xf32, #tpu.memory_space<vmem>>, vector<1x128xf32>
    %396 = vector.broadcast %395 : vector<1x128xf32> to vector<2x128xf32>
    %397 = arith.addf %394, %396 : vector<2x128xf32>
    %c0_172 = arith.constant 0 : index
    %c0_173 = arith.constant 0 : index
    %398 = vector.load %arg17[%c0_172, %c0_173] : memref<2x128xf32, #tpu.memory_space<vmem>>, vector<2x128xf32>
    tpu.vector_store %arg17[%c0_172, %c0_173], %397 {strides = array<i32>} : memref<2x128xf32, #tpu.memory_space<vmem>>, vector<2x128xf32>,
    return
  }
}

</mosaic_0001>

<bundles_post_ra>
// kernel: tpu_custom_call.1
= control target key start
LH: loop header
LB: loop body
LE: loop exit
PB: predicated region body
PF: predicated region fallthrough
CT: control target
= control target key end

     0   :  { %s20986_s0 = inlined_call_operand.vmem [shape: f32[2,17,48], index: 0, kind: input, shape index: {}]   ;;  %s20987_s1 = inlined_call_operand.vmem [shape: f32[48,32], index: 1, kind: input, shape index: {}]   ;;  %s20988_s2 = inlined_call_operand.hbm [shape: f32[17,32], index: 2, kind: input, shape index: {}]   ;;  %s20989_s3 = inlined_call_operand.vmem [shape: f32[2,32,96], index: 3, kind: input, shape index: {}]   ;;  %s20990_s4 = inlined_call_operand.hbm [shape: f32[2,1,96], index: 4, kind: input, shape index: {}]   ;;  %s20991_s5 = inlined_call_operand.vmem [shape: f32[2,32,32], index: 5, kind: input, shape index: {}]   ;;  %s20992_s6 = inlined_call_operand.hbm [shape: f32[2,1,32], index: 6, kind: input, shape index: {}]   ;;  %s20993_s7 = inlined_call_operand.hbm [shape: f32[2,1,32], index: 7, kind: input, shape index: {}]   ;;  %s20994_s8 = inlined_call_operand.hbm [shape: f32[2,1,32], index: 8, kind: input, shape index: {}]   ;;  %s20995_s9 = inlined_call_operand.vmem [shape: f32[2,32,32], index: 9, kind: input, shape index: {}]   ;;  %s20996_s10 = inlined_call_operand.vmem [shape: f32[2,1,32], index: 10, kind: input, shape index: {}]   ;;  %s20997_s11 = inlined_call_operand.hbm [shape: f32[2,32,32], index: 11, kind: input, shape index: {}]   ;;  %s20998_s12 = inlined_call_operand.vmem [shape: f32[2,1,32], index: 12, kind: input, shape index: {}]   ;;  %s20999_s13 = inlined_call_operand.vmem [shape: f32[2,1,32], index: 13, kind: input, shape index: {}]   ;;  %s21000_s14 = inlined_call_operand.vmem [shape: f32[2,1,32], index: 14, kind: input, shape index: {}]   ;;  %s21001_s15 = inlined_call_operand.hbm [shape: f32[32,128], index: 15, kind: input, shape index: {}]   ;;  %s21002_s16 = inlined_call_operand.vmem [shape: f32[1,128], index: 16, kind: input, shape index: {}]   ;;  %s21003_s17 = inlined_call_operand.hbm [shape: f32[2,128], index: 17, kind: output, shape index: {}]  }
   0x1   :  { %21133 = sst [smem:[#allocation49_spill]] %s20986_s0 }
   0x2   :  { %21134 = sst [smem:[#allocation50_spill]] %s20987_s1 }
   0x3   :  { %22 = vsyncpa [#allocation3], 0 }
   0x4   :  { %23 = vsyncpa [#allocation6], 0 }
   0x5   :  { %24 = vsyncpa [#allocation9], 0 }
   0x6   :  { %25 = vsyncpa [#allocation12], 0 }
   0x7   :  { %26 = vsyncpa [#allocation4], 0  ;;  %s16232_s24 = smov [#allocation5]   ;;  %s16046_s28 = scalar_lea.hbm %s20990_s4, 32 }
   0x8   :  { %s50_s25 = sshll.u32 %s16232_s24, 4  ;;  %p16047_p0 = scmp.ne.s32.totalorder %s20990_s4, %s16046_s28  ;;  %s51_s25 = int_to_ptr.vmem [resolvable:$true] %s50_s25 }
   0x9   :  { %p16050_p1 = scmp.lt.u32.totalorder %s16046_s28, %s20990_s4 }
   0xb   :  { %p16052_p2 = pnand %p16050_p1, %p16047_p0 }
   0xd   :  { %16055 = shalt.err (!%p16052_p2)
}
   0xe   :  { %s16056_s19 = scalar_lea.vmem %s51_s25, 32  ;;  %p16061_p4 = scmp.lt.s32.totalorder %s51_s25, %s51_s25 }
   0xf   :  { %p16057_p3 = scmp.ne.s32.totalorder %s51_s25, %s16056_s19  ;;  %p16062_p5 = scmp.lt.s32.totalorder %s16056_s19, %s16056_s19 }
  0x11   :  { %p16063_p6 = por %p16062_p5, %p16061_p4 }
  0x13   :  { %p16064_p7 = pnand %p16063_p6, %p16057_p3 }
  0x15   :  { %16067 = shalt.err (!%p16064_p7)
}
  0x16   :  { %s16233_s1 = smov 16   ;;  %s16234_s20 = smov 1  }
  0x17   :  { %56 = dma.hbm_to_vmem [thread:$0]  %s20990_s4, 32, %s51_s25, [#allocation6], %s16233_s1, %s16233_s1, %s16234_s20  }
  0x18   :  { %s16235_s23 = smov [#allocation8]   ;;  %s16068_s28 = scalar_lea.hbm %s20993_s7, 32 }
  0x19   :  { %s76_s24 = sshll.u32 %s16235_s23, 4  ;;  %p16069_p8 = scmp.ne.s32.totalorder %s20993_s7, %s16068_s28  ;;  %s77_s24 = int_to_ptr.vmem [resolvable:$true] %s76_s24 }
  0x1a   :  { %p16072_p9 = scmp.lt.u32.totalorder %s16068_s28, %s20993_s7 }
  0x1c   :  { %p16074_p10 = pnand %p16072_p9, %p16069_p8 }
  0x1e   :  { %16077 = shalt.err (!%p16074_p10)
}
  0x1f   :  { %s16078_s19 = scalar_lea.vmem %s77_s24, 32  ;;  %p16083_p12 = scmp.lt.s32.totalorder %s77_s24, %s77_s24 }
  0x20   :  { %p16079_p11 = scmp.ne.s32.totalorder %s77_s24, %s16078_s19  ;;  %p16084_p13 = scmp.lt.s32.totalorder %s16078_s19, %s16078_s19 }
  0x22   :  { %p16085_p0 = por %p16084_p13, %p16083_p12 }
  0x24   :  { %p16086_p1 = pnand %p16085_p0, %p16079_p11 }
  0x26   :  { %16089 = shalt.err (!%p16086_p1)
}
  0x27   :  { %82 = dma.hbm_to_vmem [thread:$0]  %s20993_s7, 32, %s77_s24, [#allocation9], %s16233_s1, %s16233_s1, %s16234_s20  }
  0x28   :  { %s16236_s21 = smov [#allocation11]   ;;  %s16237_s23 = smov [#allocation2]  }
  0x29   :  { %s104_s22 = sshll.u32 %s16236_s21, 4  ;;  %s36_s26 = sshll.u32 %s16237_s23, 4  ;;  %s105_s22 = int_to_ptr.vmem [resolvable:$true] %s104_s22  ;;  %s16380_s26 = int_to_ptr.vmem [resolvable:$true] %s36_s26 }
  0x2a   :  { %s16090_s29 = scalar_lea.hbm %s20997_s11, 1024 }
  0x2b   :  { %p16091_p2 = scmp.ne.s32.totalorder %s20997_s11, %s16090_s29  ;;  %p16094_p3 = scmp.lt.u32.totalorder %s16090_s29, %s20997_s11 }
  0x2d   :  { %p16096_p4 = pnand %p16094_p3, %p16091_p2 }
  0x2f   :  { %16099 = shalt.err (!%p16096_p4)
}
  0x30   :  { %s16100_s7 = scalar_lea.vmem %s105_s22, 1024  ;;  %p16105_p6 = scmp.lt.s32.totalorder %s105_s22, %s105_s22 }
  0x31   :  { %p16101_p5 = scmp.ne.s32.totalorder %s105_s22, %s16100_s7  ;;  %p16106_p7 = scmp.lt.s32.totalorder %s16100_s7, %s16100_s7 }
  0x33   :  { %p16107_p8 = por %p16106_p7, %p16105_p6 }
  0x35   :  { %p16108_p9 = pnand %p16107_p8, %p16101_p5 }
  0x37   :  { %16111 = shalt.err (!%p16108_p9)
}
  0x38   :  { %s16238_s24 = smov 128   ;;  %s16239_s4 = smov 8  }
  0x39   :  { %110 = dma.hbm_to_vmem [thread:$0]  %s20997_s11, 1024, %s105_s22, [#allocation12], %s16238_s24, %s16238_s24, %s16239_s4  }
  0x3a   :  { %s16112_s28 = scalar_lea.hbm %s20988_s2, 384 }
  0x3b   :  { %p16113_p10 = scmp.ne.s32.totalorder %s20988_s2, %s16112_s28  ;;  %p16116_p11 = scmp.lt.u32.totalorder %s16112_s28, %s20988_s2 }
  0x3d   :  { %p16118_p12 = pnand %p16116_p11, %p16113_p10 }
  0x3f   :  { %16121 = shalt.err (!%p16118_p12)
}
  0x40   :  { %s16122_s19 = scalar_lea.vmem %s16380_s26, 384  ;;  %p16127_p0 = scmp.lt.s32.totalorder %s16380_s26, %s16380_s26 }
  0x41   :  { %p16123_p13 = scmp.ne.s32.totalorder %s16380_s26, %s16122_s19  ;;  %p16128_p1 = scmp.lt.s32.totalorder %s16122_s19, %s16122_s19 }
  0x43   :  { %p16129_p2 = por %p16128_p1, %p16127_p0 }
  0x45   :  { %p16130_p3 = pnand %p16129_p2, %p16123_p13 }
  0x47   :  { %16133 = shalt.err (!%p16130_p3)
}
  0x48   :  { %42 = dma.hbm_to_vmem [thread:$0]  %s20988_s2, 384, %s16380_s26, [#allocation3], %s16238_s24, %s16238_s24, %s16239_s4  }
  0x49   :  { %s16240_s7 = smov [#allocation7]   ;;  %s16241_s21 = smov [#allocation10]  }
  0x4a   :  { %s64_s25 = sshll.u32 %s16240_s7, 4  ;;  %s88_s23 = sshll.u32 %s16241_s21, 4  ;;  %s65_s25 = int_to_ptr.vmem [resolvable:$true] %s64_s25  ;;  %s16417_s23 = int_to_ptr.vmem [resolvable:$true] %s88_s23 }
  0x4b   :  { %s16134_s29 = scalar_lea.hbm %s20992_s6, 32 }
  0x4c   :  { %p16135_p4 = scmp.ne.s32.totalorder %s20992_s6, %s16134_s29  ;;  %p16138_p5 = scmp.lt.u32.totalorder %s16134_s29, %s20992_s6 }
  0x4e   :  { %p16140_p6 = pnand %p16138_p5, %p16135_p4 }
  0x50   :  { %16143 = shalt.err (!%p16140_p6)
}
  0x51   :  { %s16144_s2 = scalar_lea.vmem %s65_s25, 32  ;;  %p16149_p8 = scmp.lt.s32.totalorder %s65_s25, %s65_s25 }
  0x52   :  { %p16145_p7 = scmp.ne.s32.totalorder %s65_s25, %s16144_s2  ;;  %p16150_p9 = scmp.lt.s32.totalorder %s16144_s2, %s16144_s2 }
  0x54   :  { %p16151_p10 = por %p16150_p9, %p16149_p8 }
  0x56   :  { %p16152_p11 = pnand %p16151_p10, %p16145_p7 }
  0x58   :  { %16155 = shalt.err (!%p16152_p11)
}
  0x59   :  { %70 = dma.hbm_to_vmem [thread:$0]  %s20992_s6, 32, %s65_s25, [#allocation6], %s16233_s1, %s16233_s1, %s16234_s20  }
  0x5a   :  { %s16156_s21 = scalar_lea.hbm %s20994_s8, 32 }
  0x5b   :  { %p16157_p12 = scmp.ne.s32.totalorder %s20994_s8, %s16156_s21  ;;  %p16160_p13 = scmp.lt.u32.totalorder %s16156_s21, %s20994_s8 }
  0x5d   :  { %p16162_p0 = pnand %p16160_p13, %p16157_p12 }
  0x5f   :  { %16165 = shalt.err (!%p16162_p0)
}
  0x60   :  { %s16166_s30 = scalar_lea.vmem %s16417_s23, 32  ;;  %p16171_p2 = scmp.lt.s32.totalorder %s16417_s23, %s16417_s23 }
  0x61   :  { %p16167_p1 = scmp.ne.s32.totalorder %s16417_s23, %s16166_s30  ;;  %p16172_p3 = scmp.lt.s32.totalorder %s16166_s30, %s16166_s30 }
  0x63   :  { %p16173_p4 = por %p16172_p3, %p16171_p2 }
  0x65   :  { %p16174_p5 = pnand %p16173_p4, %p16167_p1 }
  0x67   :  { %16177 = shalt.err (!%p16174_p5)
}
  0x68   :  { %94 = dma.hbm_to_vmem [thread:$0]  %s20994_s8, 32, %s16417_s23, [#allocation9], %s16233_s1, %s16233_s1, %s16234_s20  }
  0x69   :  { %s16242_s18 = smov [#allocation13]   ;;  %s16178_s11 = scalar_lea.hbm %s21001_s15, 512 }
  0x6a   :  { %s122_s19 = sshll.u32 %s16242_s18, 4  ;;  %p16179_p6 = scmp.ne.s32.totalorder %s21001_s15, %s16178_s11  ;;  %s123_s19 = int_to_ptr.vmem [resolvable:$true] %s122_s19 }
  0x6b   :  { %p16182_p7 = scmp.lt.u32.totalorder %s16178_s11, %s21001_s15 }
  0x6d   :  { %p16184_p8 = pnand %p16182_p7, %p16179_p6 }
  0x6f   :  { %16187 = shalt.err (!%p16184_p8)
}
  0x70   :  { %s16188_s28 = scalar_lea.vmem %s123_s19, 512  ;;  %p16193_p10 = scmp.lt.s32.totalorder %s123_s19, %s123_s19 }
  0x71   :  { %p16189_p9 = scmp.ne.s32.totalorder %s123_s19, %s16188_s28  ;;  %p16194_p11 = scmp.lt.s32.totalorder %s16188_s28, %s16188_s28 }
  0x73   :  { %p16195_p12 = por %p16194_p11, %p16193_p10 }
  0x75   :  { %p16196_p13 = pnand %p16195_p12, %p16189_p9 }
  0x77   :  { %16199 = shalt.err (!%p16196_p13)
}
  0x78   :  { %128 = dma.hbm_to_vmem [thread:$0]  %s21001_s15, 512, %s123_s19, [#allocation12], %s16238_s24, %s16238_s24, %s16239_s4  }
  0x79   :  { %16222 = dma.done.wait [#allocation3], 384  }
  0x7a   :  { %16223 = vsyncadd [#allocation3], 4294966912 }
  0x7b   :  { %16224 = dma.done.wait [#allocation6], 64  }
  0x7c   :  { %16225 = vsyncadd [#allocation6], 4294967232 }
  0x7d   :  { %16226 = dma.done.wait [#allocation9], 64  }
  0x7e   :  { %16227 = vsyncadd [#allocation9], 4294967232 }
  0x7f   :  { %16228 = dma.done.wait [#allocation12], 1536  }
  0x80   :  { %16229 = vsyncadd [#allocation12], 4294965760  ;;  %v168_v0 = vlaneseq  ;;  %v21006_v1 = vmov 0.0|0.0   ;;  %vm16244_vm0 = vmmov 0   ;;  %v21008_v2 = vmov 0.0   ;;  %s21136_s23 = sld [smem:[#allocation50_spill]] }
  0x81   :  { %15406 = vmatprep.subr.bf16.mxu0 %v21006_v1  ;;  %14716 = vmatprep.mubr.msk.f32.mxu0 %vm16244_vm0, %v21008_v2  ;;  %v16246_v3 = vmov 1966171168   ;;  %s21137_s21 = sld [smem:[#allocation49_spill]]  ;;  %vm605_vm1 = vcmask 392192   ;;  %vm1388_vm2 = vcmask 261120   ;;  %s16247_s7 = smov 96  }
  0x82   :  { %v166_v4 = vunpack.c.l.s4 %v16246_v3  ;;  %v16472_v5 = vshrl.u32 %v168_v0, 7  ;;  %15415 = vmatprep.subr.bf16.mxu1 %v21006_v1  ;;  %14739 = vmatprep.mubr.msk.f32.mxu1 %vm16244_vm0, %v21008_v2  ;;  %vm1830_vm3 = vcmask 64512   ;;  %vm2133_vm5 = vcmask 138240   ;;  %s16249_s27 = smov 88   ;;  %s16250_s28 = smov 120  }
  0x83   :  { %vm16998_vm4 = vmpackc.low %vm1830_vm3, %vm1830_vm3  ;;  %vm2140_vm6 = vcmask 131072   ;;  %vm2218_vm7 = vcmask 1040384   ;;  %s16251_s8 = smov 56   ;;  %s16252_s20 = smov 80   ;;  %vm3894_vm8 = vcmask 130048   ;;  %vm3901_vm9 = vcmask 195584  }
  0x84   :  { %21135 = vst [vmem:[#allocation20_spill] sm:$0xff] %v16472_v5  ;;  %v167_v6 = vunpack.c.0.s8 %v166_v4  ;;  %s16253_s15 = smov 112   ;;  %s16254_s24 = smov 48   ;;  %vm5015_vm10 = vcmask 254976  }
  0x85   :  { %s16256_s29 = smov 104   ;;  %s16257_s0 = smov 40  }
  0x86   :  { %v16478_v7 = vsub.s32 %v167_v6, %v16472_v5  ;;  %v388_v8 = vld [vmem:[%s21136_s23] sm:$0xff]  ;;  %v389_v9 = vld [vmem:[%s21136_s23 + $0x8] sm:$0xff]  ;;  %v390_v10 = vld [vmem:[%s21136_s23 + $0x10] sm:$0xff]  ;;  %s16258_s30 = smov 24   ;;  %s16259_s2 = smov [#allocation14]  }
  0x87   :  { %v15407_v11 = vpack.c.bf16 %v389_v9, %v388_v8  ;;  %v391_v12 = vld [vmem:[%s21136_s23 + $0x18] sm:$0xff]  ;;  %v392_v13 = vld [vmem:[%s21136_s23 + $0x20] sm:$0xff]  ;;  %v393_v14 = vld [vmem:[%s21136_s23 + $0x28] sm:$0xff]  ;;  %s16255_s23 = smov 72   ;;  %s14150_s26 = sshll.u32 %s16259_s2, 4  ;;  %s14151_s26 = int_to_ptr.vmem [resolvable:$true] %s14150_s26 }
  0x88   :  { %v15410_v15 = vpack.c.bf16 %v391_v12, %v390_v10  ;;  %v15413_v16 = vpack.c.bf16 %v393_v14, %v392_v13  ;;  %v152_v17 = vld [vmem:[%s21137_s21] sm:$0xff]  ;;  %v153_v18 = vld [vmem:[%s21137_s21 + $0x8] sm:$0xff]  ;;  %v16507_v19 = vld.sshfl [vmem:[%s21137_s21 + $0x10] sm:$0x1 pattern:$0x75316420]  ;;  %p16205_p1 = scmp.lt.s32.totalorder %s14151_s26, %s14151_s26 }
  0x89   :  { %15408 = vmatpush3.bf16.msra.mxu0 %v15407_v11  ;;  %v164_v20 = vcombine.high %v152_v17, %v152_v17  ;;  %v171_v21 = vrot.slane %v152_v17, %v16478_v7  ;;  %v213_v22 = vcombine.high %v153_v18, %v153_v18  ;;  %v220_v23 = vrot.slane %v153_v18, %v16478_v7  ;;  %v155_v24 = vld [vmem:[%s21137_s21 + $0x18] sm:$0xff]  ;;  %v16517_v25 = vld [vmem:[%s21137_s21 + $0x20] sm:$0xff]  ;;  %s16200_s11 = scalar_lea.vmem %s14151_s26, 32 }
  0x8a   :  { %15409 = vmatprep.subr.bf16.mxu0 %v21006_v1  ;;  %v275_v26 = vrot.slane %v16507_v19, %v16478_v7  ;;  %v276_v27 = vcombine.high %v155_v24, %v155_v24  ;;  %v283_v28 = vrot.slane %v155_v24, %v16478_v7  ;;  %v325_v29 = vcombine.high %v16517_v25, %v16517_v25  ;;  %p16201_p0 = scmp.ne.s32.totalorder %s14151_s26, %s16200_s11  ;;  %p16206_p2 = scmp.lt.s32.totalorder %s16200_s11, %s16200_s11 }
  0x8b   :  { %v178_v30 = vrot.slane %v164_v20, %v16478_v7  ;;  %v179_v31 = vcombine.high %v171_v21, %v171_v21  ;;  %v187_v32 = vrot.slane %v171_v21, %v16478_v7  ;;  %v227_v33 = vrot.slane %v213_v22, %v16478_v7 }
  0x8c   :  { %v228_v34 = vcombine.high %v220_v23, %v220_v23  ;;  %v236_v35 = vrot.slane %v220_v23, %v16478_v7  ;;  %v290_v36 = vrot.slane %v276_v27, %v16478_v7  ;;  %v291_v37 = vcombine.high %v283_v28, %v283_v28  ;;  %p16207_p3 = por %p16206_p2, %p16205_p1 }
  0x8d   :  { %15411 = vmatpush3.bf16.msra.mxu0 %v15410_v15  ;;  %v180_v38 = vcombine.high %v178_v30, %v178_v30  ;;  %v194_v39 = vrot.slane %v178_v30, %v16478_v7  ;;  %v201_v40 = vrot.slane %v179_v31, %v16478_v7  ;;  %v229_v41 = vcombine.high %v227_v33, %v227_v33 }
  0x8e   :  { %15412 = vmatprep.subr.bf16.mxu0 %v21006_v1  ;;  %v243_v42 = vrot.slane %v227_v33, %v16478_v7  ;;  %v250_v43 = vrot.slane %v228_v34, %v16478_v7  ;;  %v292_v44 = vcombine.high %v290_v36, %v290_v36  ;;  %v299_v45 = vrot.slane %v283_v28, %v16478_v7  ;;  %p16208_p4 = pnand %p16207_p3, %p16201_p0 }
  0x8f   :  { %v208_v46 = vrot.slane %v180_v38, %v16478_v7  ;;  %v394_v47 = vcombine.low %v187_v32, %v201_v40  ;;  %v14164_v48 = vcombine.high %v187_v32, %v201_v40  ;;  %v257_v49 = vrot.slane %v229_v41, %v16478_v7 }
  0x90   :  { %v443_v50 = vcombine.low %v236_v35, %v250_v43  ;;  %v14166_v51 = vcombine.high %v236_v35, %v250_v43  ;;  %v306_v52 = vrot.slane %v290_v36, %v16478_v7  ;;  %v313_v53 = vrot.slane %v291_v37, %v16478_v7 }
  0x91   :  { %15414 = vmatpush3.bf16.msra.mxu0 %v15413_v16  ;;  %v396_v54 = vcombine.low %v194_v39, %v208_v46  ;;  %v14165_v55 = vcombine.high %v194_v39, %v208_v46  ;;  %v404_v56 = vrot.slane %v394_v47, %v16478_v7  ;;  %v411_v57 = vrot.slane %v14164_v48, %v16478_v7  ;;  %v14163_v39 = vld.sshfl [vmem:[%s21137_s21 + $0x28] sm:$0x1 pattern:$0x75316420]  ;;  %s16248_s21 = smov 64  }
  0x92   :  { %v445_v58 = vcombine.low %v243_v42, %v257_v49  ;;  %v14167_v59 = vcombine.high %v243_v42, %v257_v49  ;;  %v453_v60 = vrot.slane %v443_v50, %v16478_v7  ;;  %v460_v61 = vrot.slane %v14166_v51, %v16478_v7  ;;  %15425 = vmatprep.subr.bf16.mxu0 %v21006_v1 }
  0x93   :  { %v418_v62 = vrot.slane %v396_v54, %v16478_v7  ;;  %v425_v63 = vrot.slane %v14165_v55, %v16478_v7  ;;  %v426_v0 = vcombine.low %v404_v56, %v411_v57  ;;  %v320_v3 = vrot.slane %v292_v44, %v16478_v7 }
  0x94   :  { %v467_v4 = vrot.slane %v445_v58, %v16478_v7  ;;  %v474_v6 = vrot.slane %v14167_v59, %v16478_v7  ;;  %v475_v8 = vcombine.low %v453_v60, %v460_v61  ;;  %v321_v9 = vcombine.high %v299_v45, %v299_v45 }
  0x95   :  { %v427_v10 = vcombine.low %v418_v62, %v425_v63  ;;  %v434_v11 = vrot.slane %v426_v0, %v16478_v7  ;;  %v322_v12 = vcombine.high %v306_v52, %v306_v52  ;;  %v323_v13 = vcombine.high %v313_v53, %v313_v53  ;;  %v1132_v0 = vld [vmem:[%s20989_s3] sm:$0xff] }
  0x96   :  { %v476_v14 = vcombine.low %v467_v4, %v474_v6  ;;  %v483_v15 = vrot.slane %v475_v8, %v16478_v7  ;;  %v492_v16 = vcombine.low %v275_v26, %v299_v45  ;;  %v493_v17 = vcombine.low %v313_v53, %v321_v9  ;;  %v1134_v6 = vld [vmem:[%s20989_s3 + $0x10] sm:$0xff]  ;;  %v1135_v8 = vld [vmem:[%s20989_s3 + $0x18] sm:$0xff] }
  0x97   :  { %v441_v18 = vrot.slane %v427_v10, %v16478_v7  ;;  %v494_v19 = vcombine.low %v323_v13, %v306_v52  ;;  %v495_v20 = vcombine.low %v320_v3, %v322_v12  ;;  %v324_v21 = vcombine.high %v320_v3, %v320_v3  ;;  %v1133_v3 = vld [vmem:[%s20989_s3 + $0x8] sm:$0xff]  ;;  %v963_v10 = vld [vmem:[#allocation2] sm:$0xff]  ;;  %v964_v12 = vld [vmem:[#allocation2 + $0x8] sm:$0xff] }
  0x98   :  { %v490_v22 = vrot.slane %v476_v14, %v16478_v7  ;;  %v502_v23 = vrot.slane %v492_v16, %v16478_v7  ;;  %v509_v24 = vrot.slane %v493_v17, %v16478_v7  ;;  %v332_v27 = vrot.slane %v16517_v25, %v16478_v7 }
  0x99   :  { %v442_v28 = vcombine.low %v434_v11, %v441_v18  ;;  %v516_v30 = vrot.slane %v494_v19, %v16478_v7  ;;  %v523_v26 = vrot.slane %v495_v20, %v16478_v7  ;;  %v339_v31 = vrot.slane %v325_v29, %v16478_v7 }
  0x9a   :  { %v524_v32 = vcombine.low %v502_v23, %v509_v24  ;;  %v340_v33 = vcombine.high %v332_v27, %v332_v27  ;;  %v348_v34 = vrot.slane %v332_v27, %v16478_v7  ;;  %v491_v35 = vcombine.low %v483_v15, %v490_v22 }
  0x9b   :  { %14717 = vmatmul.mubr.msk.f32.vlgmr.msra.gmra.mrb[0].mxu0 %vm605_vm1, %v442_v28  ;;  %v525_v36 = vcombine.low %v516_v30, %v523_v26  ;;  %v341_v37 = vcombine.high %v339_v31, %v339_v31  ;;  %v355_v38 = vrot.slane %v339_v31, %v16478_v7  ;;  %v387_v48 = vrot.slane %v14163_v39, %v16478_v7 }
  0x9c   :  { %14719 = vmatprep.mubr.msk.f32.mxu0 %vm16244_vm0, %v21008_v2  ;;  %v532_v25 = vrot.slane %v524_v32, %v16478_v7  ;;  %v362_v29 = vrot.slane %v340_v33, %v16478_v7  ;;  %v370_v40 = vcombine.high %v348_v34, %v348_v34  ;;  %v541_v41 = vcombine.low %v324_v21, %v348_v34 }
  0x9d   :  { %v539_v42 = vrot.slane %v525_v36, %v16478_v7  ;;  %v369_v43 = vrot.slane %v341_v37, %v16478_v7  ;;  %v371_v44 = vcombine.high %v355_v38, %v355_v38  ;;  %v15416_v4 = vpack.c.bf16 %v1133_v3, %v1132_v0 }
  0x9e   :  { %v372_v45 = vcombine.high %v362_v29, %v362_v29  ;;  %v542_v46 = vcombine.low %v362_v29, %v370_v40  ;;  %v551_v47 = vrot.slane %v541_v41, %v16478_v7  ;;  %v15419_v9 = vpack.c.bf16 %v1135_v8, %v1134_v6  ;;  %v14173_v29 = vld.sshfl [vmem:[#allocation2 + $0x10] sm:$0x1 pattern:$0x75316420] }
  0x9f   :  { %14720 = vmatmul.mubr.msk.f32.gmra.mrb[2].mxu0 %vm605_vm1, %v491_v35  ;;  %v540_v49 = vcombine.low %v532_v25, %v539_v42  ;;  %v544_v50 = vcombine.low %v369_v43, %v371_v44  ;;  %v373_v51 = vcombine.high %v369_v43, %v369_v43  ;;  %15417 = vmatpush3.bf16.msra.mxu1 %v15416_v4 }
  0xa0   :  { %14722 = vmatprep.mubr.msk.f32.mxu0 %vm16244_vm0, %v21008_v2  ;;  %v543_v52 = vcombine.low %v372_v45, %v355_v38  ;;  %v558_v53 = vrot.slane %v542_v46, %v16478_v7  ;;  %15418 = vmatprep.subr.bf16.mxu1 %v21006_v1  ;;  %v969_v11 = vcombine.high %v963_v10, %v963_v10 }
  0xa1   :  { %v572_v54 = vrot.slane %v544_v50, %v16478_v7  ;;  %v590_v57 = vcombine.low %v373_v51, %v387_v48  ;;  %v1018_v13 = vcombine.high %v964_v12, %v964_v12  ;;  %v976_v14 = vrot.slane %v963_v10, %v16478_v7 }
  0xa2   :  { %v565_v55 = vrot.slane %v543_v52, %v16478_v7  ;;  %v573_v56 = vcombine.low %v551_v47, %v558_v53  ;;  %v983_v15 = vrot.slane %v969_v11, %v16478_v7  ;;  %v1025_v16 = vrot.slane %v964_v12, %v16478_v7 }
  0xa3   :  { %14723 = vmatmul.mubr.msk.f32.gmra.mrb[4].mxu0 %vm605_vm1, %v540_v49  ;;  %v597_v61 = vrot.slane %v590_v57, %v16478_v7  ;;  %15420 = vmatpush3.bf16.msra.mxu1 %v15419_v9  ;;  %v1032_v17 = vrot.slane %v1018_v13, %v16478_v7  ;;  %v984_v18 = vcombine.high %v976_v14, %v976_v14 }
  0xa4   :  { %14725 = vmatprep.mubr.msk.f32.mxu0 %vm16244_vm0, %v21008_v2  ;;  %v574_v58 = vcombine.low %v565_v55, %v572_v54  ;;  %v581_v59 = vrot.slane %v573_v56, %v16478_v7  ;;  %15421 = vmatprep.subr.bf16.mxu1 %v21006_v1  ;;  %v985_v19 = vcombine.high %v983_v15, %v983_v15 }
  0xa5   :  { %v604_v63 = vrot.slane %v597_v61, %v16478_v7  ;;  %v16616_v20 = vrot.slane %v976_v14, %v16478_v7  ;;  %v16619_v21 = vrot.slane %v983_v15, %v16478_v7  ;;  %v1033_v22 = vcombine.high %v1025_v16, %v1025_v16 }
  0xa6   :  { %v588_v60 = vrot.slane %v574_v58, %v16478_v7  ;;  %v1034_v23 = vcombine.high %v1032_v17, %v1032_v17  ;;  %v16622_v27 = vrot.slane %v984_v18, %v16478_v7  ;;  %v16625_v28 = vrot.slane %v985_v19, %v16478_v7 }
  0xa7   :  { %v16628_v30 = vrot.slane %v1025_v16, %v16478_v7  ;;  %v16631_v26 = vrot.slane %v1032_v17, %v16478_v7  ;;  %v16636_v34 = vcombine.high %v16616_v20, %v16616_v20  ;;  %v16640_v35 = vcombine.high %v16619_v21, %v16619_v21 }
  0xa8   :  { %v589_v62 = vcombine.low %v581_v59, %v588_v60  ;;  %v16643_v36 = vrot.slane %v1033_v22, %v16478_v7  ;;  %v16648_v25 = vrot.slane %v1034_v23, %v16478_v7  ;;  %v16652_v40 = vcombine.high %v16622_v27, %v16622_v27 }
  0xa9   :  { %v16656_v42 = vcombine.high %v16628_v30, %v16628_v30  ;;  %v16660_v43 = vcombine.high %v16631_v26, %v16631_v26  ;;  %v16664_v44 = vcombine.high %v16625_v28, %v16625_v28  ;;  %v16674_v53 = vrot.slane %v14173_v29, %v16478_v7 }
  0xaa   :  { %14726 = vmatmul.mubr.msk.f32.gmra.mrb[6].mxu0 %vm605_vm1, %v589_v62  ;;  %v16671_v52 = vcombine.high %v16643_v36, %v16643_v36  ;;  %v16684_v57 = vcombine.high %v16648_v25, %v16648_v25 }
  0xab   :  { %14728 = vmatprep.mubr.msk.f32.mxu0 %vm16244_vm0, %v21008_v2 }
  0xae   :  { %14729 = vmatmul.mubr.msk.f32.gmra.mrb[8].mxu0 %vm605_vm1, %v604_v63 }
  0xaf   :  { %14775 = vmatprep.mubr.msk.f32.mxu0 %vm16244_vm0, %v21008_v2 }
 0x16e   :  { %v682_v24 = vpop.f32.mrb[0].mxu0 }
 0x16f   :  { %v711_v31 = vcombine.high %v682_v24, %v682_v24  ;;  %v718_v32 = vrot.slane %v682_v24, %v16478_v7  ;;  %v14718_v33 = vpop.f32.mrb[1].mxu0 }
 0x171   :  { %v725_v37 = vrot.slane %v711_v31, %v16478_v7  ;;  %v726_v38 = vcombine.high %v718_v32, %v718_v32  ;;  %v734_v39 = vrot.slane %v718_v32, %v16478_v7 }
 0x172   :  { %v687_v41 = vpop.f32.mrb[2].mxu0 }
 0x173   :  { %v727_v45 = vcombine.high %v725_v37, %v725_v37  ;;  %v741_v46 = vrot.slane %v725_v37, %v16478_v7  ;;  %v748_v47 = vrot.slane %v726_v38, %v16478_v7  ;;  %v756_v48 = vcombine.high %v734_v39, %v734_v39  ;;  %v14721_v49 = vpop.f32.mrb[3].mxu0 }
 0x174   :  { %v760_v50 = vcombine.high %v687_v41, %v687_v41  ;;  %v767_v51 = vrot.slane %v687_v41, %v16478_v7  ;;  %v16687_v59 = vadd.f32 %v16616_v20, %v734_v39 }
 0x175   :  { %v16677_v54 = vrot.slane %v727_v45, %v16478_v7  ;;  %v758_v55 = vcombine.high %v748_v47, %v748_v47  ;;  %v16680_v56 = vadd.f32 %v16622_v27, %v748_v47  ;;  %v757_v58 = vcombine.high %v741_v46, %v741_v46 }
 0x176   :  { %v774_v60 = vrot.slane %v760_v50, %v16478_v7  ;;  %v775_v61 = vcombine.high %v767_v51, %v767_v51  ;;  %v692_v62 = vpop.f32.mrb[4].mxu0  ;;  %v16691_v63 = vadd.f32 %v16636_v34, %v756_v48  ;;  %v16697_v3 = vadd.f32 %v16619_v21, %v741_v46 }
 0x177   :  { %v16694_v0 = vadd.f32 %v16652_v40, %v758_v55  ;;  %v16701_v4 = vadd.f32 %v16625_v28, %v16677_v54  ;;  %v14724_v6 = vpop.f32.mrb[5].mxu0  ;;  %v1177_v8 = vcombine.low %v16687_v59, %v16680_v56  ;;  %v783_v10 = vrot.slane %v767_v51, %v16478_v7 }
 0x178   :  { %v776_v9 = vcombine.high %v774_v60, %v774_v60  ;;  %v790_v11 = vrot.slane %v774_v60, %v16478_v7  ;;  %v759_v12 = vcombine.high %v16677_v54, %v16677_v54  ;;  %v797_v15 = vrot.slane %v775_v61, %v16478_v7 }
 0x179   :  { %v1178_v13 = vcombine.low %v16691_v63, %v16694_v0  ;;  %v1179_v14 = vcombine.low %v16697_v3, %v16701_v4  ;;  %v16715_v16 = vadd.f32 %v16640_v35, %v757_v58  ;;  %v805_v18 = vcombine.high %v783_v10, %v783_v10 }
 0x17a   :  { %v16718_v17 = vrot.slane %v776_v9, %v16478_v7  ;;  %v809_v19 = vcombine.high %v692_v62, %v692_v62  ;;  %v16721_v22 = vrot.slane %v1177_v8, %v16478_v7  ;;  %v806_v24 = vcombine.high %v790_v11, %v790_v11 }
 0x17b   :  { %v16724_v23 = vrot.slane %v1178_v13, %v16478_v7  ;;  %v807_v31 = vcombine.high %v797_v15, %v797_v15  ;;  %v16727_v32 = vrot.slane %v1179_v14, %v16478_v7  ;;  %v16732_v37 = vadd.f32 %v16628_v30, %v783_v10 }
 0x17c   :  { %v808_v33 = vcombine.high %v16718_v17, %v16718_v17  ;;  %v16735_v38 = vadd.f32 %v16643_v36, %v797_v15  ;;  %v16738_v39 = vadd.f32 %v16656_v42, %v805_v18  ;;  %v16745_v41 = vadd.f32 %v16648_v25, %v16718_v17 }
 0x17d   :  { %v16741_v29 = vadd.f32 %v16671_v52, %v807_v31  ;;  %v816_v45 = vrot.slane %v692_v62, %v16478_v7  ;;  %v697_v46 = vpop.f32.mrb[6].mxu0  ;;  %v16749_v47 = vadd.f32 %v16631_v26, %v790_v11  ;;  %v823_v49 = vrot.slane %v809_v19, %v16478_v7 }
 0x17e   :  { %v1226_v48 = vcombine.low %v16732_v37, %v16735_v38  ;;  %v858_v50 = vcombine.high %v697_v46, %v697_v46  ;;  %v14727_v51 = vpop.f32.mrb[7].mxu0  ;;  %v16755_v55 = vadd.f32 %v16660_v43, %v806_v24  ;;  %v865_v61 = vrot.slane %v697_v46, %v16478_v7 }
 0x17f   :  { %v824_v58 = vcombine.high %v816_v45, %v816_v45  ;;  %v832_v60 = vrot.slane %v816_v45, %v16478_v7  ;;  %v1227_v62 = vcombine.low %v16738_v39, %v16741_v29  ;;  %v825_v6 = vcombine.high %v823_v49, %v823_v49 }
 0x180   :  { %v839_v8 = vrot.slane %v823_v49, %v16478_v7  ;;  %v872_v9 = vrot.slane %v858_v50, %v16478_v7  ;;  %v1228_v10 = vcombine.low %v16749_v47, %v16745_v41  ;;  %v16766_v11 = vrot.slane %v1226_v48, %v16478_v7 }
 0x181   :  { %v846_v13 = vrot.slane %v824_v58, %v16478_v7  ;;  %v854_v14 = vcombine.high %v832_v60, %v832_v60  ;;  %v702_v15 = vpop.f32.mrb[8].mxu0  ;;  %v853_v18 = vrot.slane %v825_v6, %v16478_v7  ;;  %v16771_v24 = vadd.f32 %v16674_v53, %v832_v60 }
 0x182   :  { %v855_v19 = vcombine.high %v839_v8, %v839_v8  ;;  %v16774_v31 = vadd.f32 %v16652_v40, %v839_v8  ;;  %v14730_v45 = vpop.f32.mrb[9].mxu0  ;;  %v873_v50 = vcombine.high %v865_v61, %v865_v61  ;;  %v874_v60 = vcombine.high %v872_v9, %v872_v9 }
 0x183   :  { %v856_v46 = vcombine.high %v846_v13, %v846_v13  ;;  %v16777_v49 = vadd.f32 %v16616_v20, %v846_v13  ;;  %v16780_v48 = vadd.f32 %v16622_v27, %v854_v14  ;;  %v857_v51 = vcombine.high %v853_v18, %v853_v18 }
 0x184   :  { %21138 = vst [vmem:[#allocation21_spill] sm:$0xff] %v16774_v31  ;;  %v16783_v58 = vadd.f32 %v16619_v21, %v853_v18  ;;  %v16786_v6 = vadd.f32 %v16625_v28, %v855_v19  ;;  %v881_v20 = vrot.slane %v865_v61, %v16478_v7  ;;  %v888_v27 = vrot.slane %v872_v9, %v16478_v7 }
 0x185   :  { %v16789_v40 = vadd.f32 %v16636_v34, %v856_v46  ;;  %v1275_v8 = vcombine.low %v16771_v24, %v16777_v49  ;;  %v1243_v13 = vrot.slane %v1227_v62, %v16478_v7  ;;  %v16797_v14 = vadd.f32 %v16640_v35, %v857_v51 }
 0x186   :  { %21139 = vst [vmem:[#allocation22_spill] sm:$0xff] %v16783_v58  ;;  %21140 = vst [vmem:[#allocation23_spill] sm:$0xff] %v16786_v6  ;;  %v895_v21 = vrot.slane %v873_v50, %v16478_v7  ;;  %v902_v28 = vrot.slane %v874_v60, %v16478_v7  ;;  %v1250_v18 = vrot.slane %v1228_v10, %v16478_v7 }
 0x187   :  { %21141 = vst [vmem:[#allocation24_spill] sm:$0xff] %v16789_v40  ;;  %21142 = vst [vmem:[#allocation25_spill] sm:$0xff] %v16797_v14  ;;  %v1277_v34 = vcombine.low %v16774_v31, %v16783_v58  ;;  %v903_v19 = vcombine.high %v881_v20, %v881_v20  ;;  %v904_v45 = vcombine.high %v888_v27, %v888_v27 }
 0x188   :  { %v1276_v61 = vcombine.low %v16780_v48, %v16789_v40  ;;  %v1285_v9 = vrot.slane %v1275_v8, %v16478_v7  ;;  %v905_v62 = vcombine.high %v895_v21, %v895_v21  ;;  %v906_v46 = vcombine.high %v902_v28, %v902_v28 }
 0x189   :  { %v1278_v35 = vcombine.low %v16786_v6, %v16797_v14  ;;  %v16813_v10 = vadd.f32 %v16664_v44, %v759_v12  ;;  %v16816_v50 = vadd.f32 %v16664_v44, %v881_v20  ;;  %v16819_v51 = vadd.f32 %v16628_v30, %v895_v21 }
 0x18a   :  { %v16822_v60 = vadd.f32 %v16643_v36, %v903_v19  ;;  %v16825_v8 = vadd.f32 %v16656_v42, %v905_v62  ;;  %v16828_v1 = vadd.f32 %v16671_v52, %v888_v27  ;;  %v16831_v54 = vadd.f32 %v16631_v26, %v902_v28 }
 0x18b   :  { %21143 = vst [vmem:[#allocation26_spill] sm:$0xff] %v16816_v50  ;;  %21144 = vst [vmem:[#allocation27_spill] sm:$0xff] %v16819_v51  ;;  %v16834_v12 = vadd.f32 %v16648_v25, %v904_v45  ;;  %v16837_v44 = vadd.f32 %v16660_v43, %v906_v46  ;;  %v1180_v30 = vcombine.low %v16715_v16, %v16813_v10 }
 0x18c   :  { %21145 = vst [vmem:[#allocation28_spill] sm:$0xff] %v16822_v60  ;;  %21146 = vst [vmem:[#allocation29_spill] sm:$0xff] %v16825_v8  ;;  %v1324_v36 = vcombine.low %v16816_v50, %v16819_v51  ;;  %v1292_v42 = vrot.slane %v1276_v61, %v16478_v7  ;;  %v1325_v52 = vcombine.low %v16822_v60, %v16825_v8 }
 0x18d   :  { %21147 = vst [vmem:[#allocation30_spill] sm:$0xff] %v16828_v1  ;;  %21148 = vst [vmem:[#allocation31_spill] sm:$0xff] %v16831_v54  ;;  %v1326_v26 = vcombine.low %v16828_v1, %v16831_v54  ;;  %v913_v25 = vrot.slane %v702_v15, %v16478_v7  ;;  %v1327_v43 = vcombine.low %v16834_v12, %v16837_v44 }
 0x18e   :  { %21149 = vst [vmem:[#allocation32_spill] sm:$0xff] %v16834_v12  ;;  %21150 = vst [vmem:[#allocation33_spill] sm:$0xff] %v16837_v44  ;;  %v1208_v20 = vrot.slane %v1180_v30, %v16478_v7  ;;  %v1209_v27 = vcombine.low %v16721_v22, %v16724_v23  ;;  %v16858_v21 = vadd.f32 %v16684_v57, %v808_v33 }
 0x18f   :  { %v1299_v28 = vrot.slane %v1277_v34, %v16478_v7  ;;  %v1334_v19 = vrot.slane %v1324_v36, %v16478_v7  ;;  %v1341_v15 = vrot.slane %v1325_v52, %v16478_v7  ;;  %v914_v45 = vcombine.high %v913_v25, %v913_v25 }
 0x190   :  { %v1348_v61 = vrot.slane %v1326_v26, %v16478_v7  ;;  %v1210_v62 = vcombine.low %v16727_v32, %v1208_v20  ;;  %v921_v46 = vrot.slane %v913_v25, %v16478_v7  ;;  %v1229_v22 = vcombine.low %v16755_v55, %v16858_v21 }
 0x191   :  { %v928_v17 = vrot.slane %v914_v45, %v16478_v7  ;;  %v1258_v23 = vcombine.low %v16766_v11, %v1243_v13  ;;  %v1306_v33 = vrot.slane %v1278_v35, %v16478_v7  ;;  %v1307_v34 = vcombine.low %v1285_v9, %v1292_v42 }
 0x192   :  { %v1217_v30 = vrot.slane %v1209_v27, %v16478_v7  ;;  %v1224_v36 = vrot.slane %v1210_v62, %v16478_v7  ;;  %v1257_v52 = vrot.slane %v1229_v22, %v16478_v7  ;;  %v1355_v32 = vrot.slane %v1327_v43, %v16478_v7 }
 0x193   :  { %v1308_v26 = vcombine.low %v1299_v28, %v1306_v33  ;;  %v16876_v2 = vadd.f32 %v16684_v57, %v921_v46  ;;  %v16879_v11 = vadd.f32 %v16674_v53, %v928_v17  ;;  %v1266_v13 = vrot.slane %v1258_v23, %v16478_v7  ;;  %v16906_v46 = vld [vmem:[#allocation5] ss:$0 sm:$0xff] }
 0x194   :  { %v1225_v25 = vcombine.low %v1217_v30, %v1224_v36  ;;  %v1259_v20 = vcombine.low %v1250_v18, %v1257_v52  ;;  %v1315_v9 = vrot.slane %v1307_v34, %v16478_v7  ;;  %v1356_v43 = vcombine.low %v1334_v19, %v1341_v15 }
 0x195   :  { %21151 = vst [vmem:[#allocation34_spill] sm:$0xff] %v16876_v2  ;;  %21152 = vst [vmem:[#allocation35_spill] sm:$0xff] %v16879_v11  ;;  %v1322_v42 = vrot.slane %v1308_v26, %v16478_v7  ;;  %v1357_v27 = vcombine.low %v1348_v61, %v1355_v32  ;;  %v21153_v28 = vmov 0.0   ;;  %v1373_v53 = vcombine.low %v16876_v2, %v16879_v11 }
 0x196   :  { %14740 = vmatmul.mubr.msk.f32.vlgmr.msra.gmra.mrb[0].mxu1 %vm1388_vm2, %v1225_v25  ;;  %v1273_v35 = vrot.slane %v1259_v20, %v16478_v7  ;;  %v1364_v45 = vrot.slane %v1356_v43, %v16478_v7 }
 0x197   :  { %14742 = vmatprep.mubr.msk.f32.mxu1 %vm16244_vm0, %v21153_v28  ;;  %v1323_v18 = vcombine.low %v1315_v9, %v1322_v42  ;;  %v1371_v62 = vrot.slane %v1357_v27, %v16478_v7  ;;  %v1380_v19 = vrot.slane %v1373_v53, %v16478_v7 }
 0x198   :  { %v1274_v57 = vcombine.low %v1266_v13, %v1273_v35 }
 0x199   :  { %v1372_v15 = vcombine.low %v1364_v45, %v1371_v62  ;;  %v1387_v61 = vrot.slane %v1380_v19, %v16478_v7 }
 0x19a   :  { %14743 = vmatmul.mubr.msk.f32.gmra.mrb[2].mxu1 %vm1388_vm2, %v1274_v57 }
 0x19b   :  { %14745 = vmatprep.mubr.msk.f32.mxu1 %vm16244_vm0, %v21153_v28 }
 0x19e   :  { %14746 = vmatmul.mubr.msk.f32.gmra.mrb[4].mxu1 %vm1388_vm2, %v1323_v18 }
 0x19f   :  { %14748 = vmatprep.mubr.msk.f32.mxu1 %vm16244_vm0, %v21153_v28 }
 0x1a2   :  { %14749 = vmatmul.mubr.msk.f32.gmra.mrb[6].mxu1 %vm1388_vm2, %v1372_v15 }
 0x1a3   :  { %14751 = vmatprep.mubr.msk.f32.mxu1 %vm16244_vm0, %v21153_v28 }
 0x1a6   :  { %14752 = vmatmul.mubr.msk.f32.gmra.mrb[8].mxu1 %vm1388_vm2, %v1387_v61 }
 0x1a7   :  { %14760 = vmatprep.mubr.msk.f32.mxu1 %vm16244_vm0, %v21153_v28 }
 0x269   :  { %v1465_v22 = vpop.f32.mrb[0].mxu1 }
 0x26a   :  { %v1466_v17 = vadd.f32 %v16906_v46, %v1465_v22  ;;  %v14741_v23 = vpop.f32.mrb[1].mxu1 }
 0x26c   :  { %v1494_v33 = vcombine.high %v1466_v17, %v1466_v17  ;;  %v1501_v34 = vrot.slane %v1466_v17, %v16478_v7 }
 0x26d   :  { %v1470_v30 = vpop.f32.mrb[2].mxu1 }
 0x26e   :  { %v1508_v36 = vrot.slane %v1494_v33, %v16478_v7  ;;  %v1509_v52 = vcombine.high %v1501_v34, %v1501_v34  ;;  %v1471_v32 = vadd.f32 %v16906_v46, %v1470_v30  ;;  %v14744_v26 = vpop.f32.mrb[3].mxu1  ;;  %v1517_v20 = vrot.slane %v1501_v34, %v16478_v7 }
 0x270   :  { %v1510_v25 = vcombine.high %v1508_v36, %v1508_v36  ;;  %v1531_v13 = vrot.slane %v1509_v52, %v16478_v7  ;;  %v1543_v9 = vcombine.high %v1471_v32, %v1471_v32  ;;  %v1524_v35 = vrot.slane %v1508_v36, %v16478_v7 }
 0x271   :  { %v1550_v42 = vrot.slane %v1471_v32, %v16478_v7  ;;  %v1475_v43 = vpop.f32.mrb[4].mxu1 }
 0x272   :  { %v1538_v27 = vrot.slane %v1510_v25, %v16478_v7  ;;  %v1712_v57 = vcombine.low %v1517_v20, %v1531_v13  ;;  %v14180_v53 = vcombine.high %v1517_v20, %v1531_v13  ;;  %v1557_v18 = vrot.slane %v1543_v9, %v16478_v7  ;;  %v14747_v45 = vpop.f32.mrb[5].mxu1 }
 0x273   :  { %v1558_v62 = vcombine.high %v1550_v42, %v1550_v42  ;;  %v1476_v19 = vadd.f32 %v16906_v46, %v1475_v43  ;;  %v1566_v33 = vrot.slane %v1550_v42, %v16478_v7 }
 0x274   :  { %v1714_v15 = vcombine.low %v1524_v35, %v1538_v27  ;;  %v14181_v61 = vcombine.high %v1524_v35, %v1538_v27  ;;  %v1722_v22 = vrot.slane %v1712_v57, %v16478_v7  ;;  %v1729_v17 = vrot.slane %v14180_v53, %v16478_v7 }
 0x275   :  { %v1559_v23 = vcombine.high %v1557_v18, %v1557_v18  ;;  %v1580_v34 = vrot.slane %v1558_v62, %v16478_v7  ;;  %v1592_v30 = vcombine.high %v1476_v19, %v1476_v19  ;;  %v1480_v36 = vpop.f32.mrb[6].mxu1  ;;  %v1573_v26 = vrot.slane %v1557_v18, %v16478_v7 }
 0x276   :  { %v1736_v52 = vrot.slane %v1714_v15, %v16478_v7  ;;  %v1743_v32 = vrot.slane %v14181_v61, %v16478_v7  ;;  %v1599_v25 = vrot.slane %v1476_v19, %v16478_v7  ;;  %v14750_v20 = vpop.f32.mrb[7].mxu1  ;;  %v1744_v42 = vcombine.low %v1722_v22, %v1729_v17 }
 0x277   :  { %v1587_v13 = vrot.slane %v1559_v23, %v16478_v7  ;;  %v1761_v9 = vcombine.low %v1566_v33, %v1580_v34  ;;  %v14182_v35 = vcombine.high %v1566_v33, %v1580_v34  ;;  %v1606_v43 = vrot.slane %v1592_v30, %v16478_v7 }
 0x278   :  { %v1745_v27 = vcombine.low %v1736_v52, %v1743_v32  ;;  %v1607_v57 = vcombine.high %v1599_v25, %v1599_v25  ;;  %v1615_v53 = vrot.slane %v1599_v25, %v16478_v7  ;;  %v1752_v32 = vrot.slane %v1744_v42, %v16478_v7 }
 0x279   :  { %v1763_v45 = vcombine.low %v1573_v26, %v1587_v13  ;;  %v14183_v62 = vcombine.high %v1573_v26, %v1587_v13  ;;  %v1771_v15 = vrot.slane %v1761_v9, %v16478_v7  ;;  %v1778_v18 = vrot.slane %v14182_v35, %v16478_v7  ;;  %v1485_v61 = vpop.f32.mrb[8].mxu1 }
 0x27a   :  { %v1759_v19 = vrot.slane %v1745_v27, %v16478_v7  ;;  %v1608_v20 = vcombine.high %v1606_v43, %v1606_v43  ;;  %v1622_v23 = vrot.slane %v1606_v43, %v16478_v7  ;;  %v1629_v33 = vrot.slane %v1607_v57, %v16478_v7  ;;  %v14753_v34 = vpop.f32.mrb[9].mxu1 }
 0x27b   :  { %v1785_v22 = vrot.slane %v1763_v45, %v16478_v7  ;;  %v1792_v17 = vrot.slane %v14183_v62, %v16478_v7  ;;  %v1793_v30 = vcombine.low %v1771_v15, %v1778_v18  ;;  %v1637_v52 = vcombine.high %v1615_v53, %v1615_v53 }
 0x27c   :  { %v1636_v26 = vrot.slane %v1608_v20, %v16478_v7  ;;  %v1638_v25 = vcombine.high %v1622_v23, %v1622_v23  ;;  %v1639_v13 = vcombine.high %v1629_v33, %v1629_v33  ;;  %v1816_v35 = vrot.slane %v1615_v53, %v16478_v7 }
 0x27d   :  { %v1794_v9 = vcombine.low %v1785_v22, %v1792_v17  ;;  %v1923_v27 = vcombine.low %v1629_v33, %v1637_v52  ;;  %v16940_v43 = vcombine.low %v1752_v32, %v1759_v19  ;;  %v1481_v34 = vadd.f32 %v16906_v46, %v1480_v36 }
 0x27e   :  { %v1924_v57 = vcombine.low %v1639_v13, %v1622_v23  ;;  %v1801_v45 = vrot.slane %v1793_v30, %v16478_v7  ;;  %v16946_v15 = vrot.slane %v1816_v35, %v16478_v7  ;;  %v1486_v42 = vadd.f32 %v16906_v46, %v1485_v61 }
 0x27f   :  { %v1808_v62 = vrot.slane %v1794_v9, %v16478_v7  ;;  %v1925_v18 = vcombine.low %v1636_v26, %v1638_v25  ;;  %v1640_v20 = vcombine.high %v1636_v26, %v1636_v26  ;;  %v1641_v22 = vcombine.high %v1481_v34, %v1481_v34 }
 0x280   :  { %v1648_v53 = vrot.slane %v1481_v34, %v16478_v7  ;;  %v1933_v19 = vrot.slane %v1923_v27, %v16478_v7  ;;  %v1940_v36 = vrot.slane %v1924_v57, %v16478_v7  ;;  %v1696_v23 = vrot.slane %v1486_v42, %v16478_v7  ;;  %1828 = vrot.lane.b32.xlu1 %v16946_v15, %s16247_s7 }
 0x281   :  { %v16950_v33 = vcombine.low %v1801_v45, %v1808_v62  ;;  %v1655_v17 = vrot.slane %v1641_v22, %v16478_v7  ;;  %v1947_v13 = vrot.slane %v1925_v18, %v16478_v7 }
 0x282   :  { %v1656_v46 = vcombine.high %v1648_v53, %v1648_v53  ;;  %v1664_v61 = vrot.slane %v1648_v53, %v16478_v7  ;;  %v1697_v30 = vcombine.high %v1696_v23, %v1696_v23  ;;  %v1955_v9 = vcombine.low %v1933_v19, %v1940_v36 }
 0x283   :  { %v16961_v52 = vpack.i.bf16 %v16950_v33, %v16940_v43  ;;  %v1657_v32 = vcombine.high %v1655_v17, %v1655_v17  ;;  %v1671_v26 = vrot.slane %v1655_v17, %v16478_v7  ;;  %v1704_v42 = vrot.slane %v1696_v23, %v16478_v7 }
 0x284   :  { %v1678_v25 = vrot.slane %v1656_v46, %v16478_v7  ;;  %v1686_v35 = vcombine.high %v1664_v61, %v1664_v61  ;;  %v1926_v27 = vcombine.low %v1640_v20, %v1664_v61  ;;  %v1711_v57 = vrot.slane %v1697_v30, %v16478_v7 }
 0x285   :  { %15614 = vrot.lane.b32.xlu0 %v16961_v52, %s16247_s7  ;;  %v1685_v34 = vrot.slane %v1657_v32, %v16478_v7  ;;  %v1687_v45 = vcombine.high %v1671_v26, %v1671_v26  ;;  %v1963_v20 = vrot.slane %v1955_v9, %v16478_v7 }
 0x286   :  { %v1688_v62 = vcombine.high %v1678_v25, %v1678_v25  ;;  %v1954_v22 = vrot.slane %v1926_v27, %v16478_v7  ;;  %v1972_v53 = vcombine.low %v1678_v25, %v1686_v35  ;;  %v2027_v17 = vrot.slane %v1711_v57, %v16478_v7 }
 0x287   :  { %v1974_v19 = vcombine.low %v1685_v34, %v1687_v45  ;;  %v1689_v36 = vcombine.high %v1685_v34, %v1685_v34 }
 0x288   :  { %v1973_v18 = vcombine.low %v1688_v62, %v1671_v26  ;;  %v1956_v46 = vcombine.low %v1947_v13, %v1954_v22  ;;  %v1982_v61 = vrot.slane %v1972_v53, %v16478_v7  ;;  %v16976_v30 = vrot.slane %v2027_v17, %v16478_v7 }
 0x289   :  { %v1975_v5 = vcombine.low %v1689_v36, %v1704_v42  ;;  %v1996_v23 = vrot.slane %v1974_v19, %v16478_v7  ;;  %v21154_v22 = vmov 0 }
 0x28a   :  { %v1989_v32 = vrot.slane %v1973_v18, %v16478_v7  ;;  %v1970_v25 = vrot.slane %v1956_v46, %v16478_v7  ;;  %2039 = vrot.lane.b32.xlu1 %v16976_v30, %s16247_s7  ;;  %v21155_v22 = vsel %vm16998_vm4, 4294967295, %v21154_v22  ;;  %v21157_v18 = vmov 0.0|0.0  }
 0x28b   :  { %v2003_v35 = vrot.slane %v1975_v5, %v16478_v7  ;;  %21156 = vst [vmem:[#allocation36_spill] sm:$0xff] %v21155_v22 }
 0x28c   :  { %v2004_v26 = vcombine.low %v1982_v61, %v1989_v32  ;;  %v16984_v9 = vcombine.low %v1963_v20, %v1970_v25 }
 0x28d   :  { %v2005_v27 = vcombine.low %v1996_v23, %v2003_v35 }
 0x28e   :  { %v2012_v13 = vrot.slane %v2004_v26, %v16478_v7 }
 0x28f   :  { %v2019_v57 = vrot.slane %v2005_v27, %v16478_v7 }
 0x291   :  { %v16988_v34 = vcombine.low %v2012_v13, %v2019_v57 }
 0x293   :  { %v16992_v45 = vpack.i.bf16 %v16988_v34, %v16984_v9 }
 0x295   :  { %15619 = vrot.lane.b32.xlu0 %v16992_v45, %s16247_s7 }
 0x2f2   :  { %v1829_v17 = vpop.permute.xlu1 %1828 }
 0x2f7   :  { %v15615_v62 = vpop.permute.xlu0 %15614 }
 0x2f8   :  { %v15617_v42 = vunpack.i.h.bf16 %v15615_v62  ;;  %v15616_v5 = vunpack.i.l.bf16 %v15615_v62 }
 0x2fa   :  { %v15422_v53 = vpack.c.bf16 %v15617_v42, %v15616_v5 }
 0x2fc   :  { %15424 = vmatpush3.bf16.xpose.msk.msra.mxu1 %vm16998_vm4, %v15422_v53  ;;  %v2040_v61 = vpop.permute.xlu1 %2039 }
 0x2fd   :  { %14758 = vmatprep.subr.mxu1 %v21153_v28 }
 0x304   :  { %14759 = vmatpush3.xpose.msk.msra.mxu1 %vm1830_vm3, %v1829_v17 }
 0x305   :  { %15429 = vmatprep.subr.bf16.mxu1 %v21157_v18 }
 0x307   :  { %14761 = vmatmul.mubr.msk.f32.vlgmr.msra.gmra.mrb[10].mxu1 %vm1830_vm3, %v16940_v43  ;;  %v15620_v19 = vpop.permute.xlu0 %15619 }
 0x308   :  { %14763 = vmatprep.mubr.msk.f32.mxu1 %vm16244_vm0, %v21153_v28  ;;  %v15622_v36 = vunpack.i.h.bf16 %v15620_v19  ;;  %v15621_v20 = vunpack.i.l.bf16 %v15620_v19 }
 0x30a   :  { %v15426_v46 = vpack.c.bf16 %v15622_v36, %v15621_v20 }
 0x30b   :  { %14764 = vmatmul.mubr.msk.f32.gmra.mrb[12].mxu1 %vm1830_vm3, %v16950_v33 }
 0x30c   :  { %14766 = vmatprep.mubr.msk.f32.mxu1 %vm16244_vm0, %v21153_v28  ;;  %15428 = vmatpush3.bf16.xpose.msk.msra.mxu0 %vm16998_vm4, %v15426_v46 }
 0x30d   :  { %14773 = vmatprep.subr.mxu0 %v21153_v28 }
 0x30f   :  { %14767 = vmatmul.mubr.msk.f32.gmra.mrb[14].mxu1 %vm1830_vm3, %v16946_v15 }
 0x310   :  { %14790 = vmatprep.mubr.msk.f32.mxu1 %vm16244_vm0, %v21153_v28 }
 0x314   :  { %14774 = vmatpush3.xpose.msk.msra.mxu0 %vm1830_vm3, %v2040_v61 }
 0x315   :  { %15432 = vmatprep.subr.bf16.mxu0 %v21157_v18 }
 0x317   :  { %14776 = vmatmul.mubr.msk.f32.vlgmr.msra.gmra.mrb[10].mxu0 %vm1830_vm3, %v16984_v9 }
 0x318   :  { %14778 = vmatprep.mubr.msk.f32.mxu0 %vm16244_vm0, %v21153_v28 }
 0x31b   :  { %14779 = vmatmul.mubr.msk.f32.gmra.mrb[12].mxu0 %vm1830_vm3, %v16988_v34 }
 0x31c   :  { %14781 = vmatprep.mubr.msk.f32.mxu0 %vm16244_vm0, %v21153_v28 }
 0x31f   :  { %14782 = vmatmul.mubr.msk.f32.gmra.mrb[14].mxu0 %vm1830_vm3, %v16976_v30 }
 0x320   :  { %14805 = vmatprep.mubr.msk.f32.mxu0 %vm16244_vm0, %v21153_v28 }
 0x3da   :  { %v1909_v32 = vpop.f32.mrb[10].mxu1 }
 0x3db   :  { %v14762_v23 = vpop.f32.mrb[11].mxu1  ;;  %v2134_v25 = vsel %vm2133_vm5, %v1909_v32, -inf }
 0x3dc   :  { %2135 = vmax.xlane.f32.xlu0 %v2134_v25 }
 0x3de   :  { %v1914_v26 = vpop.f32.mrb[12].mxu1 }
 0x3df   :  { %v14765_v35 = vpop.f32.mrb[13].mxu1  ;;  %v2137_v13 = vsel %vm2133_vm5, %v1914_v26, -inf }
 0x3e0   :  { %2138 = vmax.xlane.f32.xlu1 %v2137_v13 }
 0x3e2   :  { %v1919_v27 = vpop.f32.mrb[14].mxu1 }
 0x3e3   :  { %v14768_v57 = vpop.f32.mrb[15].mxu1  ;;  %v2141_v62 = vsel %vm2140_vm6, %v1919_v27, -inf }
 0x3e4   :  { %2142 = vmax.xlane.f32.xlu0 %v2141_v62 }
 0x3ea   :  { %v2119_v42 = vpop.f32.mrb[10].mxu0 }
 0x3eb   :  { %v14777_v5 = vpop.f32.mrb[11].mxu0  ;;  %v2144_v53 = vsel %vm2133_vm5, %v2119_v42, -inf }
 0x3ec   :  { %2145 = vmax.xlane.f32.xlu0 %v2144_v53 }
 0x3ee   :  { %v17040_v17 = vpop.f32.mrb[12].mxu0 }
 0x3ef   :  { %v14780_v19 = vpop.f32.mrb[13].mxu0  ;;  %v2147_v36 = vsel %vm2133_vm5, %v17040_v17, -inf }
 0x3f0   :  { %2148 = vmax.xlane.f32.xlu1 %v2147_v36 }
 0x3f2   :  { %v17044_v20 = vpop.f32.mrb[14].mxu0 }
 0x3f3   :  { %v14783_v46 = vpop.f32.mrb[15].mxu0  ;;  %v2150_v61 = vsel %vm2140_vm6, %v17044_v20, -inf }
 0x3f4   :  { %2151 = vmax.xlane.f32.xlu0 %v2150_v61 }
 0x401   :  { %2205 = vrot.lane.b32.xlu1 %v16946_v15, %s16248_s21 }
 0x405   :  { %15634 = vrot.lane.b32.xlu1 %v16961_v52, %s16249_s27 }
 0x409   :  { %15639 = vrot.lane.b32.xlu1 %v16992_v45, %s16249_s27 }
 0x40a   :  { %15624 = vrot.lane.b32.xlu0 %v16961_v52, %s16248_s21 }
 0x40e   :  { %15629 = vrot.lane.b32.xlu0 %v16992_v45, %s16248_s21 }
 0x412   :  { %2305 = vrot.lane.b32.xlu0 %v16976_v30, %s16248_s21 }
 0x469   :  { %v2136_v23 = vpop.xlane.xlu0 %2135 }
 0x46a   :  { %v2153_v25 = vsub.f32 %v1909_v32, %v2136_v23 }
 0x46c   :  { %v2159_v35 = vmul.f32 1.442695, %v2153_v25 }
 0x46d   :  { %v2139_v13 = vpop.xlane.xlu1 %2138 }
 0x46e   :  { %15779 = vpow2.f32 %v2159_v35  ;;  %v2154_v57 = vsub.f32 %v1914_v26, %v2139_v13 }
 0x470   :  { %v2161_v62 = vmul.f32 1.442695, %v2154_v57 }
 0x471   :  { %v2143_v5 = vpop.xlane.xlu0 %2142 }
 0x472   :  { %15781 = vpow2.f32 %v2161_v62  ;;  %v2155_v53 = vsub.f32 %v1919_v27, %v2143_v5 }
 0x474   :  { %v2163_v19 = vmul.f32 1.442695, %v2155_v53 }
 0x476   :  { %15783 = vpow2.f32 %v2163_v19 }
 0x478   :  { %v17060_v36 = vpop.eup %15779 }
 0x479   :  { %v2171_v46 = vsel %vm2133_vm5, %v17060_v36, 0.0  ;;  %v2146_v61 = vpop.xlane.xlu0 %2145 }
 0x47a   :  { %2172 = vadd.xlane.f32.xlu1 %v2171_v46  ;;  %v2156_v11 = vsub.f32 %v2119_v42, %v2146_v61 }
 0x47c   :  { %v17064_v2 = vpop.eup %15781  ;;  %v2165_v32 = vmul.f32 1.442695, %v2156_v11 }
 0x47d   :  { %v2174_v26 = vsel %vm2133_vm5, %v17064_v2, 0.0  ;;  %v2149_v42 = vpop.xlane.xlu1 %2148 }
 0x47e   :  { %2175 = vadd.xlane.f32.xlu0 %v2174_v26  ;;  %15785 = vpow2.f32 %v2165_v32 }
 0x480   :  { %v17068_v23 = vpop.eup %15783 }
 0x481   :  { %v2177_v27 = vsel %vm2140_vm6, %v17068_v23, 0.0  ;;  %v2152_v25 = vpop.xlane.xlu0 %2151  ;;  %v2206_v32 = vpop.permute.xlu1 %2205 }
 0x482   :  { %2178 = vadd.xlane.f32.xlu1 %v2177_v27  ;;  %v2157_v27 = vsub.f32 %v17040_v17, %v2149_v42 }
 0x485   :  { %v15625_v35 = vpop.permute.xlu0 %15624 }
 0x486   :  { %v15627_v13 = vunpack.i.h.bf16 %v15625_v35  ;;  %v15626_v57 = vunpack.i.l.bf16 %v15625_v35  ;;  %v2167_v35 = vmul.f32 1.442695, %v2157_v27 }
 0x488   :  { %v17072_v62 = vpop.eup %15785  ;;  %v15430_v5 = vpack.c.bf16 %v15627_v13, %v15626_v57  ;;  %v2158_v13 = vsub.f32 %v17044_v20, %v2152_v25  ;;  %15787 = vpow2.f32 %v2167_v35  ;;  %v15635_v25 = vpop.permute.xlu1 %15634 }
 0x489   :  { %v15630_v11 = vpop.permute.xlu0 %15629  ;;  %v2180_v53 = vsel %vm2133_vm5, %v17072_v62, 0.0 }
 0x48a   :  { %v15632_v19 = vunpack.i.h.bf16 %v15630_v11  ;;  %v15631_v46 = vunpack.i.l.bf16 %v15630_v11  ;;  %2181 = vadd.xlane.f32.xlu0 %v2180_v53  ;;  %15431 = vmatpush3.bf16.msra.mxu1 %v15430_v5  ;;  %v2169_v57 = vmul.f32 1.442695, %v2158_v13 }
 0x48b   :  { %14788 = vmatprep.subr.mxu1 %v21153_v28 }
 0x48c   :  { %v15433_v61 = vpack.c.bf16 %v15632_v19, %v15631_v46  ;;  %15789 = vpow2.f32 %v2169_v57  ;;  %v15640_v11 = vpop.permute.xlu1 %15639 }
 0x48d   :  { %v2306_v26 = vpop.permute.xlu0 %2305 }
 0x48e   :  { %15434 = vmatpush3.bf16.msra.mxu0 %v15433_v61  ;;  %14789 = vmatpush3.msk.msra.mxu1 %vm2218_vm7, %v2206_v32  ;;  %v15637_v61 = vunpack.i.h.bf16 %v15635_v25  ;;  %v15636_v32 = vunpack.i.l.bf16 %v15635_v25 }
 0x48f   :  { %14803 = vmatprep.subr.mxu0 %v21153_v28  ;;  %15435 = vmatprep.subr.bf16.mxu1 %v21157_v18 }
 0x490   :  { %v15436_v35 = vpack.c.bf16 %v15637_v61, %v15636_v32 }
 0x492   :  { %14804 = vmatpush3.msk.msra.mxu0 %vm2218_vm7, %v2306_v26  ;;  %v17096_v5 = vpop.eup %15787 }
 0x493   :  { %2400 = vrot.lane.b32.xlu1 %v16940_v43, %s16250_s28  ;;  %15439 = vmatprep.subr.bf16.mxu0 %v21157_v18  ;;  %v2183_v17 = vsel %vm2133_vm5, %v17096_v5, 0.0 }
 0x496   :  { %v17100_v42 = vpop.eup %15789 }
 0x497   :  { %2514 = vrot.lane.b32.xlu1 %v16976_v30, %s16249_s27  ;;  %v2186_v20 = vsel %vm2140_vm6, %v17100_v42, 0.0 }
 0x4a0   :  { %2410 = vrot.lane.b32.xlu0 %v16946_v15, %s16249_s27 }
 0x4a4   :  { %2402 = vrot.lane.b32.xlu0 %v16950_v33, %s16250_s28 }
 0x4a8   :  { %2404 = vrot.lane.b32.xlu0 %v16946_v15, %s16250_s28 }
 0x4ac   :  { %2506 = vrot.lane.b32.xlu0 %v16988_v34, %s16250_s28 }
 0x4bb   :  { %2184 = vadd.xlane.f32.xlu1 %v2183_v17 }
 0x4bf   :  { %2187 = vadd.xlane.f32.xlu1 %v2186_v20 }
 0x4d0   :  { %2504 = vrot.lane.b32.xlu1 %v16984_v9, %s16250_s28 }
 0x4d4   :  { %2508 = vrot.lane.b32.xlu1 %v16976_v30, %s16250_s28 }
 0x507   :  { %v2173_v53 = vpop.xlane.xlu1 %2172 }
 0x508   :  { %15791 = vrcp.f32 %v2173_v53  ;;  %v15642_v53 = vunpack.i.h.bf16 %v15640_v11 }
 0x50b   :  { %v2176_v19 = vpop.xlane.xlu0 %2175 }
 0x50c   :  { %15793 = vrcp.f32 %v2176_v19  ;;  %v15641_v19 = vunpack.i.l.bf16 %v15640_v11 }
 0x50e   :  { %v15440_v32 = vpack.c.bf16 %v15642_v53, %v15641_v19 }
 0x50f   :  { %v2179_v46 = vpop.xlane.xlu1 %2178 }
 0x510   :  { %15795 = vrcp.f32 %v2179_v46 }
 0x512   :  { %v15792_v26 = vpop.eup %15791 }
 0x513   :  { %v2195_v27 = vmul.f32 %v15792_v26, %v17060_v36 }
 0x515   :  { %14791 = vmatmul.mubr.msk.f32.vlgmr.msra.gmra.mrb[16].mxu1 %vm2133_vm5, %v2195_v27 }
 0x516   :  { %v15794_v13 = vpop.eup %15793  ;;  %15438 = vmatpush3.bf16.xpose.msk.msra.mxu1 %vm16998_vm4, %v15436_v35  ;;  %14793 = vmatprep.mubr.msk.f32.mxu1 %vm16244_vm0, %v21153_v28 }
 0x517   :  { %v2196_v57 = vmul.f32 %v15794_v13, %v17064_v2  ;;  %14818 = vmatprep.subr.mxu1 %v21153_v28  ;;  %v2182_v17 = vpop.xlane.xlu0 %2181  ;;  %v2401_v2 = vpop.permute.xlu1 %2400 }
 0x518   :  { %15797 = vrcp.f32 %v2182_v17 }
 0x519   :  { %14794 = vmatmul.mubr.msk.f32.gmra.mrb[18].mxu1 %vm2133_vm5, %v2196_v57 }
 0x51a   :  { %v15796_v20 = vpop.eup %15795  ;;  %14796 = vmatprep.mubr.msk.f32.mxu1 %vm16244_vm0, %v21153_v28 }
 0x51b   :  { %v2197_v36 = vmul.f32 %v15796_v20, %v17068_v23  ;;  %v2411_v25 = vpop.permute.xlu0 %2410 }
 0x51d   :  { %14797 = vmatmul.mubr.msk.f32.gmra.mrb[20].mxu1 %vm2133_vm5, %v2197_v36 }
 0x51e   :  { %14819 = vmatpush3.xpose.msk.msra.mxu1 %vm1830_vm3, %v2411_v25  ;;  %14820 = vmatprep.mubr.msk.f32.mxu1 %vm16244_vm0, %v21153_v28 }
 0x51f   :  { %15443 = vmatprep.subr.bf16.mxu1 %v21157_v18  ;;  %v2403_v46 = vpop.permute.xlu0 %2402 }
 0x521   :  { %14821 = vmatmul.mubr.msk.f32.vlgmr.msra.gmra.mrb[22].mxu1 %vm1830_vm3, %v2401_v2 }
 0x522   :  { %14823 = vmatprep.mubr.msk.f32.mxu1 %vm16244_vm0, %v21153_v28  ;;  %v15798_v23 = vpop.eup %15797 }
 0x523   :  { %v2198_v61 = vmul.f32 %v15798_v23, %v17072_v62  ;;  %v2405_v11 = vpop.permute.xlu0 %2404  ;;  %v2515_v62 = vpop.permute.xlu1 %2514 }
 0x525   :  { %14824 = vmatmul.mubr.msk.f32.gmra.mrb[24].mxu1 %vm1830_vm3, %v2403_v46  ;;  %14806 = vmatmul.mubr.msk.f32.vlgmr.msra.gmra.mrb[16].mxu0 %vm2133_vm5, %v2198_v61 }
 0x526   :  { %14826 = vmatprep.mubr.msk.f32.mxu1 %vm16244_vm0, %v21153_v28  ;;  %15442 = vmatpush3.bf16.xpose.msk.msra.mxu0 %vm16998_vm4, %v15440_v32 }
 0x527   :  { %14808 = vmatprep.mubr.msk.f32.mxu0 %vm16244_vm0, %v21153_v28  ;;  %14833 = vmatprep.subr.mxu0 %v21153_v28 }
 0x529   :  { %14827 = vmatmul.mubr.msk.f32.gmra.mrb[26].mxu1 %vm1830_vm3, %v2405_v11 }
 0x52a   :  { %14850 = vmatprep.mubr.msk.f32.mxu1 %vm16244_vm0, %v21153_v28 }
 0x52e   :  { %14834 = vmatpush3.xpose.msk.msra.mxu0 %vm1830_vm3, %v2515_v62 }
 0x52f   :  { %15446 = vmatprep.subr.bf16.mxu0 %v21157_v18 }
 0x548   :  { %v2185_v26 = vpop.xlane.xlu1 %2184 }
 0x549   :  { %15799 = vrcp.f32 %v2185_v26 }
 0x54c   :  { %v2188_v27 = vpop.xlane.xlu1 %2187 }
 0x54d   :  { %15801 = vrcp.f32 %v2188_v27 }
 0x550   :  { %v2505_v20 = vpop.permute.xlu1 %2504 }
 0x553   :  { %v15800_v35 = vpop.eup %15799 }
 0x554   :  { %v2199_v13 = vmul.f32 %v15800_v35, %v17096_v5  ;;  %v2507_v5 = vpop.permute.xlu0 %2506  ;;  %v2509_v36 = vpop.permute.xlu1 %2508 }
 0x556   :  { %14809 = vmatmul.mubr.msk.f32.gmra.mrb[18].mxu0 %vm2133_vm5, %v2199_v13 }
 0x557   :  { %v15802_v57 = vpop.eup %15801  ;;  %14811 = vmatprep.mubr.msk.f32.mxu0 %vm16244_vm0, %v21153_v28 }
 0x558   :  { %v2200_v17 = vmul.f32 %v15802_v57, %v17100_v42 }
 0x55a   :  { %14812 = vmatmul.mubr.msk.f32.gmra.mrb[20].mxu0 %vm2133_vm5, %v2200_v17 }
 0x55b   :  { %14835 = vmatprep.mubr.msk.f32.mxu0 %vm16244_vm0, %v21153_v28 }
 0x55e   :  { %14836 = vmatmul.mubr.msk.f32.vlgmr.msra.gmra.mrb[22].mxu0 %vm1830_vm3, %v2505_v20 }
 0x55f   :  { %14838 = vmatprep.mubr.msk.f32.mxu0 %vm16244_vm0, %v21153_v28 }
 0x562   :  { %14839 = vmatmul.mubr.msk.f32.gmra.mrb[24].mxu0 %vm1830_vm3, %v2507_v5 }
 0x563   :  { %14841 = vmatprep.mubr.msk.f32.mxu0 %vm16244_vm0, %v21153_v28 }
 0x566   :  { %14842 = vmatmul.mubr.msk.f32.gmra.mrb[26].mxu0 %vm1830_vm3, %v2509_v36 }
 0x567   :  { %14865 = vmatprep.mubr.msk.f32.mxu0 %vm16244_vm0, %v21153_v28 }
 0x5e8   :  { %v17160_v42 = vpop.f32.mrb[16].mxu1 }
 0x5e9   :  { %v14792_v25 = vpop.f32.mrb[17].mxu1 }
 0x5ec   :  { %v17162_v2 = vpop.f32.mrb[18].mxu1 }
 0x5ed   :  { %v14795_v53 = vpop.f32.mrb[19].mxu1 }
 0x5f0   :  { %v17164_v19 = vpop.f32.mrb[20].mxu1 }
 0x5f1   :  { %v14798_v46 = vpop.f32.mrb[21].mxu1 }
 0x5f4   :  { %v2490_v23 = vpop.f32.mrb[22].mxu1 }
 0x5f5   :  { %v14822_v61 = vpop.f32.mrb[23].mxu1  ;;  %v2608_v32 = vsel %vm2133_vm5, %v2490_v23, -inf }
 0x5f6   :  { %2609 = vmax.xlane.f32.xlu0 %v2608_v32 }
 0x5f8   :  { %v2495_v11 = vpop.f32.mrb[24].mxu1  ;;  %v17167_v62 = vpop.f32.mrb[16].mxu0 }
 0x5f9   :  { %v14825_v26 = vpop.f32.mrb[25].mxu1  ;;  %v2611_v27 = vsel %vm2133_vm5, %v2495_v11, -inf  ;;  %v14807_v35 = vpop.f32.mrb[17].mxu0 }
 0x5fa   :  { %2612 = vmax.xlane.f32.xlu1 %v2611_v27 }
 0x5fc   :  { %v2500_v13 = vpop.f32.mrb[26].mxu1 }
 0x5fd   :  { %v14828_v57 = vpop.f32.mrb[27].mxu1  ;;  %v2614_v17 = vsel %vm2140_vm6, %v2500_v13, -inf }
 0x5fe   :  { %2615 = vmax.xlane.f32.xlu0 %v2614_v17 }
 0x629   :  { %v17171_v20 = vpop.f32.mrb[18].mxu0 }
 0x62a   :  { %v14810_v5 = vpop.f32.mrb[19].mxu0 }
 0x62d   :  { %v17173_v36 = vpop.f32.mrb[20].mxu0 }
 0x62e   :  { %v14813_v25 = vpop.f32.mrb[21].mxu0 }
 0x631   :  { %v2594_v53 = vpop.f32.mrb[22].mxu0 }
 0x632   :  { %v14837_v46 = vpop.f32.mrb[23].mxu0  ;;  %v2617_v61 = vsel %vm2133_vm5, %v2594_v53, -inf }
 0x633   :  { %2618 = vmax.xlane.f32.xlu0 %v2617_v61 }
 0x635   :  { %v2599_v32 = vpop.f32.mrb[24].mxu0 }
 0x636   :  { %v14840_v26 = vpop.f32.mrb[25].mxu0  ;;  %v2620_v27 = vsel %vm2133_vm5, %v2599_v32, -inf }
 0x637   :  { %2621 = vmax.xlane.f32.xlu1 %v2620_v27 }
 0x639   :  { %v2604_v35 = vpop.f32.mrb[26].mxu0 }
 0x63a   :  { %v14843_v57 = vpop.f32.mrb[27].mxu0  ;;  %v2623_v17 = vsel %vm2140_vm6, %v2604_v35, -inf }
 0x63b   :  { %2624 = vmax.xlane.f32.xlu0 %v2623_v17 }
 0x648   :  { %2678 = vrot.lane.b32.xlu1 %v16946_v15, %s16251_s8 }
 0x64c   :  { %15654 = vrot.lane.b32.xlu1 %v16961_v52, %s16252_s20 }
 0x650   :  { %15659 = vrot.lane.b32.xlu1 %v16992_v45, %s16252_s20 }
 0x651   :  { %15644 = vrot.lane.b32.xlu0 %v16961_v52, %s16251_s8 }
 0x655   :  { %15649 = vrot.lane.b32.xlu0 %v16992_v45, %s16251_s8 }
 0x659   :  { %2777 = vrot.lane.b32.xlu0 %v16976_v30, %s16251_s8 }
 0x683   :  { %v2610_v5 = vpop.xlane.xlu0 %2609 }
 0x684   :  { %v2626_v25 = vsub.f32 %v2490_v23, %v2610_v5 }
 0x686   :  { %v2632_v46 = vmul.f32 1.442695, %v2626_v25 }
 0x687   :  { %v2613_v61 = vpop.xlane.xlu1 %2612 }
 0x688   :  { %15803 = vpow2.f32 %v2632_v46  ;;  %v2627_v26 = vsub.f32 %v2495_v11, %v2613_v61 }
 0x68a   :  { %v2634_v27 = vmul.f32 1.442695, %v2627_v26 }
 0x68b   :  { %v2616_v57 = vpop.xlane.xlu0 %2615 }
 0x68c   :  { %15805 = vpow2.f32 %v2634_v27  ;;  %v2628_v17 = vsub.f32 %v2500_v13, %v2616_v57 }
 0x68e   :  { %v2636_v44 = vmul.f32 1.442695, %v2628_v17 }
 0x690   :  { %15807 = vpow2.f32 %v2636_v44 }
 0x692   :  { %v17190_v8 = vpop.eup %15803 }
 0x693   :  { %v2644_v12 = vsel %vm2133_vm5, %v17190_v8, 0.0 }
 0x694   :  { %2645 = vadd.xlane.f32.xlu1 %v2644_v12 }
 0x696   :  { %v17194_v54 = vpop.eup %15805 }
 0x697   :  { %v2647_v23 = vsel %vm2133_vm5, %v17194_v54, 0.0 }
 0x698   :  { %2648 = vadd.xlane.f32.xlu0 %v2647_v23 }
 0x69a   :  { %v17198_v5 = vpop.eup %15807 }
 0x69b   :  { %v2650_v11 = vsel %vm2140_vm6, %v17198_v5, 0.0 }
 0x69c   :  { %2651 = vadd.xlane.f32.xlu1 %v2650_v11 }
 0x6ad   :  { %2872 = vrot.lane.b32.xlu1 %v16940_v43, %s16253_s15 }
 0x6b1   :  { %2986 = vrot.lane.b32.xlu1 %v16976_v30, %s16252_s20 }
 0x6c0   :  { %v2619_v12 = vpop.xlane.xlu0 %2618 }
 0x6c1   :  { %v2629_v44 = vsub.f32 %v2594_v53, %v2619_v12 }
 0x6c3   :  { %v2638_v13 = vmul.f32 1.442695, %v2629_v44 }
 0x6c4   :  { %v2622_v25 = vpop.xlane.xlu1 %2621 }
 0x6c5   :  { %15809 = vpow2.f32 %v2638_v13  ;;  %v2630_v46 = vsub.f32 %v2599_v32, %v2622_v25 }
 0x6c7   :  { %v2640_v61 = vmul.f32 1.442695, %v2630_v46 }
 0x6c8   :  { %v2625_v26 = vpop.xlane.xlu0 %2624  ;;  %v2679_v25 = vpop.permute.xlu1 %2678 }
 0x6c9   :  { %15811 = vpow2.f32 %v2640_v61  ;;  %v2631_v27 = vsub.f32 %v2604_v35, %v2625_v26 }
 0x6cb   :  { %v2642_v57 = vmul.f32 1.442695, %v2631_v27 }
 0x6cc   :  { %v15645_v17 = vpop.permute.xlu0 %15644  ;;  %v15655_v61 = vpop.permute.xlu1 %15654 }
 0x6cd   :  { %15813 = vpow2.f32 %v2642_v57  ;;  %v15647_v23 = vunpack.i.h.bf16 %v15645_v17  ;;  %v15646_v11 = vunpack.i.l.bf16 %v15645_v17 }
 0x6cf   :  { %v17206_v60 = vpop.eup %15809  ;;  %v15444_v1 = vpack.c.bf16 %v15647_v23, %v15646_v11  ;;  %v15657_v23 = vunpack.i.h.bf16 %v15655_v61  ;;  %v15656_v11 = vunpack.i.l.bf16 %v15655_v61 }
 0x6d0   :  { %v15650_v51 = vpop.permute.xlu0 %15649  ;;  %v2653_v53 = vsel %vm2133_vm5, %v17206_v60, 0.0  ;;  %v15660_v26 = vpop.permute.xlu1 %15659 }
 0x6d1   :  { %v15652_v12 = vunpack.i.h.bf16 %v15650_v51  ;;  %v15651_v44 = vunpack.i.l.bf16 %v15650_v51  ;;  %2654 = vadd.xlane.f32.xlu0 %v2653_v53  ;;  %15445 = vmatpush3.bf16.msra.mxu1 %v15444_v1 }
 0x6d2   :  { %14848 = vmatprep.subr.mxu1 %v21153_v28 }
 0x6d3   :  { %v17210_v32 = vpop.eup %15811  ;;  %v15447_v13 = vpack.c.bf16 %v15652_v12, %v15651_v44  ;;  %v15450_v44 = vpack.c.bf16 %v15657_v23, %v15656_v11 }
 0x6d4   :  { %v2656_v35 = vsel %vm2133_vm5, %v17210_v32, 0.0  ;;  %v2778_v1 = vpop.permute.xlu0 %2777 }
 0x6d5   :  { %2657 = vadd.xlane.f32.xlu1 %v2656_v35  ;;  %15448 = vmatpush3.bf16.msra.mxu0 %v15447_v13 }
 0x6d6   :  { %14849 = vmatpush3.msk.msra.mxu1 %vm2218_vm7, %v2679_v25  ;;  %14863 = vmatprep.subr.mxu0 %v21153_v28 }
 0x6d7   :  { %v17217_v46 = vpop.eup %15813  ;;  %15449 = vmatprep.subr.bf16.mxu1 %v21157_v18 }
 0x6d8   :  { %v2659_v51 = vsel %vm2140_vm6, %v17217_v46, 0.0 }
 0x6d9   :  { %2660 = vadd.xlane.f32.xlu1 %v2659_v51  ;;  %14864 = vmatpush3.msk.msra.mxu0 %vm2218_vm7, %v2778_v1 }
 0x6da   :  { %15453 = vmatprep.subr.bf16.mxu0 %v21157_v18 }
 0x6e7   :  { %2882 = vrot.lane.b32.xlu0 %v16946_v15, %s16252_s20 }
 0x6ea   :  { %2976 = vrot.lane.b32.xlu1 %v16984_v9, %s16253_s15 }
 0x6eb   :  { %2874 = vrot.lane.b32.xlu0 %v16950_v33, %s16253_s15 }
 0x6ee   :  { %2980 = vrot.lane.b32.xlu1 %v16976_v30, %s16253_s15 }
 0x6ef   :  { %2876 = vrot.lane.b32.xlu0 %v16946_v15, %s16253_s15 }
 0x6f3   :  { %2978 = vrot.lane.b32.xlu0 %v16988_v34, %s16253_s15 }
 0x721   :  { %v2646_v27 = vpop.xlane.xlu1 %2645 }
 0x722   :  { %15815 = vrcp.f32 %v2646_v27 }
 0x725   :  { %v2649_v57 = vpop.xlane.xlu0 %2648 }
 0x726   :  { %15817 = vrcp.f32 %v2649_v57 }
 0x729   :  { %v2652_v17 = vpop.xlane.xlu1 %2651 }
 0x72a   :  { %15819 = vrcp.f32 %v2652_v17  ;;  %v15661_v17 = vunpack.i.l.bf16 %v15660_v26 }
 0x72c   :  { %v15816_v53 = vpop.eup %15815 }
 0x72d   :  { %v2668_v12 = vmul.f32 %v15816_v53, %v17190_v8  ;;  %v2873_v1 = vpop.permute.xlu1 %2872 }
 0x72f   :  { %14851 = vmatmul.mubr.msk.f32.vlgmr.msra.gmra.mrb[28].mxu1 %vm2133_vm5, %v2668_v12 }
 0x730   :  { %v15818_v13 = vpop.eup %15817  ;;  %15452 = vmatpush3.bf16.xpose.msk.msra.mxu1 %vm16998_vm4, %v15450_v44  ;;  %14853 = vmatprep.mubr.msk.f32.mxu1 %vm16244_vm0, %v21153_v28 }
 0x731   :  { %v2669_v35 = vmul.f32 %v15818_v13, %v17194_v54  ;;  %14878 = vmatprep.subr.mxu1 %v21153_v28  ;;  %v2987_v51 = vpop.permute.xlu1 %2986 }
 0x733   :  { %14854 = vmatmul.mubr.msk.f32.gmra.mrb[30].mxu1 %vm2133_vm5, %v2669_v35 }
 0x734   :  { %v15820_v25 = vpop.eup %15819  ;;  %14856 = vmatprep.mubr.msk.f32.mxu1 %vm16244_vm0, %v21153_v28 }
 0x735   :  { %v2670_v8 = vmul.f32 %v15820_v25, %v17198_v5  ;;  %v15662_v5 = vunpack.i.h.bf16 %v15660_v26 }
 0x737   :  { %14857 = vmatmul.mubr.msk.f32.gmra.mrb[32].mxu1 %vm2133_vm5, %v2670_v8  ;;  %v15454_v12 = vpack.c.bf16 %v15662_v5, %v15661_v17 }
 0x738   :  { %14880 = vmatprep.mubr.msk.f32.mxu1 %vm16244_vm0, %v21153_v28 }
 0x75e   :  { %v2655_v61 = vpop.xlane.xlu0 %2654 }
 0x75f   :  { %15821 = vrcp.f32 %v2655_v61 }
 0x762   :  { %v2658_v54 = vpop.xlane.xlu1 %2657  ;;  %v2883_v27 = vpop.permute.xlu0 %2882 }
 0x763   :  { %15823 = vrcp.f32 %v2658_v54  ;;  %14879 = vmatpush3.xpose.msk.msra.mxu1 %vm1830_vm3, %v2883_v27 }
 0x764   :  { %15457 = vmatprep.subr.bf16.mxu1 %v21157_v18 }
 0x766   :  { %v2661_v57 = vpop.xlane.xlu1 %2660  ;;  %14881 = vmatmul.mubr.msk.f32.vlgmr.msra.gmra.mrb[34].mxu1 %vm1830_vm3, %v2873_v1  ;;  %v2875_v23 = vpop.permute.xlu0 %2874 }
 0x767   :  { %15825 = vrcp.f32 %v2661_v57  ;;  %14883 = vmatprep.mubr.msk.f32.mxu1 %vm16244_vm0, %v21153_v28 }
 0x769   :  { %v15822_v11 = vpop.eup %15821 }
 0x76a   :  { %v2671_v53 = vmul.f32 %v15822_v11, %v17206_v60  ;;  %14884 = vmatmul.mubr.msk.f32.gmra.mrb[36].mxu1 %vm1830_vm3, %v2875_v23  ;;  %v2877_v13 = vpop.permute.xlu0 %2876 }
 0x76b   :  { %14886 = vmatprep.mubr.msk.f32.mxu1 %vm16244_vm0, %v21153_v28 }
 0x76c   :  { %14866 = vmatmul.mubr.msk.f32.vlgmr.msra.gmra.mrb[28].mxu0 %vm2133_vm5, %v2671_v53 }
 0x76d   :  { %v15824_v44 = vpop.eup %15823  ;;  %15456 = vmatpush3.bf16.xpose.msk.msra.mxu0 %vm16998_vm4, %v15454_v12  ;;  %14868 = vmatprep.mubr.msk.f32.mxu0 %vm16244_vm0, %v21153_v28 }
 0x76e   :  { %14887 = vmatmul.mubr.msk.f32.gmra.mrb[38].mxu1 %vm1830_vm3, %v2877_v13  ;;  %v2672_v60 = vmul.f32 %v15824_v44, %v17210_v32  ;;  %14893 = vmatprep.subr.mxu0 %v21153_v28  ;;  %v2977_v32 = vpop.permute.xlu1 %2976  ;;  %v2979_v25 = vpop.permute.xlu0 %2978 }
 0x76f   :  { %14910 = vmatprep.mubr.msk.f32.mxu1 %vm16244_vm0, %v21153_v28 }
 0x770   :  { %14869 = vmatmul.mubr.msk.f32.gmra.mrb[30].mxu0 %vm2133_vm5, %v2672_v60 }
 0x771   :  { %v15826_v26 = vpop.eup %15825  ;;  %14871 = vmatprep.mubr.msk.f32.mxu0 %vm16244_vm0, %v21153_v28 }
 0x772   :  { %v2673_v35 = vmul.f32 %v15826_v26, %v17217_v46  ;;  %v2981_v46 = vpop.permute.xlu1 %2980 }
 0x774   :  { %14872 = vmatmul.mubr.msk.f32.gmra.mrb[32].mxu0 %vm2133_vm5, %v2673_v35 }
 0x775   :  { %14894 = vmatpush3.xpose.msk.msra.mxu0 %vm1830_vm3, %v2987_v51  ;;  %14895 = vmatprep.mubr.msk.f32.mxu0 %vm16244_vm0, %v21153_v28 }
 0x776   :  { %15460 = vmatprep.subr.bf16.mxu0 %v21157_v18 }
 0x778   :  { %14896 = vmatmul.mubr.msk.f32.vlgmr.msra.gmra.mrb[34].mxu0 %vm1830_vm3, %v2977_v32 }
 0x779   :  { %14898 = vmatprep.mubr.msk.f32.mxu0 %vm16244_vm0, %v21153_v28 }
 0x77c   :  { %14899 = vmatmul.mubr.msk.f32.gmra.mrb[36].mxu0 %vm1830_vm3, %v2979_v25 }
 0x77d   :  { %14901 = vmatprep.mubr.msk.f32.mxu0 %vm16244_vm0, %v21153_v28 }
 0x780   :  { %14902 = vmatmul.mubr.msk.f32.gmra.mrb[38].mxu0 %vm1830_vm3, %v2981_v46 }
 0x781   :  { %14925 = vmatprep.mubr.msk.f32.mxu0 %vm16244_vm0, %v21153_v28 }
 0x802   :  { %v17288_v8 = vpop.f32.mrb[28].mxu1 }
 0x803   :  { %v14852_v1 = vpop.f32.mrb[29].mxu1 }
 0x806   :  { %v17290_v51 = vpop.f32.mrb[30].mxu1 }
 0x807   :  { %v14855_v61 = vpop.f32.mrb[31].mxu1 }
 0x80a   :  { %v17292_v54 = vpop.f32.mrb[32].mxu1 }
 0x80b   :  { %v14858_v27 = vpop.f32.mrb[33].mxu1 }
 0x839   :  { %v2962_v57 = vpop.f32.mrb[34].mxu1 }
 0x83a   :  { %v14882_v5 = vpop.f32.mrb[35].mxu1  ;;  %v3080_v17 = vsel %vm2133_vm5, %v2962_v57, -inf }
 0x83b   :  { %3081 = vmax.xlane.f32.xlu0 %v3080_v17 }
 0x83d   :  { %v2967_v23 = vpop.f32.mrb[36].mxu1 }
 0x83e   :  { %v14885_v11 = vpop.f32.mrb[37].mxu1  ;;  %v3083_v53 = vsel %vm2133_vm5, %v2967_v23, -inf }
 0x83f   :  { %3084 = vmax.xlane.f32.xlu1 %v3083_v53  ;;  %v17296_v12 = vpop.f32.mrb[28].mxu0 }
 0x840   :  { %v14867_v44 = vpop.f32.mrb[29].mxu0 }
 0x841   :  { %v2972_v13 = vpop.f32.mrb[38].mxu1 }
 0x842   :  { %v14888_v60 = vpop.f32.mrb[39].mxu1  ;;  %v3086_v26 = vsel %vm2140_vm6, %v2972_v13, -inf }
 0x843   :  { %3087 = vmax.xlane.f32.xlu0 %v3086_v26  ;;  %v17299_v35 = vpop.f32.mrb[30].mxu0 }
 0x844   :  { %v14870_v32 = vpop.f32.mrb[31].mxu0 }
 0x847   :  { %v17301_v25 = vpop.f32.mrb[32].mxu0 }
 0x848   :  { %v14873_v46 = vpop.f32.mrb[33].mxu0 }
 0x84b   :  { %v3066_v1 = vpop.f32.mrb[34].mxu0 }
 0x84c   :  { %v14897_v61 = vpop.f32.mrb[35].mxu0  ;;  %v3089_v27 = vsel %vm2133_vm5, %v3066_v1, -inf }
 0x84d   :  { %3090 = vmax.xlane.f32.xlu0 %v3089_v27 }
 0x84f   :  { %v17304_v5 = vpop.f32.mrb[36].mxu0 }
 0x850   :  { %v14900_v17 = vpop.f32.mrb[37].mxu0  ;;  %v3092_v11 = vsel %vm2133_vm5, %v17304_v5, -inf }
 0x851   :  { %3093 = vmax.xlane.f32.xlu1 %v3092_v11 }
 0x853   :  { %v17308_v53 = vpop.f32.mrb[38].mxu0 }
 0x854   :  { %v14903_v44 = vpop.f32.mrb[39].mxu0  ;;  %v3095_v60 = vsel %vm2140_vm6, %v17308_v53, -inf }
 0x855   :  { %3096 = vmax.xlane.f32.xlu0 %v3095_v60 }
 0x862   :  { %3150 = vrot.lane.b32.xlu1 %v16946_v15, %s16254_s24 }
 0x866   :  { %15674 = vrot.lane.b32.xlu1 %v16961_v52, %s16255_s23 }
 0x86a   :  { %15679 = vrot.lane.b32.xlu1 %v16992_v45, %s16255_s23 }
 0x86b   :  { %15664 = vrot.lane.b32.xlu0 %v16961_v52, %s16254_s24 }
 0x86f   :  { %15669 = vrot.lane.b32.xlu0 %v16992_v45, %s16254_s24 }
 0x873   :  { %3249 = vrot.lane.b32.xlu0 %v16976_v30, %s16254_s24 }
 0x8c8   :  { %v3082_v26 = vpop.xlane.xlu0 %3081 }
 0x8c9   :  { %v3098_v32 = vsub.f32 %v2962_v57, %v3082_v26 }
 0x8cb   :  { %v3104_v46 = vmul.f32 1.442695, %v3098_v32 }
 0x8cc   :  { %v3085_v61 = vpop.xlane.xlu1 %3084 }
 0x8cd   :  { %15827 = vpow2.f32 %v3104_v46  ;;  %v3099_v27 = vsub.f32 %v2967_v23, %v3085_v61 }
 0x8cf   :  { %v3106_v17 = vmul.f32 1.442695, %v3099_v27 }
 0x8d0   :  { %v3088_v11 = vpop.xlane.xlu0 %3087 }
 0x8d1   :  { %15829 = vpow2.f32 %v3106_v17  ;;  %v3100_v44 = vsub.f32 %v2972_v13, %v3088_v11 }
 0x8d3   :  { %v3108_v60 = vmul.f32 1.442695, %v3100_v44 }
 0x8d5   :  { %15831 = vpow2.f32 %v3108_v60 }
 0x8d7   :  { %v17324_v50 = vpop.eup %15827 }
 0x8d8   :  { %v3116_v14 = vsel %vm2133_vm5, %v17324_v50, 0.0 }
 0x8d9   :  { %3117 = vadd.xlane.f32.xlu1 %v3116_v14 }
 0x8da   :  { %v3091_v6 = vpop.xlane.xlu0 %3090 }
 0x8db   :  { %v17328_v58 = vpop.eup %15829  ;;  %v3101_v57 = vsub.f32 %v3066_v1, %v3091_v6 }
 0x8dc   :  { %v3119_v26 = vsel %vm2133_vm5, %v17328_v58, 0.0 }
 0x8dd   :  { %v3110_v23 = vmul.f32 1.442695, %v3101_v57  ;;  %3120 = vadd.xlane.f32.xlu0 %v3119_v26 }
 0x8de   :  { %v3094_v11 = vpop.xlane.xlu1 %3093 }
 0x8df   :  { %v17332_v32 = vpop.eup %15831  ;;  %15833 = vpow2.f32 %v3110_v23 }
 0x8e0   :  { %v3122_v13 = vsel %vm2140_vm6, %v17332_v32, 0.0 }
 0x8e1   :  { %3123 = vadd.xlane.f32.xlu1 %v3122_v13 }
 0x8e2   :  { %v3097_v46 = vpop.xlane.xlu0 %3096  ;;  %v3151_v23 = vpop.permute.xlu1 %3150 }
 0x8e6   :  { %v15665_v61 = vpop.permute.xlu0 %15664 }
 0x8e7   :  { %v15667_v27 = vunpack.i.h.bf16 %v15665_v61  ;;  %v15666_v14 = vunpack.i.l.bf16 %v15665_v61  ;;  %v3102_v61 = vsub.f32 %v17304_v5, %v3094_v11 }
 0x8e9   :  { %v17336_v17 = vpop.eup %15833  ;;  %v15458_v6 = vpack.c.bf16 %v15667_v27, %v15666_v14  ;;  %v3112_v27 = vmul.f32 1.442695, %v3102_v61  ;;  %v3103_v14 = vsub.f32 %v17308_v53, %v3097_v46 }
 0x8ea   :  { %v15670_v1 = vpop.permute.xlu0 %15669  ;;  %v3125_v44 = vsel %vm2133_vm5, %v17336_v17, 0.0 }
 0x8eb   :  { %v15672_v60 = vunpack.i.h.bf16 %v15670_v1  ;;  %v15671_v57 = vunpack.i.l.bf16 %v15670_v1  ;;  %3126 = vadd.xlane.f32.xlu0 %v3125_v44  ;;  %15459 = vmatpush3.bf16.msra.mxu1 %v15458_v6  ;;  %15835 = vpow2.f32 %v3112_v27 }
 0x8ec   :  { %14908 = vmatprep.subr.mxu1 %v21153_v28 }
 0x8ed   :  { %v15461_v26 = vpack.c.bf16 %v15672_v60, %v15671_v57 }
 0x8ee   :  { %v3250_v13 = vpop.permute.xlu0 %3249 }
 0x8ef   :  { %15462 = vmatpush3.bf16.msra.mxu0 %v15461_v26  ;;  %14909 = vmatpush3.msk.msra.mxu1 %vm2218_vm7, %v3151_v23 }
 0x8f0   :  { %14923 = vmatprep.subr.mxu0 %v21153_v28  ;;  %15463 = vmatprep.subr.bf16.mxu1 %v21157_v18 }
 0x8f2   :  { %3344 = vrot.lane.b32.xlu1 %v16940_v43, %s16256_s29  ;;  %v3114_v43 = vmul.f32 1.442695, %v3103_v14 }
 0x8f3   :  { %14924 = vmatpush3.msk.msra.mxu0 %vm2218_vm7, %v3250_v13 }
 0x8f4   :  { %15467 = vmatprep.subr.bf16.mxu0 %v21157_v18  ;;  %15837 = vpow2.f32 %v3114_v43 }
 0x8f5   :  { %v17360_v6 = vpop.eup %15835 }
 0x8f6   :  { %3458 = vrot.lane.b32.xlu1 %v16976_v30, %s16255_s23  ;;  %v3128_v5 = vsel %vm2133_vm5, %v17360_v6, 0.0 }
 0x8fe   :  { %v17364_v11 = vpop.eup %15837 }
 0x901   :  { %3354 = vrot.lane.b32.xlu0 %v16946_v15, %s16255_s23 }
 0x905   :  { %3346 = vrot.lane.b32.xlu0 %v16950_v33, %s16256_s29  ;;  %v3131_v33 = vsel %vm2140_vm6, %v17364_v11, 0.0 }
 0x909   :  { %3448 = vrot.lane.b32.xlu0 %v16984_v9, %s16256_s29  ;;  %v15675_v9 = vpop.permute.xlu1 %15674 }
 0x90a   :  { %v15677_v44 = vunpack.i.h.bf16 %v15675_v9  ;;  %v15676_v60 = vunpack.i.l.bf16 %v15675_v9 }
 0x90c   :  { %v15464_v23 = vpack.c.bf16 %v15677_v44, %v15676_v60 }
 0x90d   :  { %3450 = vrot.lane.b32.xlu0 %v16988_v34, %s16256_s29  ;;  %v15680_v34 = vpop.permute.xlu1 %15679 }
 0x91a   :  { %3129 = vadd.xlane.f32.xlu1 %v3128_v5  ;;  %v15682_v5 = vunpack.i.h.bf16 %v15680_v34 }
 0x91e   :  { %3132 = vadd.xlane.f32.xlu1 %v3131_v33  ;;  %v15681_v33 = vunpack.i.l.bf16 %v15680_v34 }
 0x92f   :  { %3348 = vrot.lane.b32.xlu1 %v16946_v15, %s16256_s29 }
 0x933   :  { %3452 = vrot.lane.b32.xlu1 %v16976_v30, %s16256_s29 }
 0x966   :  { %v3118_v53 = vpop.xlane.xlu1 %3117 }
 0x967   :  { %15839 = vrcp.f32 %v3118_v53 }
 0x96a   :  { %v3121_v46 = vpop.xlane.xlu0 %3120 }
 0x96b   :  { %15841 = vrcp.f32 %v3121_v46  ;;  %v15468_v46 = vpack.c.bf16 %v15682_v5, %v15681_v33 }
 0x96e   :  { %v3124_v1 = vpop.xlane.xlu1 %3123 }
 0x96f   :  { %15843 = vrcp.f32 %v3124_v1 }
 0x971   :  { %v15840_v57 = vpop.eup %15839 }
 0x972   :  { %v3140_v26 = vmul.f32 %v15840_v57, %v17324_v50 }
 0x974   :  { %14911 = vmatmul.mubr.msk.f32.vlgmr.msra.gmra.mrb[40].mxu1 %vm2133_vm5, %v3140_v26 }
 0x975   :  { %v15842_v13 = vpop.eup %15841  ;;  %15466 = vmatpush3.bf16.xpose.msk.msra.mxu1 %vm16998_vm4, %v15464_v23  ;;  %14913 = vmatprep.mubr.msk.f32.mxu1 %vm16244_vm0, %v21153_v28 }
 0x976   :  { %v3141_v61 = vmul.f32 %v15842_v13, %v17328_v58  ;;  %14938 = vmatprep.subr.mxu1 %v21153_v28  ;;  %v3345_v58 = vpop.permute.xlu1 %3344 }
 0x978   :  { %v3127_v27 = vpop.xlane.xlu0 %3126  ;;  %14914 = vmatmul.mubr.msk.f32.gmra.mrb[42].mxu1 %vm2133_vm5, %v3141_v61 }
 0x979   :  { %v15844_v14 = vpop.eup %15843  ;;  %15845 = vrcp.f32 %v3127_v27  ;;  %14916 = vmatprep.mubr.msk.f32.mxu1 %vm16244_vm0, %v21153_v28 }
 0x97a   :  { %v3142_v50 = vmul.f32 %v15844_v14, %v17332_v32  ;;  %v3459_v34 = vpop.permute.xlu1 %3458 }
 0x97c   :  { %v3355_v43 = vpop.permute.xlu0 %3354  ;;  %14917 = vmatmul.mubr.msk.f32.gmra.mrb[44].mxu1 %vm2133_vm5, %v3142_v50 }
 0x97d   :  { %14939 = vmatpush3.xpose.msk.msra.mxu1 %vm1830_vm3, %v3355_v43  ;;  %14940 = vmatprep.mubr.msk.f32.mxu1 %vm16244_vm0, %v21153_v28 }
 0x97e   :  { %15581 = vmatprep.subr.bf16.mxu1 %v21157_v18 }
 0x980   :  { %14941 = vmatmul.mubr.msk.f32.vlgmr.msra.gmra.mrb[46].mxu1 %vm1830_vm3, %v3345_v58  ;;  %v3347_v32 = vpop.permute.xlu0 %3346 }
 0x981   :  { %14943 = vmatprep.mubr.msk.f32.mxu1 %vm16244_vm0, %v21153_v28 }
 0x983   :  { %v15846_v9 = vpop.eup %15845 }
 0x984   :  { %v3143_v53 = vmul.f32 %v15846_v9, %v17336_v17  ;;  %14944 = vmatmul.mubr.msk.f32.gmra.mrb[48].mxu1 %vm1830_vm3, %v3347_v32  ;;  %v3449_v13 = vpop.permute.xlu0 %3448 }
 0x985   :  { %14946 = vmatprep.mubr.msk.f32.mxu1 %vm16244_vm0, %v21153_v28 }
 0x986   :  { %14926 = vmatmul.mubr.msk.f32.vlgmr.msra.gmra.mrb[40].mxu0 %vm2133_vm5, %v3143_v53 }
 0x987   :  { %15470 = vmatpush3.bf16.xpose.msk.msra.mxu0 %vm16998_vm4, %v15468_v46  ;;  %14928 = vmatprep.mubr.msk.f32.mxu0 %vm16244_vm0, %v21153_v28 }
 0x988   :  { %14953 = vmatprep.subr.mxu0 %v21153_v28 }
 0x98f   :  { %14954 = vmatpush3.xpose.msk.msra.mxu0 %vm1830_vm3, %v3459_v34 }
 0x990   :  { %15471 = vmatprep.subr.bf16.mxu0 %v21157_v18 }
 0x9a7   :  { %v3130_v17 = vpop.xlane.xlu1 %3129 }
 0x9a8   :  { %15847 = vrcp.f32 %v3130_v17 }
 0x9ab   :  { %v3133_v1 = vpop.xlane.xlu1 %3132 }
 0x9ac   :  { %15849 = vrcp.f32 %v3133_v1 }
 0x9af   :  { %v3349_v44 = vpop.permute.xlu1 %3348 }
 0x9b0   :  { %14947 = vmatmul.mubr.msk.f32.gmra.mrb[50].mxu1 %vm1830_vm3, %v3349_v44 }
 0x9b1   :  { %14973 = vmatprep.mubr.msk.f32.mxu1 %vm16244_vm0, %v21153_v28 }
 0x9b2   :  { %v15848_v60 = vpop.eup %15847 }
 0x9b3   :  { %v3144_v57 = vmul.f32 %v15848_v60, %v17360_v6  ;;  %v3451_v6 = vpop.permute.xlu0 %3450  ;;  %v3453_v61 = vpop.permute.xlu1 %3452 }
 0x9b5   :  { %14929 = vmatmul.mubr.msk.f32.gmra.mrb[42].mxu0 %vm2133_vm5, %v3144_v57 }
 0x9b6   :  { %v15850_v26 = vpop.eup %15849  ;;  %14931 = vmatprep.mubr.msk.f32.mxu0 %vm16244_vm0, %v21153_v28 }
 0x9b7   :  { %v3145_v23 = vmul.f32 %v15850_v26, %v17364_v11 }
 0x9b9   :  { %14932 = vmatmul.mubr.msk.f32.gmra.mrb[44].mxu0 %vm2133_vm5, %v3145_v23 }
 0x9ba   :  { %14955 = vmatprep.mubr.msk.f32.mxu0 %vm16244_vm0, %v21153_v28 }
 0x9bd   :  { %14956 = vmatmul.mubr.msk.f32.vlgmr.msra.gmra.mrb[46].mxu0 %vm1830_vm3, %v3449_v13 }
 0x9be   :  { %14958 = vmatprep.mubr.msk.f32.mxu0 %vm16244_vm0, %v21153_v28 }
 0x9c1   :  { %14959 = vmatmul.mubr.msk.f32.gmra.mrb[48].mxu0 %vm1830_vm3, %v3451_v6 }
 0x9c2   :  { %14961 = vmatprep.mubr.msk.f32.mxu0 %vm16244_vm0, %v21153_v28 }
 0x9c5   :  { %14962 = vmatmul.mubr.msk.f32.gmra.mrb[50].mxu0 %vm1830_vm3, %v3453_v61 }
 0x9c6   :  { %14970 = vmatprep.mubr.msk.f32.mxu0 %vm16244_vm0, %v21153_v28 }
 0xa47   :  { %v17424_v11 = vpop.f32.mrb[40].mxu1 }
 0xa48   :  { %v14912_v27 = vpop.f32.mrb[41].mxu1 }
 0xa4b   :  { %v17426_v14 = vpop.f32.mrb[42].mxu1 }
 0xa4c   :  { %v14915_v50 = vpop.f32.mrb[43].mxu1 }
 0xa4f   :  { %v17428_v43 = vpop.f32.mrb[44].mxu1 }
 0xa50   :  { %v14918_v58 = vpop.f32.mrb[45].mxu1 }
 0xa53   :  { %v3434_v5 = vpop.f32.mrb[46].mxu1 }
 0xa54   :  { %v14942_v33 = vpop.f32.mrb[47].mxu1  ;;  %v3552_v9 = vsel %vm2133_vm5, %v3434_v5, -inf }
 0xa55   :  { %3553 = vmax.xlane.f32.xlu0 %v3552_v9 }
 0xa57   :  { %v3439_v32 = vpop.f32.mrb[48].mxu1 }
 0xa58   :  { %v14945_v53 = vpop.f32.mrb[49].mxu1  ;;  %v3555_v46 = vsel %vm2133_vm5, %v3439_v32, -inf }
 0xa59   :  { %3556 = vmax.xlane.f32.xlu1 %v3555_v46  ;;  %v17432_v34 = vpop.f32.mrb[40].mxu0 }
 0xa5a   :  { %v14927_v17 = vpop.f32.mrb[41].mxu0 }
 0xa83   :  { %v3444_v1 = vpop.f32.mrb[50].mxu1 }
 0xa84   :  { %v14948_v44 = vpop.f32.mrb[51].mxu1  ;;  %v3558_v58 = vsel %vm2140_vm6, %v3444_v1, -inf }
 0xa88   :  { %v17434_v60 = vpop.f32.mrb[42].mxu0 }
 0xa89   :  { %v14930_v57 = vpop.f32.mrb[43].mxu0 }
 0xa8c   :  { %v17436_v26 = vpop.f32.mrb[44].mxu0 }
 0xa8d   :  { %v14933_v23 = vpop.f32.mrb[45].mxu0 }
 0xa90   :  { %v3538_v13 = vpop.f32.mrb[46].mxu0 }
 0xa91   :  { %v14957_v6 = vpop.f32.mrb[47].mxu0  ;;  %v3561_v61 = vsel %vm2133_vm5, %v3538_v13, -inf }
 0xa92   :  { %3562 = vmax.xlane.f32.xlu0 %v3561_v61 }
 0xa94   :  { %v3543_v27 = vpop.f32.mrb[48].mxu0 }
 0xa95   :  { %v14960_v50 = vpop.f32.mrb[49].mxu0  ;;  %v3564_v33 = vsel %vm2133_vm5, %v3543_v27, -inf }
 0xa96   :  { %3559 = vmax.xlane.f32.xlu0 %v3558_v58  ;;  %3565 = vmax.xlane.f32.xlu1 %v3564_v33 }
 0xa98   :  { %v3548_v9 = vpop.f32.mrb[50].mxu0 }
 0xa99   :  { %v14963_v53 = vpop.f32.mrb[51].mxu0  ;;  %v3567_v46 = vsel %vm2140_vm6, %v3548_v9, -inf }
 0xa9a   :  { %3568 = vmax.xlane.f32.xlu0 %v3567_v46 }
 0xaa7   :  { %3622 = vrot.lane.b32.xlu1 %v16946_v15, %s16257_s0 }
 0xab0   :  { %15684 = vrot.lane.b32.xlu0 %v16961_v52, %s16257_s0 }
 0xae2   :  { %v3554_v17 = vpop.xlane.xlu0 %3553 }
 0xae3   :  { %v3570_v44 = vsub.f32 %v3434_v5, %v3554_v17 }
 0xae5   :  { %v3576_v57 = vmul.f32 1.442695, %v3570_v44 }
 0xae6   :  { %v3557_v23 = vpop.xlane.xlu1 %3556 }
 0xae7   :  { %15851 = vpow2.f32 %v3576_v57  ;;  %v3571_v6 = vsub.f32 %v3439_v32, %v3557_v23 }
 0xae9   :  { %v3578_v61 = vmul.f32 1.442695, %v3571_v6 }
 0xaeb   :  { %15853 = vpow2.f32 %v3578_v61 }
 0xaf1   :  { %v17446_v50 = vpop.eup %15851 }
 0xaf2   :  { %v3588_v58 = vsel %vm2133_vm5, %v17446_v50, 0.0 }
 0xaf3   :  { %3589 = vadd.xlane.f32.xlu1 %v3588_v58 }
 0xaf5   :  { %v17450_v33 = vpop.eup %15853 }
 0xaf6   :  { %v3591_v15 = vsel %vm2133_vm5, %v17450_v33, 0.0 }
 0xaf7   :  { %3592 = vadd.xlane.f32.xlu0 %v3591_v15 }
 0xb1f   :  { %v3563_v52 = vpop.xlane.xlu0 %3562 }
 0xb20   :  { %v3573_v5 = vsub.f32 %v3538_v13, %v3563_v52 }
 0xb22   :  { %v3582_v53 = vmul.f32 1.442695, %v3573_v5 }
 0xb23   :  { %v3560_v46 = vpop.xlane.xlu0 %3559  ;;  %v3566_v17 = vpop.xlane.xlu1 %3565 }
 0xb24   :  { %15855 = vpow2.f32 %v3582_v53  ;;  %v3572_v32 = vsub.f32 %v3444_v1, %v3560_v46  ;;  %v3574_v44 = vsub.f32 %v3543_v27, %v3566_v17 }
 0xb26   :  { %v3580_v57 = vmul.f32 1.442695, %v3572_v32  ;;  %v3584_v23 = vmul.f32 1.442695, %v3574_v44 }
 0xb27   :  { %v3569_v6 = vpop.xlane.xlu0 %3568  ;;  %v3623_v15 = vpop.permute.xlu1 %3622 }
 0xb28   :  { %15857 = vpow2.f32 %v3580_v57 }
 0xb29   :  { %15859 = vpow2.f32 %v3584_v23 }
 0xb2b   :  { %v15685_v61 = vpop.permute.xlu0 %15684 }
 0xb2c   :  { %v15687_v58 = vunpack.i.h.bf16 %v15685_v61  ;;  %v15686_v22 = vunpack.i.l.bf16 %v15685_v61 }
 0xb2e   :  { %v17454_v40 = vpop.eup %15855  ;;  %v15472_v31 = vpack.c.bf16 %v15687_v58, %v15686_v22 }
 0xb2f   :  { %v3597_v13 = vsel %vm2133_vm5, %v17454_v40, 0.0 }
 0xb30   :  { %3598 = vadd.xlane.f32.xlu1 %v3597_v13  ;;  %15473 = vmatpush3.bf16.msra.mxu0 %v15472_v31 }
 0xb31   :  { %15583 = vmatpush3.bf16.msra.mxu1 %v15472_v31  ;;  %14968 = vmatprep.subr.mxu0 %v21153_v28  ;;  %v3575_v31 = vsub.f32 %v3548_v9, %v3569_v6 }
 0xb32   :  { %v15858_v1 = vpop.eup %15857  ;;  %15582 = vmatprep.subr.mxu1 %v21153_v28 }
 0xb33   :  { %v17460_v27 = vpop.eup %15859  ;;  %v3594_v52 = vsel %vm2140_vm6, %v15858_v1, 0.0  ;;  %v3586_v22 = vmul.f32 1.442695, %v3575_v31 }
 0xb34   :  { %v3600_v5 = vsel %vm2133_vm5, %v17460_v27, 0.0  ;;  %3595 = vadd.xlane.f32.xlu0 %v3594_v52  ;;  %14969 = vmatpush3.msk.msra.mxu0 %vm2218_vm7, %v3623_v15  ;;  %v4139_v52 = vld [vmem:[%s20991_s5 + $0x8] sm:$0xff] }
 0xb35   :  { %3601 = vadd.xlane.f32.xlu1 %v3600_v5  ;;  %15584 = vmatpush3.msk.msra.mxu1 %vm2218_vm7, %v3623_v15  ;;  %15861 = vpow2.f32 %v3586_v22  ;;  %v4138_v15 = vld [vmem:[%s20991_s5] sm:$0xff]  ;;  %v4140_v5 = vld [vmem:[%s20991_s5 + $0x10] sm:$0xff]  ;;  %v4141_v22 = vld [vmem:[%s20991_s5 + $0x18] sm:$0xff] }
 0xb36   :  { %15474 = vmatprep.subr.bf16.mxu0 %v21157_v18  ;;  %15477 = vmatprep.subr.bf16.mxu1 %v21157_v18  ;;  %v15478_v31 = vpack.c.bf16 %v4139_v52, %v4138_v15 }
 0xb46   :  { %15689 = vrot.lane.b32.xlu1 %v16992_v45, %s16257_s0 }
 0xb4a   :  { %3721 = vrot.lane.b32.xlu0 %v16976_v30, %s16257_s0  ;;  %v15862_v30 = vpop.eup %15861 }
 0xb4b   :  { %v3603_v45 = vsel %vm2140_vm6, %v15862_v30, 0.0 }
 0xb4e   :  { %3822 = vrot.lane.b32.xlu0 %v17288_v8, %s16239_s4 }
 0xb52   :  { %3846 = vrot.lane.b32.xlu0 %v17424_v11, %s16233_s1 }
 0xb56   :  { %3824 = vrot.lane.b32.xlu0 %v17290_v51, %s16239_s4 }
 0xb5a   :  { %3848 = vrot.lane.b32.xlu0 %v17426_v14, %s16233_s1 }
 0xb5e   :  { %3828 = vrot.lane.b32.xlu0 %v17296_v12, %s16239_s4 }
 0xb62   :  { %3852 = vrot.lane.b32.xlu0 %v17432_v34, %s16233_s1 }
 0xb66   :  { %3830 = vrot.lane.b32.xlu0 %v17299_v35, %s16239_s4 }
 0xb6a   :  { %3604 = vadd.xlane.f32.xlu1 %v3603_v45  ;;  %3850 = vrot.lane.b32.xlu0 %v17428_v43, %s16233_s1 }
 0xb6e   :  { %3854 = vrot.lane.b32.xlu0 %v17434_v60, %s16233_s1 }
 0xb7b   :  { %3826 = vrot.lane.b32.xlu1 %v17292_v54, %s16239_s4 }
 0xb80   :  { %v3590_v8 = vpop.xlane.xlu1 %3589 }
 0xb81   :  { %15863 = vrcp.f32 %v3590_v8 }
 0xb84   :  { %v3593_v51 = vpop.xlane.xlu0 %3592 }
 0xb85   :  { %15865 = vrcp.f32 %v3593_v51 }
 0xb8b   :  { %v15864_v12 = vpop.eup %15863 }
 0xb8c   :  { %v3612_v11 = vmul.f32 %v15864_v12, %v17446_v50 }
 0xb8e   :  { %14971 = vmatmul.mubr.msk.f32.vlgmr.msra.gmra.mrb[52].mxu0 %vm2133_vm5, %v3612_v11 }
 0xb8f   :  { %v15866_v35 = vpop.eup %15865  ;;  %14985 = vmatprep.mubr.msk.f32.mxu0 %vm16244_vm0, %v21153_v28 }
 0xb90   :  { %v3613_v14 = vmul.f32 %v15866_v35, %v17450_v33 }
 0xb92   :  { %14974 = vmatmul.mubr.msk.f32.vlgmr.msra.gmra.mrb[52].mxu1 %vm2133_vm5, %v3613_v14 }
 0xb93   :  { %14976 = vmatprep.mubr.msk.f32.mxu1 %vm16244_vm0, %v21153_v28  ;;  %15479 = vmatpush3.bf16.msra.mxu1 %v15478_v31 }
 0xb94   :  { %15480 = vmatprep.subr.bf16.mxu1 %v21157_v18 }
 0xbbd   :  { %v3599_v54 = vpop.xlane.xlu1 %3598 }
 0xbbe   :  { %15867 = vrcp.f32 %v3599_v54 }
 0xbc1   :  { %v3596_v43 = vpop.xlane.xlu0 %3595 }
 0xbc2   :  { %v3602_v34 = vpop.xlane.xlu1 %3601  ;;  %15869 = vrcp.f32 %v3596_v43 }
 0xbc3   :  { %15871 = vrcp.f32 %v3602_v34 }
 0xbc5   :  { %v3722_v32 = vpop.permute.xlu0 %3721 }
 0xbc6   :  { %v15690_v60 = vpop.permute.xlu1 %15689 }
 0xbc7   :  { %v15692_v9 = vunpack.i.h.bf16 %v15690_v60  ;;  %v15691_v50 = vunpack.i.l.bf16 %v15690_v60 }
 0xbc8   :  { %v15868_v46 = vpop.eup %15867 }
 0xbc9   :  { %v15475_v53 = vpack.c.bf16 %v15692_v9, %v15691_v50  ;;  %v3615_v44 = vmul.f32 %v15868_v46, %v17454_v40  ;;  %v3823_v45 = vpop.permute.xlu0 %3822 }
 0xbcb   :  { %15476 = vmatpush3.bf16.msra.mxu0 %v15475_v53 }
 0xbcc   :  { %v15870_v17 = vpop.eup %15869  ;;  %14983 = vmatprep.subr.mxu0 %v21153_v28 }
 0xbcd   :  { %v3614_v33 = vmul.f32 %v15870_v17, %v15858_v1  ;;  %v15872_v57 = vpop.eup %15871  ;;  %v3847_v35 = vpop.permute.xlu0 %3846  ;;  %v3888_v17 = vsel %vm1830_vm3, %v17160_v42, %v3823_v45 }
 0xbce   :  { %v3616_v23 = vmul.f32 %v15872_v57, %v17460_v27 }
 0xbcf   :  { %14984 = vmatpush3.msk.msra.mxu0 %vm2218_vm7, %v3722_v32  ;;  %14977 = vmatmul.mubr.msk.f32.gmra.mrb[54].mxu1 %vm2133_vm5, %v3614_v33 }
 0xbd0   :  { %14986 = vmatmul.mubr.msk.f32.vlgmr.msra.gmra.mrb[54].mxu0 %vm2133_vm5, %v3615_v44  ;;  %15002 = vmatprep.mubr.msk.f32.mxu1 %vm16244_vm0, %v21153_v28 }
 0xbd1   :  { %14988 = vmatprep.mubr.msk.f32.mxu0 %vm16244_vm0, %v21153_v28  ;;  %15483 = vmatprep.subr.bf16.mxu0 %v21157_v18  ;;  %v3825_v43 = vpop.permute.xlu0 %3824 }
 0xbd2   :  { %v3889_v57 = vsel %vm1830_vm3, %v17162_v2, %v3825_v43 }
 0xbd4   :  { %14989 = vmatmul.mubr.msk.f32.gmra.mrb[56].mxu0 %vm2133_vm5, %v3616_v23 }
 0xbd5   :  { %14991 = vmatprep.mubr.msk.f32.mxu0 %vm16244_vm0, %v21153_v28  ;;  %v3849_v34 = vpop.permute.xlu0 %3848 }
 0xbd6   :  { %v3896_v23 = vsel %vm3894_vm8, %v3889_v57, %v3849_v34 }
 0xbd9   :  { %v17542_v60 = vpop.permute.xlu0 %3828 }
 0xbdd   :  { %v17544_v9 = vpop.permute.xlu0 %3852 }
 0xbe1   :  { %v17546_v50 = vpop.permute.xlu0 %3830 }
 0xbe5   :  { %v17548_v53 = vpop.permute.xlu0 %3850 }
 0xbe9   :  { %v17550_v46 = vpop.permute.xlu0 %3854 }
 0xbf7   :  { %v3605_v40 = vpop.xlane.xlu1 %3604 }
 0xbf8   :  { %15873 = vrcp.f32 %v3605_v40 }
 0xc02   :  { %v15874_v6 = vpop.eup %15873 }
 0xc03   :  { %v3617_v61 = vmul.f32 %v15874_v6, %v15862_v30  ;;  %v15481_v30 = vpack.c.bf16 %v4141_v22, %v4140_v5 }
 0xc05   :  { %14992 = vmatmul.mubr.msk.f32.gmra.mrb[58].mxu0 %vm2133_vm5, %v3617_v61  ;;  %15482 = vmatpush3.bf16.msra.mxu1 %v15481_v30 }
 0xc06   :  { %15025 = vmatprep.mubr.msk.f32.mxu0 %vm16244_vm0, %v21153_v28  ;;  %15489 = vmatprep.subr.bf16.mxu1 %v21157_v18 }
 0xc61   :  { %v3703_v58 = vpop.f32.mrb[52].mxu0 }
 0xc62   :  { %3870 = vrot.lane.b32.xlu0 %v3703_v58, %s16258_s30  ;;  %v14972_v13 = vpop.f32.mrb[53].mxu0 }
 0xc65   :  { %v3708_v1 = vpop.f32.mrb[52].mxu1 }
 0xc66   :  { %v14975_v27 = vpop.f32.mrb[53].mxu1  ;;  %3872 = vrot.lane.b32.xlu0 %v3708_v1, %s16258_s30 }
 0xca2   :  { %v3713_v8 = vpop.f32.mrb[54].mxu1 }
 0xca3   :  { %v3802_v51 = vpop.f32.mrb[54].mxu0  ;;  %v14978_v12 = vpop.f32.mrb[55].mxu1 }
 0xca4   :  { %3876 = vrot.lane.b32.xlu0 %v3802_v51, %s16258_s30  ;;  %v14987_v11 = vpop.f32.mrb[55].mxu0 }
 0xca7   :  { %v3807_v14 = vpop.f32.mrb[56].mxu0 }
 0xca8   :  { %3874 = vrot.lane.b32.xlu0 %v3713_v8, %s16258_s30  ;;  %3878 = vrot.lane.b32.xlu1 %v3807_v14, %s16258_s30  ;;  %v14990_v54 = vpop.f32.mrb[57].mxu0 }
 0xcac   :  { %3832 = vrot.lane.b32.xlu0 %v17301_v25, %s16239_s4  ;;  %3856 = vrot.lane.b32.xlu1 %v17436_v26, %s16233_s1  ;;  %v3895_v25 = vsel %vm3894_vm8, %v3888_v17, %v3847_v35 }
 0xcd4   :  { %v3871_v33 = vpop.permute.xlu0 %3870 }
 0xcd5   :  { %v3902_v26 = vsel %vm3901_vm9, %v3895_v25, %v3871_v33 }
 0xcd6   :  { %v3914_v32 = vcombine.high %v3902_v26, %v3902_v26  ;;  %v3921_v44 = vrot.slane %v3902_v26, %v16478_v7 }
 0xcd8   :  { %v3928_v40 = vrot.slane %v3914_v32, %v16478_v7  ;;  %v3929_v6 = vcombine.high %v3921_v44, %v3921_v44  ;;  %v3812_v61 = vpop.f32.mrb[58].mxu0  ;;  %v3873_v58 = vpop.permute.xlu0 %3872  ;;  %v3937_v27 = vrot.slane %v3921_v44, %v16478_v7 }
 0xcd9   :  { %v3903_v42 = vsel %vm3901_vm9, %v3896_v23, %v3873_v58  ;;  %3880 = vrot.lane.b32.xlu0 %v3812_v61, %s16258_s30  ;;  %v14993_v13 = vpop.f32.mrb[59].mxu0 }
 0xcda   :  { %v3930_v1 = vcombine.high %v3928_v40, %v3928_v40  ;;  %v3951_v15 = vrot.slane %v3929_v6, %v16478_v7  ;;  %v3963_v52 = vcombine.high %v3903_v42, %v3903_v42  ;;  %v3944_v2 = vrot.slane %v3928_v40, %v16478_v7 }
 0xcdb   :  { %v3970_v5 = vrot.slane %v3903_v42, %v16478_v7 }
 0xcdc   :  { %v3958_v31 = vrot.slane %v3930_v1, %v16478_v7  ;;  %v4149_v22 = vcombine.low %v3937_v27, %v3951_v15  ;;  %v14265_v30 = vcombine.high %v3937_v27, %v3951_v15  ;;  %v3977_v45 = vrot.slane %v3963_v52, %v16478_v7 }
 0xcdd   :  { %v3978_v8 = vcombine.high %v3970_v5, %v3970_v5  ;;  %v3986_v54 = vrot.slane %v3970_v5, %v16478_v7 }
 0xcde   :  { %v4151_v51 = vcombine.low %v3944_v2, %v3958_v31  ;;  %v14266_v12 = vcombine.high %v3944_v2, %v3958_v31  ;;  %v4159_v11 = vrot.slane %v4149_v22, %v16478_v7  ;;  %v4166_v35 = vrot.slane %v14265_v30, %v16478_v7  ;;  %v3827_v22 = vpop.permute.xlu1 %3826 }
 0xcdf   :  { %v3979_v14 = vcombine.high %v3977_v45, %v3977_v45  ;;  %v4000_v43 = vrot.slane %v3978_v8, %v16478_v7  ;;  %v3993_v33 = vrot.slane %v3977_v45, %v16478_v7  ;;  %v3891_v30 = vsel %vm1830_vm3, %v17167_v62, %v17542_v60 }
 0xce0   :  { %v4173_v34 = vrot.slane %v4151_v51, %v16478_v7  ;;  %v4180_v17 = vrot.slane %v14266_v12, %v16478_v7  ;;  %v4181_v25 = vcombine.low %v4159_v11, %v4166_v35  ;;  %v3898_v45 = vsel %vm3894_vm8, %v3891_v30, %v17544_v9 }
 0xce1   :  { %v4007_v26 = vrot.slane %v3979_v14, %v16478_v7  ;;  %v4198_v32 = vcombine.low %v3986_v54, %v4000_v43  ;;  %v14267_v44 = vcombine.high %v3986_v54, %v4000_v43  ;;  %v3890_v51 = vsel %vm1830_vm3, %v17164_v19, %v3827_v22 }
 0xce2   :  { %v4182_v57 = vcombine.low %v4173_v34, %v4180_v17  ;;  %v4189_v58 = vrot.slane %v4181_v25, %v16478_v7  ;;  %v3892_v11 = vsel %vm1830_vm3, %v17171_v20, %v17546_v50  ;;  %v3897_v19 = vsel %vm3894_vm8, %v3890_v51, %v17548_v53 }
 0xce3   :  { %v4200_v23 = vcombine.low %v3993_v33, %v4007_v26  ;;  %v14268_v40 = vcombine.high %v3993_v33, %v4007_v26  ;;  %v4208_v6 = vrot.slane %v4198_v32, %v16478_v7  ;;  %v4215_v61 = vrot.slane %v14267_v44, %v16478_v7 }
 0xce4   :  { %v4196_v42 = vrot.slane %v4182_v57, %v16478_v7  ;;  %v3899_v54 = vsel %vm3894_vm8, %v3892_v11, %v17550_v46 }
 0xce5   :  { %v4222_v13 = vrot.slane %v4200_v23, %v16478_v7  ;;  %v4229_v1 = vrot.slane %v14268_v40, %v16478_v7  ;;  %v4230_v27 = vcombine.low %v4208_v6, %v4215_v61 }
 0xce6   :  { %v4197_v15 = vcombine.low %v4189_v58, %v4196_v42 }
 0xce7   :  { %v4231_v52 = vcombine.low %v4222_v13, %v4229_v1  ;;  %v4238_v2 = vrot.slane %v4230_v27, %v16478_v7 }
 0xce8   :  { %15003 = vmatmul.mubr.msk.f32.vlgmr.msra.gmra.mrb[56].mxu1 %vm1388_vm2, %v4197_v15 }
 0xce9   :  { %15005 = vmatprep.mubr.msk.f32.mxu1 %vm16244_vm0, %v21153_v28  ;;  %v4245_v5 = vrot.slane %v4231_v52, %v16478_v7 }
 0xceb   :  { %v4246_v31 = vcombine.low %v4238_v2, %v4245_v5 }
 0xced   :  { %15006 = vmatmul.mubr.msk.f32.gmra.mrb[58].mxu1 %vm1388_vm2, %v4246_v31 }
 0xcee   :  { %15008 = vmatprep.mubr.msk.f32.mxu1 %vm16244_vm0, %v21153_v28 }
 0xd16   :  { %v3877_v8 = vpop.permute.xlu0 %3876 }
 0xd17   :  { %v3905_v12 = vsel %vm3901_vm9, %v3898_v45, %v3877_v8 }
 0xd18   :  { %v4026_v35 = vcombine.high %v3905_v12, %v3905_v12  ;;  %v4033_v14 = vrot.slane %v3905_v12, %v16478_v7 }
 0xd1a   :  { %v4040_v62 = vrot.slane %v4026_v35, %v16478_v7  ;;  %v4041_v60 = vcombine.high %v4033_v14, %v4033_v14  ;;  %v4049_v9 = vrot.slane %v4033_v14, %v16478_v7  ;;  %v3875_v43 = vpop.permute.xlu0 %3874  ;;  %v3879_v34 = vpop.permute.xlu1 %3878 }
 0xd1b   :  { %v3904_v17 = vsel %vm3901_vm9, %v3897_v19, %v3875_v43  ;;  %v3906_v20 = vsel %vm3901_vm9, %v3899_v54, %v3879_v34 }
 0xd1c   :  { %v4042_v50 = vcombine.high %v4040_v62, %v4040_v62  ;;  %v4056_v25 = vrot.slane %v4040_v62, %v16478_v7  ;;  %v4063_v33 = vrot.slane %v4041_v60, %v16478_v7  ;;  %v4071_v46 = vcombine.high %v4049_v9, %v4049_v9 }
 0xd1d   :  { %v4018_v26 = vrot.slane %v3904_v17, %v16478_v7  ;;  %v4075_v32 = vcombine.high %v3906_v20, %v3906_v20  ;;  %v4082_v44 = vrot.slane %v3906_v20, %v16478_v7 }
 0xd1e   :  { %v4070_v57 = vrot.slane %v4042_v50, %v16478_v7  ;;  %v4072_v53 = vcombine.high %v4056_v25, %v4056_v25  ;;  %v4073_v23 = vcombine.high %v4063_v33, %v4063_v33  ;;  %v4248_v40 = vcombine.low %v4063_v33, %v4071_v46 }
 0xd1f   :  { %v4025_v6 = vrot.slane %v4018_v26, %v16478_v7  ;;  %v4089_v61 = vrot.slane %v4075_v32, %v16478_v7  ;;  %v4090_v58 = vcombine.high %v4082_v44, %v4082_v44  ;;  %v4098_v42 = vrot.slane %v4082_v44, %v16478_v7 }
 0xd20   :  { %v4249_v13 = vcombine.low %v4073_v23, %v4056_v25  ;;  %v4250_v1 = vcombine.low %v4070_v57, %v4072_v53  ;;  %v4264_v27 = vrot.slane %v4248_v40, %v16478_v7  ;;  %v4074_v15 = vcombine.high %v4070_v57, %v4070_v57  ;;  %v3833_v57 = vpop.permute.xlu0 %3832  ;;  %v3857_v23 = vpop.permute.xlu1 %3856 }
 0xd21   :  { %v4247_v52 = vcombine.low %v4025_v6, %v4049_v9  ;;  %v4091_v2 = vcombine.high %v4089_v61, %v4089_v61  ;;  %v4105_v5 = vrot.slane %v4089_v61, %v16478_v7  ;;  %v4112_v31 = vrot.slane %v4090_v58, %v16478_v7 }
 0xd22   :  { %v4271_v22 = vrot.slane %v4249_v13, %v16478_v7  ;;  %v4278_v30 = vrot.slane %v4250_v1, %v16478_v7  ;;  %v4120_v45 = vcombine.high %v4098_v42, %v4098_v42  ;;  %v4296_v8 = vcombine.low %v4074_v15, %v4098_v42 }
 0xd23   :  { %v4257_v51 = vrot.slane %v4247_v52, %v16478_v7  ;;  %v4119_v12 = vrot.slane %v4091_v2, %v16478_v7  ;;  %v4121_v11 = vcombine.high %v4105_v5, %v4105_v5  ;;  %v4122_v35 = vcombine.high %v4112_v31, %v4112_v31 }
 0xd24   :  { %v4297_v14 = vcombine.low %v4112_v31, %v4120_v45  ;;  %v4306_v54 = vrot.slane %v4296_v8, %v16478_v7  ;;  %v4280_v62 = vcombine.low %v4271_v22, %v4278_v30  ;;  %v3893_v53 = vsel %vm1830_vm3, %v17173_v36, %v3833_v57  ;;  %v17651_v36 = vld [vmem:[#allocation7] ss:$0 sm:$0xff] }
 0xd25   :  { %v4279_v60 = vcombine.low %v4257_v51, %v4264_v27  ;;  %v4298_v9 = vcombine.low %v4122_v35, %v4105_v5  ;;  %v4299_v19 = vcombine.low %v4119_v12, %v4121_v11  ;;  %v3900_v40 = vsel %vm3894_vm8, %v3893_v53, %v3857_v23 }
 0xd26   :  { %v4313_v43 = vrot.slane %v4297_v14, %v16478_v7  ;;  %v4294_v34 = vrot.slane %v4280_v62, %v16478_v7  ;;  %v4123_v42 = vcombine.high %v4119_v12, %v4119_v12 }
 0xd27   :  { %v4320_v17 = vrot.slane %v4298_v9, %v16478_v7  ;;  %v4327_v20 = vrot.slane %v4299_v19, %v16478_v7  ;;  %v4287_v50 = vrot.slane %v4279_v60, %v16478_v7 }
 0xd28   :  { %v4328_v25 = vcombine.low %v4306_v54, %v4313_v43 }
 0xd29   :  { %v4295_v33 = vcombine.low %v4287_v50, %v4294_v34  ;;  %v4329_v46 = vcombine.low %v4320_v17, %v4327_v20 }
 0xd2a   :  { %v4336_v26 = vrot.slane %v4328_v25, %v16478_v7 }
 0xd2b   :  { %15009 = vmatmul.mubr.msk.f32.gmra.mrb[60].mxu1 %vm1388_vm2, %v4295_v33  ;;  %v4343_v32 = vrot.slane %v4329_v46, %v16478_v7 }
 0xd2c   :  { %15011 = vmatprep.mubr.msk.f32.mxu1 %vm16244_vm0, %v21153_v28 }
 0xd2d   :  { %v4344_v44 = vcombine.low %v4336_v26, %v4343_v32 }
 0xd2f   :  { %15012 = vmatmul.mubr.msk.f32.gmra.mrb[62].mxu1 %vm1388_vm2, %v4344_v44 }
 0xd30   :  { %15014 = vmatprep.mubr.msk.f32.mxu1 %vm16244_vm0, %v21153_v28 }
 0xd4b   :  { %v3881_v6 = vpop.permute.xlu0 %3880 }
 0xd4c   :  { %v3907_v61 = vsel %vm3901_vm9, %v3900_v40, %v3881_v6 }
 0xd4d   :  { %v4130_v58 = vrot.slane %v3907_v61, %v16478_v7 }
 0xd4f   :  { %v4137_v13 = vrot.slane %v4130_v58, %v16478_v7 }
 0xd51   :  { %v4345_v1 = vcombine.low %v4123_v42, %v4137_v13 }
 0xd53   :  { %v4352_v27 = vrot.slane %v4345_v1, %v16478_v7 }
 0xd55   :  { %v4359_v15 = vrot.slane %v4352_v27, %v16478_v7 }
 0xd57   :  { %15015 = vmatmul.mubr.msk.f32.gmra.mrb[64].mxu1 %vm1388_vm2, %v4359_v15 }
 0xd58   :  { %15048 = vmatprep.mubr.msk.f32.mxu1 %vm16244_vm0, %v21153_v28 }
 0xdbb   :  { %v4436_v52 = vpop.f32.mrb[56].mxu1 }
 0xdbc   :  { %v4437_v2 = vadd.f32 %v17651_v36, %v4436_v52  ;;  %v15004_v5 = vpop.f32.mrb[57].mxu1 }
 0xdbe   :  { %v4465_v31 = vcombine.high %v4437_v2, %v4437_v2  ;;  %v4472_v22 = vrot.slane %v4437_v2, %v16478_v7 }
 0xdc0   :  { %v4479_v30 = vrot.slane %v4465_v31, %v16478_v7  ;;  %v4480_v45 = vcombine.high %v4472_v22, %v4472_v22  ;;  %v4488_v8 = vrot.slane %v4472_v22, %v16478_v7  ;;  %v4441_v51 = vpop.f32.mrb[58].mxu1 }
 0xdc1   :  { %v4442_v12 = vadd.f32 %v17651_v36, %v4441_v51  ;;  %v15007_v11 = vpop.f32.mrb[59].mxu1 }
 0xdc2   :  { %v4481_v35 = vcombine.high %v4479_v30, %v4479_v30  ;;  %v4495_v14 = vrot.slane %v4479_v30, %v16478_v7  ;;  %v4502_v54 = vrot.slane %v4480_v45, %v16478_v7  ;;  %v4510_v62 = vcombine.high %v4488_v8, %v4488_v8 }
 0xdc3   :  { %v17661_v60 = vadd.f32 %v4488_v8, %v16687_v59  ;;  %v4514_v9 = vcombine.high %v4442_v12, %v4442_v12  ;;  %v4521_v19 = vrot.slane %v4442_v12, %v16478_v7 }
 0xdc4   :  { %v4509_v43 = vrot.slane %v4481_v35, %v16478_v7  ;;  %v4511_v34 = vcombine.high %v4495_v14, %v4495_v14  ;;  %v4512_v17 = vcombine.high %v4502_v54, %v4502_v54  ;;  %v17666_v20 = vadd.f32 %v4502_v54, %v16680_v56 }
 0xdc5   :  { %v17669_v50 = vadd.f32 %v4510_v62, %v16691_v63  ;;  %v17672_v25 = vadd.f32 %v4495_v14, %v16697_v3  ;;  %v4528_v33 = vrot.slane %v4514_v9, %v16478_v7  ;;  %v4529_v59 = vcombine.high %v4521_v19, %v4521_v19 }
 0xdc6   :  { %v4513_v46 = vcombine.high %v4509_v43, %v4509_v43  ;;  %v17676_v26 = vadd.f32 %v4512_v17, %v16694_v0  ;;  %v17679_v32 = vadd.f32 %v4509_v43, %v16701_v4  ;;  %v17682_v44 = vadd.f32 %v4511_v34, %v16715_v16 }
 0xdc7   :  { %v4787_v56 = vcombine.low %v17661_v60, %v17666_v20  ;;  %v4530_v63 = vcombine.high %v4528_v33, %v4528_v33  ;;  %v4537_v3 = vrot.slane %v4521_v19, %v16478_v7  ;;  %v4544_v57 = vrot.slane %v4528_v33, %v16478_v7 }
 0xdc8   :  { %v17689_v53 = vadd.f32 %v4513_v46, %v16813_v10  ;;  %v4788_v0 = vcombine.low %v17669_v50, %v17676_v26  ;;  %v4789_v4 = vcombine.low %v17672_v25, %v17679_v32  ;;  %v4551_v16 = vrot.slane %v4529_v59, %v16478_v7 }
 0xdc9   :  { %v4558_v23 = vrot.slane %v4530_v63, %v16478_v7  ;;  %v4559_v40 = vcombine.high %v4537_v3, %v4537_v3  ;;  %v4560_v6 = vcombine.high %v4544_v57, %v4544_v57  ;;  %v17698_v61 = vadd.f32 %v4537_v3, %v16732_v37 }
 0xdca   :  { %v4561_v58 = vcombine.high %v4551_v16, %v4551_v16  ;;  %v17701_v42 = vadd.f32 %v4551_v16, %v16735_v38  ;;  %v17704_v10 = vadd.f32 %v4544_v57, %v16749_v47  ;;  %v4790_v13 = vcombine.low %v17682_v44, %v17689_v53 }
 0xdcb   :  { %v4562_v1 = vcombine.high %v4558_v23, %v4558_v23  ;;  %v17709_v27 = vadd.f32 %v4559_v40, %v16738_v39  ;;  %v17712_v15 = vadd.f32 %v4558_v23, %v16745_v41  ;;  %v17715_v37 = vadd.f32 %v4560_v6, %v16755_v55 }
 0xdcc   :  { %v17718_v52 = vadd.f32 %v4561_v58, %v16741_v29  ;;  %v4836_v38 = vcombine.low %v17698_v61, %v17701_v42  ;;  %v4797_v47 = vrot.slane %v4787_v56, %v16478_v7  ;;  %v4804_v2 = vrot.slane %v4788_v0, %v16478_v7 }
 0xdcd   :  { %v17725_v5 = vadd.f32 %v4562_v1, %v16858_v21  ;;  %v4838_v39 = vcombine.low %v17704_v10, %v17712_v15  ;;  %v4811_v41 = vrot.slane %v4789_v4, %v16478_v7  ;;  %v4818_v55 = vrot.slane %v4790_v13, %v16478_v7 }
 0xdce   :  { %v4837_v29 = vcombine.low %v17709_v27, %v17718_v52  ;;  %v4819_v31 = vcombine.low %v4797_v47, %v4804_v2  ;;  %v4846_v45 = vrot.slane %v4836_v38, %v16478_v7 }
 0xdcf   :  { %v4820_v22 = vcombine.low %v4811_v41, %v4818_v55  ;;  %v4839_v30 = vcombine.low %v17715_v37, %v17725_v5  ;;  %v4860_v12 = vrot.slane %v4838_v39, %v16478_v7 }
 0xdd0   :  { %v4853_v21 = vrot.slane %v4837_v29, %v16478_v7  ;;  %v4827_v8 = vrot.slane %v4819_v31, %v16478_v7  ;;  %v21158_v29 = vld [vmem:[#allocation21_spill] sm:$0xff] }
 0xdd1   :  { %v4834_v51 = vrot.slane %v4820_v22, %v16478_v7  ;;  %v4867_v11 = vrot.slane %v4839_v30, %v16478_v7 }
 0xdd2   :  { %v4868_v35 = vcombine.low %v4846_v45, %v4853_v21  ;;  %v21159_v45 = vld [vmem:[#allocation24_spill] sm:$0xff] }
 0xdd3   :  { %v4835_v14 = vcombine.low %v4827_v8, %v4834_v51  ;;  %v4869_v54 = vcombine.low %v4860_v12, %v4867_v11  ;;  %v21160_v8 = vld [vmem:[#allocation22_spill] sm:$0xff]  ;;  %v21161_v12 = vld [vmem:[#allocation23_spill] sm:$0xff] }
 0xdd4   :  { %v4876_v9 = vrot.slane %v4868_v35, %v16478_v7 }
 0xdd5   :  { %v5003_v62 = vsel %vm1388_vm2, %v4835_v14, 0.0  ;;  %v4883_v19 = vrot.slane %v4869_v54, %v16478_v7  ;;  %v21162_v54 = vld [vmem:[#allocation25_spill] sm:$0xff] }
 0xdd6   :  { %5004 = vadd.xlane.f32.xlu1 %v5003_v62 }
 0xdd7   :  { %v4884_v43 = vcombine.low %v4876_v9, %v4883_v19 }
 0xdd9   :  { %v5006_v34 = vsel %vm1388_vm2, %v4884_v43, 0.0 }
 0xdda   :  { %5007 = vadd.xlane.f32.xlu0 %v5006_v34 }
 0xdfe   :  { %v4446_v17 = vpop.f32.mrb[60].mxu1 }
 0xdff   :  { %v4447_v33 = vadd.f32 %v17651_v36, %v4446_v17  ;;  %v15010_v59 = vpop.f32.mrb[61].mxu1 }
 0xe00   :  { %v21163_v59 = vld [vmem:[#allocation26_spill] sm:$0xff] }
 0xe01   :  { %v4563_v46 = vcombine.high %v4447_v33, %v4447_v33  ;;  %v4570_v56 = vrot.slane %v4447_v33, %v16478_v7 }
 0xe02   :  { %v4451_v63 = vpop.f32.mrb[62].mxu1 }
 0xe03   :  { %v4577_v3 = vrot.slane %v4563_v46, %v16478_v7  ;;  %v4578_v57 = vcombine.high %v4570_v56, %v4570_v56  ;;  %v4586_v0 = vrot.slane %v4570_v56, %v16478_v7  ;;  %v4452_v4 = vadd.f32 %v17651_v36, %v4451_v63  ;;  %v15013_v16 = vpop.f32.mrb[63].mxu1  ;;  %v21164_v63 = vld [vmem:[#allocation27_spill] sm:$0xff] }
 0xe05   :  { %v4579_v23 = vcombine.high %v4577_v3, %v4577_v3  ;;  %v4593_v40 = vrot.slane %v4577_v3, %v16478_v7  ;;  %v4600_v6 = vrot.slane %v4578_v57, %v16478_v7  ;;  %v4608_v58 = vcombine.high %v4586_v0, %v4586_v0  ;;  %v21165_v57 = vld [vmem:[#allocation30_spill] sm:$0xff] }
 0xe06   :  { %v17753_v13 = vadd.f32 %v4586_v0, %v16771_v24  ;;  %v4612_v1 = vcombine.high %v4452_v4, %v4452_v4  ;;  %v4619_v38 = vrot.slane %v4452_v4, %v16478_v7 }
 0xe07   :  { %v4607_v47 = vrot.slane %v4579_v23, %v16478_v7  ;;  %v4609_v2 = vcombine.high %v4593_v40, %v4593_v40  ;;  %v4610_v39 = vcombine.high %v4600_v6, %v4600_v6  ;;  %v17758_v41 = vadd.f32 %v4600_v6, %v16777_v49  ;;  %v21166_v23 = vld [vmem:[#allocation28_spill] sm:$0xff]  ;;  %v21167_v6 = vld [vmem:[#allocation31_spill] sm:$0xff] }
 0xe08   :  { %v17761_v55 = vadd.f32 %v4608_v58, %v16780_v48  ;;  %v17764_v31 = vadd.f32 %v4593_v40, %v21158_v29  ;;  %v4626_v22 = vrot.slane %v4612_v1, %v16478_v7  ;;  %v4627_v24 = vcombine.high %v4619_v38, %v4619_v38  ;;  %v21168_v1 = vld [vmem:[#allocation32_spill] sm:$0xff] }
 0xe09   :  { %v4611_v30 = vcombine.high %v4607_v47, %v4607_v47  ;;  %v17768_v21 = vadd.f32 %v4610_v39, %v21159_v45  ;;  %v17771_v51 = vadd.f32 %v4607_v47, %v21160_v8  ;;  %v17774_v11 = vadd.f32 %v4609_v2, %v21161_v12  ;;  %v21169_v47 = vld [vmem:[#allocation29_spill] sm:$0xff] }
 0xe0a   :  { %v4885_v49 = vcombine.low %v17753_v13, %v17758_v41  ;;  %v4628_v48 = vcombine.high %v4626_v22, %v4626_v22  ;;  %v4635_v35 = vrot.slane %v4619_v38, %v16478_v7  ;;  %v4642_v14 = vrot.slane %v4626_v22, %v16478_v7 }
 0xe0b   :  { %v17781_v62 = vadd.f32 %v4611_v30, %v21162_v54  ;;  %v4886_v9 = vcombine.low %v17761_v55, %v17768_v21  ;;  %v4887_v19 = vcombine.low %v17764_v31, %v17771_v51  ;;  %v4649_v43 = vrot.slane %v4627_v24, %v16478_v7  ;;  %v21170_v24 = vld [vmem:[#allocation33_spill] sm:$0xff] }
 0xe0c   :  { %v4656_v34 = vrot.slane %v4628_v48, %v16478_v7  ;;  %v4657_v17 = vcombine.high %v4635_v35, %v4635_v35  ;;  %v4658_v33 = vcombine.high %v4642_v14, %v4642_v14  ;;  %v17790_v46 = vadd.f32 %v4635_v35, %v21163_v59 }
 0xe0d   :  { %v4659_v56 = vcombine.high %v4649_v43, %v4649_v43  ;;  %v17793_v3 = vadd.f32 %v4649_v43, %v21164_v63  ;;  %v17796_v0 = vadd.f32 %v4642_v14, %v21165_v57  ;;  %v4888_v4 = vcombine.low %v17774_v11, %v17781_v62 }
 0xe0e   :  { %v4660_v16 = vcombine.high %v4656_v34, %v4656_v34  ;;  %v17801_v40 = vadd.f32 %v4657_v17, %v21166_v23  ;;  %v17804_v58 = vadd.f32 %v4656_v34, %v21167_v6  ;;  %v17807_v38 = vadd.f32 %v4658_v33, %v21168_v1 }
 0xe0f   :  { %v17810_v2 = vadd.f32 %v4659_v56, %v21169_v47  ;;  %v4934_v39 = vcombine.low %v17790_v46, %v17793_v3  ;;  %v4895_v29 = vrot.slane %v4885_v49, %v16478_v7  ;;  %v4902_v22 = vrot.slane %v4886_v9, %v16478_v7 }
 0xe10   :  { %v17817_v30 = vadd.f32 %v4660_v16, %v21170_v24  ;;  %v4936_v45 = vcombine.low %v17796_v0, %v17804_v58  ;;  %v4909_v8 = vrot.slane %v4887_v19, %v16478_v7  ;;  %v4916_v12 = vrot.slane %v4888_v4, %v16478_v7 }
 0xe11   :  { %v4935_v48 = vcombine.low %v17801_v40, %v17810_v2  ;;  %v4917_v35 = vcombine.low %v4895_v29, %v4902_v22  ;;  %v4944_v54 = vrot.slane %v4934_v39, %v16478_v7 }
 0xe12   :  { %v4918_v14 = vcombine.low %v4909_v8, %v4916_v12  ;;  %v4937_v49 = vcombine.low %v17807_v38, %v17817_v30  ;;  %v4958_v19 = vrot.slane %v4936_v45, %v16478_v7  ;;  %v21171_v45 = vld [vmem:[#allocation34_spill] sm:$0xff]  ;;  %v21172_v12 = vld [vmem:[#allocation35_spill] sm:$0xff] }
 0xe13   :  { %v4951_v9 = vrot.slane %v4935_v48, %v16478_v7  ;;  %v4925_v43 = vrot.slane %v4917_v35, %v16478_v7 }
 0xe14   :  { %v4932_v34 = vrot.slane %v4918_v14, %v16478_v7  ;;  %v4965_v17 = vrot.slane %v4937_v49, %v16478_v7 }
 0xe15   :  { %v4966_v33 = vcombine.low %v4944_v54, %v4951_v9  ;;  %v21173_v54 = vld [vmem:[#allocation20_spill] sm:$0xff] }
 0xe16   :  { %v4933_v59 = vcombine.low %v4925_v43, %v4932_v34  ;;  %v4967_v56 = vcombine.low %v4958_v19, %v4965_v17  ;;  %v17853_v9 = vsub.s32 0, %v21173_v54  ;;  %v17856_v43 = vsub.s32 1, %v21173_v54 }
 0xe17   :  { %v4974_v57 = vrot.slane %v4966_v33, %v16478_v7  ;;  %v17859_v34 = vsub.s32 2, %v21173_v54  ;;  %v17862_v19 = vsub.s32 3, %v21173_v54  ;;  %v17865_v33 = vsub.s32 4, %v21173_v54 }
 0xe18   :  { %v5009_v63 = vsel %vm1388_vm2, %v4933_v59, 0.0  ;;  %v4981_v4 = vrot.slane %v4967_v56, %v16478_v7  ;;  %21174 = vst [vmem:[#allocation21_spill] sm:$0xff] %v17853_v9  ;;  %21175 = vst [vmem:[#allocation24_spill] sm:$0xff] %v17856_v43  ;;  %v17868_v59 = vsub.s32 5, %v21173_v54  ;;  %v17871_v56 = vsub.s32 6, %v21173_v54 }
 0xe19   :  { %5010 = vadd.xlane.f32.xlu0 %v5009_v63  ;;  %21176 = vst [vmem:[#allocation22_spill] sm:$0xff] %v17859_v34  ;;  %21177 = vst [vmem:[#allocation23_spill] sm:$0xff] %v17862_v19  ;;  %v17874_v63 = vsub.s32 7, %v21173_v54 }
 0xe1a   :  { %v4982_v16 = vcombine.low %v4974_v57, %v4981_v4  ;;  %21178 = vst [vmem:[#allocation25_spill] sm:$0xff] %v17865_v33  ;;  %21179 = vst [vmem:[#allocation26_spill] sm:$0xff] %v17868_v59 }
 0xe1b   :  { %21180 = vst [vmem:[#allocation27_spill] sm:$0xff] %v17871_v56  ;;  %21181 = vst [vmem:[#allocation30_spill] sm:$0xff] %v17874_v63 }
 0xe1c   :  { %v5012_v23 = vsel %vm1388_vm2, %v4982_v16, 0.0 }
 0xe1d   :  { %5013 = vadd.xlane.f32.xlu1 %v5012_v23 }
 0xe2a   :  { %v4456_v6 = vpop.f32.mrb[64].mxu1 }
 0xe2b   :  { %v4457_v1 = vadd.f32 %v17651_v36, %v4456_v6  ;;  %v15016_v47 = vpop.f32.mrb[65].mxu1 }
 0xe2d   :  { %v4667_v39 = vrot.slane %v4457_v1, %v16478_v7 }
 0xe2f   :  { %v4668_v29 = vcombine.high %v4667_v39, %v4667_v39  ;;  %v4675_v22 = vrot.slane %v4667_v39, %v16478_v7 }
 0xe31   :  { %v4682_v24 = vrot.slane %v4668_v29, %v16478_v7  ;;  %v17842_v8 = vadd.f32 %v4675_v22, %v21171_v45 }
 0xe33   :  { %v17845_v48 = vadd.f32 %v4682_v24, %v21172_v12 }
 0xe35   :  { %v4983_v35 = vcombine.low %v17842_v8, %v17845_v48 }
 0xe37   :  { %v4990_v14 = vrot.slane %v4983_v35, %v16478_v7 }
 0xe39   :  { %v4997_v36 = vrot.slane %v4990_v14, %v16478_v7 }
 0xe3b   :  { %v5016_v49 = vsel %vm5015_vm10, %v4997_v36, 0.0 }
 0xe3c   :  { %5017 = vadd.xlane.f32.xlu0 %v5016_v49 }
 0xe63   :  { %v5005_v17 = vpop.xlane.xlu1 %5004 }
 0xe64   :  { %v5020_v57 = vmul.f32 0.03125, %v5005_v17 }
 0xe66   :  { %v5033_v4 = vrot.slane %v5020_v57, %v17853_v9  ;;  %v5037_v16 = vrot.slane %v5020_v57, %v17856_v43  ;;  %v5041_v23 = vrot.slane %v5020_v57, %v17859_v34  ;;  %v5045_v6 = vrot.slane %v5020_v57, %v17862_v19 }
 0xe67   :  { %v5008_v1 = vpop.xlane.xlu0 %5007  ;;  %v5049_v47 = vrot.slane %v5020_v57, %v17865_v33  ;;  %v5053_v39 = vrot.slane %v5020_v57, %v17868_v59  ;;  %v5057_v29 = vrot.slane %v5020_v57, %v17871_v56  ;;  %v5061_v22 = vrot.slane %v5020_v57, %v17874_v63 }
 0xe68   :  { %v5021_v24 = vmul.f32 0.03125, %v5008_v1  ;;  %v17885_v45 = vsub.f32 %v17661_v60, %v5033_v4  ;;  %v17888_v12 = vsub.f32 %v17666_v20, %v5037_v16  ;;  %v17891_v35 = vsub.f32 %v17669_v50, %v5041_v23 }
 0xe69   :  { %v17894_v14 = vsub.f32 %v17676_v26, %v5045_v6  ;;  %v17897_v36 = vsub.f32 %v17672_v25, %v5049_v47  ;;  %v17900_v49 = vsub.f32 %v17679_v32, %v5053_v39  ;;  %v17903_v54 = vsub.f32 %v17682_v44, %v5057_v29 }
 0xe6a   :  { %v17906_v60 = vsub.f32 %v17689_v53, %v5061_v22  ;;  %v5234_v20 = vmul.f32 %v17885_v45, %v17885_v45  ;;  %v5235_v50 = vmul.f32 %v17888_v12, %v17888_v12  ;;  %v5236_v26 = vmul.f32 %v17891_v35, %v17891_v35 }
 0xe6b   :  { %v5237_v25 = vmul.f32 %v17894_v14, %v17894_v14  ;;  %v5238_v32 = vmul.f32 %v17897_v36, %v17897_v36  ;;  %v5239_v44 = vmul.f32 %v17900_v49, %v17900_v49  ;;  %v5240_v53 = vmul.f32 %v17903_v54, %v17903_v54 }
 0xe6c   :  { %21182 = vst [vmem:[#allocation28_spill] sm:$0xff] %v17906_v60  ;;  %v5241_v17 = vmul.f32 %v17906_v60, %v17906_v60  ;;  %v5302_v57 = vcombine.low %v5234_v20, %v5235_v50  ;;  %v5065_v4 = vrot.slane %v5021_v24, %v17853_v9  ;;  %v5069_v16 = vrot.slane %v5021_v24, %v17856_v43 }
 0xe6d   :  { %v5303_v23 = vcombine.low %v5236_v26, %v5237_v25  ;;  %v5304_v6 = vcombine.low %v5238_v32, %v5239_v44  ;;  %v5073_v1 = vrot.slane %v5021_v24, %v17859_v34  ;;  %v5077_v47 = vrot.slane %v5021_v24, %v17862_v19 }
 0xe6e   :  { %v5305_v39 = vcombine.low %v5240_v53, %v5241_v17  ;;  %v5312_v29 = vrot.slane %v5302_v57, %v16478_v7  ;;  %v5081_v22 = vrot.slane %v5021_v24, %v17865_v33  ;;  %v5085_v28 = vrot.slane %v5021_v24, %v17868_v59 }
 0xe6f   :  { %v5319_v60 = vrot.slane %v5303_v23, %v16478_v7  ;;  %v5326_v20 = vrot.slane %v5304_v6, %v16478_v7  ;;  %v5089_v50 = vrot.slane %v5021_v24, %v17871_v56  ;;  %v5093_v26 = vrot.slane %v5021_v24, %v17874_v63 }
 0xe70   :  { %v5333_v25 = vrot.slane %v5305_v39, %v16478_v7  ;;  %v17937_v32 = vsub.f32 %v17698_v61, %v5065_v4  ;;  %v17940_v44 = vsub.f32 %v17701_v42, %v5069_v16  ;;  %v17943_v53 = vsub.f32 %v17709_v27, %v5073_v1 }
 0xe71   :  { %v5334_v17 = vcombine.low %v5312_v29, %v5319_v60  ;;  %v17946_v57 = vsub.f32 %v17718_v52, %v5077_v47  ;;  %v17949_v23 = vsub.f32 %v17704_v10, %v5081_v22  ;;  %v17952_v24 = vsub.f32 %v17712_v15, %v5085_v28 }
 0xe72   :  { %v5335_v6 = vcombine.low %v5326_v20, %v5333_v25  ;;  %v17955_v61 = vsub.f32 %v17715_v37, %v5089_v50  ;;  %v17958_v42 = vsub.f32 %v17725_v5, %v5093_v26  ;;  %v5242_v27 = vmul.f32 %v17937_v32, %v17937_v32 }
 0xe73   :  { %v5342_v60 = vrot.slane %v5334_v17, %v16478_v7  ;;  %v5243_v52 = vmul.f32 %v17940_v44, %v17940_v44  ;;  %v5244_v10 = vmul.f32 %v17943_v53, %v17943_v53  ;;  %v5245_v28 = vmul.f32 %v17946_v57, %v17946_v57 }
 0xe74   :  { %21183 = vst [vmem:[#allocation31_spill] sm:$0xff] %v17955_v61  ;;  %21184 = vst [vmem:[#allocation32_spill] sm:$0xff] %v17958_v42  ;;  %v5349_v15 = vrot.slane %v5335_v6, %v16478_v7  ;;  %v5246_v37 = vmul.f32 %v17949_v23, %v17949_v23  ;;  %v5247_v5 = vmul.f32 %v17952_v24, %v17952_v24 }
 0xe75   :  { %v5248_v4 = vmul.f32 %v17955_v61, %v17955_v61  ;;  %v5249_v16 = vmul.f32 %v17958_v42, %v17958_v42  ;;  %v5351_v1 = vcombine.low %v5242_v27, %v5243_v52  ;;  %v5352_v47 = vcombine.low %v5244_v10, %v5245_v28  ;;  %v5949_v10 = vld [vmem:[%s20995_s9] sm:$0xff]  ;;  %v5950_v28 = vld [vmem:[%s20995_s9 + $0x8] sm:$0xff] }
 0xe76   :  { %v5350_v39 = vcombine.low %v5342_v60, %v5349_v15  ;;  %v5353_v29 = vcombine.low %v5246_v37, %v5247_v5  ;;  %v5951_v15 = vld [vmem:[%s20995_s9 + $0x10] sm:$0xff]  ;;  %v15484_v37 = vpack.c.bf16 %v5950_v28, %v5949_v10 }
 0xe77   :  { %v5354_v22 = vcombine.low %v5248_v4, %v5249_v16  ;;  %v5361_v20 = vrot.slane %v5351_v1, %v16478_v7  ;;  %v5368_v50 = vrot.slane %v5352_v47, %v16478_v7 }
 0xe78   :  { %v5518_v26 = vsel %vm1388_vm2, %v5350_v39, 0.0  ;;  %v5375_v25 = vrot.slane %v5353_v29, %v16478_v7  ;;  %15485 = vmatpush3.bf16.msra.mxu0 %v15484_v37 }
 0xe79   :  { %5519 = vadd.xlane.f32.xlu1 %v5518_v26  ;;  %v5382_v17 = vrot.slane %v5354_v22, %v16478_v7  ;;  %v5383_v6 = vcombine.low %v5361_v20, %v5368_v50  ;;  %15486 = vmatprep.subr.bf16.mxu0 %v21157_v18 }
 0xe7b   :  { %v5384_v61 = vcombine.low %v5375_v25, %v5382_v17  ;;  %v5391_v42 = vrot.slane %v5383_v6, %v16478_v7 }
 0xe7d   :  { %v5398_v27 = vrot.slane %v5384_v61, %v16478_v7  ;;  %v5952_v61 = vld [vmem:[%s20995_s9 + $0x18] sm:$0xff] }
 0xe7f   :  { %v5399_v60 = vcombine.low %v5391_v42, %v5398_v27  ;;  %v15487_v42 = vpack.c.bf16 %v5952_v61, %v5951_v15 }
 0xe81   :  { %v5521_v52 = vsel %vm1388_vm2, %v5399_v60, 0.0  ;;  %15488 = vmatpush3.bf16.msra.mxu0 %v15487_v42 }
 0xe82   :  { %5522 = vadd.xlane.f32.xlu0 %v5521_v52  ;;  %15495 = vmatprep.subr.bf16.mxu0 %v21157_v18 }
 0xea6   :  { %v5011_v5 = vpop.xlane.xlu0 %5010 }
 0xea7   :  { %v5022_v4 = vmul.f32 0.03125, %v5011_v5 }
 0xea9   :  { %v5097_v16 = vrot.slane %v5022_v4, %v17853_v9  ;;  %v5101_v1 = vrot.slane %v5022_v4, %v17856_v43  ;;  %v5105_v47 = vrot.slane %v5022_v4, %v17859_v34  ;;  %v5109_v39 = vrot.slane %v5022_v4, %v17862_v19 }
 0xeaa   :  { %v5014_v29 = vpop.xlane.xlu1 %5013  ;;  %v5113_v22 = vrot.slane %v5022_v4, %v17865_v33  ;;  %v5117_v20 = vrot.slane %v5022_v4, %v17868_v59  ;;  %v5121_v50 = vrot.slane %v5022_v4, %v17871_v56  ;;  %v5125_v26 = vrot.slane %v5022_v4, %v17874_v63 }
 0xeab   :  { %v5023_v25 = vmul.f32 0.03125, %v5014_v29  ;;  %v18009_v17 = vsub.f32 %v17753_v13, %v5097_v16  ;;  %v18012_v6 = vsub.f32 %v17758_v41, %v5101_v1  ;;  %v18015_v27 = vsub.f32 %v17761_v55, %v5105_v47 }
 0xeac   :  { %v18018_v60 = vsub.f32 %v17768_v21, %v5109_v39  ;;  %v18021_v52 = vsub.f32 %v17764_v31, %v5113_v22  ;;  %v18024_v10 = vsub.f32 %v17771_v51, %v5117_v20  ;;  %v18027_v28 = vsub.f32 %v17774_v11, %v5121_v50 }
 0xead   :  { %v18030_v13 = vsub.f32 %v17781_v62, %v5125_v26  ;;  %v5250_v41 = vmul.f32 %v18009_v17, %v18009_v17  ;;  %v5251_v55 = vmul.f32 %v18012_v6, %v18012_v6  ;;  %v5252_v21 = vmul.f32 %v18015_v27, %v18015_v27 }
 0xeae   :  { %v5253_v31 = vmul.f32 %v18018_v60, %v18018_v60  ;;  %v5254_v51 = vmul.f32 %v18021_v52, %v18021_v52  ;;  %v5255_v11 = vmul.f32 %v18024_v10, %v18024_v10  ;;  %v5256_v62 = vmul.f32 %v18027_v28, %v18027_v28 }
 0xeaf   :  { %21185 = vst [vmem:[#allocation29_spill] sm:$0xff] %v18030_v13  ;;  %v5257_v15 = vmul.f32 %v18030_v13, %v18030_v13  ;;  %v5400_v37 = vcombine.low %v5250_v41, %v5251_v55  ;;  %v5129_v61 = vrot.slane %v5023_v25, %v17853_v9  ;;  %v5133_v42 = vrot.slane %v5023_v25, %v17856_v43 }
 0xeb0   :  { %v5401_v5 = vcombine.low %v5252_v21, %v5253_v31  ;;  %v5402_v4 = vcombine.low %v5254_v51, %v5255_v11  ;;  %v5137_v16 = vrot.slane %v5023_v25, %v17859_v34  ;;  %v5141_v1 = vrot.slane %v5023_v25, %v17862_v19 }
 0xeb1   :  { %v5403_v47 = vcombine.low %v5256_v62, %v5257_v15  ;;  %v5410_v39 = vrot.slane %v5400_v37, %v16478_v7  ;;  %v5145_v29 = vrot.slane %v5023_v25, %v17865_v33  ;;  %v5149_v22 = vrot.slane %v5023_v25, %v17868_v59 }
 0xeb2   :  { %v5417_v20 = vrot.slane %v5401_v5, %v16478_v7  ;;  %v5424_v50 = vrot.slane %v5402_v4, %v16478_v7  ;;  %v5153_v26 = vrot.slane %v5023_v25, %v17871_v56  ;;  %v5157_v41 = vrot.slane %v5023_v25, %v17874_v63 }
 0xeb3   :  { %v5431_v55 = vrot.slane %v5403_v47, %v16478_v7  ;;  %v18061_v21 = vsub.f32 %v17790_v46, %v5129_v61  ;;  %v18064_v31 = vsub.f32 %v17793_v3, %v5133_v42  ;;  %v18067_v51 = vsub.f32 %v17801_v40, %v5137_v16 }
 0xeb4   :  { %v5432_v11 = vcombine.low %v5410_v39, %v5417_v20  ;;  %v18070_v62 = vsub.f32 %v17810_v2, %v5141_v1  ;;  %v18073_v15 = vsub.f32 %v17796_v0, %v5145_v29  ;;  %v18076_v25 = vsub.f32 %v17804_v58, %v5149_v22 }
 0xeb5   :  { %21186 = vst [vmem:[#allocation33_spill] sm:$0xff] %v18061_v21  ;;  %21187 = vst [vmem:[#allocation34_spill] sm:$0xff] %v18064_v31  ;;  %v5433_v37 = vcombine.low %v5424_v50, %v5431_v55  ;;  %v18079_v46 = vsub.f32 %v17807_v38, %v5153_v26  ;;  %v18082_v3 = vsub.f32 %v17817_v30, %v5157_v41 }
 0xeb6   :  { %21188 = vst [vmem:[#allocation35_spill] sm:$0xff] %v18067_v51  ;;  %21189 = vst [vmem:[#allocation20_spill] sm:$0xff] %v18070_v62  ;;  %v5258_v40 = vmul.f32 %v18061_v21, %v18061_v21  ;;  %v5440_v61 = vrot.slane %v5432_v11, %v16478_v7  ;;  %v5259_v2 = vmul.f32 %v18064_v31, %v18064_v31  ;;  %v21196_v31 = vld [vmem:[#allocation28_spill] sm:$0xff] }
 0xeb7   :  { %21190 = vst [vmem:[#allocation37_spill] sm:$0xff] %v18073_v15  ;;  %21191 = vst [vmem:[#allocation38_spill] sm:$0xff] %v18076_v25  ;;  %v5260_v0 = vmul.f32 %v18067_v51, %v18067_v51  ;;  %v5261_v58 = vmul.f32 %v18070_v62, %v18070_v62  ;;  %v5447_v38 = vrot.slane %v5433_v37, %v16478_v7 }
 0xeb8   :  { %21192 = vst [vmem:[#allocation39_spill] sm:$0xff] %v18079_v46  ;;  %21193 = vst [vmem:[#allocation40_spill] sm:$0xff] %v18082_v3  ;;  %v5262_v30 = vmul.f32 %v18073_v15, %v18073_v15  ;;  %v5263_v42 = vmul.f32 %v18076_v25, %v18076_v25  ;;  %v5264_v5 = vmul.f32 %v18079_v46, %v18079_v46 }
 0xeb9   :  { %v5265_v4 = vmul.f32 %v18082_v3, %v18082_v3  ;;  %v5449_v16 = vcombine.low %v5258_v40, %v5259_v2  ;;  %v5450_v1 = vcombine.low %v5260_v0, %v5261_v58  ;;  %v5448_v47 = vcombine.low %v5440_v61, %v5447_v38 }
 0xeba   :  { %v5451_v39 = vcombine.low %v5262_v30, %v5263_v42 }
 0xebb   :  { %v5452_v29 = vcombine.low %v5264_v5, %v5265_v4  ;;  %v5459_v22 = vrot.slane %v5449_v16, %v16478_v7  ;;  %v5466_v20 = vrot.slane %v5450_v1, %v16478_v7  ;;  %v5524_v50 = vsel %vm1388_vm2, %v5448_v47, 0.0 }
 0xebc   :  { %v5473_v26 = vrot.slane %v5451_v39, %v16478_v7  ;;  %5525 = vadd.xlane.f32.xlu1 %v5524_v50 }
 0xebd   :  { %v5480_v41 = vrot.slane %v5452_v29, %v16478_v7  ;;  %v5481_v55 = vcombine.low %v5459_v22, %v5466_v20  ;;  %v14274_v22 = vld [vmem:[#allocation8] ss:$0 sm:$0xff] }
 0xebe   :  { %v5762_v20 = vcombine.high %v14274_v22, %v14274_v22 }
 0xebf   :  { %v5482_v11 = vcombine.low %v5473_v26, %v5480_v41  ;;  %v5489_v37 = vrot.slane %v5481_v55, %v16478_v7  ;;  %v5769_v41 = vrot.slane %v14274_v22, %v16478_v7 }
 0xec0   :  { %v5776_v55 = vrot.slane %v5762_v20, %v16478_v7 }
 0xec1   :  { %v5496_v40 = vrot.slane %v5482_v11, %v16478_v7 }
 0xec3   :  { %v5497_v61 = vcombine.low %v5489_v37, %v5496_v40 }
 0xec5   :  { %v5527_v2 = vsel %vm1388_vm2, %v5497_v61, 0.0  ;;  %v5777_v61 = vcombine.high %v5769_v41, %v5769_v41 }
 0xec6   :  { %5528 = vadd.xlane.f32.xlu0 %v5527_v2  ;;  %v5778_v2 = vcombine.high %v5776_v55, %v5776_v55 }
 0xec9   :  { %v5018_v0 = vpop.xlane.xlu0 %5017 }
 0xeca   :  { %v5024_v58 = vmul.f32 0.03125, %v5018_v0 }
 0xecc   :  { %v5161_v38 = vrot.slane %v5024_v58, %v17853_v9  ;;  %v5165_v30 = vrot.slane %v5024_v58, %v17856_v43 }
 0xece   :  { %v18113_v42 = vsub.f32 %v17842_v8, %v5161_v38  ;;  %v18116_v5 = vsub.f32 %v17845_v48, %v5165_v30  ;;  %v14275_v8 = vld [vmem:[#allocation10] ss:$0 sm:$0xff]  ;;  %v18130_v30 = vrot.slane %v5769_v41, %v16478_v7 }
 0xecf   :  { %v5858_v50 = vcombine.high %v14275_v8, %v14275_v8  ;;  %v5865_v37 = vrot.slane %v14275_v8, %v16478_v7 }
 0xed0   :  { %21194 = vst [vmem:[#allocation41_spill] sm:$0xff] %v18113_v42  ;;  %21195 = vst [vmem:[#allocation42_spill] sm:$0xff] %v18116_v5  ;;  %v5266_v4 = vmul.f32 %v18113_v42, %v18113_v42  ;;  %v5267_v16 = vmul.f32 %v18116_v5, %v18116_v5 }
 0xed1   :  { %v5872_v40 = vrot.slane %v5858_v50, %v16478_v7  ;;  %v5873_v0 = vcombine.high %v5865_v37, %v5865_v37  ;;  %v18155_v50 = vcombine.high %v18130_v30, %v18130_v30 }
 0xed2   :  { %v5498_v1 = vcombine.low %v5266_v4, %v5267_v16  ;;  %v18133_v16 = vrot.slane %v5776_v55, %v16478_v7 }
 0xed3   :  { %v5874_v58 = vcombine.high %v5872_v40, %v5872_v40  ;;  %v18148_v22 = vrot.slane %v5873_v0, %v16478_v7 }
 0xed4   :  { %v5505_v47 = vrot.slane %v5498_v1, %v16478_v7  ;;  %v18136_v1 = vrot.slane %v5777_v61, %v16478_v7 }
 0xed5   :  { %v18151_v8 = vrot.slane %v5874_v58, %v16478_v7 }
 0xed6   :  { %v5512_v39 = vrot.slane %v5505_v47, %v16478_v7  ;;  %v18139_v47 = vrot.slane %v5778_v2, %v16478_v7 }
 0xed7   :  { %v18183_v61 = vcombine.high %v18151_v8, %v18151_v8 }
 0xed8   :  { %v5530_v29 = vsel %vm5015_vm10, %v5512_v39, 0.0  ;;  %v18142_v39 = vrot.slane %v5865_v37, %v16478_v7  ;;  %v18167_v41 = vcombine.high %v18139_v47, %v18139_v47 }
 0xed9   :  { %5531 = vadd.xlane.f32.xlu1 %v5530_v29  ;;  %v18145_v29 = vrot.slane %v5872_v40, %v16478_v7  ;;  %v18179_v40 = vcombine.high %v18148_v22, %v18148_v22 }
 0xedb   :  { %v18175_v37 = vcombine.high %v18145_v29, %v18145_v29 }
 0xf06   :  { %v5520_v48 = vpop.xlane.xlu1 %5519 }
 0xf07   :  { %v5533_v26 = vmul.f32 0.03125, %v5520_v48  ;;  %v18159_v48 = vcombine.high %v18133_v16, %v18133_v16 }
 0xf09   :  { %v5538_v11 = vadd.f32 1e-05, %v5533_v26  ;;  %v18163_v26 = vcombine.high %v18136_v1, %v18136_v1 }
 0xf0b   :  { %15875 = vrsqrt.f32 %v5538_v11  ;;  %v18171_v11 = vcombine.high %v18142_v39, %v18142_v39 }
 0xf0f   :  { %v5523_v38 = vpop.xlane.xlu0 %5522 }
 0xf10   :  { %v5534_v4 = vmul.f32 0.03125, %v5523_v38 }
 0xf12   :  { %v5539_v20 = vadd.f32 1e-05, %v5534_v4 }
 0xf14   :  { %15877 = vrsqrt.f32 %v5539_v20 }
 0xf15   :  { %v15876_v55 = vpop.eup %15875 }
 0xf16   :  { %v5556_v2 = vrot.slane %v15876_v55, %v17853_v9  ;;  %v5560_v0 = vrot.slane %v15876_v55, %v17856_v43  ;;  %v5564_v58 = vrot.slane %v15876_v55, %v17859_v34  ;;  %v5568_v38 = vrot.slane %v15876_v55, %v17862_v19 }
 0xf17   :  { %v5572_v4 = vrot.slane %v15876_v55, %v17865_v33  ;;  %v5576_v20 = vrot.slane %v15876_v55, %v17868_v59  ;;  %v5580_v18 = vrot.slane %v15876_v55, %v17871_v56  ;;  %v5584_v5 = vrot.slane %v15876_v55, %v17874_v63 }
 0xf18   :  { %v5723_v42 = vmul.f32 %v5556_v2, %v17885_v45  ;;  %v5724_v3 = vmul.f32 %v5560_v0, %v17888_v12  ;;  %v5725_v46 = vmul.f32 %v5564_v58, %v17891_v35  ;;  %v5726_v25 = vmul.f32 %v5568_v38, %v17894_v14 }
 0xf19   :  { %v5727_v15 = vmul.f32 %v5572_v4, %v17897_v36  ;;  %v5728_v62 = vmul.f32 %v5576_v20, %v17900_v49  ;;  %v5729_v51 = vmul.f32 %v5580_v18, %v17903_v54  ;;  %v5730_v21 = vmul.f32 %v5584_v5, %v21196_v31 }
 0xf1a   :  { %v5819_v13 = vmul.f32 %v18130_v30, %v5723_v42  ;;  %v5820_v55 = vmul.f32 %v18136_v1, %v5724_v3  ;;  %v5821_v45 = vmul.f32 %v18155_v50, %v5725_v46  ;;  %v5822_v12 = vmul.f32 %v18163_v26, %v5726_v25 }
 0xf1b   :  { %v5823_v35 = vmul.f32 %v18133_v16, %v5727_v15  ;;  %v5824_v14 = vmul.f32 %v18139_v47, %v5728_v62  ;;  %v5825_v36 = vmul.f32 %v18159_v48, %v5729_v51  ;;  %v5826_v49 = vmul.f32 %v18167_v41, %v5730_v21 }
 0xf1c   :  { %v18210_v18 = vadd.f32 %v18142_v39, %v5819_v13  ;;  %v18213_v54 = vadd.f32 %v18148_v22, %v5820_v55  ;;  %v18216_v31 = vadd.f32 %v18171_v11, %v5821_v45  ;;  %v18219_v46 = vadd.f32 %v18179_v40, %v5822_v12 }
 0xf1d   :  { %v18222_v15 = vadd.f32 %v18145_v29, %v5823_v35  ;;  %v18225_v62 = vadd.f32 %v18151_v8, %v5824_v14  ;;  %v18228_v21 = vadd.f32 %v18175_v37, %v5825_v36  ;;  %v18231_v13 = vadd.f32 %v18183_v61, %v5826_v49 }
 0xf1e   :  { %21197 = vst [vmem:[#allocation28_spill] sm:$0xff] %v18216_v31  ;;  %21198 = vst [vmem:[#allocation43_spill] sm:$0xff] %v18219_v46  ;;  %v15878_v51 = vpop.eup %15877  ;;  %v5994_v25 = vcombine.low %v18210_v18, %v18213_v54  ;;  %v5995_v3 = vcombine.low %v18216_v31, %v18219_v46 }
 0xf1f   :  { %21199 = vst [vmem:[#allocation44_spill] sm:$0xff] %v18222_v15  ;;  %21200 = vst [vmem:[#allocation45_spill] sm:$0xff] %v18225_v62  ;;  %v5996_v42 = vcombine.low %v18222_v15, %v18225_v62  ;;  %v5997_v5 = vcombine.low %v18228_v21, %v18231_v13  ;;  %v5588_v2 = vrot.slane %v15878_v51, %v17853_v9 }
 0xf20   :  { %21201 = vst [vmem:[#allocation46_spill] sm:$0xff] %v18228_v21  ;;  %21202 = vst [vmem:[#allocation47_spill] sm:$0xff] %v18231_v13  ;;  %v5592_v0 = vrot.slane %v15878_v51, %v17856_v43  ;;  %v6004_v58 = vrot.slane %v5994_v25, %v16478_v7  ;;  %v6011_v38 = vrot.slane %v5995_v3, %v16478_v7 }
 0xf21   :  { %v5596_v4 = vrot.slane %v15878_v51, %v17859_v34  ;;  %v5600_v20 = vrot.slane %v15878_v51, %v17862_v19  ;;  %v6018_v55 = vrot.slane %v5996_v42, %v16478_v7  ;;  %v6025_v45 = vrot.slane %v5997_v5, %v16478_v7 }
 0xf22   :  { %v5604_v12 = vrot.slane %v15878_v51, %v17865_v33  ;;  %v5608_v35 = vrot.slane %v15878_v51, %v17868_v59  ;;  %v6026_v14 = vcombine.low %v6004_v58, %v6011_v38  ;;  %v5612_v36 = vrot.slane %v15878_v51, %v17871_v56  ;;  %v21203_v58 = vld [vmem:[#allocation31_spill] sm:$0xff] }
 0xf23   :  { %v5616_v49 = vrot.slane %v15878_v51, %v17874_v63  ;;  %v5731_v25 = vmul.f32 %v5588_v2, %v17937_v32  ;;  %v6027_v3 = vcombine.low %v6018_v55, %v6025_v45  ;;  %v5732_v13 = vmul.f32 %v5592_v0, %v17940_v44  ;;  %v21204_v51 = vld [vmem:[#allocation32_spill] sm:$0xff] }
 0xf24   :  { %v5733_v21 = vmul.f32 %v5596_v4, %v17943_v53  ;;  %v5734_v42 = vmul.f32 %v5600_v20, %v17946_v57  ;;  %v6034_v5 = vrot.slane %v6026_v14, %v16478_v7  ;;  %v5735_v15 = vmul.f32 %v5604_v12, %v17949_v23 }
 0xf25   :  { %v5736_v62 = vmul.f32 %v5608_v35, %v17952_v24  ;;  %v5737_v38 = vmul.f32 %v5612_v36, %v21203_v58  ;;  %v6041_v46 = vrot.slane %v6027_v3, %v16478_v7  ;;  %v5738_v31 = vmul.f32 %v5616_v49, %v21204_v51 }
 0xf26   :  { %v5827_v32 = vmul.f32 %v18130_v30, %v5731_v25  ;;  %v5828_v44 = vmul.f32 %v18136_v1, %v5732_v13  ;;  %v5829_v53 = vmul.f32 %v18155_v50, %v5733_v21  ;;  %v5830_v57 = vmul.f32 %v18163_v26, %v5734_v42 }
 0xf27   :  { %v5831_v2 = vmul.f32 %v18133_v16, %v5735_v15  ;;  %v5832_v23 = vmul.f32 %v18139_v47, %v5736_v62  ;;  %v6042_v0 = vcombine.low %v6034_v5, %v6041_v46  ;;  %v5833_v24 = vmul.f32 %v18159_v48, %v5737_v38 }
 0xf28   :  { %v5834_v4 = vmul.f32 %v18167_v41, %v5738_v31  ;;  %v18272_v20 = vadd.f32 %v18142_v39, %v5827_v32  ;;  %v18275_v55 = vadd.f32 %v18148_v22, %v5828_v44  ;;  %v18278_v13 = vadd.f32 %v18171_v11, %v5829_v53 }
 0xf29   :  { %v18281_v21 = vadd.f32 %v18179_v40, %v5830_v57  ;;  %v18284_v15 = vadd.f32 %v18145_v29, %v5831_v2  ;;  %15026 = vmatmul.mubr.msk.f32.vlgmr.msra.gmra.mrb[60].mxu0 %vm1388_vm2, %v6042_v0  ;;  %v18288_v46 = vadd.f32 %v18151_v8, %v5832_v23  ;;  %v18291_v31 = vadd.f32 %v18175_v37, %v5833_v24 }
 0xf2a   :  { %v18294_v62 = vadd.f32 %v18183_v61, %v5834_v4  ;;  %v21205_v45 = vmov 0.0   ;;  %v6043_v12 = vcombine.low %v18272_v20, %v18275_v55 }
 0xf2b   :  { %15028 = vmatprep.mubr.msk.f32.mxu0 %vm16244_vm0, %v21205_v45  ;;  %v6044_v35 = vcombine.low %v18278_v13, %v18281_v21  ;;  %v6045_v14 = vcombine.low %v18284_v15, %v18288_v46 }
 0xf2c   :  { %v6046_v36 = vcombine.low %v18291_v31, %v18294_v62  ;;  %v6053_v49 = vrot.slane %v6043_v12, %v16478_v7 }
 0xf2d   :  { %v6060_v25 = vrot.slane %v6044_v35, %v16478_v7  ;;  %v6067_v3 = vrot.slane %v6045_v14, %v16478_v7 }
 0xf2e   :  { %v6074_v42 = vrot.slane %v6046_v36, %v16478_v7 }
 0xf2f   :  { %v6075_v5 = vcombine.low %v6053_v49, %v6060_v25 }
 0xf30   :  { %v6076_v58 = vcombine.low %v6067_v3, %v6074_v42 }
 0xf31   :  { %v6083_v38 = vrot.slane %v6075_v5, %v16478_v7 }
 0xf32   :  { %v6090_v51 = vrot.slane %v6076_v58, %v16478_v7 }
 0xf34   :  { %v6091_v32 = vcombine.low %v6083_v38, %v6090_v51 }
 0xf36   :  { %15029 = vmatmul.mubr.msk.f32.gmra.mrb[62].mxu0 %vm1388_vm2, %v6091_v32 }
 0xf37   :  { %15031 = vmatprep.mubr.msk.f32.mxu0 %vm16244_vm0, %v21205_v45 }
 0xf49   :  { %v5526_v44 = vpop.xlane.xlu1 %5525 }
 0xf4a   :  { %v5535_v53 = vmul.f32 0.03125, %v5526_v44 }
 0xf4c   :  { %v5540_v57 = vadd.f32 1e-05, %v5535_v53  ;;  %v21206_v53 = vld [vmem:[#allocation29_spill] sm:$0xff] }
 0xf4e   :  { %15879 = vrsqrt.f32 %v5540_v57 }
 0xf53   :  { %v5529_v2 = vpop.xlane.xlu0 %5528 }
 0xf54   :  { %v5536_v23 = vmul.f32 0.03125, %v5529_v2 }
 0xf56   :  { %v5541_v0 = vadd.f32 1e-05, %v5536_v23 }
 0xf58   :  { %15881 = vrsqrt.f32 %v5541_v0  ;;  %v15880_v24 = vpop.eup %15879 }
 0xf59   :  { %v5620_v4 = vrot.slane %v15880_v24, %v17853_v9  ;;  %v5624_v12 = vrot.slane %v15880_v24, %v17856_v43  ;;  %v5628_v35 = vrot.slane %v15880_v24, %v17859_v34  ;;  %v5632_v14 = vrot.slane %v15880_v24, %v17862_v19 }
 0xf5a   :  { %v5636_v36 = vrot.slane %v15880_v24, %v17865_v33  ;;  %v5640_v49 = vrot.slane %v15880_v24, %v17868_v59  ;;  %v5644_v25 = vrot.slane %v15880_v24, %v17871_v56  ;;  %v5648_v3 = vrot.slane %v15880_v24, %v17874_v63 }
 0xf5b   :  { %v5739_v42 = vmul.f32 %v5620_v4, %v18009_v17  ;;  %v5740_v5 = vmul.f32 %v5624_v12, %v18012_v6  ;;  %v5741_v58 = vmul.f32 %v5628_v35, %v18015_v27  ;;  %v5742_v38 = vmul.f32 %v5632_v14, %v18018_v60 }
 0xf5c   :  { %v5743_v51 = vmul.f32 %v5636_v36, %v18021_v52  ;;  %v5744_v32 = vmul.f32 %v5640_v49, %v18024_v10  ;;  %v5745_v44 = vmul.f32 %v5644_v25, %v18027_v28  ;;  %v5746_v57 = vmul.f32 %v5648_v3, %v21206_v53 }
 0xf5d   :  { %v5835_v2 = vmul.f32 %v18130_v30, %v5739_v42  ;;  %v5836_v23 = vmul.f32 %v18136_v1, %v5740_v5  ;;  %v5837_v17 = vmul.f32 %v18155_v50, %v5741_v58  ;;  %v5838_v6 = vmul.f32 %v18163_v26, %v5742_v38 }
 0xf5e   :  { %v5839_v27 = vmul.f32 %v18133_v16, %v5743_v51  ;;  %v5840_v60 = vmul.f32 %v18139_v47, %v5744_v32  ;;  %v5841_v52 = vmul.f32 %v18159_v48, %v5745_v44  ;;  %v5842_v10 = vmul.f32 %v18167_v41, %v5746_v57 }
 0xf5f   :  { %v18340_v28 = vadd.f32 %v18142_v39, %v5835_v2  ;;  %v18343_v0 = vadd.f32 %v18148_v22, %v5836_v23  ;;  %v18346_v24 = vadd.f32 %v18171_v11, %v5837_v17  ;;  %v18349_v4 = vadd.f32 %v18179_v40, %v5838_v6 }
 0xf60   :  { %v18352_v12 = vadd.f32 %v18145_v29, %v5839_v27  ;;  %v18355_v35 = vadd.f32 %v18151_v8, %v5840_v60  ;;  %v18358_v14 = vadd.f32 %v18175_v37, %v5841_v52  ;;  %v18361_v36 = vadd.f32 %v18183_v61, %v5842_v10  ;;  %v21211_v52 = vld [vmem:[#allocation33_spill] sm:$0xff] }
 0xf61   :  { %v6092_v25 = vcombine.low %v18340_v28, %v18343_v0  ;;  %v6093_v3 = vcombine.low %v18346_v24, %v18349_v4 }
 0xf62   :  { %21207 = vst [vmem:[#allocation31_spill] sm:$0xff] %v18352_v12  ;;  %21208 = vst [vmem:[#allocation32_spill] sm:$0xff] %v18355_v35  ;;  %v15882_v49 = vpop.eup %15881  ;;  %v6094_v42 = vcombine.low %v18352_v12, %v18355_v35  ;;  %v6095_v5 = vcombine.low %v18358_v14, %v18361_v36  ;;  %v21215_v12 = vld [vmem:[#allocation37_spill] sm:$0xff] }
 0xf63   :  { %21209 = vst [vmem:[#allocation29_spill] sm:$0xff] %v18358_v14  ;;  %21210 = vst [vmem:[#allocation48_spill] sm:$0xff] %v18361_v36  ;;  %v5652_v58 = vrot.slane %v15882_v49, %v17853_v9  ;;  %v5656_v38 = vrot.slane %v15882_v49, %v17856_v43  ;;  %v6102_v51 = vrot.slane %v6092_v25, %v16478_v7 }
 0xf64   :  { %v6109_v32 = vrot.slane %v6093_v3, %v16478_v7  ;;  %v5660_v44 = vrot.slane %v15882_v49, %v17859_v34  ;;  %v5664_v53 = vrot.slane %v15882_v49, %v17862_v19  ;;  %v6116_v57 = vrot.slane %v6094_v42, %v16478_v7  ;;  %v21212_v34 = vld [vmem:[#allocation34_spill] sm:$0xff]  ;;  %v21213_v19 = vld [vmem:[#allocation35_spill] sm:$0xff]  ;;  %v21214_v42 = vld [vmem:[#allocation20_spill] sm:$0xff] }
 0xf65   :  { %v6123_v2 = vrot.slane %v6095_v5, %v16478_v7  ;;  %v5668_v23 = vrot.slane %v15882_v49, %v17865_v33  ;;  %v5672_v17 = vrot.slane %v15882_v49, %v17868_v59  ;;  %v5676_v27 = vrot.slane %v15882_v49, %v17871_v56 }
 0xf66   :  { %v6124_v6 = vcombine.low %v6102_v51, %v6109_v32  ;;  %v5680_v60 = vrot.slane %v15882_v49, %v17874_v63  ;;  %v5747_v10 = vmul.f32 %v5652_v58, %v21211_v52  ;;  %v5532_v25 = vpop.xlane.xlu1 %5531  ;;  %v5748_v36 = vmul.f32 %v5656_v38, %v21212_v34  ;;  %v21216_v51 = vld [vmem:[#allocation38_spill] sm:$0xff]  ;;  %v21217_v49 = vld [vmem:[#allocation39_spill] sm:$0xff]  ;;  %v21218_v58 = vld [vmem:[#allocation40_spill] sm:$0xff] }
 0xf67   :  { %v6125_v3 = vcombine.low %v6116_v57, %v6123_v2  ;;  %v5749_v14 = vmul.f32 %v5660_v44, %v21213_v19  ;;  %v5750_v35 = vmul.f32 %v5664_v53, %v21214_v42  ;;  %v5537_v5 = vmul.f32 0.03125, %v5532_v25 }
 0xf68   :  { %v6132_v33 = vrot.slane %v6124_v6, %v16478_v7  ;;  %v5751_v59 = vmul.f32 %v5668_v23, %v21215_v12  ;;  %v5752_v32 = vmul.f32 %v5672_v17, %v21216_v51  ;;  %v5753_v63 = vmul.f32 %v5676_v27, %v21217_v49 }
 0xf69   :  { %v6139_v56 = vrot.slane %v6125_v3, %v16478_v7  ;;  %v5754_v52 = vmul.f32 %v5680_v60, %v21218_v58  ;;  %v5843_v57 = vmul.f32 %v18130_v30, %v5747_v10  ;;  %v5542_v34 = vadd.f32 1e-05, %v5537_v5  ;;  %v21219_v3 = vld [vmem:[#allocation41_spill] sm:$0xff]  ;;  %v21220_v5 = vld [vmem:[#allocation42_spill] sm:$0xff] }
 0xf6a   :  { %v5844_v19 = vmul.f32 %v18136_v1, %v5748_v36  ;;  %v5845_v38 = vmul.f32 %v18155_v50, %v5749_v14  ;;  %v5846_v44 = vmul.f32 %v18163_v26, %v5750_v35  ;;  %v5847_v12 = vmul.f32 %v18133_v16, %v5751_v59 }
 0xf6b   :  { %v6140_v53 = vcombine.low %v6132_v33, %v6139_v56  ;;  %v5848_v2 = vmul.f32 %v18139_v47, %v5752_v32  ;;  %v5849_v23 = vmul.f32 %v18159_v48, %v5753_v63  ;;  %15883 = vrsqrt.f32 %v5542_v34 }
 0xf6c   :  { %v5850_v17 = vmul.f32 %v18167_v41, %v5754_v52  ;;  %v18402_v6 = vadd.f32 %v18142_v39, %v5843_v57  ;;  %v18405_v27 = vadd.f32 %v18148_v22, %v5844_v19  ;;  %v18409_v50 = vadd.f32 %v18171_v11, %v5845_v38 }
 0xf6d   :  { %15032 = vmatmul.mubr.msk.f32.gmra.mrb[64].mxu0 %vm1388_vm2, %v6140_v53  ;;  %v18412_v33 = vadd.f32 %v18179_v40, %v5846_v44  ;;  %v18415_v59 = vadd.f32 %v18145_v29, %v5847_v12  ;;  %v18418_v56 = vadd.f32 %v18151_v8, %v5848_v2  ;;  %v18423_v63 = vadd.f32 %v18175_v37, %v5849_v23  ;;  %v6443_v44 = vld [vmem:[#allocation11 + $0x18] sm:$0xff]  ;;  %v18469_v12 = vld [vmem:[%s20996_s10] ss:$0 sm:$0xff] }
 0xf6e   :  { %15034 = vmatprep.mubr.msk.f32.mxu0 %vm16244_vm0, %v21205_v45  ;;  %v18426_v16 = vadd.f32 %v18183_v61, %v5850_v17  ;;  %v6141_v47 = vcombine.low %v18402_v6, %v18405_v27 }
 0xf6f   :  { %v6142_v48 = vcombine.low %v18409_v50, %v18412_v33  ;;  %v6143_v29 = vcombine.low %v18415_v59, %v18418_v56 }
 0xf70   :  { %v6144_v8 = vcombine.low %v18423_v63, %v18426_v16  ;;  %v6151_v26 = vrot.slane %v6141_v47, %v16478_v7 }
 0xf71   :  { %v6158_v41 = vrot.slane %v6142_v48, %v16478_v7  ;;  %v6165_v11 = vrot.slane %v6143_v29, %v16478_v7 }
 0xf72   :  { %v6172_v37 = vrot.slane %v6144_v8, %v16478_v7 }
 0xf73   :  { %v6173_v40 = vcombine.low %v6151_v26, %v6158_v41 }
 0xf74   :  { %v6174_v61 = vcombine.low %v6165_v11, %v6172_v37 }
 0xf75   :  { %v6181_v35 = vrot.slane %v6173_v40, %v16478_v7  ;;  %v15884_v14 = vpop.eup %15883 }
 0xf76   :  { %v6188_v36 = vrot.slane %v6174_v61, %v16478_v7  ;;  %v5684_v60 = vrot.slane %v15884_v14, %v17853_v9  ;;  %v5688_v10 = vrot.slane %v15884_v14, %v17856_v43 }
 0xf78   :  { %v6189_v25 = vcombine.low %v6181_v35, %v6188_v36  ;;  %v5755_v42 = vmul.f32 %v5684_v60, %v21219_v3  ;;  %v5756_v51 = vmul.f32 %v5688_v10, %v21220_v5 }
 0xf7a   :  { %15035 = vmatmul.mubr.msk.f32.gmra.mrb[66].mxu0 %vm1388_vm2, %v6189_v25  ;;  %v5851_v32 = vmul.f32 %v18130_v30, %v5755_v42  ;;  %v5852_v49 = vmul.f32 %v18136_v1, %v5756_v51  ;;  %v6440_v30 = vld [vmem:[#allocation11] sm:$0xff]  ;;  %v6441_v1 = vld [vmem:[#allocation11 + $0x8] sm:$0xff] }
 0xf7b   :  { %15037 = vmatprep.mubr.msk.f32.mxu0 %vm16244_vm0, %v21205_v45  ;;  %v15490_v38 = vpack.c.bf16 %v6441_v1, %v6440_v30 }
 0xf7c   :  { %v18452_v58 = vadd.f32 %v18142_v39, %v5851_v32  ;;  %v18455_v52 = vadd.f32 %v18148_v22, %v5852_v49  ;;  %v21221_v39 = vmov 0.0|0.0   ;;  %v6442_v22 = vld [vmem:[#allocation11 + $0x10] sm:$0xff] }
 0xf7d   :  { %15491 = vmatpush3.bf16.msra.mxu1 %v15490_v38  ;;  %v15493_v53 = vpack.c.bf16 %v6443_v44, %v6442_v22 }
 0xf7e   :  { %v6190_v57 = vcombine.low %v18452_v58, %v18455_v52  ;;  %15492 = vmatprep.subr.bf16.mxu1 %v21221_v39 }
 0xf80   :  { %v6197_v34 = vrot.slane %v6190_v57, %v16478_v7 }
 0xf81   :  { %15494 = vmatpush3.bf16.msra.mxu1 %v15493_v53 }
 0xf82   :  { %v6204_v19 = vrot.slane %v6197_v34, %v16478_v7  ;;  %15501 = vmatprep.subr.bf16.mxu1 %v21221_v39 }
 0xf84   :  { %15038 = vmatmul.mubr.msk.f32.gmra.mrb[68].mxu0 %vm1388_vm2, %v6204_v19 }
 0xf85   :  { %15071 = vmatprep.mubr.msk.f32.mxu0 %vm16244_vm0, %v21205_v45 }
 0xffc   :  { %v6281_v2 = vpop.f32.mrb[60].mxu0 }
 0xffd   :  { %v6282_v23 = vadd.f32 %v18469_v12, %v6281_v2  ;;  %v15027_v17 = vpop.f32.mrb[61].mxu0 }
 0xfff   :  { %v6305_v47 = vmul.f32 0.70710677, %v6282_v23 }
0x1001   :  { %v6310_v48 = vand.u32 2147483647, %v6305_v47  ;;  %vm6410_vm11 = vcmp.ge.f32.partialorder %v6305_v47, 0.0 }
0x1003   :  { %v6315_v29 = vmul.f32 0.3275911, %v6310_v48  ;;  %v6380_v40 = vsub.f32 0.0, %v6310_v48 }
0x1005   :  { %v6320_v8 = vadd.f32 1.0, %v6315_v29  ;;  %v6385_v36 = vmul.f32 %v6380_v40, %v6310_v48 }
0x1007   :  { %15885 = vrcp.f32 %v6320_v8  ;;  %v6390_v3 = vmul.f32 1.442695, %v6385_v36  ;;  %v6425_v36 = vmul.f32 0.5, %v6282_v23 }
0x1009   :  { %v6286_v26 = vpop.f32.mrb[62].mxu0 }
0x100a   :  { %v6287_v41 = vadd.f32 %v18469_v12, %v6286_v26  ;;  %v15030_v11 = vpop.f32.mrb[63].mxu0 }
0x100c   :  { %v6306_v37 = vmul.f32 0.70710677, %v6287_v41 }
0x100e   :  { %v6311_v61 = vand.u32 2147483647, %v6306_v37  ;;  %vm6411_vm12 = vcmp.ge.f32.partialorder %v6306_v37, 0.0 }
0x1010   :  { %v6316_v35 = vmul.f32 0.3275911, %v6311_v61  ;;  %v6381_v51 = vsub.f32 0.0, %v6311_v61 }
0x1011   :  { %v15886_v14 = vpop.eup %15885 }
0x1012   :  { %v6321_v60 = vadd.f32 1.0, %v6316_v35  ;;  %v6335_v10 = vmul.f32 1.0614054, %v15886_v14  ;;  %v6386_v34 = vmul.f32 %v6381_v51, %v6311_v61 }
0x1014   :  { %15887 = vrcp.f32 %v6321_v60  ;;  %v6340_v25 = vadd.f32 -1.4531521, %v6335_v10  ;;  %v6392_v22 = vmul.f32 1.442695, %v6386_v34 }
0x1015   :  { %15889 = vpow2.f32 %v6390_v3 }
0x1016   :  { %v6345_v42 = vmul.f32 %v15886_v14, %v6340_v25  ;;  %15891 = vpow2.f32 %v6392_v22 }
0x1018   :  { %v6350_v5 = vadd.f32 1.4214138, %v6345_v42 }
0x101a   :  { %v6355_v32 = vmul.f32 %v15886_v14, %v6350_v5 }
0x101c   :  { %v6360_v49 = vadd.f32 -0.28449672, %v6355_v32  ;;  %v6426_v32 = vmul.f32 0.5, %v6287_v41 }
0x101e   :  { %v15888_v57 = vpop.eup %15887  ;;  %v6365_v19 = vmul.f32 %v15886_v14, %v6360_v49 }
0x101f   :  { %v6336_v30 = vmul.f32 1.0614054, %v15888_v57  ;;  %v15890_v2 = vpop.eup %15889 }
0x1020   :  { %v6370_v1 = vadd.f32 0.2548296, %v6365_v19  ;;  %v15892_v3 = vpop.eup %15891 }
0x1021   :  { %v6341_v38 = vadd.f32 -1.4531521, %v6336_v30 }
0x1022   :  { %v6375_v44 = vmul.f32 %v15886_v14, %v6370_v1 }
0x1023   :  { %v6346_v53 = vmul.f32 %v15888_v57, %v6341_v38 }
0x1024   :  { %v6400_v17 = vmul.f32 %v15890_v2, %v6375_v44 }
0x1025   :  { %v6351_v48 = vadd.f32 1.4214138, %v6346_v53 }
0x1026   :  { %v6405_v29 = vsub.f32 1.0, %v6400_v17 }
0x1027   :  { %v6356_v8 = vmul.f32 %v15888_v57, %v6351_v48 }
0x1028   :  { %v6415_v26 = vsub.f32 0.0, %v6405_v29 }
0x1029   :  { %v6361_v11 = vadd.f32 -0.28449672, %v6356_v8 }
0x102a   :  { %v6420_v40 = vsel %vm6410_vm11, %v6405_v29, %v6415_v26 }
0x102b   :  { %v6366_v35 = vmul.f32 %v15888_v57, %v6361_v11  ;;  %v6430_v61 = vadd.f32 1.0, %v6420_v40 }
0x102d   :  { %v6371_v60 = vadd.f32 0.2548296, %v6366_v35  ;;  %v6435_v10 = vmul.f32 %v6430_v61, %v6425_v36 }
0x102f   :  { %v6376_v25 = vmul.f32 %v15888_v57, %v6371_v60  ;;  %15049 = vmatmul.mubr.msk.f32.vlgmr.msra.gmra.mrb[66].mxu1 %vm1388_vm2, %v6435_v10 }
0x1030   :  { %15051 = vmatprep.mubr.msk.f32.mxu1 %vm16244_vm0, %v21205_v45 }
0x1031   :  { %v6401_v14 = vmul.f32 %v15892_v3, %v6376_v25 }
0x1033   :  { %v6406_v42 = vsub.f32 1.0, %v6401_v14 }
0x1035   :  { %v6416_v5 = vsub.f32 0.0, %v6406_v42 }
0x1037   :  { %v6421_v51 = vsel %vm6411_vm12, %v6406_v42, %v6416_v5 }
0x1038   :  { %v6431_v47 = vadd.f32 1.0, %v6421_v51 }
0x103a   :  { %v6436_v49 = vmul.f32 %v6431_v47, %v6426_v32 }
0x103c   :  { %15052 = vmatmul.mubr.msk.f32.gmra.mrb[68].mxu1 %vm1388_vm2, %v6436_v49 }
0x103d   :  { %15054 = vmatprep.mubr.msk.f32.mxu1 %vm16244_vm0, %v21205_v45 }
0x1040   :  { %v6291_v23 = vpop.f32.mrb[64].mxu0 }
0x1041   :  { %v6292_v57 = vadd.f32 %v18469_v12, %v6291_v23  ;;  %v15033_v34 = vpop.f32.mrb[65].mxu0 }
0x1043   :  { %v6307_v19 = vmul.f32 0.70710677, %v6292_v57 }
0x1045   :  { %v6312_v30 = vand.u32 2147483647, %v6307_v19  ;;  %vm6412_vm13 = vcmp.ge.f32.partialorder %v6307_v19, 0.0 }
0x1047   :  { %v6317_v1 = vmul.f32 0.3275911, %v6312_v30  ;;  %v6382_v53 = vsub.f32 0.0, %v6312_v30 }
0x1049   :  { %v6322_v38 = vadd.f32 1.0, %v6317_v1  ;;  %v6387_v29 = vmul.f32 %v6382_v53, %v6312_v30 }
0x104b   :  { %15893 = vrcp.f32 %v6322_v38  ;;  %v6394_v35 = vmul.f32 1.442695, %v6387_v29 }
0x104d   :  { %v6296_v22 = vpop.f32.mrb[66].mxu0 }
0x104e   :  { %v18481_v37 = vadd.f32 %v18469_v12, %v6296_v22  ;;  %v15036_v41 = vpop.f32.mrb[67].mxu0 }
0x1050   :  { %v18484_v44 = vmul.f32 0.70710677, %v18481_v37 }
0x1052   :  { %v6313_v2 = vand.u32 2147483647, %v18484_v44  ;;  %vm6413_vm14 = vcmp.ge.f32.partialorder %v18484_v44, 0.0 }
0x1054   :  { %v6318_v17 = vmul.f32 0.3275911, %v6313_v2  ;;  %v6383_v42 = vsub.f32 0.0, %v6313_v2 }
0x1055   :  { %v15894_v48 = vpop.eup %15893 }
0x1056   :  { %v6337_v8 = vmul.f32 1.0614054, %v15894_v48  ;;  %v6323_v26 = vadd.f32 1.0, %v6318_v17  ;;  %v6388_v23 = vmul.f32 %v6383_v42, %v6313_v2 }
0x1057   :  { %v6301_v40 = vpop.f32.mrb[68].mxu0 }
0x1058   :  { %v6342_v11 = vadd.f32 -1.4531521, %v6337_v8  ;;  %15895 = vrcp.f32 %v6323_v26  ;;  %v18488_v36 = vadd.f32 %v18469_v12, %v6301_v40  ;;  %v15039_v61 = vpop.f32.mrb[69].mxu0  ;;  %v6396_v38 = vmul.f32 1.442695, %v6388_v23 }
0x1059   :  { %15897 = vpow2.f32 %v6394_v35 }
0x105a   :  { %v6347_v60 = vmul.f32 %v15894_v48, %v6342_v11  ;;  %v18491_v10 = vmul.f32 0.70710677, %v18488_v36 }
0x105c   :  { %v6352_v25 = vadd.f32 1.4214138, %v6347_v60  ;;  %v6314_v3 = vand.u32 2147483647, %v18491_v10  ;;  %vm6414_vm15 = vcmp.ge.f32.partialorder %v18491_v10, 0.0 }
0x105e   :  { %v6357_v14 = vmul.f32 %v15894_v48, %v6352_v25  ;;  %v6319_v5 = vmul.f32 0.3275911, %v6314_v3  ;;  %v6384_v29 = vsub.f32 0.0, %v6314_v3  ;;  %v6427_v25 = vmul.f32 0.5, %v6292_v57 }
0x1060   :  { %v6362_v51 = vadd.f32 -0.28449672, %v6357_v14  ;;  %v6324_v32 = vadd.f32 1.0, %v6319_v5  ;;  %v6389_v61 = vmul.f32 %v6384_v29, %v6314_v3 }
0x1062   :  { %v15896_v47 = vpop.eup %15895  ;;  %v6367_v49 = vmul.f32 %v15894_v48, %v6362_v51  ;;  %15899 = vrcp.f32 %v6324_v32  ;;  %v6398_v32 = vmul.f32 1.442695, %v6389_v61  ;;  %v6429_v61 = vmul.f32 0.5, %v18488_v36 }
0x1063   :  { %v6338_v34 = vmul.f32 1.0614054, %v15896_v47  ;;  %v15898_v22 = vpop.eup %15897  ;;  %15901 = vpow2.f32 %v6396_v38 }
0x1064   :  { %v6372_v12 = vadd.f32 0.2548296, %v6367_v49  ;;  %15903 = vpow2.f32 %v6398_v32 }
0x1065   :  { %v6343_v30 = vadd.f32 -1.4531521, %v6338_v34 }
0x1066   :  { %v6377_v1 = vmul.f32 %v15894_v48, %v6372_v12 }
0x1067   :  { %v6348_v41 = vmul.f32 %v15896_v47, %v6343_v30 }
0x1068   :  { %v6402_v53 = vmul.f32 %v15898_v22, %v6377_v1 }
0x1069   :  { %v6353_v17 = vadd.f32 1.4214138, %v6348_v41  ;;  %v6428_v41 = vmul.f32 0.5, %v18481_v37 }
0x106a   :  { %v6407_v8 = vsub.f32 1.0, %v6402_v53 }
0x106b   :  { %v6358_v26 = vmul.f32 %v15896_v47, %v6353_v17 }
0x106c   :  { %v6417_v11 = vsub.f32 0.0, %v6407_v8  ;;  %v15900_v40 = vpop.eup %15899 }
0x106d   :  { %v6363_v35 = vadd.f32 -0.28449672, %v6358_v26  ;;  %v6339_v60 = vmul.f32 1.0614054, %v15900_v40  ;;  %v15902_v34 = vpop.eup %15901 }
0x106e   :  { %v6422_v2 = vsel %vm6412_vm13, %v6407_v8, %v6417_v11  ;;  %v15904_v8 = vpop.eup %15903 }
0x106f   :  { %v6432_v14 = vadd.f32 1.0, %v6422_v2  ;;  %v6368_v42 = vmul.f32 %v15896_v47, %v6363_v35  ;;  %v6344_v48 = vadd.f32 -1.4531521, %v6339_v60 }
0x1071   :  { %v6437_v5 = vmul.f32 %v6432_v14, %v6427_v25  ;;  %v6373_v51 = vadd.f32 0.2548296, %v6368_v42  ;;  %v6349_v49 = vmul.f32 %v15900_v40, %v6344_v48 }
0x1073   :  { %v6378_v23 = vmul.f32 %v15896_v47, %v6373_v51  ;;  %15055 = vmatmul.mubr.msk.f32.gmra.mrb[70].mxu1 %vm1388_vm2, %v6437_v5  ;;  %v6354_v12 = vadd.f32 1.4214138, %v6349_v49 }
0x1074   :  { %15057 = vmatprep.mubr.msk.f32.mxu1 %vm16244_vm0, %v21205_v45 }
0x1075   :  { %v6403_v19 = vmul.f32 %v15902_v34, %v6378_v23  ;;  %v6359_v3 = vmul.f32 %v15900_v40, %v6354_v12 }
0x1077   :  { %v6408_v30 = vsub.f32 1.0, %v6403_v19  ;;  %v6364_v57 = vadd.f32 -0.28449672, %v6359_v3 }
0x1079   :  { %v6418_v1 = vsub.f32 0.0, %v6408_v30  ;;  %v6369_v38 = vmul.f32 %v15900_v40, %v6364_v57 }
0x107b   :  { %v6423_v22 = vsel %vm6413_vm14, %v6408_v30, %v6418_v1  ;;  %v6374_v53 = vadd.f32 0.2548296, %v6369_v38  ;;  %v21222_v1 = vld [vmem:[#allocation28_spill] sm:$0xff] }
0x107c   :  { %v6433_v47 = vadd.f32 1.0, %v6423_v22  ;;  %v21223_v22 = vld [vmem:[#allocation43_spill] sm:$0xff] }
0x107d   :  { %v6379_v29 = vmul.f32 %v15900_v40, %v6374_v53  ;;  %v18510_v40 = vld [vmem:[%s20998_s12] ss:$0 sm:$0xff] }
0x107e   :  { %v6438_v17 = vmul.f32 %v6433_v47, %v6428_v41  ;;  %v21224_v47 = vld [vmem:[#allocation45_spill] sm:$0xff] }
0x107f   :  { %v6404_v26 = vmul.f32 %v15904_v8, %v6379_v29 }
0x1080   :  { %15058 = vmatmul.mubr.msk.f32.gmra.mrb[72].mxu1 %vm1388_vm2, %v6438_v17  ;;  %v21225_v17 = vld [vmem:[#allocation44_spill] sm:$0xff] }
0x1081   :  { %15060 = vmatprep.mubr.msk.f32.mxu1 %vm16244_vm0, %v21205_v45  ;;  %v6409_v11 = vsub.f32 1.0, %v6404_v26  ;;  %v21226_v26 = vld [vmem:[#allocation46_spill] sm:$0xff] }
0x1083   :  { %v6419_v35 = vsub.f32 0.0, %v6409_v11 }
0x1085   :  { %v6424_v44 = vsel %vm6414_vm15, %v6409_v11, %v6419_v35  ;;  %v21227_v11 = vld [vmem:[#allocation47_spill] sm:$0xff] }
0x1086   :  { %v6434_v2 = vadd.f32 1.0, %v6424_v44 }
0x1088   :  { %v6439_v37 = vmul.f32 %v6434_v2, %v6429_v61 }
0x108a   :  { %15061 = vmatmul.mubr.msk.f32.gmra.mrb[74].mxu1 %vm1388_vm2, %v6439_v37 }
0x108b   :  { %15092 = vmatprep.mubr.msk.f32.mxu1 %vm16244_vm0, %v21205_v45 }
0x1102   :  { %v6532_v60 = vpop.f32.mrb[66].mxu1 }
0x1103   :  { %v6533_v25 = vadd.f32 %v18510_v40, %v6532_v60  ;;  %v15050_v14 = vpop.f32.mrb[67].mxu1 }
0x1105   :  { %v6561_v10 = vcombine.high %v6533_v25, %v6533_v25  ;;  %v6568_v42 = vrot.slane %v6533_v25, %v16478_v7 }
0x1107   :  { %v6575_v36 = vrot.slane %v6561_v10, %v16478_v7  ;;  %v6576_v48 = vcombine.high %v6568_v42, %v6568_v42  ;;  %v6584_v5 = vrot.slane %v6568_v42, %v16478_v7 }
0x1109   :  { %v6577_v51 = vcombine.high %v6575_v36, %v6575_v36  ;;  %v6591_v32 = vrot.slane %v6575_v36, %v16478_v7  ;;  %v6598_v49 = vrot.slane %v6576_v48, %v16478_v7  ;;  %v6606_v23 = vcombine.high %v6584_v5, %v6584_v5 }
0x110a   :  { %v18523_v30 = vadd.f32 %v6584_v5, %v18210_v18 }
0x110b   :  { %v6605_v34 = vrot.slane %v6577_v51, %v16478_v7  ;;  %v6607_v12 = vcombine.high %v6591_v32, %v6591_v32  ;;  %v6608_v19 = vcombine.high %v6598_v49, %v6598_v49  ;;  %v18520_v3 = vadd.f32 %v6598_v49, %v18213_v54 }
0x110c   :  { %v18526_v38 = vadd.f32 %v6606_v23, %v21222_v1  ;;  %v18535_v29 = vadd.f32 %v6591_v32, %v21225_v17 }
0x110d   :  { %v6609_v57 = vcombine.high %v6605_v34, %v6605_v34  ;;  %v18529_v41 = vadd.f32 %v6608_v19, %v21223_v22  ;;  %v18532_v53 = vadd.f32 %v6605_v34, %v21224_v47  ;;  %v6883_v54 = vcombine.low %v18523_v30, %v18520_v3 }
0x110e   :  { %v18540_v18 = vadd.f32 %v6607_v12, %v21226_v26 }
0x110f   :  { %v6537_v8 = vpop.f32.mrb[68].mxu1  ;;  %v18543_v35 = vadd.f32 %v6609_v57, %v21227_v11  ;;  %v6884_v44 = vcombine.low %v18526_v38, %v18529_v41  ;;  %v6885_v37 = vcombine.low %v18535_v29, %v18532_v53  ;;  %v6893_v42 = vrot.slane %v6883_v54, %v16478_v7 }
0x1110   :  { %v6538_v61 = vadd.f32 %v18510_v40, %v6537_v8  ;;  %v15053_v2 = vpop.f32.mrb[69].mxu1 }
0x1111   :  { %v6886_v14 = vcombine.low %v18540_v18, %v18543_v35  ;;  %v6900_v10 = vrot.slane %v6884_v44, %v16478_v7  ;;  %v6907_v32 = vrot.slane %v6885_v37, %v16478_v7 }
0x1112   :  { %v6610_v60 = vcombine.high %v6538_v61, %v6538_v61  ;;  %v6617_v25 = vrot.slane %v6538_v61, %v16478_v7 }
0x1113   :  { %v6914_v51 = vrot.slane %v6886_v14, %v16478_v7  ;;  %v6915_v49 = vcombine.low %v6893_v42, %v6900_v10 }
0x1114   :  { %v6624_v36 = vrot.slane %v6610_v60, %v16478_v7  ;;  %v6625_v48 = vcombine.high %v6617_v25, %v6617_v25  ;;  %v6633_v5 = vrot.slane %v6617_v25, %v16478_v7 }
0x1115   :  { %v6916_v57 = vcombine.low %v6907_v32, %v6914_v51  ;;  %v6923_v26 = vrot.slane %v6915_v49, %v16478_v7 }
0x1116   :  { %v6626_v23 = vcombine.high %v6624_v36, %v6624_v36  ;;  %v6640_v34 = vrot.slane %v6624_v36, %v16478_v7  ;;  %v6647_v12 = vrot.slane %v6625_v48, %v16478_v7  ;;  %v6655_v19 = vcombine.high %v6633_v5, %v6633_v5 }
0x1117   :  { %v18566_v54 = vadd.f32 %v6633_v5, %v18272_v20  ;;  %v6930_v11 = vrot.slane %v6916_v57, %v16478_v7 }
0x1118   :  { %v6654_v1 = vrot.slane %v6626_v23, %v16478_v7  ;;  %v6656_v22 = vcombine.high %v6640_v34, %v6640_v34  ;;  %v6657_v47 = vcombine.high %v6647_v12, %v6647_v12  ;;  %v18563_v17 = vadd.f32 %v6647_v12, %v18275_v55 }
0x1119   :  { %v18569_v8 = vadd.f32 %v6655_v19, %v18278_v13  ;;  %v18577_v2 = vadd.f32 %v6640_v34, %v18284_v15  ;;  %v6931_v37 = vcombine.low %v6923_v26, %v6930_v11 }
0x111a   :  { %v6658_v44 = vcombine.high %v6654_v1, %v6654_v1  ;;  %v18574_v61 = vadd.f32 %v6657_v47, %v18281_v21  ;;  %v18580_v55 = vadd.f32 %v6654_v1, %v18288_v46  ;;  %v6932_v20 = vcombine.low %v18566_v54, %v18563_v17 }
0x111b   :  { %v18585_v13 = vadd.f32 %v6656_v22, %v18291_v31  ;;  %v7099_v25 = vsel %vm1388_vm2, %v6931_v37, 0.0 }
0x111c   :  { %v18588_v60 = vadd.f32 %v6658_v44, %v18294_v62  ;;  %v6933_v21 = vcombine.low %v18569_v8, %v18574_v61  ;;  %v6934_v15 = vcombine.low %v18577_v2, %v18580_v55  ;;  %7100 = vadd.xlane.f32.xlu0 %v7099_v25  ;;  %v6942_v14 = vrot.slane %v6932_v20, %v16478_v7 }
0x111e   :  { %v6935_v46 = vcombine.low %v18585_v13, %v18588_v60  ;;  %v6949_v31 = vrot.slane %v6933_v21, %v16478_v7  ;;  %v6956_v10 = vrot.slane %v6934_v15, %v16478_v7 }
0x1120   :  { %v6963_v62 = vrot.slane %v6935_v46, %v16478_v7  ;;  %v6964_v42 = vcombine.low %v6942_v14, %v6949_v31 }
0x1122   :  { %v6965_v36 = vcombine.low %v6956_v10, %v6963_v62  ;;  %v6972_v48 = vrot.slane %v6964_v42, %v16478_v7  ;;  %v21228_v10 = vld [vmem:[#allocation31_spill] sm:$0xff]  ;;  %v21229_v42 = vld [vmem:[#allocation32_spill] sm:$0xff] }
0x1124   :  { %v6979_v5 = vrot.slane %v6965_v36, %v16478_v7 }
0x1126   :  { %v6980_v51 = vcombine.low %v6972_v48, %v6979_v5  ;;  %v21230_v48 = vld [vmem:[#allocation29_spill] sm:$0xff] }
0x1128   :  { %v7102_v32 = vsel %vm1388_vm2, %v6980_v51, 0.0 }
0x1129   :  { %7103 = vadd.xlane.f32.xlu1 %v7102_v32 }
0x1146   :  { %v6542_v49 = vpop.f32.mrb[70].mxu1 }
0x1147   :  { %v6543_v23 = vadd.f32 %v18510_v40, %v6542_v49  ;;  %v15056_v34 = vpop.f32.mrb[71].mxu1 }
0x1149   :  { %v6659_v12 = vcombine.high %v6543_v23, %v6543_v23  ;;  %v6666_v19 = vrot.slane %v6543_v23, %v16478_v7 }
0x114b   :  { %v6673_v57 = vrot.slane %v6659_v12, %v16478_v7  ;;  %v6674_v1 = vcombine.high %v6666_v19, %v6666_v19  ;;  %v6682_v22 = vrot.slane %v6666_v19, %v16478_v7 }
0x114d   :  { %v6675_v47 = vcombine.high %v6673_v57, %v6673_v57  ;;  %v6689_v26 = vrot.slane %v6673_v57, %v16478_v7  ;;  %v6696_v11 = vrot.slane %v6674_v1, %v16478_v7  ;;  %v6704_v44 = vcombine.high %v6682_v22, %v6682_v22 }
0x114e   :  { %v18615_v25 = vadd.f32 %v6682_v22, %v18340_v28  ;;  %v21231_v28 = vld [vmem:[#allocation48_spill] sm:$0xff] }
0x114f   :  { %v6703_v20 = vrot.slane %v6675_v47, %v16478_v7  ;;  %v6705_v37 = vcombine.high %v6689_v26, %v6689_v26  ;;  %v6706_v21 = vcombine.high %v6696_v11, %v6696_v11  ;;  %v18612_v15 = vadd.f32 %v6696_v11, %v18343_v0 }
0x1150   :  { %v18618_v46 = vadd.f32 %v6704_v44, %v18346_v24  ;;  %v18624_v62 = vadd.f32 %v6689_v26, %v21228_v10 }
0x1151   :  { %v6707_v14 = vcombine.high %v6703_v20, %v6703_v20  ;;  %v18621_v31 = vadd.f32 %v6706_v21, %v18349_v4  ;;  %v18627_v36 = vadd.f32 %v6703_v20, %v21229_v42  ;;  %v6981_v0 = vcombine.low %v18615_v25, %v18612_v15 }
0x1152   :  { %v18632_v5 = vadd.f32 %v6705_v37, %v21230_v48 }
0x1153   :  { %v18635_v51 = vadd.f32 %v6707_v14, %v21231_v28  ;;  %v6982_v24 = vcombine.low %v18618_v46, %v18621_v31  ;;  %v6983_v4 = vcombine.low %v18624_v62, %v18627_v36  ;;  %v6547_v32 = vpop.f32.mrb[72].mxu1  ;;  %v6991_v12 = vrot.slane %v6981_v0, %v16478_v7 }
0x1154   :  { %v6548_v49 = vadd.f32 %v18510_v40, %v6547_v32  ;;  %v15059_v23 = vpop.f32.mrb[73].mxu1 }
0x1155   :  { %v6984_v34 = vcombine.low %v18632_v5, %v18635_v51  ;;  %v6998_v19 = vrot.slane %v6982_v24, %v16478_v7  ;;  %v7005_v22 = vrot.slane %v6983_v4, %v16478_v7 }
0x1156   :  { %v6708_v57 = vcombine.high %v6548_v49, %v6548_v49  ;;  %v6715_v1 = vrot.slane %v6548_v49, %v16478_v7 }
0x1157   :  { %v7012_v47 = vrot.slane %v6984_v34, %v16478_v7  ;;  %v7013_v26 = vcombine.low %v6991_v12, %v6998_v19 }
0x1158   :  { %v6722_v11 = vrot.slane %v6708_v57, %v16478_v7  ;;  %v6723_v44 = vcombine.high %v6715_v1, %v6715_v1  ;;  %v6731_v20 = vrot.slane %v6715_v1, %v16478_v7 }
0x1159   :  { %v7014_v37 = vcombine.low %v7005_v22, %v7012_v47  ;;  %v7021_v0 = vrot.slane %v7013_v26, %v16478_v7 }
0x115a   :  { %v6724_v21 = vcombine.high %v6722_v11, %v6722_v11  ;;  %v6738_v14 = vrot.slane %v6722_v11, %v16478_v7  ;;  %v6745_v10 = vrot.slane %v6723_v44, %v16478_v7  ;;  %v6753_v42 = vcombine.high %v6731_v20, %v6731_v20 }
0x115b   :  { %v7028_v48 = vrot.slane %v7014_v37, %v16478_v7  ;;  %v18660_v49 = vadd.f32 %v6731_v20, %v18402_v6 }
0x115c   :  { %v6752_v28 = vrot.slane %v6724_v21, %v16478_v7  ;;  %v6754_v24 = vcombine.high %v6738_v14, %v6738_v14  ;;  %v6755_v4 = vcombine.high %v6745_v10, %v6745_v10  ;;  %v18657_v32 = vadd.f32 %v6745_v10, %v18405_v27 }
0x115d   :  { %v18663_v23 = vadd.f32 %v6753_v42, %v18409_v50  ;;  %v7029_v34 = vcombine.low %v7021_v0, %v7028_v48  ;;  %v18669_v57 = vadd.f32 %v6738_v14, %v18415_v59  ;;  %v6552_v22 = vpop.f32.mrb[74].mxu1 }
0x115e   :  { %v6756_v12 = vcombine.high %v6752_v28, %v6752_v28  ;;  %v18666_v19 = vadd.f32 %v6755_v4, %v18412_v33  ;;  %v18672_v1 = vadd.f32 %v6752_v28, %v18418_v56  ;;  %v7030_v27 = vcombine.low %v18660_v49, %v18657_v32  ;;  %v15062_v47 = vpop.f32.mrb[75].mxu1 }
0x115f   :  { %v7105_v6 = vsel %vm1388_vm2, %v7029_v34, 0.0  ;;  %v6553_v50 = vadd.f32 %v18510_v40, %v6552_v22  ;;  %v18679_v26 = vadd.f32 %v6754_v24, %v18423_v63 }
0x1160   :  { %v18682_v33 = vadd.f32 %v6756_v12, %v18426_v16  ;;  %v7031_v59 = vcombine.low %v18663_v23, %v18666_v19  ;;  %v7032_v56 = vcombine.low %v18669_v57, %v18672_v1  ;;  %7106 = vadd.xlane.f32.xlu0 %v7105_v6  ;;  %v7040_v40 = vrot.slane %v7030_v27, %v16478_v7 }
0x1161   :  { %v6763_v11 = vrot.slane %v6553_v50, %v16478_v7 }
0x1162   :  { %v7033_v44 = vcombine.low %v18679_v26, %v18682_v33  ;;  %v7047_v63 = vrot.slane %v7031_v59, %v16478_v7  ;;  %v7054_v37 = vrot.slane %v7032_v56, %v16478_v7  ;;  %v21232_v59 = vld [vmem:[#allocation22_spill] sm:$0xff] }
0x1163   :  { %v6764_v20 = vcombine.high %v6763_v11, %v6763_v11  ;;  %v6771_v16 = vrot.slane %v6763_v11, %v16478_v7  ;;  %v21233_v11 = vld [vmem:[#allocation23_spill] sm:$0xff] }
0x1164   :  { %v7061_v21 = vrot.slane %v7033_v44, %v16478_v7  ;;  %v7062_v14 = vcombine.low %v7040_v40, %v7047_v63  ;;  %v21234_v40 = vld [vmem:[#allocation25_spill] sm:$0xff] }
0x1165   :  { %v6778_v10 = vrot.slane %v6764_v20, %v16478_v7  ;;  %v18698_v0 = vadd.f32 %v6771_v16, %v18452_v58  ;;  %v21235_v20 = vld [vmem:[#allocation26_spill] sm:$0xff] }
0x1166   :  { %v7063_v42 = vcombine.low %v7054_v37, %v7061_v21  ;;  %v7070_v28 = vrot.slane %v7062_v14, %v16478_v7  ;;  %v21236_v37 = vld [vmem:[#allocation27_spill] sm:$0xff]  ;;  %v21237_v14 = vld [vmem:[#allocation30_spill] sm:$0xff] }
0x1167   :  { %v18701_v48 = vadd.f32 %v6778_v10, %v18455_v52 }
0x1168   :  { %v7077_v24 = vrot.slane %v7063_v42, %v16478_v7 }
0x1169   :  { %v7079_v4 = vcombine.low %v18698_v0, %v18701_v48 }
0x116a   :  { %v7078_v34 = vcombine.low %v7070_v28, %v7077_v24 }
0x116b   :  { %v7086_v12 = vrot.slane %v7079_v4, %v16478_v7 }
0x116c   :  { %v7108_v22 = vsel %vm1388_vm2, %v7078_v34, 0.0 }
0x116d   :  { %7109 = vadd.xlane.f32.xlu1 %v7108_v22  ;;  %v7093_v27 = vrot.slane %v7086_v12, %v16478_v7 }
0x116f   :  { %v7111_v58 = vsel %vm5015_vm10, %v7093_v27, 0.0 }
0x1170   :  { %7112 = vadd.xlane.f32.xlu0 %v7111_v58 }
0x11a9   :  { %v7101_v52 = vpop.xlane.xlu0 %7100 }
0x11aa   :  { %v7114_v6 = vmul.f32 0.03125, %v7101_v52 }
0x11ac   :  { %v7127_v50 = vrot.slane %v7114_v6, %v17853_v9  ;;  %v7131_v47 = vrot.slane %v7114_v6, %v17856_v43  ;;  %v7135_v56 = vrot.slane %v7114_v6, %v21232_v59  ;;  %v7139_v44 = vrot.slane %v7114_v6, %v21233_v11 }
0x11ad   :  { %v7143_v63 = vrot.slane %v7114_v6, %v21234_v40  ;;  %v7147_v16 = vrot.slane %v7114_v6, %v21235_v20  ;;  %v7151_v21 = vrot.slane %v7114_v6, %v21236_v37  ;;  %v7155_v10 = vrot.slane %v7114_v6, %v21237_v14 }
0x11ae   :  { %v18720_v42 = vsub.f32 %v18523_v30, %v7127_v50  ;;  %v18723_v28 = vsub.f32 %v18520_v3, %v7131_v47  ;;  %v18726_v24 = vsub.f32 %v18526_v38, %v7135_v56  ;;  %v18729_v4 = vsub.f32 %v18529_v41, %v7139_v44 }
0x11af   :  { %v18732_v34 = vsub.f32 %v18535_v29, %v7143_v63  ;;  %v18735_v12 = vsub.f32 %v18532_v53, %v7147_v16  ;;  %v18738_v22 = vsub.f32 %v18540_v18, %v7151_v21  ;;  %v18741_v30 = vsub.f32 %v18543_v35, %v7155_v10 }
0x11b0   :  { %v7328_v3 = vmul.f32 %v18720_v42, %v18720_v42  ;;  %v7329_v38 = vmul.f32 %v18723_v28, %v18723_v28  ;;  %v7330_v41 = vmul.f32 %v18726_v24, %v18726_v24  ;;  %v7331_v29 = vmul.f32 %v18729_v4, %v18729_v4 }
0x11b1   :  { %21238 = vst [vmem:[#allocation33_spill] sm:$0xff] %v18738_v22  ;;  %21239 = vst [vmem:[#allocation34_spill] sm:$0xff] %v18741_v30  ;;  %v7332_v53 = vmul.f32 %v18732_v34, %v18732_v34  ;;  %v7333_v18 = vmul.f32 %v18735_v12, %v18735_v12  ;;  %v7334_v35 = vmul.f32 %v18738_v22, %v18738_v22 }
0x11b2   :  { %v7335_v27 = vmul.f32 %v18741_v30, %v18741_v30  ;;  %v7396_v58 = vcombine.low %v7328_v3, %v7329_v38  ;;  %v7397_v52 = vcombine.low %v7330_v41, %v7331_v29 }
0x11b3   :  { %v7398_v6 = vcombine.low %v7332_v53, %v7333_v18 }
0x11b4   :  { %v7399_v50 = vcombine.low %v7334_v35, %v7335_v27  ;;  %v7406_v56 = vrot.slane %v7396_v58, %v16478_v7  ;;  %v7413_v44 = vrot.slane %v7397_v52, %v16478_v7 }
0x11b5   :  { %v7420_v16 = vrot.slane %v7398_v6, %v16478_v7 }
0x11b6   :  { %v7104_v47 = vpop.xlane.xlu1 %7103  ;;  %v7427_v21 = vrot.slane %v7399_v50, %v16478_v7  ;;  %v7428_v10 = vcombine.low %v7406_v56, %v7413_v44 }
0x11b7   :  { %v7115_v63 = vmul.f32 0.03125, %v7104_v47 }
0x11b8   :  { %v7429_v45 = vcombine.low %v7420_v16, %v7427_v21  ;;  %v7436_v38 = vrot.slane %v7428_v10, %v16478_v7 }
0x11b9   :  { %v7159_v22 = vrot.slane %v7115_v63, %v17853_v9  ;;  %v7163_v30 = vrot.slane %v7115_v63, %v17856_v43  ;;  %v7167_v3 = vrot.slane %v7115_v63, %v21232_v59  ;;  %v7171_v41 = vrot.slane %v7115_v63, %v21233_v11 }
0x11ba   :  { %v7175_v29 = vrot.slane %v7115_v63, %v21234_v40  ;;  %v7179_v53 = vrot.slane %v7115_v63, %v21235_v20  ;;  %v7443_v18 = vrot.slane %v7429_v45, %v16478_v7  ;;  %v7183_v35 = vrot.slane %v7115_v63, %v21236_v37 }
0x11bb   :  { %v7187_v27 = vrot.slane %v7115_v63, %v21237_v14  ;;  %v18774_v58 = vsub.f32 %v18566_v54, %v7159_v22  ;;  %v18777_v52 = vsub.f32 %v18563_v17, %v7163_v30  ;;  %v18780_v6 = vsub.f32 %v18569_v8, %v7167_v3 }
0x11bc   :  { %v18783_v50 = vsub.f32 %v18574_v61, %v7171_v41  ;;  %v18786_v47 = vsub.f32 %v18577_v2, %v7175_v29  ;;  %v7444_v45 = vcombine.low %v7436_v38, %v7443_v18  ;;  %v18789_v56 = vsub.f32 %v18580_v55, %v7179_v53 }
0x11bd   :  { %v18792_v44 = vsub.f32 %v18585_v13, %v7183_v35  ;;  %v18795_v54 = vsub.f32 %v18588_v60, %v7187_v27  ;;  %v7336_v17 = vmul.f32 %v18774_v58, %v18774_v58  ;;  %v7337_v8 = vmul.f32 %v18777_v52, %v18777_v52 }
0x11be   :  { %v7338_v61 = vmul.f32 %v18780_v6, %v18780_v6  ;;  %v7339_v2 = vmul.f32 %v18783_v50, %v18783_v50  ;;  %v7612_v55 = vsel %vm1388_vm2, %v7444_v45, 0.0  ;;  %v7340_v13 = vmul.f32 %v18786_v47, %v18786_v47 }
0x11bf   :  { %v7341_v60 = vmul.f32 %v18789_v56, %v18789_v56  ;;  %v7342_v22 = vmul.f32 %v18792_v44, %v18792_v44  ;;  %7613 = vadd.xlane.f32.xlu1 %v7612_v55  ;;  %v7343_v30 = vmul.f32 %v18795_v54, %v18795_v54  ;;  %v7445_v63 = vcombine.low %v7336_v17, %v7337_v8  ;;  %v14290_v8 = vld [vmem:[%s20989_s3 + $0x20] sm:$0xff] }
0x11c0   :  { %v7446_v16 = vcombine.low %v7338_v61, %v7339_v2  ;;  %v14291_v61 = vld [vmem:[%s20989_s3 + $0x28] sm:$0xff]  ;;  %v14292_v2 = vld [vmem:[%s20989_s3 + $0x30] sm:$0xff] }
0x11c1   :  { %v7447_v21 = vcombine.low %v7340_v13, %v7341_v60  ;;  %v7448_v10 = vcombine.low %v7342_v22, %v7343_v30  ;;  %v7455_v3 = vrot.slane %v7445_v63, %v16478_v7  ;;  %v15496_v55 = vpack.c.bf16 %v14291_v61, %v14290_v8  ;;  %v14293_v13 = vld [vmem:[%s20989_s3 + $0x38] sm:$0xff] }
0x11c2   :  { %v7462_v38 = vrot.slane %v7446_v16, %v16478_v7  ;;  %v15499_v60 = vpack.c.bf16 %v14293_v13, %v14292_v2 }
0x11c3   :  { %v7469_v41 = vrot.slane %v7447_v21, %v16478_v7  ;;  %v7476_v29 = vrot.slane %v7448_v10, %v16478_v7  ;;  %15497 = vmatpush3.bf16.msra.mxu0 %v15496_v55 }
0x11c4   :  { %v7477_v53 = vcombine.low %v7455_v3, %v7462_v38  ;;  %15498 = vmatprep.subr.bf16.mxu0 %v21221_v39 }
0x11c5   :  { %v7478_v18 = vcombine.low %v7469_v41, %v7476_v29 }
0x11c6   :  { %v7485_v35 = vrot.slane %v7477_v53, %v16478_v7 }
0x11c7   :  { %v7492_v27 = vrot.slane %v7478_v18, %v16478_v7  ;;  %15500 = vmatpush3.bf16.msra.mxu0 %v15499_v60 }
0x11c8   :  { %15505 = vmatprep.subr.bf16.mxu0 %v21221_v39 }
0x11c9   :  { %v7493_v45 = vcombine.low %v7485_v35, %v7492_v27 }
0x11cb   :  { %v7615_v17 = vsel %vm1388_vm2, %v7493_v45, 0.0 }
0x11cc   :  { %7616 = vadd.xlane.f32.xlu0 %v7615_v17 }
0x11ed   :  { %v7107_v22 = vpop.xlane.xlu0 %7106 }
0x11ee   :  { %v7116_v30 = vmul.f32 0.03125, %v7107_v22 }
0x11f0   :  { %v7191_v63 = vrot.slane %v7116_v30, %v17853_v9  ;;  %v7195_v16 = vrot.slane %v7116_v30, %v17856_v43  ;;  %v7199_v21 = vrot.slane %v7116_v30, %v21232_v59  ;;  %v7203_v10 = vrot.slane %v7116_v30, %v21233_v11 }
0x11f1   :  { %v7207_v3 = vrot.slane %v7116_v30, %v21234_v40  ;;  %v7211_v38 = vrot.slane %v7116_v30, %v21235_v20  ;;  %v7215_v41 = vrot.slane %v7116_v30, %v21236_v37  ;;  %v7219_v29 = vrot.slane %v7116_v30, %v21237_v14 }
0x11f2   :  { %v18844_v53 = vsub.f32 %v18615_v25, %v7191_v63  ;;  %v18847_v18 = vsub.f32 %v18612_v15, %v7195_v16  ;;  %v18850_v35 = vsub.f32 %v18618_v46, %v7199_v21  ;;  %v18853_v27 = vsub.f32 %v18621_v31, %v7203_v10 }
0x11f3   :  { %v18856_v45 = vsub.f32 %v18624_v62, %v7207_v3  ;;  %v18859_v17 = vsub.f32 %v18627_v36, %v7211_v38  ;;  %v18862_v8 = vsub.f32 %v18632_v5, %v7215_v41  ;;  %v18865_v25 = vsub.f32 %v18635_v51, %v7219_v29 }
0x11f4   :  { %v7344_v15 = vmul.f32 %v18844_v53, %v18844_v53  ;;  %v7345_v46 = vmul.f32 %v18847_v18, %v18847_v18  ;;  %v7346_v31 = vmul.f32 %v18850_v35, %v18850_v35  ;;  %v7347_v62 = vmul.f32 %v18853_v27, %v18853_v27 }
0x11f5   :  { %21240 = vst [vmem:[#allocation35_spill] sm:$0xff] %v18859_v17  ;;  %21241 = vst [vmem:[#allocation20_spill] sm:$0xff] %v18862_v8  ;;  %v7348_v36 = vmul.f32 %v18856_v45, %v18856_v45  ;;  %v7349_v5 = vmul.f32 %v18859_v17, %v18859_v17  ;;  %v7350_v51 = vmul.f32 %v18862_v8, %v18862_v8  ;;  %v21254_v8 = vld [vmem:[#allocation34_spill] sm:$0xff] }
0x11f6   :  { %21242 = vst [vmem:[#allocation37_spill] sm:$0xff] %v18865_v25  ;;  %v7351_v61 = vmul.f32 %v18865_v25, %v18865_v25  ;;  %v7494_v2 = vcombine.low %v7344_v15, %v7345_v46  ;;  %v7495_v55 = vcombine.low %v7346_v31, %v7347_v62 }
0x11f7   :  { %v7496_v13 = vcombine.low %v7348_v36, %v7349_v5 }
0x11f8   :  { %v7497_v60 = vcombine.low %v7350_v51, %v7351_v61  ;;  %v7504_v22 = vrot.slane %v7494_v2, %v16478_v7  ;;  %v7511_v30 = vrot.slane %v7495_v55, %v16478_v7 }
0x11f9   :  { %v7518_v63 = vrot.slane %v7496_v13, %v16478_v7 }
0x11fa   :  { %v7525_v16 = vrot.slane %v7497_v60, %v16478_v7  ;;  %v7110_v21 = vpop.xlane.xlu1 %7109  ;;  %v7526_v10 = vcombine.low %v7504_v22, %v7511_v30 }
0x11fb   :  { %v7117_v3 = vmul.f32 0.03125, %v7110_v21 }
0x11fc   :  { %v7527_v38 = vcombine.low %v7518_v63, %v7525_v16  ;;  %v7534_v41 = vrot.slane %v7526_v10, %v16478_v7 }
0x11fd   :  { %v7113_v15 = vpop.xlane.xlu0 %7112  ;;  %v7223_v46 = vrot.slane %v7117_v3, %v17853_v9  ;;  %v7227_v31 = vrot.slane %v7117_v3, %v17856_v43  ;;  %v7231_v62 = vrot.slane %v7117_v3, %v21232_v59  ;;  %v7235_v5 = vrot.slane %v7117_v3, %v21233_v11 }
0x11fe   :  { %v7541_v29 = vrot.slane %v7527_v38, %v16478_v7  ;;  %v7118_v36 = vmul.f32 0.03125, %v7113_v15  ;;  %v7239_v51 = vrot.slane %v7117_v3, %v21234_v40  ;;  %v7243_v61 = vrot.slane %v7117_v3, %v21235_v20 }
0x11ff   :  { %v7247_v55 = vrot.slane %v7117_v3, %v21236_v37  ;;  %v7251_v13 = vrot.slane %v7117_v3, %v21237_v14  ;;  %v18898_v60 = vsub.f32 %v18660_v49, %v7223_v46  ;;  %v18903_v63 = vsub.f32 %v18657_v32, %v7227_v31 }
0x1200   :  { %v7542_v2 = vcombine.low %v7534_v41, %v7541_v29  ;;  %v7255_v22 = vrot.slane %v7118_v36, %v17853_v9  ;;  %v7259_v30 = vrot.slane %v7118_v36, %v17856_v43  ;;  %v18906_v16 = vsub.f32 %v18663_v23, %v7231_v62 }
0x1201   :  { %21243 = vst [vmem:[#allocation38_spill] sm:$0xff] %v18898_v60  ;;  %21244 = vst [vmem:[#allocation39_spill] sm:$0xff] %v18903_v63  ;;  %v18910_v10 = vsub.f32 %v18666_v19, %v7235_v5  ;;  %v18913_v3 = vsub.f32 %v18669_v57, %v7239_v51  ;;  %v18916_v49 = vsub.f32 %v18672_v1, %v7243_v61 }
0x1202   :  { %21245 = vst [vmem:[#allocation40_spill] sm:$0xff] %v18906_v16  ;;  %v7618_v21 = vsel %vm1388_vm2, %v7542_v2, 0.0  ;;  %v18919_v38 = vsub.f32 %v18698_v0, %v7255_v22  ;;  %v18922_v32 = vsub.f32 %v18701_v48, %v7259_v30  ;;  %v18925_v23 = vsub.f32 %v18679_v26, %v7247_v55 }
0x1203   :  { %21246 = vst [vmem:[#allocation41_spill] sm:$0xff] %v18910_v10  ;;  %21247 = vst [vmem:[#allocation42_spill] sm:$0xff] %v18913_v3  ;;  %7619 = vadd.xlane.f32.xlu1 %v7618_v21  ;;  %v18928_v41 = vsub.f32 %v18682_v33, %v7251_v13  ;;  %v7352_v19 = vmul.f32 %v18898_v60, %v18898_v60  ;;  %v7353_v57 = vmul.f32 %v18903_v63, %v18903_v63 }
0x1204   :  { %21248 = vst [vmem:[#allocation28_spill] sm:$0xff] %v18916_v49  ;;  %21249 = vst [vmem:[#allocation43_spill] sm:$0xff] %v18919_v38  ;;  %v7354_v1 = vmul.f32 %v18906_v16, %v18906_v16  ;;  %v7355_v0 = vmul.f32 %v18910_v10, %v18910_v10  ;;  %v7360_v48 = vmul.f32 %v18919_v38, %v18919_v38  ;;  %v21253_v38 = vld [vmem:[#allocation33_spill] sm:$0xff] }
0x1205   :  { %21250 = vst [vmem:[#allocation45_spill] sm:$0xff] %v18922_v32  ;;  %21251 = vst [vmem:[#allocation44_spill] sm:$0xff] %v18925_v23  ;;  %v7361_v26 = vmul.f32 %v18922_v32, %v18922_v32  ;;  %v7356_v33 = vmul.f32 %v18913_v3, %v18913_v3  ;;  %v7357_v29 = vmul.f32 %v18916_v49, %v18916_v49 }
0x1206   :  { %21252 = vst [vmem:[#allocation46_spill] sm:$0xff] %v18928_v41  ;;  %v7358_v15 = vmul.f32 %v18925_v23, %v18925_v23  ;;  %v7359_v46 = vmul.f32 %v18928_v41, %v18928_v41  ;;  %v7543_v31 = vcombine.low %v7352_v19, %v7353_v57  ;;  %v7544_v62 = vcombine.low %v7354_v1, %v7355_v0 }
0x1207   :  { %v7545_v36 = vcombine.low %v7356_v33, %v7357_v29  ;;  %v7592_v5 = vcombine.low %v7360_v48, %v7361_v26  ;;  %v14288_v26 = vld [vmem:[%s20999_s13] ss:$0 sm:$0xff] }
0x1208   :  { %v7546_v51 = vcombine.low %v7358_v15, %v7359_v46  ;;  %v7553_v61 = vrot.slane %v7543_v31, %v16478_v7  ;;  %v7560_v2 = vrot.slane %v7544_v62, %v16478_v7  ;;  %v14289_v33 = vld [vmem:[%s21000_s14] ss:$0 sm:$0xff]  ;;  %v7856_v29 = vcombine.high %v14288_v26, %v14288_v26 }
0x1209   :  { %v7567_v55 = vrot.slane %v7545_v36, %v16478_v7  ;;  %v7599_v13 = vrot.slane %v7592_v5, %v16478_v7  ;;  %v7952_v15 = vcombine.high %v14289_v33, %v14289_v33  ;;  %v7863_v62 = vrot.slane %v14288_v26, %v16478_v7 }
0x120a   :  { %v7574_v22 = vrot.slane %v7546_v51, %v16478_v7  ;;  %v7575_v30 = vcombine.low %v7553_v61, %v7560_v2  ;;  %v7870_v36 = vrot.slane %v7856_v29, %v16478_v7  ;;  %v7959_v5 = vrot.slane %v14289_v33, %v16478_v7 }
0x120b   :  { %v7606_v21 = vrot.slane %v7599_v13, %v16478_v7  ;;  %v7966_v51 = vrot.slane %v7952_v15, %v16478_v7  ;;  %v7871_v61 = vcombine.high %v7863_v62, %v7863_v62 }
0x120c   :  { %v7576_v39 = vcombine.low %v7567_v55, %v7574_v22  ;;  %v7583_v19 = vrot.slane %v7575_v30, %v16478_v7  ;;  %v7872_v2 = vcombine.high %v7870_v36, %v7870_v36  ;;  %v7967_v55 = vcombine.high %v7959_v5, %v7959_v5 }
0x120d   :  { %v7624_v57 = vsel %vm5015_vm10, %v7606_v21, 0.0  ;;  %v7968_v13 = vcombine.high %v7966_v51, %v7966_v51  ;;  %v18971_v22 = vrot.slane %v7863_v62, %v16478_v7  ;;  %v18974_v30 = vrot.slane %v7870_v36, %v16478_v7 }
0x120e   :  { %v7590_v1 = vrot.slane %v7576_v39, %v16478_v7  ;;  %7625 = vadd.xlane.f32.xlu1 %v7624_v57  ;;  %v18977_v21 = vrot.slane %v7871_v61, %v16478_v7  ;;  %v18983_v57 = vrot.slane %v7872_v2, %v16478_v7 }
0x120f   :  { %v18996_v33 = vcombine.high %v18971_v22, %v18971_v22  ;;  %v19000_v15 = vcombine.high %v18974_v30, %v18974_v30 }
0x1210   :  { %v7591_v0 = vcombine.low %v7583_v19, %v7590_v1  ;;  %v18980_v19 = vrot.slane %v7959_v5, %v16478_v7  ;;  %v18986_v1 = vrot.slane %v7966_v51, %v16478_v7 }
0x1212   :  { %v7621_v48 = vsel %vm1388_vm2, %v7591_v0, 0.0  ;;  %v18989_v0 = vrot.slane %v7967_v55, %v16478_v7  ;;  %v19016_v36 = vcombine.high %v18986_v1, %v18986_v1 }
0x1213   :  { %7622 = vadd.xlane.f32.xlu0 %v7621_v48  ;;  %v18992_v48 = vrot.slane %v7968_v13, %v16478_v7 }
0x1214   :  { %v19020_v5 = vcombine.high %v18989_v0, %v18989_v0 }
0x1215   :  { %v19024_v51 = vcombine.high %v18992_v48, %v18992_v48 }
0x124c   :  { %v7614_v46 = vpop.xlane.xlu1 %7613 }
0x124d   :  { %v7627_v31 = vmul.f32 0.03125, %v7614_v46  ;;  %v19004_v46 = vcombine.high %v18977_v21, %v18977_v21 }
0x124f   :  { %v7632_v39 = vadd.f32 1e-05, %v7627_v31  ;;  %v19008_v31 = vcombine.high %v18980_v19, %v18980_v19 }
0x1251   :  { %15905 = vrsqrt.f32 %v7632_v39  ;;  %v19012_v39 = vcombine.high %v18983_v57, %v18983_v57 }
0x1259   :  { %v7617_v26 = vpop.xlane.xlu0 %7616 }
0x125a   :  { %v7628_v29 = vmul.f32 0.03125, %v7617_v26 }
0x125b   :  { %v15906_v62 = vpop.eup %15905 }
0x125c   :  { %v7633_v61 = vadd.f32 1e-05, %v7628_v29  ;;  %v7650_v2 = vrot.slane %v15906_v62, %v17853_v9  ;;  %v7654_v55 = vrot.slane %v15906_v62, %v17856_v43  ;;  %v7658_v13 = vrot.slane %v15906_v62, %v21232_v59 }
0x125d   :  { %v7662_v26 = vrot.slane %v15906_v62, %v21233_v11  ;;  %v7666_v41 = vrot.slane %v15906_v62, %v21234_v40  ;;  %v7670_v23 = vrot.slane %v15906_v62, %v21235_v20  ;;  %v7674_v49 = vrot.slane %v15906_v62, %v21236_v37 }
0x125e   :  { %15907 = vrsqrt.f32 %v7633_v61  ;;  %v7678_v3 = vrot.slane %v15906_v62, %v21237_v14  ;;  %v7817_v10 = vmul.f32 %v7650_v2, %v18720_v42  ;;  %v7818_v29 = vmul.f32 %v7654_v55, %v18723_v28 }
0x125f   :  { %v7819_v16 = vmul.f32 %v7658_v13, %v18726_v24  ;;  %v7820_v63 = vmul.f32 %v7662_v26, %v18729_v4  ;;  %v7821_v60 = vmul.f32 %v7666_v41, %v18732_v34  ;;  %v7822_v32 = vmul.f32 %v7670_v23, %v18735_v12 }
0x1260   :  { %v7823_v25 = vmul.f32 %v7674_v49, %v21253_v38  ;;  %v7824_v17 = vmul.f32 %v7678_v3, %v21254_v8  ;;  %v7913_v61 = vmul.f32 %v18971_v22, %v7817_v10  ;;  %v7914_v62 = vmul.f32 %v18977_v21, %v7818_v29 }
0x1261   :  { %v7915_v42 = vmul.f32 %v18996_v33, %v7819_v16  ;;  %v7916_v28 = vmul.f32 %v19004_v46, %v7820_v63  ;;  %v7917_v24 = vmul.f32 %v18974_v30, %v7821_v60  ;;  %v7918_v4 = vmul.f32 %v18983_v57, %v7822_v32 }
0x1262   :  { %v7919_v34 = vmul.f32 %v19000_v15, %v7823_v25  ;;  %v7920_v12 = vmul.f32 %v19012_v39, %v7824_v17  ;;  %v19051_v49 = vadd.f32 %v18980_v19, %v7913_v61  ;;  %v19054_v8 = vadd.f32 %v18989_v0, %v7914_v62 }
0x1263   :  { %v19057_v10 = vadd.f32 %v19008_v31, %v7915_v42  ;;  %v19060_v16 = vadd.f32 %v19020_v5, %v7916_v28  ;;  %v19063_v60 = vadd.f32 %v18986_v1, %v7917_v24  ;;  %v19066_v63 = vadd.f32 %v18992_v48, %v7918_v4 }
0x1264   :  { %v19069_v17 = vadd.f32 %v19016_v36, %v7919_v34  ;;  %v19072_v25 = vadd.f32 %v19024_v51, %v7920_v12  ;;  %v8090_v3 = vcombine.low %v19051_v49, %v19054_v8 }
0x1265   :  { %21255 = vst [vmem:[#allocation47_spill] sm:$0xff] %v19066_v63  ;;  %v8091_v38 = vcombine.low %v19057_v10, %v19060_v16  ;;  %v8092_v32 = vcombine.low %v19063_v60, %v19066_v63 }
0x1266   :  { %21256 = vst [vmem:[#allocation31_spill] sm:$0xff] %v19069_v17  ;;  %21257 = vst [vmem:[#allocation32_spill] sm:$0xff] %v19072_v25  ;;  %v8093_v23 = vcombine.low %v19069_v17, %v19072_v25  ;;  %v8100_v41 = vrot.slane %v8090_v3, %v16478_v7 }
0x1267   :  { %v8107_v2 = vrot.slane %v8091_v38, %v16478_v7  ;;  %v8114_v55 = vrot.slane %v8092_v32, %v16478_v7 }
0x1268   :  { %v15908_v13 = vpop.eup %15907  ;;  %v8121_v26 = vrot.slane %v8093_v23, %v16478_v7 }
0x1269   :  { %v8122_v29 = vcombine.low %v8100_v41, %v8107_v2  ;;  %v7682_v61 = vrot.slane %v15908_v13, %v17853_v9  ;;  %v7686_v62 = vrot.slane %v15908_v13, %v17856_v43  ;;  %v7690_v42 = vrot.slane %v15908_v13, %v21232_v59 }
0x126a   :  { %v8123_v28 = vcombine.low %v8114_v55, %v8121_v26  ;;  %v7694_v24 = vrot.slane %v15908_v13, %v21233_v11  ;;  %v7698_v4 = vrot.slane %v15908_v13, %v21234_v40  ;;  %v7702_v34 = vrot.slane %v15908_v13, %v21235_v20 }
0x126b   :  { %v8130_v12 = vrot.slane %v8122_v29, %v16478_v7  ;;  %v7706_v3 = vrot.slane %v15908_v13, %v21236_v37  ;;  %v7710_v38 = vrot.slane %v15908_v13, %v21237_v14  ;;  %v7825_v32 = vmul.f32 %v7682_v61, %v18774_v58 }
0x126c   :  { %v8137_v23 = vrot.slane %v8123_v28, %v16478_v7  ;;  %v7826_v41 = vmul.f32 %v7686_v62, %v18777_v52  ;;  %v7827_v2 = vmul.f32 %v7690_v42, %v18780_v6  ;;  %v7828_v55 = vmul.f32 %v7694_v24, %v18783_v50 }
0x126d   :  { %v7829_v26 = vmul.f32 %v7698_v4, %v18786_v47  ;;  %v7830_v25 = vmul.f32 %v7702_v34, %v18789_v56  ;;  %v7831_v29 = vmul.f32 %v7706_v3, %v18792_v44  ;;  %v7832_v17 = vmul.f32 %v7710_v38, %v18795_v54 }
0x126e   :  { %v8138_v63 = vcombine.low %v8130_v12, %v8137_v23  ;;  %v7921_v13 = vmul.f32 %v18971_v22, %v7825_v32  ;;  %v7922_v58 = vmul.f32 %v18977_v21, %v7826_v41  ;;  %v7923_v61 = vmul.f32 %v18996_v33, %v7827_v2 }
0x126f   :  { %v7924_v52 = vmul.f32 %v19004_v46, %v7828_v55  ;;  %v7925_v6 = vmul.f32 %v18974_v30, %v7829_v26  ;;  %v7926_v50 = vmul.f32 %v18983_v57, %v7830_v25  ;;  %v7927_v47 = vmul.f32 %v19000_v15, %v7831_v29 }
0x1270   :  { %15072 = vmatmul.mubr.msk.f32.vlgmr.msra.gmra.mrb[70].mxu0 %vm1388_vm2, %v8138_v63  ;;  %v7928_v56 = vmul.f32 %v19012_v39, %v7832_v17  ;;  %v19114_v44 = vadd.f32 %v18980_v19, %v7921_v13  ;;  %v19117_v54 = vadd.f32 %v18989_v0, %v7922_v58  ;;  %v19120_v62 = vadd.f32 %v19008_v31, %v7923_v61 }
0x1271   :  { %v21258_v42 = vmov 0.0   ;;  %v19125_v25 = vadd.f32 %v19020_v5, %v7924_v52  ;;  %v19128_v28 = vadd.f32 %v18986_v1, %v7925_v6  ;;  %v19131_v63 = vadd.f32 %v18992_v48, %v7926_v50 }
0x1272   :  { %15074 = vmatprep.mubr.msk.f32.mxu0 %vm16244_vm0, %v21258_v42  ;;  %v19134_v17 = vadd.f32 %v19016_v36, %v7927_v47  ;;  %v19137_v24 = vadd.f32 %v19024_v51, %v7928_v56  ;;  %v8139_v4 = vcombine.low %v19114_v44, %v19117_v54 }
0x1273   :  { %21259 = vst [vmem:[#allocation29_spill] sm:$0xff] %v19125_v25  ;;  %v8140_v34 = vcombine.low %v19120_v62, %v19125_v25  ;;  %v8141_v12 = vcombine.low %v19128_v28, %v19131_v63 }
0x1274   :  { %21260 = vst [vmem:[#allocation48_spill] sm:$0xff] %v19134_v17  ;;  %21261 = vst [vmem:[#allocation30_spill] sm:$0xff] %v19137_v24  ;;  %v8142_v3 = vcombine.low %v19134_v17, %v19137_v24  ;;  %v8149_v38 = vrot.slane %v8139_v4, %v16478_v7  ;;  %v21264_v24 = vld [vmem:[#allocation37_spill] sm:$0xff] }
0x1275   :  { %v8156_v32 = vrot.slane %v8140_v34, %v16478_v7  ;;  %v8163_v23 = vrot.slane %v8141_v12, %v16478_v7 }
0x1276   :  { %v8170_v41 = vrot.slane %v8142_v3, %v16478_v7 }
0x1277   :  { %v8171_v2 = vcombine.low %v8149_v38, %v8156_v32 }
0x1278   :  { %v8172_v55 = vcombine.low %v8163_v23, %v8170_v41 }
0x1279   :  { %v8179_v26 = vrot.slane %v8171_v2, %v16478_v7 }
0x127a   :  { %v8186_v29 = vrot.slane %v8172_v55, %v16478_v7 }
0x127c   :  { %v8187_v13 = vcombine.low %v8179_v26, %v8186_v29 }
0x127e   :  { %15075 = vmatmul.mubr.msk.f32.gmra.mrb[72].mxu0 %vm1388_vm2, %v8187_v13 }
0x127f   :  { %15077 = vmatprep.mubr.msk.f32.mxu0 %vm16244_vm0, %v21258_v42 }
0x1290   :  { %v7620_v58 = vpop.xlane.xlu1 %7619 }
0x1291   :  { %v7629_v61 = vmul.f32 0.03125, %v7620_v58 }
0x1293   :  { %v7634_v52 = vadd.f32 1e-05, %v7629_v61 }
0x1295   :  { %15909 = vrsqrt.f32 %v7634_v52 }
0x129b   :  { %v7626_v6 = vpop.xlane.xlu1 %7625 }
0x129c   :  { %v7631_v50 = vmul.f32 0.03125, %v7626_v6  ;;  %v21262_v6 = vld [vmem:[#allocation35_spill] sm:$0xff] }
0x129e   :  { %v7636_v47 = vadd.f32 1e-05, %v7631_v50 }
0x129f   :  { %v15910_v56 = vpop.eup %15909 }
0x12a0   :  { %v7623_v4 = vpop.xlane.xlu0 %7622  ;;  %15911 = vrsqrt.f32 %v7636_v47  ;;  %v7714_v34 = vrot.slane %v15910_v56, %v17853_v9  ;;  %v7718_v12 = vrot.slane %v15910_v56, %v17856_v43  ;;  %v7722_v3 = vrot.slane %v15910_v56, %v21232_v59  ;;  %v21263_v47 = vld [vmem:[#allocation20_spill] sm:$0xff] }
0x12a1   :  { %v7630_v38 = vmul.f32 0.03125, %v7623_v4  ;;  %v7726_v32 = vrot.slane %v15910_v56, %v21233_v11  ;;  %v7730_v23 = vrot.slane %v15910_v56, %v21234_v40  ;;  %v7734_v41 = vrot.slane %v15910_v56, %v21235_v20 }
0x12a2   :  { %v7738_v2 = vrot.slane %v15910_v56, %v21236_v37  ;;  %v7742_v55 = vrot.slane %v15910_v56, %v21237_v14  ;;  %v7833_v26 = vmul.f32 %v7714_v34, %v18844_v53  ;;  %v7834_v29 = vmul.f32 %v7718_v12, %v18847_v18 }
0x12a3   :  { %v7635_v13 = vadd.f32 1e-05, %v7630_v38  ;;  %v7835_v58 = vmul.f32 %v7722_v3, %v18850_v35  ;;  %v7836_v61 = vmul.f32 %v7726_v32, %v18853_v27  ;;  %v7837_v52 = vmul.f32 %v7730_v23, %v18856_v45 }
0x12a4   :  { %v7838_v50 = vmul.f32 %v7734_v41, %v21262_v6  ;;  %v7839_v4 = vmul.f32 %v7738_v2, %v21263_v47  ;;  %v7840_v17 = vmul.f32 %v7742_v55, %v21264_v24  ;;  %v7929_v25 = vmul.f32 %v18971_v22, %v7833_v26  ;;  %v21267_v47 = vld [vmem:[#allocation43_spill] sm:$0xff] }
0x12a5   :  { %15913 = vrsqrt.f32 %v7635_v13  ;;  %v7930_v53 = vmul.f32 %v18977_v21, %v7834_v29  ;;  %v7931_v18 = vmul.f32 %v18996_v33, %v7835_v58  ;;  %v7932_v56 = vmul.f32 %v19004_v46, %v7836_v61 }
0x12a6   :  { %v7933_v35 = vmul.f32 %v18974_v30, %v7837_v52  ;;  %v7934_v27 = vmul.f32 %v18983_v57, %v7838_v50  ;;  %v7935_v45 = vmul.f32 %v19000_v15, %v7839_v4  ;;  %v7936_v34 = vmul.f32 %v19012_v39, %v7840_v17 }
0x12a7   :  { %v19181_v12 = vadd.f32 %v18980_v19, %v7929_v25  ;;  %v19184_v24 = vadd.f32 %v18989_v0, %v7930_v53  ;;  %v19187_v3 = vadd.f32 %v19008_v31, %v7931_v18  ;;  %v19190_v38 = vadd.f32 %v19020_v5, %v7932_v56  ;;  %v21268_v53 = vld [vmem:[#allocation45_spill] sm:$0xff] }
0x12a8   :  { %v19193_v32 = vadd.f32 %v18986_v1, %v7933_v35  ;;  %v19196_v23 = vadd.f32 %v18992_v48, %v7934_v27  ;;  %v19199_v17 = vadd.f32 %v19016_v36, %v7935_v45  ;;  %v19202_v25 = vadd.f32 %v19024_v51, %v7936_v34 }
0x12a9   :  { %v8188_v41 = vcombine.low %v19181_v12, %v19184_v24  ;;  %v8189_v2 = vcombine.low %v19187_v3, %v19190_v38 }
0x12aa   :  { %21265 = vst [vmem:[#allocation33_spill] sm:$0xff] %v19199_v17  ;;  %21266 = vst [vmem:[#allocation34_spill] sm:$0xff] %v19202_v25  ;;  %v15912_v55 = vpop.eup %15911  ;;  %v8190_v26 = vcombine.low %v19193_v32, %v19196_v23  ;;  %v8191_v29 = vcombine.low %v19199_v17, %v19202_v25 }
0x12ab   :  { %v7778_v13 = vrot.slane %v15912_v55, %v17853_v9  ;;  %v7782_v58 = vrot.slane %v15912_v55, %v17856_v43  ;;  %v8198_v61 = vrot.slane %v8188_v41, %v16478_v7  ;;  %v8205_v52 = vrot.slane %v8189_v2, %v16478_v7 }
0x12ac   :  { %v8212_v6 = vrot.slane %v8190_v26, %v16478_v7  ;;  %v8219_v50 = vrot.slane %v8191_v29, %v16478_v7 }
0x12ad   :  { %v7849_v4 = vmul.f32 %v7778_v13, %v21267_v47  ;;  %v7850_v18 = vmul.f32 %v7782_v58, %v21268_v53  ;;  %v8220_v56 = vcombine.low %v8198_v61, %v8205_v52  ;;  %v21269_v47 = vld [vmem:[#allocation38_spill] sm:$0xff]  ;;  %v21270_v53 = vld [vmem:[#allocation39_spill] sm:$0xff] }
0x12ae   :  { %v8221_v35 = vcombine.low %v8212_v6, %v8219_v50 }
0x12af   :  { %v15914_v27 = vpop.eup %15913  ;;  %v8228_v45 = vrot.slane %v8220_v56, %v16478_v7  ;;  %v7945_v34 = vmul.f32 %v18971_v22, %v7849_v4  ;;  %v7946_v55 = vmul.f32 %v18977_v21, %v7850_v18  ;;  %v21271_v56 = vld [vmem:[#allocation40_spill] sm:$0xff] }
0x12b0   :  { %v8235_v41 = vrot.slane %v8221_v35, %v16478_v7  ;;  %v7746_v2 = vrot.slane %v15914_v27, %v17853_v9  ;;  %v7750_v26 = vrot.slane %v15914_v27, %v17856_v43  ;;  %v7754_v29 = vrot.slane %v15914_v27, %v21232_v59  ;;  %v21272_v43 = vld [vmem:[#allocation41_spill] sm:$0xff]  ;;  %v21273_v59 = vld [vmem:[#allocation42_spill] sm:$0xff] }
0x12b1   :  { %v7758_v13 = vrot.slane %v15914_v27, %v21233_v11  ;;  %v7762_v58 = vrot.slane %v15914_v27, %v21234_v40  ;;  %v7766_v61 = vrot.slane %v15914_v27, %v21235_v20  ;;  %v7770_v52 = vrot.slane %v15914_v27, %v21236_v37  ;;  %v21274_v11 = vld [vmem:[#allocation28_spill] sm:$0xff]  ;;  %v21276_v37 = vld [vmem:[#allocation46_spill] sm:$0xff] }
0x12b2   :  { %v8236_v6 = vcombine.low %v8228_v45, %v8235_v41  ;;  %v7774_v50 = vrot.slane %v15914_v27, %v21237_v14  ;;  %v7841_v4 = vmul.f32 %v7746_v2, %v21269_v47  ;;  %v7842_v18 = vmul.f32 %v7750_v26, %v21270_v53  ;;  %v21275_v20 = vld [vmem:[#allocation44_spill] sm:$0xff] }
0x12b3   :  { %v7843_v35 = vmul.f32 %v7754_v29, %v21271_v56  ;;  %v7844_v9 = vmul.f32 %v7758_v13, %v21272_v43  ;;  %v7845_v25 = vmul.f32 %v7762_v58, %v21273_v59  ;;  %v7846_v17 = vmul.f32 %v7766_v61, %v21274_v11  ;;  %v19305_v61 = vld [vmem:[#allocation5 + $0x1] ss:$0 sm:$0xff] }
0x12b4   :  { %15078 = vmatmul.mubr.msk.f32.gmra.mrb[74].mxu0 %vm1388_vm2, %v8236_v6  ;;  %v7847_v40 = vmul.f32 %v7770_v52, %v21275_v20  ;;  %v7848_v45 = vmul.f32 %v7774_v50, %v21276_v37  ;;  %v7937_v27 = vmul.f32 %v18971_v22, %v7841_v4  ;;  %v7938_v41 = vmul.f32 %v18977_v21, %v7842_v18 }
0x12b5   :  { %15080 = vmatprep.mubr.msk.f32.mxu0 %vm16244_vm0, %v21258_v42  ;;  %v7939_v2 = vmul.f32 %v18996_v33, %v7843_v35  ;;  %v7940_v43 = vmul.f32 %v19004_v46, %v7844_v9  ;;  %v7941_v59 = vmul.f32 %v18974_v30, %v7845_v25  ;;  %v7942_v11 = vmul.f32 %v18983_v57, %v7846_v17 }
0x12b6   :  { %v7943_v26 = vmul.f32 %v19000_v15, %v7847_v40  ;;  %v7944_v20 = vmul.f32 %v19012_v39, %v7848_v45  ;;  %v19252_v37 = vadd.f32 %v18980_v19, %v7937_v27  ;;  %v19255_v22 = vadd.f32 %v18989_v0, %v7938_v41 }
0x12b7   :  { %v19258_v21 = vadd.f32 %v19008_v31, %v7939_v2  ;;  %v19261_v33 = vadd.f32 %v19020_v5, %v7940_v43  ;;  %v19264_v9 = vadd.f32 %v18986_v1, %v7941_v59  ;;  %v19267_v30 = vadd.f32 %v18992_v48, %v7942_v11 }
0x12b8   :  { %21277 = vst [vmem:[#allocation35_spill] sm:$0xff] %v19252_v37  ;;  %21278 = vst [vmem:[#allocation20_spill] sm:$0xff] %v19255_v22  ;;  %v19270_v40 = vadd.f32 %v19016_v36, %v7943_v26  ;;  %v19273_v57 = vadd.f32 %v19024_v51, %v7944_v20  ;;  %v8237_v15 = vcombine.low %v19252_v37, %v19255_v22 }
0x12b9   :  { %21279 = vst [vmem:[#allocation37_spill] sm:$0xff] %v19258_v21  ;;  %21280 = vst [vmem:[#allocation43_spill] sm:$0xff] %v19261_v33  ;;  %v19278_v46 = vadd.f32 %v18980_v19, %v7945_v34  ;;  %v8238_v31 = vcombine.low %v19258_v21, %v19261_v33  ;;  %v8239_v1 = vcombine.low %v19264_v9, %v19267_v30 }
0x12ba   :  { %21281 = vst [vmem:[#allocation45_spill] sm:$0xff] %v19264_v9  ;;  %21282 = vst [vmem:[#allocation38_spill] sm:$0xff] %v19267_v30  ;;  %v19285_v48 = vadd.f32 %v18989_v0, %v7946_v55  ;;  %v8240_v39 = vcombine.low %v19270_v40, %v19273_v57  ;;  %v8247_v36 = vrot.slane %v8237_v15, %v16478_v7 }
0x12bb   :  { %21283 = vst [vmem:[#allocation39_spill] sm:$0xff] %v19270_v40  ;;  %21284 = vst [vmem:[#allocation40_spill] sm:$0xff] %v19273_v57  ;;  %v8254_v5 = vrot.slane %v8238_v31, %v16478_v7  ;;  %v8261_v51 = vrot.slane %v8239_v1, %v16478_v7 }
0x12bc   :  { %21285 = vst [vmem:[#allocation41_spill] sm:$0xff] %v19278_v46  ;;  %21286 = vst [vmem:[#allocation42_spill] sm:$0xff] %v19285_v48  ;;  %v8268_v19 = vrot.slane %v8240_v39, %v16478_v7  ;;  %v8286_v17 = vcombine.low %v19278_v46, %v19285_v48 }
0x12bd   :  { %v8269_v25 = vcombine.low %v8247_v36, %v8254_v5 }
0x12be   :  { %v8270_v34 = vcombine.low %v8261_v51, %v8268_v19  ;;  %v8293_v55 = vrot.slane %v8286_v17, %v16478_v7 }
0x12bf   :  { %v8277_v29 = vrot.slane %v8269_v25, %v16478_v7 }
0x12c0   :  { %v8284_v0 = vrot.slane %v8270_v34, %v16478_v7  ;;  %v8300_v58 = vrot.slane %v8293_v55, %v16478_v7 }
0x12c2   :  { %v8285_v13 = vcombine.low %v8277_v29, %v8284_v0 }
0x12c4   :  { %15081 = vmatmul.mubr.msk.f32.gmra.mrb[76].mxu0 %vm1388_vm2, %v8285_v13 }
0x12c5   :  { %15083 = vmatprep.mubr.msk.f32.mxu0 %vm16244_vm0, %v21258_v42 }
0x12c8   :  { %15084 = vmatmul.mubr.msk.f32.gmra.mrb[78].mxu0 %vm1388_vm2, %v8300_v58 }
0x12c9   :  { %15107 = vmatprep.mubr.msk.f32.mxu0 %vm16244_vm0, %v21258_v42 }
0x1343   :  { %v8377_v52 = vpop.f32.mrb[70].mxu0 }
0x1344   :  { %v8378_v6 = vadd.f32 %v19305_v61, %v8377_v52  ;;  %v15073_v50 = vpop.f32.mrb[71].mxu0 }
0x1346   :  { %v8406_v47 = vcombine.high %v8378_v6, %v8378_v6  ;;  %v8413_v53 = vrot.slane %v8378_v6, %v16478_v7 }
0x1348   :  { %v8420_v4 = vrot.slane %v8406_v47, %v16478_v7  ;;  %v8421_v56 = vcombine.high %v8413_v53, %v8413_v53  ;;  %v8429_v59 = vrot.slane %v8413_v53, %v16478_v7 }
0x134a   :  { %v8422_v18 = vcombine.high %v8420_v4, %v8420_v4  ;;  %v8436_v45 = vrot.slane %v8420_v4, %v16478_v7  ;;  %v8443_v27 = vrot.slane %v8421_v56, %v16478_v7 }
0x134c   :  { %v8450_v35 = vrot.slane %v8422_v18, %v16478_v7  ;;  %v8624_v31 = vcombine.low %v8429_v59, %v8443_v27  ;;  %v14300_v1 = vcombine.high %v8429_v59, %v8443_v27 }
0x134e   :  { %v8626_v11 = vcombine.low %v8436_v45, %v8450_v35  ;;  %v14301_v26 = vcombine.high %v8436_v45, %v8450_v35  ;;  %v8634_v34 = vrot.slane %v8624_v31, %v16478_v7  ;;  %v8641_v29 = vrot.slane %v14300_v1, %v16478_v7 }
0x1350   :  { %v8648_v5 = vrot.slane %v8626_v11, %v16478_v7  ;;  %v8655_v51 = vrot.slane %v14301_v26, %v16478_v7  ;;  %v8656_v53 = vcombine.low %v8634_v34, %v8641_v29 }
0x1351   :  { %v8382_v41 = vpop.f32.mrb[72].mxu0 }
0x1352   :  { %v8383_v2 = vadd.f32 %v19305_v61, %v8382_v41  ;;  %v15076_v43 = vpop.f32.mrb[73].mxu0  ;;  %v8657_v52 = vcombine.low %v8648_v5, %v8655_v51  ;;  %v8664_v41 = vrot.slane %v8656_v53, %v16478_v7 }
0x1354   :  { %v8455_v20 = vcombine.high %v8383_v2, %v8383_v2  ;;  %v8462_v15 = vrot.slane %v8383_v2, %v16478_v7  ;;  %v8671_v45 = vrot.slane %v8657_v52, %v16478_v7 }
0x1356   :  { %v8469_v39 = vrot.slane %v8455_v20, %v16478_v7  ;;  %v8470_v36 = vcombine.high %v8462_v15, %v8462_v15  ;;  %v8478_v17 = vrot.slane %v8462_v15, %v16478_v7  ;;  %v19333_v59 = vcombine.low %v8664_v41, %v8671_v45 }
0x1358   :  { %v8471_v19 = vcombine.high %v8469_v39, %v8469_v39  ;;  %v8492_v25 = vrot.slane %v8470_v36, %v16478_v7  ;;  %v8485_v0 = vrot.slane %v8469_v39, %v16478_v7 }
0x135a   :  { %v8499_v55 = vrot.slane %v8471_v19, %v16478_v7  ;;  %v8673_v13 = vcombine.low %v8478_v17, %v8492_v25  ;;  %v14302_v58 = vcombine.high %v8478_v17, %v8492_v25 }
0x135c   :  { %v8675_v6 = vcombine.low %v8485_v0, %v8499_v55  ;;  %v14303_v50 = vcombine.high %v8485_v0, %v8499_v55  ;;  %v8683_v47 = vrot.slane %v8673_v13, %v16478_v7  ;;  %v8690_v4 = vrot.slane %v14302_v58, %v16478_v7 }
0x135e   :  { %v8697_v18 = vrot.slane %v8675_v6, %v16478_v7  ;;  %v8704_v56 = vrot.slane %v14303_v50, %v16478_v7  ;;  %v8705_v35 = vcombine.low %v8683_v47, %v8690_v4 }
0x1360   :  { %v8706_v27 = vcombine.low %v8697_v18, %v8704_v56  ;;  %v8713_v2 = vrot.slane %v8705_v35, %v16478_v7 }
0x1362   :  { %v8720_v43 = vrot.slane %v8706_v27, %v16478_v7 }
0x1364   :  { %v19335_v11 = vcombine.low %v8713_v2, %v8720_v43 }
0x1366   :  { %v19339_v26 = vpack.i.bf16 %v19335_v11, %v19333_v59 }
0x1368   :  { %15694 = vrot.lane.b32.xlu0 %v19339_v26, %s16247_s7 }
0x1387   :  { %v8387_v20 = vpop.f32.mrb[74].mxu0 }
0x1388   :  { %v8388_v15 = vadd.f32 %v19305_v61, %v8387_v20  ;;  %v15079_v31 = vpop.f32.mrb[75].mxu0 }
0x138a   :  { %v8511_v1 = vrot.slane %v8388_v15, %v16478_v7  ;;  %v8504_v39 = vcombine.high %v8388_v15, %v8388_v15 }
0x138c   :  { %v8519_v36 = vcombine.high %v8511_v1, %v8511_v1  ;;  %v8518_v5 = vrot.slane %v8504_v39, %v16478_v7  ;;  %v19348_v17 = vrot.slane %v8511_v1, %v16478_v7 }
0x138e   :  { %v8541_v51 = vrot.slane %v8519_v36, %v16478_v7  ;;  %v8520_v19 = vcombine.high %v8518_v5, %v8518_v5  ;;  %v8534_v25 = vrot.slane %v8518_v5, %v16478_v7  ;;  %v8549_v0 = vcombine.high %v19348_v17, %v19348_v17 }
0x1390   :  { %v8551_v34 = vcombine.high %v8541_v51, %v8541_v51  ;;  %v8548_v29 = vrot.slane %v8520_v19, %v16478_v7  ;;  %v8550_v55 = vcombine.high %v8534_v25, %v8534_v25  ;;  %v8834_v4 = vcombine.low %v8541_v51, %v8549_v0 }
0x1392   :  { %v8835_v6 = vcombine.low %v8551_v34, %v8534_v25  ;;  %v8836_v53 = vcombine.low %v8548_v29, %v8550_v55  ;;  %v8552_v18 = vcombine.high %v8548_v29, %v8548_v29  ;;  %v8844_v39 = vrot.slane %v8834_v4, %v16478_v7 }
0x1394   :  { %v8851_v43 = vrot.slane %v8835_v6, %v16478_v7  ;;  %v8858_v5 = vrot.slane %v8836_v53, %v16478_v7 }
0x1396   :  { %v8866_v29 = vcombine.low %v8844_v39, %v8851_v43 }
0x1397   :  { %v8392_v13 = vpop.f32.mrb[76].mxu0 }
0x1398   :  { %v8393_v58 = vadd.f32 %v19305_v61, %v8392_v13  ;;  %v15082_v52 = vpop.f32.mrb[77].mxu0 }
0x139a   :  { %v8553_v50 = vcombine.high %v8393_v58, %v8393_v58  ;;  %v8560_v47 = vrot.slane %v8393_v58, %v16478_v7 }
0x139b   :  { %v8397_v56 = vpop.f32.mrb[78].mxu0 }
0x139c   :  { %v8567_v35 = vrot.slane %v8553_v50, %v16478_v7  ;;  %v8568_v45 = vcombine.high %v8560_v47, %v8560_v47  ;;  %v8576_v27 = vrot.slane %v8560_v47, %v16478_v7  ;;  %v8398_v41 = vadd.f32 %v19305_v61, %v8397_v56  ;;  %v15085_v2 = vpop.f32.mrb[79].mxu0 }
0x139d   :  { %v8874_v56 = vrot.slane %v8866_v29, %v16478_v7 }
0x139e   :  { %v8569_v20 = vcombine.high %v8567_v35, %v8567_v35  ;;  %v8583_v15 = vrot.slane %v8567_v35, %v16478_v7  ;;  %v8590_v31 = vrot.slane %v8568_v45, %v16478_v7  ;;  %v8598_v1 = vcombine.high %v8576_v27, %v8576_v27 }
0x139f   :  { %v8837_v36 = vcombine.low %v8552_v18, %v8576_v27  ;;  %v8608_v51 = vrot.slane %v8398_v41, %v16478_v7 }
0x13a0   :  { %v8597_v19 = vrot.slane %v8569_v20, %v16478_v7  ;;  %v8599_v25 = vcombine.high %v8583_v15, %v8583_v15  ;;  %v8600_v61 = vcombine.high %v8590_v31, %v8590_v31  ;;  %v8883_v34 = vcombine.low %v8590_v31, %v8598_v1 }
0x13a1   :  { %v8865_v0 = vrot.slane %v8837_v36, %v16478_v7  ;;  %v8609_v55 = vcombine.high %v8608_v51, %v8608_v51  ;;  %v8616_v13 = vrot.slane %v8608_v51, %v16478_v7  ;;  %v8728_v36 = vrot.slane %v19348_v17, %v16478_v7 }
0x13a2   :  { %v8884_v58 = vcombine.low %v8600_v61, %v8583_v15  ;;  %v8885_v52 = vcombine.low %v8597_v19, %v8599_v25  ;;  %v8601_v6 = vcombine.high %v8597_v19, %v8597_v19  ;;  %v8893_v4 = vrot.slane %v8883_v34, %v16478_v7 }
0x13a3   :  { %v8867_v50 = vcombine.low %v8858_v5, %v8865_v0  ;;  %v8623_v47 = vrot.slane %v8609_v55, %v16478_v7  ;;  %v19396_v51 = vrot.slane %v8728_v36, %v16478_v7 }
0x13a4   :  { %v8900_v53 = vrot.slane %v8884_v58, %v16478_v7  ;;  %v8886_v18 = vcombine.low %v8601_v6, %v8616_v13  ;;  %v8907_v41 = vrot.slane %v8885_v52, %v16478_v7  ;;  %v21288_v52 = vmov 0.0|0.0  }
0x13a5   :  { %v8881_v35 = vrot.slane %v8867_v50, %v16478_v7  ;;  %v8938_v45 = vrot.slane %v8623_v47, %v16478_v7 }
0x13a6   :  { %v8915_v27 = vcombine.low %v8893_v4, %v8900_v53  ;;  %v8914_v2 = vrot.slane %v8886_v18, %v16478_v7 }
0x13a7   :  { %v19376_v43 = vcombine.low %v8874_v56, %v8881_v35  ;;  %v19379_v20 = vrot.slane %v8938_v45, %v16478_v7 }
0x13a8   :  { %v8916_v15 = vcombine.low %v8907_v41, %v8914_v2  ;;  %v8923_v31 = vrot.slane %v8915_v27, %v16478_v7 }
0x13a9   :  { %8950 = vrot.lane.b32.xlu0 %v19379_v20, %s16247_s7 }
0x13aa   :  { %v8930_v1 = vrot.slane %v8916_v15, %v16478_v7 }
0x13ac   :  { %v19385_v39 = vcombine.low %v8923_v31, %v8930_v1 }
0x13ae   :  { %v19391_v5 = vpack.i.bf16 %v19385_v39, %v19376_v43 }
0x13b0   :  { %15699 = vrot.lane.b32.xlu1 %v19391_v5, %s16247_s7 }
0x13b4   :  { %8740 = vrot.lane.b32.xlu1 %v19396_v51, %s16247_s7 }
0x13da   :  { %v15695_v19 = vpop.permute.xlu0 %15694 }
0x13db   :  { %v15697_v25 = vunpack.i.h.bf16 %v15695_v19  ;;  %v15696_v61 = vunpack.i.l.bf16 %v15695_v19 }
0x13dd   :  { %v15502_v34 = vpack.c.bf16 %v15697_v25, %v15696_v61 }
0x13df   :  { %15504 = vmatpush3.bf16.xpose.msk.msra.mxu1 %vm16998_vm4, %v15502_v34 }
0x13e0   :  { %15090 = vmatprep.subr.mxu1 %v21258_v42 }
0x141b   :  { %v8951_v6 = vpop.permute.xlu0 %8950 }
0x1422   :  { %v15700_v17 = vpop.permute.xlu1 %15699 }
0x1423   :  { %v15702_v0 = vunpack.i.h.bf16 %v15700_v17  ;;  %v15701_v55 = vunpack.i.l.bf16 %v15700_v17 }
0x1425   :  { %v15506_v13 = vpack.c.bf16 %v15702_v0, %v15701_v55 }
0x1426   :  { %v8741_v58 = vpop.permute.xlu1 %8740 }
0x1427   :  { %15091 = vmatpush3.xpose.msk.msra.mxu1 %vm1830_vm3, %v8741_v58  ;;  %15508 = vmatpush3.bf16.xpose.msk.msra.mxu0 %vm16998_vm4, %v15506_v13 }
0x1428   :  { %15105 = vmatprep.subr.mxu0 %v21258_v42  ;;  %15509 = vmatprep.subr.bf16.mxu1 %v21288_v52 }
0x142a   :  { %15093 = vmatmul.mubr.msk.f32.vlgmr.msra.gmra.mrb[76].mxu1 %vm1830_vm3, %v19333_v59 }
0x142b   :  { %15095 = vmatprep.mubr.msk.f32.mxu1 %vm16244_vm0, %v21258_v42 }
0x142e   :  { %15096 = vmatmul.mubr.msk.f32.gmra.mrb[78].mxu1 %vm1830_vm3, %v19335_v11 }
0x142f   :  { %15106 = vmatpush3.xpose.msk.msra.mxu0 %vm1830_vm3, %v8951_v6  ;;  %15098 = vmatprep.mubr.msk.f32.mxu1 %vm16244_vm0, %v21258_v42 }
0x1430   :  { %15512 = vmatprep.subr.bf16.mxu0 %v21288_v52 }
0x1432   :  { %15099 = vmatmul.mubr.msk.f32.gmra.mrb[80].mxu1 %vm1830_vm3, %v19396_v51  ;;  %15108 = vmatmul.mubr.msk.f32.vlgmr.msra.gmra.mrb[80].mxu0 %vm1830_vm3, %v19376_v43 }
0x1433   :  { %15110 = vmatprep.mubr.msk.f32.mxu0 %vm16244_vm0, %v21258_v42  ;;  %15122 = vmatprep.mubr.msk.f32.mxu1 %vm16244_vm0, %v21258_v42 }
0x1436   :  { %15111 = vmatmul.mubr.msk.f32.gmra.mrb[82].mxu0 %vm1830_vm3, %v19385_v39 }
0x1437   :  { %15113 = vmatprep.mubr.msk.f32.mxu0 %vm16244_vm0, %v21258_v42 }
0x143a   :  { %15114 = vmatmul.mubr.msk.f32.gmra.mrb[84].mxu0 %vm1830_vm3, %v19379_v20 }
0x143b   :  { %15137 = vmatprep.mubr.msk.f32.mxu0 %vm16244_vm0, %v21258_v42 }
0x14fd   :  { %v8820_v50 = vpop.f32.mrb[76].mxu1 }
0x14fe   :  { %v15094_v47 = vpop.f32.mrb[77].mxu1  ;;  %v9044_v4 = vsel %vm2133_vm5, %v8820_v50, -inf }
0x14ff   :  { %9045 = vmax.xlane.f32.xlu1 %v9044_v4 }
0x1501   :  { %v8825_v53 = vpop.f32.mrb[78].mxu1 }
0x1502   :  { %v15097_v18 = vpop.f32.mrb[79].mxu1  ;;  %v9047_v56 = vsel %vm2133_vm5, %v8825_v53, -inf }
0x1503   :  { %9048 = vmax.xlane.f32.xlu0 %v9047_v56 }
0x1505   :  { %v8830_v35 = vpop.f32.mrb[80].mxu1  ;;  %v9030_v45 = vpop.f32.mrb[80].mxu0 }
0x1506   :  { %v15100_v27 = vpop.f32.mrb[81].mxu1  ;;  %v15109_v41 = vpop.f32.mrb[81].mxu0  ;;  %v9050_v2 = vsel %vm2140_vm6, %v8830_v35, -inf  ;;  %v9053_v15 = vsel %vm2133_vm5, %v9030_v45, -inf }
0x1507   :  { %9051 = vmax.xlane.f32.xlu0 %v9050_v2  ;;  %9054 = vmax.xlane.f32.xlu1 %v9053_v15 }
0x1509   :  { %v19438_v31 = vpop.f32.mrb[82].mxu0 }
0x150a   :  { %v15112_v1 = vpop.f32.mrb[83].mxu0  ;;  %v9056_v36 = vsel %vm2133_vm5, %v19438_v31, -inf }
0x150b   :  { %9057 = vmax.xlane.f32.xlu0 %v9056_v36 }
0x150d   :  { %v19442_v19 = vpop.f32.mrb[84].mxu0 }
0x150e   :  { %v15115_v25 = vpop.f32.mrb[85].mxu0  ;;  %v9059_v61 = vsel %vm2140_vm6, %v19442_v19, -inf }
0x150f   :  { %9060 = vmax.xlane.f32.xlu1 %v9059_v61 }
0x1520   :  { %15704 = vrot.lane.b32.xlu1 %v19339_v26, %s16248_s21 }
0x1521   :  { %9114 = vrot.lane.b32.xlu0 %v19396_v51, %s16248_s21 }
0x1524   :  { %15709 = vrot.lane.b32.xlu1 %v19391_v5, %s16248_s21 }
0x1525   :  { %15719 = vrot.lane.b32.xlu0 %v19391_v5, %s16249_s27 }
0x1528   :  { %15714 = vrot.lane.b32.xlu1 %v19339_v26, %s16249_s27 }
0x1529   :  { %9308 = vrot.lane.b32.xlu0 %v19333_v59, %s16250_s28 }
0x152c   :  { %9213 = vrot.lane.b32.xlu1 %v19379_v20, %s16248_s21 }
0x1530   :  { %9318 = vrot.lane.b32.xlu1 %v19396_v51, %s16249_s27 }
0x158c   :  { %v9046_v34 = vpop.xlane.xlu1 %9045 }
0x158d   :  { %v9062_v17 = vsub.f32 %v8820_v50, %v9046_v34 }
0x158f   :  { %v9068_v0 = vmul.f32 1.442695, %v9062_v17 }
0x1590   :  { %v9049_v55 = vpop.xlane.xlu0 %9048 }
0x1591   :  { %15915 = vpow2.f32 %v9068_v0  ;;  %v9063_v13 = vsub.f32 %v8825_v53, %v9049_v55 }
0x1593   :  { %v9070_v58 = vmul.f32 1.442695, %v9063_v13 }
0x1594   :  { %v9052_v6 = vpop.xlane.xlu0 %9051  ;;  %v9055_v47 = vpop.xlane.xlu1 %9054 }
0x1595   :  { %15917 = vpow2.f32 %v9070_v58  ;;  %v9064_v4 = vsub.f32 %v8830_v35, %v9052_v6  ;;  %v9065_v18 = vsub.f32 %v9030_v45, %v9055_v47 }
0x1597   :  { %v9072_v56 = vmul.f32 1.442695, %v9064_v4  ;;  %v9074_v27 = vmul.f32 1.442695, %v9065_v18 }
0x1598   :  { %v9058_v25 = vpop.xlane.xlu0 %9057 }
0x1599   :  { %15919 = vpow2.f32 %v9072_v56  ;;  %v9066_v56 = vsub.f32 %v19438_v31, %v9058_v25 }
0x159a   :  { %15921 = vpow2.f32 %v9074_v27 }
0x159b   :  { %v19462_v41 = vpop.eup %15915  ;;  %v9076_v27 = vmul.f32 1.442695, %v9066_v56 }
0x159c   :  { %v9061_v2 = vpop.xlane.xlu1 %9060  ;;  %v9080_v50 = vsel %vm2133_vm5, %v19462_v41, 0.0  ;;  %v9115_v4 = vpop.permute.xlu0 %9114 }
0x159d   :  { %9081 = vadd.xlane.f32.xlu0 %v9080_v50  ;;  %v9067_v50 = vsub.f32 %v19442_v19, %v9061_v2  ;;  %15923 = vpow2.f32 %v9076_v27 }
0x159f   :  { %v19466_v15 = vpop.eup %15917 }
0x15a0   :  { %v15705_v53 = vpop.permute.xlu1 %15704  ;;  %v9083_v1 = vsel %vm2133_vm5, %v19466_v15, 0.0  ;;  %v15720_v31 = vpop.permute.xlu0 %15719 }
0x15a1   :  { %v15707_v36 = vunpack.i.h.bf16 %v15705_v53  ;;  %9084 = vadd.xlane.f32.xlu1 %v9083_v1  ;;  %v15706_v35 = vunpack.i.l.bf16 %v15705_v53  ;;  %v9078_v53 = vmul.f32 1.442695, %v9067_v50  ;;  %v15721_v50 = vunpack.i.l.bf16 %v15720_v31 }
0x15a3   :  { %v19470_v45 = vpop.eup %15919  ;;  %v15510_v34 = vpack.c.bf16 %v15707_v36, %v15706_v35  ;;  %15925 = vpow2.f32 %v9078_v53 }
0x15a4   :  { %v19472_v61 = vpop.eup %15921  ;;  %v15710_v17 = vpop.permute.xlu1 %15709  ;;  %v9086_v0 = vsel %vm2140_vm6, %v19470_v45, 0.0 }
0x15a5   :  { %v15712_v55 = vunpack.i.h.bf16 %v15710_v17  ;;  %v15711_v13 = vunpack.i.l.bf16 %v15710_v17  ;;  %9087 = vadd.xlane.f32.xlu0 %v9086_v0  ;;  %v9089_v58 = vsel %vm2133_vm5, %v19472_v61, 0.0  ;;  %15511 = vmatpush3.bf16.msra.mxu1 %v15510_v34  ;;  %v9309_v19 = vpop.permute.xlu0 %9308 }
0x15a6   :  { %9090 = vadd.xlane.f32.xlu1 %v9089_v58  ;;  %15120 = vmatprep.subr.mxu1 %v21258_v42 }
0x15a7   :  { %v15513_v6 = vpack.c.bf16 %v15712_v55, %v15711_v13  ;;  %v19494_v1 = vpop.eup %15923 }
0x15a8   :  { %v15715_v47 = vpop.permute.xlu1 %15714  ;;  %v9092_v36 = vsel %vm2133_vm5, %v19494_v1, 0.0 }
0x15a9   :  { %15514 = vmatpush3.bf16.msra.mxu0 %v15513_v6  ;;  %15121 = vmatpush3.msk.msra.mxu1 %vm2218_vm7, %v9115_v4  ;;  %v15717_v55 = vunpack.i.h.bf16 %v15715_v47  ;;  %v15716_v13 = vunpack.i.l.bf16 %v15715_v47  ;;  %v15722_v47 = vunpack.i.h.bf16 %v15720_v31 }
0x15aa   :  { %15135 = vmatprep.subr.mxu0 %v21258_v42  ;;  %15515 = vmatprep.subr.bf16.mxu1 %v21288_v52 }
0x15ac   :  { %v9214_v18 = vpop.permute.xlu1 %9213 }
0x15ad   :  { %15136 = vmatpush3.msk.msra.mxu0 %vm2218_vm7, %v9214_v18  ;;  %v19498_v35 = vpop.eup %15925  ;;  %v15516_v18 = vpack.c.bf16 %v15717_v55, %v15716_v13 }
0x15ae   :  { %15519 = vmatprep.subr.bf16.mxu0 %v21288_v52  ;;  %v9095_v34 = vsel %vm2140_vm6, %v19498_v35, 0.0 }
0x15b0   :  { %v9319_v2 = vpop.permute.xlu1 %9318 }
0x15b7   :  { %9310 = vrot.lane.b32.xlu1 %v19335_v11, %s16250_s28 }
0x15bb   :  { %9312 = vrot.lane.b32.xlu1 %v19396_v51, %s16250_s28  ;;  %9422 = vrot.lane.b32.xlu0 %v19379_v20, %s16249_s27 }
0x15bf   :  { %9414 = vrot.lane.b32.xlu1 %v19385_v39, %s16250_s28 }
0x15da   :  { %9093 = vadd.xlane.f32.xlu0 %v9092_v36 }
0x15de   :  { %9096 = vadd.xlane.f32.xlu0 %v9095_v34 }
0x15f4   :  { %9412 = vrot.lane.b32.xlu0 %v19376_v43, %s16250_s28 }
0x15f8   :  { %9416 = vrot.lane.b32.xlu0 %v19379_v20, %s16250_s28 }
0x162a   :  { %v9082_v25 = vpop.xlane.xlu0 %9081 }
0x162b   :  { %15927 = vrcp.f32 %v9082_v25  ;;  %v15520_v25 = vpack.c.bf16 %v15722_v47, %v15721_v50 }
0x162e   :  { %v9085_v17 = vpop.xlane.xlu1 %9084 }
0x162f   :  { %15929 = vrcp.f32 %v9085_v17 }
0x1632   :  { %v9088_v0 = vpop.xlane.xlu0 %9087 }
0x1633   :  { %15931 = vrcp.f32 %v9088_v0  ;;  %v9091_v58 = vpop.xlane.xlu1 %9090 }
0x1634   :  { %15933 = vrcp.f32 %v9091_v58 }
0x1635   :  { %v15928_v6 = vpop.eup %15927 }
0x1636   :  { %v9104_v4 = vmul.f32 %v15928_v6, %v19462_v41 }
0x1638   :  { %15123 = vmatmul.mubr.msk.f32.vlgmr.msra.gmra.mrb[82].mxu1 %vm2133_vm5, %v9104_v4 }
0x1639   :  { %v15930_v56 = vpop.eup %15929  ;;  %15518 = vmatpush3.bf16.xpose.msk.msra.mxu1 %vm16998_vm4, %v15516_v18  ;;  %15125 = vmatprep.mubr.msk.f32.mxu1 %vm16244_vm0, %v21258_v42 }
0x163a   :  { %v9105_v27 = vmul.f32 %v15930_v56, %v19466_v15  ;;  %15150 = vmatprep.subr.mxu1 %v21258_v42  ;;  %v9311_v15 = vpop.permute.xlu1 %9310 }
0x163c   :  { %15126 = vmatmul.mubr.msk.f32.gmra.mrb[84].mxu1 %vm2133_vm5, %v9105_v27 }
0x163d   :  { %v15932_v53 = vpop.eup %15931  ;;  %15128 = vmatprep.mubr.msk.f32.mxu1 %vm16244_vm0, %v21258_v42 }
0x163e   :  { %v15934_v41 = vpop.eup %15933  ;;  %v9106_v36 = vmul.f32 %v15932_v53, %v19470_v45  ;;  %v9423_v45 = vpop.permute.xlu0 %9422 }
0x163f   :  { %v9107_v34 = vmul.f32 %v15934_v41, %v19472_v61  ;;  %v9313_v61 = vpop.permute.xlu1 %9312 }
0x1640   :  { %15129 = vmatmul.mubr.msk.f32.gmra.mrb[86].mxu1 %vm2133_vm5, %v9106_v36 }
0x1641   :  { %15138 = vmatmul.mubr.msk.f32.vlgmr.msra.gmra.mrb[86].mxu0 %vm2133_vm5, %v9107_v34  ;;  %15151 = vmatpush3.xpose.msk.msra.mxu1 %vm1830_vm3, %v9319_v2 }
0x1642   :  { %15522 = vmatpush3.bf16.xpose.msk.msra.mxu0 %vm16998_vm4, %v15520_v25  ;;  %15152 = vmatprep.mubr.msk.f32.mxu1 %vm16244_vm0, %v21258_v42 }
0x1643   :  { %15165 = vmatprep.subr.mxu0 %v21258_v42  ;;  %15140 = vmatprep.mubr.msk.f32.mxu0 %vm16244_vm0, %v21258_v42 }
0x1644   :  { %15153 = vmatmul.mubr.msk.f32.vlgmr.msra.gmra.mrb[88].mxu1 %vm1830_vm3, %v9309_v19  ;;  %15523 = vmatprep.subr.bf16.mxu1 %v21288_v52 }
0x1645   :  { %15155 = vmatprep.mubr.msk.f32.mxu1 %vm16244_vm0, %v21258_v42 }
0x1648   :  { %15156 = vmatmul.mubr.msk.f32.gmra.mrb[90].mxu1 %vm1830_vm3, %v9311_v15 }
0x1649   :  { %15158 = vmatprep.mubr.msk.f32.mxu1 %vm16244_vm0, %v21258_v42 }
0x164a   :  { %15166 = vmatpush3.xpose.msk.msra.mxu0 %vm1830_vm3, %v9423_v45 }
0x164b   :  { %15526 = vmatprep.subr.bf16.mxu0 %v21288_v52 }
0x164c   :  { %15159 = vmatmul.mubr.msk.f32.gmra.mrb[92].mxu1 %vm1830_vm3, %v9313_v61 }
0x164d   :  { %15182 = vmatprep.mubr.msk.f32.mxu1 %vm16244_vm0, %v21258_v42 }
0x1667   :  { %v9094_v31 = vpop.xlane.xlu0 %9093 }
0x1668   :  { %15935 = vrcp.f32 %v9094_v31 }
0x166b   :  { %v9097_v19 = vpop.xlane.xlu0 %9096 }
0x166c   :  { %15937 = vrcp.f32 %v9097_v19 }
0x166f   :  { %v9413_v13 = vpop.permute.xlu0 %9412 }
0x1672   :  { %v15936_v2 = vpop.eup %15935 }
0x1673   :  { %v9108_v17 = vmul.f32 %v15936_v2, %v19494_v1  ;;  %v9415_v1 = vpop.permute.xlu1 %9414  ;;  %v9417_v58 = vpop.permute.xlu0 %9416 }
0x1675   :  { %15141 = vmatmul.mubr.msk.f32.gmra.mrb[88].mxu0 %vm2133_vm5, %v9108_v17 }
0x1676   :  { %v15938_v0 = vpop.eup %15937  ;;  %15143 = vmatprep.mubr.msk.f32.mxu0 %vm16244_vm0, %v21258_v42 }
0x1677   :  { %v9109_v55 = vmul.f32 %v15938_v0, %v19498_v35 }
0x1679   :  { %15144 = vmatmul.mubr.msk.f32.gmra.mrb[90].mxu0 %vm2133_vm5, %v9109_v55 }
0x167a   :  { %15167 = vmatprep.mubr.msk.f32.mxu0 %vm16244_vm0, %v21258_v42 }
0x167d   :  { %15168 = vmatmul.mubr.msk.f32.vlgmr.msra.gmra.mrb[92].mxu0 %vm1830_vm3, %v9413_v13 }
0x167e   :  { %15170 = vmatprep.mubr.msk.f32.mxu0 %vm16244_vm0, %v21258_v42 }
0x1681   :  { %15171 = vmatmul.mubr.msk.f32.gmra.mrb[94].mxu0 %vm1830_vm3, %v9415_v1 }
0x1682   :  { %15173 = vmatprep.mubr.msk.f32.mxu0 %vm16244_vm0, %v21258_v42 }
0x1685   :  { %15174 = vmatmul.mubr.msk.f32.gmra.mrb[96].mxu0 %vm1830_vm3, %v9417_v58 }
0x1686   :  { %15197 = vmatprep.mubr.msk.f32.mxu0 %vm16244_vm0, %v21258_v42 }
0x170b   :  { %v19558_v35 = vpop.f32.mrb[82].mxu1 }
0x170c   :  { %v15124_v6 = vpop.f32.mrb[83].mxu1 }
0x170f   :  { %v19560_v4 = vpop.f32.mrb[84].mxu1 }
0x1710   :  { %v15127_v18 = vpop.f32.mrb[85].mxu1 }
0x1713   :  { %v19562_v56 = vpop.f32.mrb[86].mxu1 }
0x1714   :  { %v19564_v27 = vpop.f32.mrb[86].mxu0  ;;  %v15130_v47 = vpop.f32.mrb[87].mxu1 }
0x1715   :  { %v15139_v50 = vpop.f32.mrb[87].mxu0 }
0x1717   :  { %v9398_v53 = vpop.f32.mrb[88].mxu1 }
0x1718   :  { %v15154_v41 = vpop.f32.mrb[89].mxu1  ;;  %v9516_v36 = vsel %vm2133_vm5, %v9398_v53, -inf }
0x1719   :  { %9517 = vmax.xlane.f32.xlu1 %v9516_v36 }
0x171b   :  { %v9403_v34 = vpop.f32.mrb[90].mxu1 }
0x171c   :  { %v15157_v25 = vpop.f32.mrb[91].mxu1  ;;  %v9519_v15 = vsel %vm2133_vm5, %v9403_v34, -inf }
0x171d   :  { %9520 = vmax.xlane.f32.xlu0 %v9519_v15 }
0x171f   :  { %v9408_v45 = vpop.f32.mrb[92].mxu1 }
0x1720   :  { %v15160_v61 = vpop.f32.mrb[93].mxu1  ;;  %v9522_v31 = vsel %vm2140_vm6, %v9408_v45, -inf }
0x1721   :  { %9523 = vmax.xlane.f32.xlu0 %v9522_v31 }
0x1748   :  { %v19569_v19 = vpop.f32.mrb[88].mxu0 }
0x1749   :  { %v15142_v2 = vpop.f32.mrb[89].mxu0 }
0x174c   :  { %v19571_v17 = vpop.f32.mrb[90].mxu0 }
0x174d   :  { %v15145_v0 = vpop.f32.mrb[91].mxu0 }
0x1750   :  { %v9502_v55 = vpop.f32.mrb[92].mxu0 }
0x1751   :  { %v15169_v13 = vpop.f32.mrb[93].mxu0  ;;  %v9525_v1 = vsel %vm2133_vm5, %v9502_v55, -inf }
0x1752   :  { %9526 = vmax.xlane.f32.xlu1 %v9525_v1 }
0x1754   :  { %v9507_v58 = vpop.f32.mrb[94].mxu0 }
0x1755   :  { %v15172_v6 = vpop.f32.mrb[95].mxu0  ;;  %v9528_v18 = vsel %vm2133_vm5, %v9507_v58, -inf }
0x1756   :  { %9529 = vmax.xlane.f32.xlu0 %v9528_v18 }
0x1758   :  { %v9512_v47 = vpop.f32.mrb[96].mxu0 }
0x1759   :  { %v15175_v50 = vpop.f32.mrb[97].mxu0  ;;  %v9531_v41 = vsel %vm2140_vm6, %v9512_v47, -inf }
0x175a   :  { %9532 = vmax.xlane.f32.xlu1 %v9531_v41 }
0x176b   :  { %15724 = vrot.lane.b32.xlu1 %v19339_v26, %s16251_s8 }
0x176c   :  { %9586 = vrot.lane.b32.xlu0 %v19396_v51, %s16251_s8 }
0x176f   :  { %15729 = vrot.lane.b32.xlu1 %v19391_v5, %s16251_s8 }
0x1770   :  { %15739 = vrot.lane.b32.xlu0 %v19391_v5, %s16252_s20 }
0x1773   :  { %15734 = vrot.lane.b32.xlu1 %v19339_v26, %s16252_s20 }
0x1774   :  { %9780 = vrot.lane.b32.xlu0 %v19333_v59, %s16253_s15 }
0x1777   :  { %9685 = vrot.lane.b32.xlu1 %v19379_v20, %s16251_s8 }
0x177b   :  { %9790 = vrot.lane.b32.xlu1 %v19396_v51, %s16252_s20 }
0x17a6   :  { %v9518_v36 = vpop.xlane.xlu1 %9517 }
0x17a7   :  { %v9534_v25 = vsub.f32 %v9398_v53, %v9518_v36 }
0x17a9   :  { %v9540_v15 = vmul.f32 1.442695, %v9534_v25 }
0x17aa   :  { %v9521_v61 = vpop.xlane.xlu0 %9520 }
0x17ab   :  { %15939 = vpow2.f32 %v9540_v15  ;;  %v9535_v31 = vsub.f32 %v9403_v34, %v9521_v61 }
0x17ad   :  { %v9542_v2 = vmul.f32 1.442695, %v9535_v31 }
0x17ae   :  { %v9524_v0 = vpop.xlane.xlu0 %9523 }
0x17af   :  { %15941 = vpow2.f32 %v9542_v2  ;;  %v9536_v13 = vsub.f32 %v9408_v45, %v9524_v0 }
0x17b1   :  { %v9544_v1 = vmul.f32 1.442695, %v9536_v13 }
0x17b3   :  { %15943 = vpow2.f32 %v9544_v1 }
0x17b5   :  { %v19592_v6 = vpop.eup %15939 }
0x17b6   :  { %v9552_v18 = vsel %vm2133_vm5, %v19592_v6, 0.0 }
0x17b7   :  { %9553 = vadd.xlane.f32.xlu0 %v9552_v18 }
0x17b9   :  { %v19596_v50 = vpop.eup %15941 }
0x17ba   :  { %v9555_v53 = vsel %vm2133_vm5, %v19596_v50, 0.0 }
0x17bb   :  { %9556 = vadd.xlane.f32.xlu1 %v9555_v53 }
0x17bd   :  { %v19600_v41 = vpop.eup %15943 }
0x17be   :  { %v9558_v34 = vsel %vm2140_vm6, %v19600_v41, 0.0 }
0x17bf   :  { %9559 = vadd.xlane.f32.xlu0 %v9558_v34 }
0x17d5   :  { %9894 = vrot.lane.b32.xlu0 %v19379_v20, %s16252_s20 }
0x17df   :  { %v9527_v45 = vpop.xlane.xlu1 %9526 }
0x17e0   :  { %v9537_v36 = vsub.f32 %v9502_v55, %v9527_v45 }
0x17e2   :  { %v9546_v25 = vmul.f32 1.442695, %v9537_v36 }
0x17e3   :  { %v9530_v15 = vpop.xlane.xlu0 %9529 }
0x17e4   :  { %15945 = vpow2.f32 %v9546_v25  ;;  %v9538_v61 = vsub.f32 %v9507_v58, %v9530_v15 }
0x17e6   :  { %v9548_v31 = vmul.f32 1.442695, %v9538_v61 }
0x17e7   :  { %v9533_v2 = vpop.xlane.xlu1 %9532  ;;  %v9587_v61 = vpop.permute.xlu0 %9586 }
0x17e8   :  { %15947 = vpow2.f32 %v9548_v31  ;;  %v9539_v0 = vsub.f32 %v9512_v47, %v9533_v2 }
0x17ea   :  { %v9550_v13 = vmul.f32 1.442695, %v9539_v0 }
0x17eb   :  { %v15725_v1 = vpop.permute.xlu1 %15724  ;;  %v15740_v0 = vpop.permute.xlu0 %15739 }
0x17ec   :  { %15949 = vpow2.f32 %v9550_v13  ;;  %v15727_v18 = vunpack.i.h.bf16 %v15725_v1  ;;  %v15726_v53 = vunpack.i.l.bf16 %v15725_v1 }
0x17ee   :  { %v19606_v48 = vpop.eup %15945  ;;  %v15524_v34 = vpack.c.bf16 %v15727_v18, %v15726_v53 }
0x17ef   :  { %v15730_v46 = vpop.permute.xlu1 %15729  ;;  %v9561_v55 = vsel %vm2133_vm5, %v19606_v48, 0.0  ;;  %v9781_v13 = vpop.permute.xlu0 %9780 }
0x17f0   :  { %v15732_v45 = vunpack.i.h.bf16 %v15730_v46  ;;  %v15731_v36 = vunpack.i.l.bf16 %v15730_v46  ;;  %9562 = vadd.xlane.f32.xlu1 %v9561_v55  ;;  %15525 = vmatpush3.bf16.msra.mxu1 %v15524_v34 }
0x17f1   :  { %15180 = vmatprep.subr.mxu1 %v21258_v42 }
0x17f2   :  { %v19610_v58 = vpop.eup %15947  ;;  %v15527_v25 = vpack.c.bf16 %v15732_v45, %v15731_v36 }
0x17f3   :  { %v15735_v47 = vpop.permute.xlu1 %15734  ;;  %v9564_v15 = vsel %vm2133_vm5, %v19610_v58, 0.0 }
0x17f4   :  { %9565 = vadd.xlane.f32.xlu0 %v9564_v15  ;;  %15528 = vmatpush3.bf16.msra.mxu0 %v15527_v25  ;;  %v15737_v55 = vunpack.i.h.bf16 %v15735_v47  ;;  %v15736_v45 = vunpack.i.l.bf16 %v15735_v47 }
0x17f5   :  { %15181 = vmatpush3.msk.msra.mxu1 %vm2218_vm7, %v9587_v61  ;;  %15195 = vmatprep.subr.mxu0 %v21258_v42 }
0x17f6   :  { %v19617_v31 = vpop.eup %15949  ;;  %15529 = vmatprep.subr.bf16.mxu1 %v21288_v52  ;;  %v15530_v15 = vpack.c.bf16 %v15737_v55, %v15736_v45  ;;  %v15741_v55 = vunpack.i.l.bf16 %v15740_v0 }
0x17f7   :  { %v9686_v46 = vpop.permute.xlu1 %9685  ;;  %v9567_v2 = vsel %vm2140_vm6, %v19617_v31, 0.0 }
0x17f8   :  { %9568 = vadd.xlane.f32.xlu0 %v9567_v2  ;;  %15196 = vmatpush3.msk.msra.mxu0 %vm2218_vm7, %v9686_v46 }
0x17f9   :  { %15533 = vmatprep.subr.bf16.mxu0 %v21288_v52 }
0x17fb   :  { %v9791_v1 = vpop.permute.xlu1 %9790 }
0x1801   :  { %9782 = vrot.lane.b32.xlu1 %v19335_v11, %s16253_s15 }
0x1805   :  { %9784 = vrot.lane.b32.xlu1 %v19396_v51, %s16253_s15 }
0x1809   :  { %9886 = vrot.lane.b32.xlu1 %v19385_v39, %s16253_s15 }
0x180e   :  { %9884 = vrot.lane.b32.xlu0 %v19376_v43, %s16253_s15 }
0x1812   :  { %9888 = vrot.lane.b32.xlu0 %v19379_v20, %s16253_s15 }
0x1844   :  { %v9554_v18 = vpop.xlane.xlu0 %9553 }
0x1845   :  { %15951 = vrcp.f32 %v9554_v18 }
0x1848   :  { %v9557_v53 = vpop.xlane.xlu1 %9556 }
0x1849   :  { %15953 = vrcp.f32 %v9557_v53 }
0x184c   :  { %v9560_v34 = vpop.xlane.xlu0 %9559 }
0x184d   :  { %15955 = vrcp.f32 %v9560_v34  ;;  %v15742_v34 = vunpack.i.h.bf16 %v15740_v0 }
0x184f   :  { %v15952_v36 = vpop.eup %15951 }
0x1850   :  { %v9576_v25 = vmul.f32 %v15952_v36, %v19592_v6  ;;  %v15534_v36 = vpack.c.bf16 %v15742_v34, %v15741_v55 }
0x1852   :  { %15183 = vmatmul.mubr.msk.f32.vlgmr.msra.gmra.mrb[94].mxu1 %vm2133_vm5, %v9576_v25 }
0x1853   :  { %v15954_v61 = vpop.eup %15953  ;;  %15532 = vmatpush3.bf16.xpose.msk.msra.mxu1 %vm16998_vm4, %v15530_v15  ;;  %15185 = vmatprep.mubr.msk.f32.mxu1 %vm16244_vm0, %v21258_v42 }
0x1854   :  { %v9577_v46 = vmul.f32 %v15954_v61, %v19596_v50  ;;  %15210 = vmatprep.subr.mxu1 %v21258_v42  ;;  %v9895_v50 = vpop.permute.xlu0 %9894 }
0x1856   :  { %15186 = vmatmul.mubr.msk.f32.gmra.mrb[96].mxu1 %vm2133_vm5, %v9577_v46 }
0x1857   :  { %v15956_v47 = vpop.eup %15955  ;;  %15188 = vmatprep.mubr.msk.f32.mxu1 %vm16244_vm0, %v21258_v42 }
0x1858   :  { %v9578_v6 = vmul.f32 %v15956_v47, %v19600_v41 }
0x185a   :  { %15189 = vmatmul.mubr.msk.f32.gmra.mrb[98].mxu1 %vm2133_vm5, %v9578_v6 }
0x185b   :  { %15211 = vmatpush3.xpose.msk.msra.mxu1 %vm1830_vm3, %v9791_v1  ;;  %15212 = vmatprep.mubr.msk.f32.mxu1 %vm16244_vm0, %v21258_v42 }
0x185c   :  { %15537 = vmatprep.subr.bf16.mxu1 %v21288_v52 }
0x185e   :  { %15213 = vmatmul.mubr.msk.f32.vlgmr.msra.gmra.mrb[100].mxu1 %vm1830_vm3, %v9781_v13 }
0x185f   :  { %15215 = vmatprep.mubr.msk.f32.mxu1 %vm16244_vm0, %v21258_v42 }
0x187d   :  { %v9563_v2 = vpop.xlane.xlu1 %9562 }
0x187e   :  { %15957 = vrcp.f32 %v9563_v2 }
0x1881   :  { %v9566_v18 = vpop.xlane.xlu0 %9565  ;;  %v9783_v53 = vpop.permute.xlu1 %9782 }
0x1882   :  { %15959 = vrcp.f32 %v9566_v18  ;;  %15216 = vmatmul.mubr.msk.f32.gmra.mrb[102].mxu1 %vm1830_vm3, %v9783_v53 }
0x1883   :  { %15218 = vmatprep.mubr.msk.f32.mxu1 %vm16244_vm0, %v21258_v42 }
0x1885   :  { %v9569_v41 = vpop.xlane.xlu0 %9568  ;;  %v9785_v1 = vpop.permute.xlu1 %9784 }
0x1886   :  { %15961 = vrcp.f32 %v9569_v41  ;;  %15219 = vmatmul.mubr.msk.f32.gmra.mrb[104].mxu1 %vm1830_vm3, %v9785_v1 }
0x1887   :  { %15242 = vmatprep.mubr.msk.f32.mxu1 %vm16244_vm0, %v21258_v42 }
0x1888   :  { %v15958_v13 = vpop.eup %15957 }
0x1889   :  { %v9579_v45 = vmul.f32 %v15958_v13, %v19606_v48  ;;  %v9887_v61 = vpop.permute.xlu1 %9886 }
0x188b   :  { %15198 = vmatmul.mubr.msk.f32.vlgmr.msra.gmra.mrb[98].mxu0 %vm2133_vm5, %v9579_v45 }
0x188c   :  { %v15960_v25 = vpop.eup %15959  ;;  %15536 = vmatpush3.bf16.xpose.msk.msra.mxu0 %vm16998_vm4, %v15534_v36  ;;  %15200 = vmatprep.mubr.msk.f32.mxu0 %vm16244_vm0, %v21258_v42 }
0x188d   :  { %v9580_v0 = vmul.f32 %v15960_v25, %v19610_v58  ;;  %15225 = vmatprep.subr.mxu0 %v21258_v42  ;;  %v9885_v58 = vpop.permute.xlu0 %9884 }
0x188f   :  { %15201 = vmatmul.mubr.msk.f32.gmra.mrb[100].mxu0 %vm2133_vm5, %v9580_v0 }
0x1890   :  { %v15962_v15 = vpop.eup %15961  ;;  %15203 = vmatprep.mubr.msk.f32.mxu0 %vm16244_vm0, %v21258_v42 }
0x1891   :  { %v9581_v48 = vmul.f32 %v15962_v15, %v19617_v31  ;;  %v9889_v31 = vpop.permute.xlu0 %9888 }
0x1893   :  { %15204 = vmatmul.mubr.msk.f32.gmra.mrb[102].mxu0 %vm2133_vm5, %v9581_v48 }
0x1894   :  { %15226 = vmatpush3.xpose.msk.msra.mxu0 %vm1830_vm3, %v9895_v50  ;;  %15227 = vmatprep.mubr.msk.f32.mxu0 %vm16244_vm0, %v21258_v42 }
0x1895   :  { %15540 = vmatprep.subr.bf16.mxu0 %v21288_v52 }
0x1897   :  { %15228 = vmatmul.mubr.msk.f32.vlgmr.msra.gmra.mrb[104].mxu0 %vm1830_vm3, %v9885_v58 }
0x1898   :  { %15230 = vmatprep.mubr.msk.f32.mxu0 %vm16244_vm0, %v21258_v42 }
0x189b   :  { %15231 = vmatmul.mubr.msk.f32.gmra.mrb[106].mxu0 %vm1830_vm3, %v9887_v61 }
0x189c   :  { %15233 = vmatprep.mubr.msk.f32.mxu0 %vm16244_vm0, %v21258_v42 }
0x189f   :  { %15234 = vmatmul.mubr.msk.f32.gmra.mrb[108].mxu0 %vm1830_vm3, %v9889_v31 }
0x18a0   :  { %15257 = vmatprep.mubr.msk.f32.mxu0 %vm16244_vm0, %v21258_v42 }
0x1925   :  { %v19686_v46 = vpop.f32.mrb[94].mxu1 }
0x1926   :  { %v15184_v47 = vpop.f32.mrb[95].mxu1 }
0x1929   :  { %v19688_v6 = vpop.f32.mrb[96].mxu1 }
0x192a   :  { %v15187_v50 = vpop.f32.mrb[97].mxu1 }
0x192d   :  { %v19690_v2 = vpop.f32.mrb[98].mxu1 }
0x192e   :  { %v15190_v18 = vpop.f32.mrb[99].mxu1 }
0x1931   :  { %v9870_v53 = vpop.f32.mrb[100].mxu1 }
0x1932   :  { %v15214_v41 = vpop.f32.mrb[101].mxu1  ;;  %v9988_v1 = vsel %vm2133_vm5, %v9870_v53, -inf }
0x1933   :  { %9989 = vmax.xlane.f32.xlu1 %v9988_v1 }
0x1955   :  { %v9875_v34 = vpop.f32.mrb[102].mxu1 }
0x1956   :  { %v15217_v55 = vpop.f32.mrb[103].mxu1  ;;  %v9991_v13 = vsel %vm2133_vm5, %v9875_v34, -inf }
0x1957   :  { %9992 = vmax.xlane.f32.xlu0 %v9991_v13 }
0x1959   :  { %v9880_v45 = vpop.f32.mrb[104].mxu1 }
0x195a   :  { %v15220_v36 = vpop.f32.mrb[105].mxu1  ;;  %v9994_v25 = vsel %vm2140_vm6, %v9880_v45, -inf }
0x195b   :  { %9995 = vmax.xlane.f32.xlu0 %v9994_v25 }
0x195e   :  { %v19695_v0 = vpop.f32.mrb[98].mxu0 }
0x195f   :  { %v15199_v15 = vpop.f32.mrb[99].mxu0 }
0x1962   :  { %v19697_v48 = vpop.f32.mrb[100].mxu0 }
0x1963   :  { %v15202_v58 = vpop.f32.mrb[101].mxu0 }
0x1966   :  { %v19699_v61 = vpop.f32.mrb[102].mxu0 }
0x1967   :  { %v15205_v31 = vpop.f32.mrb[103].mxu0 }
0x196a   :  { %v9974_v47 = vpop.f32.mrb[104].mxu0 }
0x196b   :  { %v15229_v50 = vpop.f32.mrb[105].mxu0  ;;  %v9997_v18 = vsel %vm2133_vm5, %v9974_v47, -inf }
0x196c   :  { %9998 = vmax.xlane.f32.xlu1 %v9997_v18 }
0x196e   :  { %v9979_v41 = vpop.f32.mrb[106].mxu0 }
0x196f   :  { %v15232_v1 = vpop.f32.mrb[107].mxu0  ;;  %v10000_v55 = vsel %vm2133_vm5, %v9979_v41, -inf }
0x1970   :  { %10001 = vmax.xlane.f32.xlu0 %v10000_v55 }
0x1972   :  { %v9984_v13 = vpop.f32.mrb[108].mxu0 }
0x1973   :  { %v15235_v36 = vpop.f32.mrb[109].mxu0  ;;  %v10003_v25 = vsel %vm2140_vm6, %v9984_v13, -inf }
0x1974   :  { %10004 = vmax.xlane.f32.xlu1 %v10003_v25 }
0x1985   :  { %15744 = vrot.lane.b32.xlu1 %v19339_v26, %s16254_s24 }
0x1986   :  { %10058 = vrot.lane.b32.xlu0 %v19396_v51, %s16254_s24 }
0x1989   :  { %15749 = vrot.lane.b32.xlu1 %v19391_v5, %s16254_s24 }
0x198a   :  { %15759 = vrot.lane.b32.xlu0 %v19391_v5, %s16255_s23 }
0x198d   :  { %15754 = vrot.lane.b32.xlu1 %v19339_v26, %s16255_s23 }
0x1991   :  { %10157 = vrot.lane.b32.xlu1 %v19379_v20, %s16254_s24 }
0x1995   :  { %10262 = vrot.lane.b32.xlu1 %v19396_v51, %s16255_s23 }
0x19c0   :  { %v9990_v15 = vpop.xlane.xlu1 %9989 }
0x19c1   :  { %v10006_v58 = vsub.f32 %v9870_v53, %v9990_v15 }
0x19c3   :  { %v10012_v31 = vmul.f32 1.442695, %v10006_v58 }
0x19c5   :  { %15963 = vpow2.f32 %v10012_v31 }
0x19cf   :  { %v19718_v50 = vpop.eup %15963 }
0x19d0   :  { %v10024_v18 = vsel %vm2133_vm5, %v19718_v50, 0.0 }
0x19d1   :  { %10025 = vadd.xlane.f32.xlu0 %v10024_v18 }
0x19e4   :  { %v9993_v1 = vpop.xlane.xlu0 %9992 }
0x19e5   :  { %v10007_v55 = vsub.f32 %v9875_v34, %v9993_v1 }
0x19e7   :  { %v10014_v36 = vmul.f32 1.442695, %v10007_v55  ;;  %10252 = vrot.lane.b32.xlu0 %v19333_v59, %s16256_s29 }
0x19e8   :  { %v9996_v25 = vpop.xlane.xlu0 %9995 }
0x19e9   :  { %15965 = vpow2.f32 %v10014_v36  ;;  %v10008_v57 = vsub.f32 %v9880_v45, %v9996_v25 }
0x19eb   :  { %v10016_v53 = vmul.f32 1.442695, %v10008_v57 }
0x19ed   :  { %15967 = vpow2.f32 %v10016_v53 }
0x19f3   :  { %v19724_v40 = vpop.eup %15965 }
0x19f4   :  { %v10027_v15 = vsel %vm2133_vm5, %v19724_v40, 0.0 }
0x19f5   :  { %10028 = vadd.xlane.f32.xlu1 %v10027_v15 }
0x19f7   :  { %v19728_v59 = vpop.eup %15967 }
0x19f8   :  { %v10030_v57 = vsel %vm2140_vm6, %v19728_v59, 0.0 }
0x19f9   :  { %v9999_v58 = vpop.xlane.xlu1 %9998 }
0x19fa   :  { %v10009_v31 = vsub.f32 %v9974_v47, %v9999_v58 }
0x19fc   :  { %v10018_v18 = vmul.f32 1.442695, %v10009_v31 }
0x19fd   :  { %v10002_v30 = vpop.xlane.xlu0 %10001 }
0x19fe   :  { %15969 = vpow2.f32 %v10018_v18  ;;  %v10010_v34 = vsub.f32 %v9979_v41, %v10002_v30 }
0x1a00   :  { %v10020_v1 = vmul.f32 1.442695, %v10010_v34 }
0x1a01   :  { %v10005_v55 = vpop.xlane.xlu1 %10004 }
0x1a02   :  { %15971 = vpow2.f32 %v10020_v1  ;;  %v10011_v45 = vsub.f32 %v9984_v13, %v10005_v55 }
0x1a04   :  { %v10022_v36 = vmul.f32 1.442695, %v10011_v45  ;;  %v10059_v45 = vpop.permute.xlu0 %10058 }
0x1a05   :  { %v15745_v25 = vpop.permute.xlu1 %15744 }
0x1a06   :  { %15973 = vpow2.f32 %v10022_v36  ;;  %v15747_v15 = vunpack.i.h.bf16 %v15745_v25  ;;  %10031 = vadd.xlane.f32.xlu0 %v10030_v57  ;;  %v15746_v53 = vunpack.i.l.bf16 %v15745_v25 }
0x1a08   :  { %v19732_v47 = vpop.eup %15969  ;;  %v15538_v58 = vpack.c.bf16 %v15747_v15, %v15746_v53  ;;  %v15760_v15 = vpop.permute.xlu0 %15759 }
0x1a09   :  { %v15750_v31 = vpop.permute.xlu1 %15749  ;;  %v10033_v30 = vsel %vm2133_vm5, %v19732_v47, 0.0 }
0x1a0a   :  { %v15752_v41 = vunpack.i.h.bf16 %v15750_v31  ;;  %v15751_v18 = vunpack.i.l.bf16 %v15750_v31  ;;  %10034 = vadd.xlane.f32.xlu1 %v10033_v30  ;;  %15539 = vmatpush3.bf16.msra.mxu1 %v15538_v58 }
0x1a0b   :  { %15240 = vmatprep.subr.mxu1 %v21258_v42 }
0x1a0c   :  { %v19736_v13 = vpop.eup %15971  ;;  %v15541_v34 = vpack.c.bf16 %v15752_v41, %v15751_v18 }
0x1a0d   :  { %v15755_v1 = vpop.permute.xlu1 %15754  ;;  %v10036_v55 = vsel %vm2133_vm5, %v19736_v13, 0.0 }
0x1a0e   :  { %10037 = vadd.xlane.f32.xlu0 %v10036_v55  ;;  %15542 = vmatpush3.bf16.msra.mxu0 %v15541_v34  ;;  %v15757_v58 = vunpack.i.h.bf16 %v15755_v1  ;;  %v15756_v31 = vunpack.i.l.bf16 %v15755_v1 }
0x1a0f   :  { %15241 = vmatpush3.msk.msra.mxu1 %vm2218_vm7, %v10059_v45  ;;  %15255 = vmatprep.subr.mxu0 %v21258_v42 }
0x1a10   :  { %v19743_v36 = vpop.eup %15973  ;;  %15543 = vmatprep.subr.bf16.mxu1 %v21288_v52  ;;  %v15544_v18 = vpack.c.bf16 %v15757_v58, %v15756_v31  ;;  %v15762_v31 = vunpack.i.h.bf16 %v15760_v15 }
0x1a11   :  { %v10158_v25 = vpop.permute.xlu1 %10157  ;;  %v10039_v57 = vsel %vm2140_vm6, %v19743_v36, 0.0 }
0x1a12   :  { %10040 = vadd.xlane.f32.xlu0 %v10039_v57  ;;  %15256 = vmatpush3.msk.msra.mxu0 %vm2218_vm7, %v10158_v25 }
0x1a13   :  { %15547 = vmatprep.subr.bf16.mxu0 %v21288_v52 }
0x1a1b   :  { %10254 = vrot.lane.b32.xlu1 %v19335_v11, %s16256_s29  ;;  %v10263_v11 = vpop.permute.xlu1 %10262 }
0x1a1f   :  { %10356 = vrot.lane.b32.xlu1 %v19376_v43, %s16256_s29 }
0x1a28   :  { %10366 = vrot.lane.b32.xlu0 %v19379_v20, %s16255_s23 }
0x1a2c   :  { %10256 = vrot.lane.b32.xlu0 %v19396_v51, %s16256_s29 }
0x1a5e   :  { %v10026_v53 = vpop.xlane.xlu0 %10025 }
0x1a5f   :  { %15975 = vrcp.f32 %v10026_v53 }
0x1a62   :  { %v10253_v1 = vpop.permute.xlu0 %10252 }
0x1a69   :  { %v15976_v30 = vpop.eup %15975 }
0x1a6a   :  { %v10048_v41 = vmul.f32 %v15976_v30, %v19718_v50  ;;  %v15761_v30 = vunpack.i.l.bf16 %v15760_v15 }
0x1a6c   :  { %15243 = vmatmul.mubr.msk.f32.vlgmr.msra.gmra.mrb[106].mxu1 %vm2133_vm5, %v10048_v41 }
0x1a6d   :  { %15546 = vmatpush3.bf16.xpose.msk.msra.mxu1 %vm16998_vm4, %v15544_v18  ;;  %15245 = vmatprep.mubr.msk.f32.mxu1 %vm16244_vm0, %v21258_v42  ;;  %v15548_v18 = vpack.c.bf16 %v15762_v31, %v15761_v30 }
0x1a6e   :  { %15270 = vmatprep.subr.mxu1 %v21258_v42 }
0x1a75   :  { %15271 = vmatpush3.xpose.msk.msra.mxu1 %vm1830_vm3, %v10263_v11 }
0x1a76   :  { %15551 = vmatprep.subr.bf16.mxu1 %v21288_v52 }
0x1a82   :  { %v10029_v43 = vpop.xlane.xlu1 %10028 }
0x1a83   :  { %15977 = vrcp.f32 %v10029_v43 }
0x1a8d   :  { %v15978_v34 = vpop.eup %15977 }
0x1a8e   :  { %v10049_v50 = vmul.f32 %v15978_v34, %v19724_v40 }
0x1a90   :  { %15246 = vmatmul.mubr.msk.f32.gmra.mrb[108].mxu1 %vm2133_vm5, %v10049_v50 }
0x1a91   :  { %15248 = vmatprep.mubr.msk.f32.mxu1 %vm16244_vm0, %v21258_v42 }
0x1a93   :  { %v10032_v55 = vpop.xlane.xlu0 %10031 }
0x1a94   :  { %15979 = vrcp.f32 %v10032_v55 }
0x1a97   :  { %v10035_v45 = vpop.xlane.xlu1 %10034 }
0x1a98   :  { %15981 = vrcp.f32 %v10035_v45 }
0x1a9b   :  { %v10038_v25 = vpop.xlane.xlu0 %10037 }
0x1a9c   :  { %15983 = vrcp.f32 %v10038_v25 }
0x1a9e   :  { %v15980_v57 = vpop.eup %15979 }
0x1a9f   :  { %v10041_v53 = vpop.xlane.xlu0 %10040  ;;  %v10050_v58 = vmul.f32 %v15980_v57, %v19728_v59 }
0x1aa0   :  { %15985 = vrcp.f32 %v10041_v53 }
0x1aa1   :  { %15249 = vmatmul.mubr.msk.f32.gmra.mrb[110].mxu1 %vm2133_vm5, %v10050_v58 }
0x1aa2   :  { %v15982_v40 = vpop.eup %15981  ;;  %15272 = vmatprep.mubr.msk.f32.mxu1 %vm16244_vm0, %v21258_v42 }
0x1aa3   :  { %v10051_v41 = vmul.f32 %v15982_v40, %v19732_v47  ;;  %v10367_v43 = vpop.permute.xlu0 %10366  ;;  %v10255_v47 = vpop.permute.xlu1 %10254 }
0x1aa5   :  { %15258 = vmatmul.mubr.msk.f32.vlgmr.msra.gmra.mrb[110].mxu0 %vm2133_vm5, %v10051_v41  ;;  %15273 = vmatmul.mubr.msk.f32.vlgmr.msra.gmra.mrb[112].mxu1 %vm1830_vm3, %v10253_v1 }
0x1aa6   :  { %v15984_v11 = vpop.eup %15983  ;;  %15550 = vmatpush3.bf16.xpose.msk.msra.mxu0 %vm16998_vm4, %v15548_v18  ;;  %15260 = vmatprep.mubr.msk.f32.mxu0 %vm16244_vm0, %v21258_v42 }
0x1aa7   :  { %15275 = vmatprep.mubr.msk.f32.mxu1 %vm16244_vm0, %v21258_v42  ;;  %v10052_v59 = vmul.f32 %v15984_v11, %v19736_v13  ;;  %15285 = vmatprep.subr.mxu0 %v21258_v42  ;;  %v10257_v34 = vpop.permute.xlu0 %10256  ;;  %v10357_v13 = vpop.permute.xlu1 %10356 }
0x1aa9   :  { %15261 = vmatmul.mubr.msk.f32.gmra.mrb[112].mxu0 %vm2133_vm5, %v10052_v59  ;;  %15276 = vmatmul.mubr.msk.f32.gmra.mrb[114].mxu1 %vm1830_vm3, %v10255_v47 }
0x1aaa   :  { %v15986_v15 = vpop.eup %15985  ;;  %15263 = vmatprep.mubr.msk.f32.mxu0 %vm16244_vm0, %v21258_v42  ;;  %15278 = vmatprep.mubr.msk.f32.mxu1 %vm16244_vm0, %v21258_v42 }
0x1aab   :  { %v10053_v29 = vmul.f32 %v15986_v15, %v19743_v36 }
0x1aad   :  { %15264 = vmatmul.mubr.msk.f32.gmra.mrb[114].mxu0 %vm2133_vm5, %v10053_v29  ;;  %15279 = vmatmul.mubr.msk.f32.gmra.mrb[116].mxu1 %vm1830_vm3, %v10257_v34 }
0x1aae   :  { %15286 = vmatpush3.xpose.msk.msra.mxu0 %vm1830_vm3, %v10367_v43  ;;  %15287 = vmatprep.mubr.msk.f32.mxu0 %vm16244_vm0, %v21258_v42 }
0x1aaf   :  { %15554 = vmatprep.subr.bf16.mxu0 %v21288_v52  ;;  %15302 = vmatprep.mubr.msk.f32.mxu1 %vm16244_vm0, %v21258_v42 }
0x1ab1   :  { %15288 = vmatmul.mubr.msk.f32.vlgmr.msra.gmra.mrb[116].mxu0 %vm1830_vm3, %v10357_v13 }
0x1ab2   :  { %15290 = vmatprep.mubr.msk.f32.mxu0 %vm16244_vm0, %v21258_v42 }
0x1b3f   :  { %v19804_v36 = vpop.f32.mrb[106].mxu1 }
0x1b40   :  { %v15244_v50 = vpop.f32.mrb[107].mxu1 }
0x1b63   :  { %v19806_v1 = vpop.f32.mrb[108].mxu1 }
0x1b64   :  { %v15247_v55 = vpop.f32.mrb[109].mxu1 }
0x1b74   :  { %v19808_v45 = vpop.f32.mrb[110].mxu1 }
0x1b75   :  { %v15250_v25 = vpop.f32.mrb[111].mxu1 }
0x1b78   :  { %v19810_v57 = vpop.f32.mrb[110].mxu0  ;;  %v10342_v53 = vpop.f32.mrb[112].mxu1 }
0x1b79   :  { %v15259_v58 = vpop.f32.mrb[111].mxu0  ;;  %v15274_v31 = vpop.f32.mrb[113].mxu1  ;;  %v10460_v30 = vsel %vm2133_vm5, %v10342_v53, -inf }
0x1b7a   :  { %10461 = vmax.xlane.f32.xlu1 %v10460_v30 }
0x1b7c   :  { %v19813_v40 = vpop.f32.mrb[112].mxu0  ;;  %v10347_v41 = vpop.f32.mrb[114].mxu1 }
0x1b7d   :  { %v15262_v18 = vpop.f32.mrb[113].mxu0  ;;  %v15277_v11 = vpop.f32.mrb[115].mxu1  ;;  %v10463_v43 = vsel %vm2133_vm5, %v10347_v41, -inf }
0x1b7e   :  { %10464 = vmax.xlane.f32.xlu0 %v10463_v43 }
0x1b80   :  { %v19816_v59 = vpop.f32.mrb[114].mxu0  ;;  %v10352_v47 = vpop.f32.mrb[116].mxu1 }
0x1b81   :  { %v15265_v15 = vpop.f32.mrb[115].mxu0  ;;  %v15280_v29 = vpop.f32.mrb[117].mxu1  ;;  %v10466_v34 = vsel %vm2140_vm6, %v10352_v47, -inf }
0x1b82   :  { %10467 = vmax.xlane.f32.xlu1 %v10466_v34 }
0x1b84   :  { %v10446_v13 = vpop.f32.mrb[116].mxu0 }
0x1b85   :  { %v15289_v50 = vpop.f32.mrb[117].mxu0  ;;  %v10469_v55 = vsel %vm2133_vm5, %v10446_v13, -inf }
0x1b86   :  { %10470 = vmax.xlane.f32.xlu0 %v10469_v55 }
0x1b93   :  { %10530 = vrot.lane.b32.xlu1 %v19396_v51, %s16257_s0 }
0x1b97   :  { %10358 = vrot.lane.b32.xlu1 %v19385_v39, %s16256_s29 }
0x1b9c   :  { %15764 = vrot.lane.b32.xlu0 %v19339_v26, %s16257_s0 }
0x1ba0   :  { %15769 = vrot.lane.b32.xlu0 %v19391_v5, %s16257_s0 }
0x1c07   :  { %v10462_v25 = vpop.xlane.xlu1 %10461 }
0x1c08   :  { %v10478_v58 = vsub.f32 %v10342_v53, %v10462_v25 }
0x1c0a   :  { %v10484_v31 = vmul.f32 1.442695, %v10478_v58 }
0x1c0b   :  { %v10465_v30 = vpop.xlane.xlu0 %10464 }
0x1c0c   :  { %15987 = vpow2.f32 %v10484_v31  ;;  %v10479_v18 = vsub.f32 %v10347_v41, %v10465_v30 }
0x1c0e   :  { %v10486_v11 = vmul.f32 1.442695, %v10479_v18 }
0x1c0f   :  { %v10468_v43 = vpop.xlane.xlu1 %10467 }
0x1c10   :  { %15989 = vpow2.f32 %v10486_v11  ;;  %v10480_v15 = vsub.f32 %v10352_v47, %v10468_v43 }
0x1c12   :  { %v10488_v51 = vmul.f32 1.442695, %v10480_v15 }
0x1c13   :  { %v10531_v29 = vpop.permute.xlu1 %10530  ;;  %v10471_v34 = vpop.xlane.xlu0 %10470 }
0x1c14   :  { %15991 = vpow2.f32 %v10488_v51  ;;  %v10481_v39 = vsub.f32 %v10446_v13, %v10471_v34 }
0x1c16   :  { %v15988_v50 = vpop.eup %15987  ;;  %v10490_v26 = vmul.f32 1.442695, %v10481_v39 }
0x1c17   :  { %v10359_v55 = vpop.permute.xlu1 %10358  ;;  %v15765_v9 = vpop.permute.xlu0 %15764  ;;  %v10496_v5 = vsel %vm2133_vm5, %v15988_v50, 0.0 }
0x1c18   :  { %15993 = vpow2.f32 %v10490_v26  ;;  %v15767_v53 = vunpack.i.h.bf16 %v15765_v9  ;;  %v15766_v25 = vunpack.i.l.bf16 %v15765_v9  ;;  %15291 = vmatmul.mubr.msk.f32.gmra.mrb[118].mxu0 %vm1830_vm3, %v10359_v55  ;;  %10497 = vadd.xlane.f32.xlu0 %v10496_v5 }
0x1c19   :  { %15293 = vmatprep.mubr.msk.f32.mxu0 %vm16244_vm0, %v21258_v42 }
0x1c1a   :  { %v15990_v41 = vpop.eup %15989  ;;  %v15552_v47 = vpack.c.bf16 %v15767_v53, %v15766_v25 }
0x1c1b   :  { %v15770_v58 = vpop.permute.xlu0 %15769  ;;  %v10499_v13 = vsel %vm2133_vm5, %v15990_v41, 0.0 }
0x1c1c   :  { %v15772_v31 = vunpack.i.h.bf16 %v15770_v58  ;;  %v15771_v30 = vunpack.i.l.bf16 %v15770_v58  ;;  %10500 = vadd.xlane.f32.xlu1 %v10499_v13  ;;  %15553 = vmatpush3.bf16.msra.mxu1 %v15552_v47  ;;  %v14384_v13 = vld [vmem:[%s20991_s5 + $0x20] sm:$0xff] }
0x1c1d   :  { %15300 = vmatprep.subr.mxu1 %v21258_v42 }
0x1c1e   :  { %v15992_v18 = vpop.eup %15991  ;;  %v15555_v11 = vpack.c.bf16 %v15772_v31, %v15771_v30  ;;  %v14385_v31 = vld [vmem:[%s20991_s5 + $0x28] sm:$0xff] }
0x1c1f   :  { %v10502_v9 = vsel %vm2140_vm6, %v15992_v18, 0.0 }
0x1c20   :  { %10503 = vadd.xlane.f32.xlu1 %v10502_v9  ;;  %15301 = vmatpush3.msk.msra.mxu1 %vm2218_vm7, %v10531_v29  ;;  %v14386_v9 = vld [vmem:[%s20991_s5 + $0x30] sm:$0xff] }
0x1c21   :  { %15556 = vmatpush3.bf16.msra.mxu0 %v15555_v11  ;;  %15557 = vmatprep.subr.bf16.mxu1 %v21288_v52 }
0x1c22   :  { %v15994_v43 = vpop.eup %15993  ;;  %15315 = vmatprep.subr.mxu0 %v21258_v42 }
0x1c23   :  { %v10505_v15 = vsel %vm2133_vm5, %v15994_v43, 0.0 }
0x1c24   :  { %10506 = vadd.xlane.f32.xlu0 %v10505_v15 }
0x1c31   :  { %10360 = vrot.lane.b32.xlu1 %v19379_v20, %s16256_s29 }
0x1c35   :  { %10730 = vrot.lane.b32.xlu1 %v19686_v46, %s16239_s4 }
0x1c39   :  { %10756 = vrot.lane.b32.xlu1 %v19806_v1, %s16233_s1 }
0x1c3a   :  { %10629 = vrot.lane.b32.xlu0 %v19379_v20, %s16257_s0 }
0x1c3e   :  { %10754 = vrot.lane.b32.xlu0 %v19804_v36, %s16233_s1 }
0x1c42   :  { %10732 = vrot.lane.b32.xlu0 %v19688_v6, %s16239_s4 }
0x1c46   :  { %10760 = vrot.lane.b32.xlu0 %v19810_v57, %s16233_s1 }
0x1ca5   :  { %v10498_v51 = vpop.xlane.xlu0 %10497 }
0x1ca6   :  { %15995 = vrcp.f32 %v10498_v51 }
0x1ca9   :  { %v10501_v29 = vpop.xlane.xlu1 %10500 }
0x1caa   :  { %15997 = vrcp.f32 %v10501_v29 }
0x1cad   :  { %v10504_v46 = vpop.xlane.xlu1 %10503 }
0x1cae   :  { %15999 = vrcp.f32 %v10504_v46 }
0x1cb0   :  { %v15996_v34 = vpop.eup %15995 }
0x1cb1   :  { %v10520_v1 = vmul.f32 %v15996_v34, %v15988_v50  ;;  %v10361_v39 = vpop.permute.xlu1 %10360  ;;  %v10507_v26 = vpop.xlane.xlu0 %10506 }
0x1cb2   :  { %16001 = vrcp.f32 %v10507_v26  ;;  %15294 = vmatmul.mubr.msk.f32.gmra.mrb[120].mxu0 %vm1830_vm3, %v10361_v39 }
0x1cb3   :  { %15303 = vmatmul.mubr.msk.f32.vlgmr.msra.gmra.mrb[118].mxu1 %vm2133_vm5, %v10520_v1  ;;  %15317 = vmatprep.mubr.msk.f32.mxu0 %vm16244_vm0, %v21258_v42 }
0x1cb4   :  { %v15998_v20 = vpop.eup %15997  ;;  %15305 = vmatprep.mubr.msk.f32.mxu1 %vm16244_vm0, %v21258_v42 }
0x1cb5   :  { %v10630_v6 = vpop.permute.xlu0 %10629  ;;  %v10521_v36 = vmul.f32 %v15998_v20, %v15990_v41 }
0x1cb6   :  { %15316 = vmatpush3.msk.msra.mxu0 %vm2218_vm7, %v10630_v6 }
0x1cb7   :  { %15306 = vmatmul.mubr.msk.f32.gmra.mrb[120].mxu1 %vm2133_vm5, %v10521_v36  ;;  %15563 = vmatprep.subr.bf16.mxu0 %v21288_v52 }
0x1cb8   :  { %v16000_v57 = vpop.eup %15999  ;;  %15308 = vmatprep.mubr.msk.f32.mxu1 %vm16244_vm0, %v21258_v42 }
0x1cb9   :  { %v10522_v50 = vmul.f32 %v16000_v57, %v15992_v18  ;;  %v15558_v18 = vpack.c.bf16 %v14385_v31, %v14384_v13  ;;  %v10755_v26 = vpop.permute.xlu0 %10754 }
0x1cbb   :  { %15309 = vmatmul.mubr.msk.f32.gmra.mrb[122].mxu1 %vm2133_vm5, %v10522_v50 }
0x1cbc   :  { %v16002_v55 = vpop.eup %16001  ;;  %15334 = vmatprep.mubr.msk.f32.mxu1 %vm16244_vm0, %v21258_v42  ;;  %15559 = vmatpush3.bf16.msra.mxu1 %v15558_v18 }
0x1cbd   :  { %v10523_v5 = vmul.f32 %v16002_v55, %v15994_v43  ;;  %15560 = vmatprep.subr.bf16.mxu1 %v21288_v52  ;;  %v14387_v43 = vld [vmem:[%s20991_s5 + $0x38] sm:$0xff]  ;;  %v10733_v20 = vpop.permute.xlu0 %10732 }
0x1cbe   :  { %v15561_v51 = vpack.c.bf16 %v14387_v43, %v14386_v9 }
0x1cbf   :  { %15318 = vmatmul.mubr.msk.f32.vlgmr.msra.gmra.mrb[122].mxu0 %vm2133_vm5, %v10523_v5 }
0x1cc0   :  { %15320 = vmatprep.mubr.msk.f32.mxu0 %vm16244_vm0, %v21258_v42  ;;  %15562 = vmatpush3.bf16.msra.mxu1 %v15561_v51 }
0x1cc1   :  { %15569 = vmatprep.subr.bf16.mxu1 %v21288_v52  ;;  %v10761_v50 = vpop.permute.xlu0 %10760 }
0x1ceb   :  { %v19870_v53 = vpop.f32.mrb[118].mxu0 }
0x1cec   :  { %v15292_v25 = vpop.f32.mrb[119].mxu0  ;;  %v10472_v39 = vsel %vm2133_vm5, %v19870_v53, -inf }
0x1d85   :  { %v19872_v41 = vpop.f32.mrb[120].mxu0 }
0x1d86   :  { %v15295_v47 = vpop.f32.mrb[121].mxu0  ;;  %v10611_v58 = vpop.f32.mrb[118].mxu1 }
0x1d87   :  { %10778 = vrot.lane.b32.xlu1 %v10611_v58, %s16258_s30  ;;  %v15304_v30 = vpop.f32.mrb[119].mxu1 }
0x1d8a   :  { %v10616_v11 = vpop.f32.mrb[120].mxu1 }
0x1d8b   :  { %10736 = vrot.lane.b32.xlu1 %v19695_v0, %s16239_s4  ;;  %10780 = vrot.lane.b32.xlu0 %v10616_v11, %s16258_s30  ;;  %v15307_v15 = vpop.f32.mrb[121].mxu1  ;;  %v10475_v0 = vsel %vm2140_vm6, %v19872_v41, -inf }
0x1d8e   :  { %v10621_v29 = vpop.f32.mrb[122].mxu1 }
0x1d8f   :  { %10734 = vrot.lane.b32.xlu0 %v19690_v2, %s16239_s4  ;;  %v15310_v46 = vpop.f32.mrb[123].mxu1  ;;  %v10731_v2 = vpop.permute.xlu1 %10730 }
0x1d90   :  { %v10796_v36 = vsel %vm1830_vm3, %v19558_v35, %v10731_v2 }
0x1d91   :  { %v10802_v57 = vsel %vm3894_vm8, %v10796_v36, %v10755_v26 }
0x1d92   :  { %v10710_v34 = vpop.f32.mrb[122].mxu0 }
0x1d93   :  { %10782 = vrot.lane.b32.xlu0 %v10621_v29, %s16258_s30  ;;  %10784 = vrot.lane.b32.xlu1 %v10710_v34, %s16258_s30  ;;  %v15319_v1 = vpop.f32.mrb[123].mxu0  ;;  %v10757_v6 = vpop.permute.xlu1 %10756 }
0x1d97   :  { %10758 = vrot.lane.b32.xlu1 %v19808_v45, %s16233_s1  ;;  %v10797_v45 = vsel %vm1830_vm3, %v19560_v4, %v10733_v20 }
0x1d98   :  { %v10803_v30 = vsel %vm3894_vm8, %v10797_v45, %v10757_v6 }
0x1db2   :  { %10476 = vmax.xlane.f32.xlu0 %v10475_v0 }
0x1dbb   :  { %10473 = vmax.xlane.f32.xlu1 %v10472_v39 }
0x1df9   :  { %v10779_v55 = vpop.permute.xlu1 %10778 }
0x1dfa   :  { %v10808_v5 = vsel %vm3901_vm9, %v10802_v57, %v10779_v55 }
0x1dfb   :  { %v10820_v25 = vcombine.high %v10808_v5, %v10808_v5  ;;  %v10827_v47 = vrot.slane %v10808_v5, %v16478_v7 }
0x1dfd   :  { %v10834_v58 = vrot.slane %v10820_v25, %v16478_v7  ;;  %v10835_v13 = vcombine.high %v10827_v47, %v10827_v47  ;;  %v10737_v31 = vpop.permute.xlu1 %10736  ;;  %v10781_v18 = vpop.permute.xlu0 %10780  ;;  %v10843_v35 = vrot.slane %v10827_v47, %v16478_v7 }
0x1dfe   :  { %v10809_v11 = vsel %vm3901_vm9, %v10803_v30, %v10781_v18  ;;  %v10799_v4 = vsel %vm1830_vm3, %v19564_v27, %v10737_v31 }
0x1dff   :  { %v10836_v9 = vcombine.high %v10834_v58, %v10834_v58  ;;  %v10857_v43 = vrot.slane %v10835_v13, %v16478_v7  ;;  %v10869_v15 = vcombine.high %v10809_v11, %v10809_v11  ;;  %v10850_v51 = vrot.slane %v10834_v58, %v16478_v7 }
0x1e00   :  { %v10876_v29 = vrot.slane %v10809_v11, %v16478_v7  ;;  %v10805_v2 = vsel %vm3894_vm8, %v10799_v4, %v10761_v50 }
0x1e01   :  { %v10864_v46 = vrot.slane %v10836_v9, %v16478_v7  ;;  %v11057_v34 = vcombine.low %v10843_v35, %v10857_v43  ;;  %v14389_v1 = vcombine.high %v10843_v35, %v10857_v43  ;;  %v10883_v0 = vrot.slane %v10869_v15, %v16478_v7  ;;  %v10735_v39 = vpop.permute.xlu0 %10734 }
0x1e02   :  { %v10884_v26 = vcombine.high %v10876_v29, %v10876_v29  ;;  %v10892_v55 = vrot.slane %v10876_v29, %v16478_v7  ;;  %v10798_v5 = vsel %vm1830_vm3, %v19562_v56, %v10735_v39 }
0x1e03   :  { %v11059_v20 = vcombine.low %v10850_v51, %v10864_v46  ;;  %v14390_v6 = vcombine.high %v10850_v51, %v10864_v46  ;;  %v11067_v36 = vrot.slane %v11057_v34, %v16478_v7  ;;  %v11074_v27 = vrot.slane %v14389_v1, %v16478_v7 }
0x1e04   :  { %v10885_v57 = vcombine.high %v10883_v0, %v10883_v0  ;;  %v10906_v45 = vrot.slane %v10884_v26, %v16478_v7  ;;  %v10899_v50 = vrot.slane %v10883_v0, %v16478_v7 }
0x1e05   :  { %v11081_v25 = vrot.slane %v11059_v20, %v16478_v7  ;;  %v11088_v47 = vrot.slane %v14390_v6, %v16478_v7  ;;  %v11089_v58 = vcombine.low %v11067_v36, %v11074_v27  ;;  %v10785_v13 = vpop.permute.xlu1 %10784  ;;  %v10783_v27 = vpop.permute.xlu0 %10782 }
0x1e06   :  { %v10913_v31 = vrot.slane %v10885_v57, %v16478_v7  ;;  %v11106_v30 = vcombine.low %v10892_v55, %v10906_v45  ;;  %v14391_v18 = vcombine.high %v10892_v55, %v10906_v45  ;;  %v10811_v35 = vsel %vm3901_vm9, %v10805_v2, %v10785_v13 }
0x1e07   :  { %v11090_v11 = vcombine.low %v11081_v25, %v11088_v47  ;;  %v11097_v9 = vrot.slane %v11089_v58, %v16478_v7  ;;  %v10932_v43 = vcombine.high %v10811_v35, %v10811_v35  ;;  %v10939_v56 = vrot.slane %v10811_v35, %v16478_v7 }
0x1e08   :  { %v11108_v4 = vcombine.low %v10899_v50, %v10913_v31  ;;  %v14392_v15 = vcombine.high %v10899_v50, %v10913_v31  ;;  %v11116_v51 = vrot.slane %v11106_v30, %v16478_v7  ;;  %v11123_v29 = vrot.slane %v14391_v18, %v16478_v7 }
0x1e09   :  { %v11104_v46 = vrot.slane %v11090_v11, %v16478_v7  ;;  %v10946_v34 = vrot.slane %v10932_v43, %v16478_v7  ;;  %v10947_v1 = vcombine.high %v10939_v56, %v10939_v56  ;;  %v10955_v0 = vrot.slane %v10939_v56, %v16478_v7  ;;  %v10759_v39 = vpop.permute.xlu1 %10758 }
0x1e0a   :  { %v11130_v26 = vrot.slane %v11108_v4, %v16478_v7  ;;  %v11137_v2 = vrot.slane %v14392_v15, %v16478_v7  ;;  %v11138_v20 = vcombine.low %v11116_v51, %v11123_v29  ;;  %v10804_v6 = vsel %vm3894_vm8, %v10798_v5, %v10759_v39 }
0x1e0b   :  { %v11105_v36 = vcombine.low %v11097_v9, %v11104_v46  ;;  %v10948_v57 = vcombine.high %v10946_v34, %v10946_v34  ;;  %v10962_v55 = vrot.slane %v10946_v34, %v16478_v7  ;;  %v10969_v45 = vrot.slane %v10947_v1, %v16478_v7 }
0x1e0c   :  { %v10977_v25 = vcombine.high %v10955_v0, %v10955_v0  ;;  %v10810_v47 = vsel %vm3901_vm9, %v10804_v6, %v10783_v27  ;;  %v11139_v58 = vcombine.low %v11130_v26, %v11137_v2  ;;  %v11146_v5 = vrot.slane %v11138_v20, %v16478_v7 }
0x1e0d   :  { %v19946_v50 = vrot.slane %v10948_v57, %v16478_v7  ;;  %v10978_v13 = vcombine.high %v10962_v55, %v10962_v55  ;;  %v10979_v31 = vcombine.high %v10969_v45, %v10969_v45  ;;  %v10924_v30 = vrot.slane %v10810_v47, %v16478_v7  ;;  %15335 = vmatmul.mubr.msk.f32.vlgmr.msra.gmra.mrb[124].mxu1 %vm1388_vm2, %v11105_v36 }
0x1e0e   :  { %15337 = vmatprep.mubr.msk.f32.mxu1 %vm16244_vm0, %v21258_v42  ;;  %v11153_v18 = vrot.slane %v11139_v58, %v16478_v7  ;;  %v11156_v35 = vcombine.low %v10969_v45, %v10977_v25 }
0x1e0f   :  { %21289 = vst [vmem:[#allocation28_spill] sm:$0xff] %v19946_v50  ;;  %v11157_v11 = vcombine.low %v10979_v31, %v10962_v55  ;;  %v11158_v9 = vcombine.low %v19946_v50, %v10978_v13  ;;  %v10931_v43 = vrot.slane %v10924_v30, %v16478_v7 }
0x1e10   :  { %v11154_v56 = vcombine.low %v11146_v5, %v11153_v18  ;;  %v11172_v29 = vrot.slane %v11156_v35, %v16478_v7 }
0x1e11   :  { %v11179_v4 = vrot.slane %v11157_v11, %v16478_v7  ;;  %v11186_v15 = vrot.slane %v11158_v9, %v16478_v7  ;;  %v11155_v51 = vcombine.low %v10931_v43, %v10955_v0 }
0x1e12   :  { %15338 = vmatmul.mubr.msk.f32.gmra.mrb[126].mxu1 %vm1388_vm2, %v11154_v56 }
0x1e13   :  { %v11165_v46 = vrot.slane %v11155_v51, %v16478_v7  ;;  %15340 = vmatprep.mubr.msk.f32.mxu1 %vm16244_vm0, %v21258_v42  ;;  %v11188_v34 = vcombine.low %v11179_v4, %v11186_v15 }
0x1e15   :  { %v11187_v1 = vcombine.low %v11165_v46, %v11172_v29  ;;  %v11202_v39 = vrot.slane %v11188_v34, %v16478_v7 }
0x1e17   :  { %v11195_v26 = vrot.slane %v11187_v1, %v16478_v7 }
0x1e19   :  { %v11203_v2 = vcombine.low %v11195_v26, %v11202_v39 }
0x1e1b   :  { %15341 = vmatmul.mubr.msk.f32.gmra.mrb[128].mxu1 %vm1388_vm2, %v11203_v2 }
0x1e1c   :  { %15343 = vmatprep.mubr.msk.f32.mxu1 %vm16244_vm0, %v21258_v42 }
0x1e3f   :  { %v10477_v0 = vpop.xlane.xlu0 %10476 }
0x1e40   :  { %v10483_v20 = vsub.f32 %v19872_v41, %v10477_v0  ;;  %v14388_v41 = vld [vmem:[#allocation7 + $0x1] ss:$0 sm:$0xff] }
0x1e42   :  { %v10494_v6 = vmul.f32 1.442695, %v10483_v20 }
0x1e44   :  { %16003 = vpow2.f32 %v10494_v6 }
0x1e48   :  { %v10474_v36 = vpop.xlane.xlu1 %10473 }
0x1e49   :  { %v10482_v27 = vsub.f32 %v19870_v53, %v10474_v36 }
0x1e4b   :  { %v10492_v57 = vmul.f32 1.442695, %v10482_v27 }
0x1e4d   :  { %16005 = vpow2.f32 %v10492_v57 }
0x1e4e   :  { %v19970_v55 = vpop.eup %16003 }
0x1e4f   :  { %v10511_v45 = vsel %vm2140_vm6, %v19970_v55, 0.0 }
0x1e50   :  { %10512 = vadd.xlane.f32.xlu1 %v10511_v45 }
0x1e57   :  { %v19974_v25 = vpop.eup %16005 }
0x1e58   :  { %v10508_v47 = vsel %vm2133_vm5, %v19974_v25, 0.0 }
0x1e59   :  { %10509 = vadd.xlane.f32.xlu0 %v10508_v47 }
0x1edd   :  { %v10513_v30 = vpop.xlane.xlu1 %10512 }
0x1ede   :  { %16007 = vrcp.f32 %v10513_v30 }
0x1ee0   :  { %v11344_v58 = vpop.f32.mrb[124].mxu1 }
0x1ee1   :  { %v11345_v13 = vadd.f32 %v14388_v41, %v11344_v58  ;;  %v15336_v31 = vpop.f32.mrb[125].mxu1  ;;  %v21290_v58 = vld [vmem:[#allocation47_spill] sm:$0xff] }
0x1ee3   :  { %v11373_v53 = vcombine.high %v11345_v13, %v11345_v13  ;;  %v11380_v5 = vrot.slane %v11345_v13, %v16478_v7 }
0x1ee5   :  { %v11387_v18 = vrot.slane %v11373_v53, %v16478_v7  ;;  %v11388_v35 = vcombine.high %v11380_v5, %v11380_v5  ;;  %v11396_v11 = vrot.slane %v11380_v5, %v16478_v7  ;;  %v11349_v9 = vpop.f32.mrb[126].mxu1  ;;  %v21292_v53 = vld [vmem:[#allocation32_spill] sm:$0xff] }
0x1ee6   :  { %v11350_v43 = vadd.f32 %v14388_v41, %v11349_v9  ;;  %v15339_v56 = vpop.f32.mrb[127].mxu1  ;;  %v10510_v4 = vpop.xlane.xlu0 %10509 }
0x1ee7   :  { %v11389_v15 = vcombine.high %v11387_v18, %v11387_v18  ;;  %v11403_v51 = vrot.slane %v11387_v18, %v16478_v7  ;;  %v11410_v29 = vrot.slane %v11388_v35, %v16478_v7  ;;  %v11418_v46 = vcombine.high %v11396_v11, %v11396_v11 }
0x1ee8   :  { %v11422_v34 = vcombine.high %v11350_v43, %v11350_v43  ;;  %v11429_v1 = vrot.slane %v11350_v43, %v16478_v7  ;;  %16009 = vrcp.f32 %v10510_v4  ;;  %v19989_v20 = vadd.f32 %v11396_v11, %v19051_v49 }
0x1ee9   :  { %v11417_v39 = vrot.slane %v11389_v15, %v16478_v7  ;;  %v11419_v26 = vcombine.high %v11403_v51, %v11403_v51  ;;  %v11420_v2 = vcombine.high %v11410_v29, %v11410_v29  ;;  %v19986_v0 = vadd.f32 %v11410_v29, %v19054_v8  ;;  %v21291_v8 = vld [vmem:[#allocation31_spill] sm:$0xff] }
0x1eea   :  { %v19992_v6 = vadd.f32 %v11418_v46, %v19057_v10  ;;  %v11436_v36 = vrot.slane %v11422_v34, %v16478_v7  ;;  %v11437_v27 = vcombine.high %v11429_v1, %v11429_v1  ;;  %v19999_v47 = vadd.f32 %v11403_v51, %v19063_v60  ;;  %v16008_v34 = vpop.eup %16007 }
0x1eeb   :  { %v11421_v57 = vcombine.high %v11417_v39, %v11417_v39  ;;  %v19996_v45 = vadd.f32 %v11420_v2, %v19060_v16  ;;  %v20002_v13 = vadd.f32 %v11417_v39, %v21290_v58  ;;  %v20005_v31 = vadd.f32 %v11419_v26, %v21291_v8  ;;  %v21295_v8 = vld [vmem:[#allocation30_spill] sm:$0xff] }
0x1eec   :  { %v11438_v49 = vcombine.high %v11436_v36, %v11436_v36  ;;  %v11445_v10 = vrot.slane %v11429_v1, %v16478_v7  ;;  %v11452_v30 = vrot.slane %v11436_v36, %v16478_v7  ;;  %v11697_v16 = vcombine.low %v19989_v20, %v19986_v0  ;;  %v21293_v36 = vld [vmem:[#allocation29_spill] sm:$0xff] }
0x1eed   :  { %v20010_v5 = vadd.f32 %v11421_v57, %v21292_v53  ;;  %v11698_v60 = vcombine.low %v19992_v6, %v19996_v45  ;;  %v11459_v18 = vrot.slane %v11437_v27, %v16478_v7  ;;  %v11699_v35 = vcombine.low %v19999_v47, %v20002_v13 }
0x1eee   :  { %v11466_v11 = vrot.slane %v11438_v49, %v16478_v7  ;;  %v11467_v9 = vcombine.high %v11445_v10, %v11445_v10  ;;  %v11468_v43 = vcombine.high %v11452_v30, %v11452_v30  ;;  %v11354_v56 = vpop.f32.mrb[128].mxu1  ;;  %v20021_v15 = vadd.f32 %v11445_v10, %v19114_v44  ;;  %v21294_v44 = vld [vmem:[#allocation48_spill] sm:$0xff] }
0x1eef   :  { %v11469_v4 = vcombine.high %v11459_v18, %v11459_v18  ;;  %v20024_v51 = vadd.f32 %v11459_v18, %v19117_v54  ;;  %v11355_v29 = vadd.f32 %v14388_v41, %v11354_v56  ;;  %v15342_v46 = vpop.f32.mrb[129].mxu1  ;;  %v20030_v26 = vadd.f32 %v11452_v30, %v19128_v28 }
0x1ef0   :  { %v11470_v1 = vcombine.high %v11466_v11, %v11466_v11  ;;  %v20027_v39 = vadd.f32 %v11467_v9, %v19120_v62  ;;  %v20033_v2 = vadd.f32 %v11466_v11, %v19131_v63  ;;  %v20039_v57 = vadd.f32 %v11468_v43, %v21294_v44 }
0x1ef1   :  { %v20036_v27 = vadd.f32 %v11469_v4, %v21293_v36  ;;  %v11471_v54 = vcombine.high %v11355_v29, %v11355_v29  ;;  %v11478_v41 = vrot.slane %v11355_v29, %v16478_v7  ;;  %v11746_v62 = vcombine.low %v20021_v15, %v20024_v51 }
0x1ef2   :  { %v16010_v58 = vpop.eup %16009  ;;  %v20043_v49 = vadd.f32 %v11470_v1, %v21295_v8  ;;  %v11748_v28 = vcombine.low %v20030_v26, %v20033_v2  ;;  %v11700_v63 = vcombine.low %v20005_v31, %v20010_v5  ;;  %v10525_v18 = vmul.f32 %v16008_v34, %v19970_v55 }
0x1ef3   :  { %v11485_v10 = vrot.slane %v11471_v54, %v16478_v7  ;;  %v11486_v30 = vcombine.high %v11478_v41, %v11478_v41  ;;  %v11494_v53 = vrot.slane %v11478_v41, %v16478_v7  ;;  %v11747_v11 = vcombine.low %v20027_v39, %v20036_v27 }
0x1ef4   :  { %v10524_v9 = vmul.f32 %v16010_v58, %v19974_v25  ;;  %v11707_v43 = vrot.slane %v11697_v16, %v16478_v7  ;;  %v11714_v56 = vrot.slane %v11698_v60, %v16478_v7  ;;  %v11721_v55 = vrot.slane %v11699_v35, %v16478_v7 }
0x1ef5   :  { %v11487_v4 = vcombine.high %v11485_v10, %v11485_v10  ;;  %v11501_v29 = vrot.slane %v11485_v10, %v16478_v7  ;;  %v11508_v46 = vrot.slane %v11486_v30, %v16478_v7  ;;  %v11516_v1 = vcombine.high %v11494_v53, %v11494_v53 }
0x1ef6   :  { %v20062_v36 = vadd.f32 %v11494_v53, %v19181_v12  ;;  %15321 = vmatmul.mubr.msk.f32.gmra.mrb[124].mxu0 %vm2133_vm5, %v10524_v9  ;;  %v11728_v34 = vrot.slane %v11700_v63, %v16478_v7  ;;  %v11729_v25 = vcombine.low %v11707_v43, %v11714_v56  ;;  %v11749_v58 = vcombine.low %v20039_v57, %v20043_v49  ;;  %v21296_v9 = vld [vmem:[#allocation33_spill] sm:$0xff] }
0x1ef7   :  { %v11515_v16 = vrot.slane %v11487_v4, %v16478_v7  ;;  %v11517_v44 = vcombine.high %v11501_v29, %v11501_v29  ;;  %v11518_v60 = vcombine.high %v11508_v46, %v11508_v46  ;;  %v20069_v54 = vadd.f32 %v11508_v46, %v19184_v24  ;;  %15323 = vmatprep.mubr.msk.f32.mxu0 %vm16244_vm0, %v21258_v42 }
0x1ef8   :  { %v20074_v12 = vadd.f32 %v11516_v1, %v19187_v3  ;;  %v20077_v41 = vadd.f32 %v11501_v29, %v19193_v32  ;;  %v11730_v35 = vcombine.low %v11721_v55, %v11728_v34  ;;  %v11737_v10 = vrot.slane %v11729_v25, %v16478_v7 }
0x1ef9   :  { %v11519_v8 = vcombine.high %v11515_v16, %v11515_v16  ;;  %v20082_v63 = vadd.f32 %v11518_v60, %v19190_v38  ;;  %v20085_v24 = vadd.f32 %v11515_v16, %v19196_v23  ;;  %v11795_v3 = vcombine.low %v20062_v36, %v20069_v54  ;;  %v21297_v38 = vld [vmem:[#allocation34_spill] sm:$0xff] }
0x1efa   :  { %15324 = vmatmul.mubr.msk.f32.gmra.mrb[126].mxu0 %vm2133_vm5, %v10525_v18  ;;  %v11744_v32 = vrot.slane %v11730_v35, %v16478_v7  ;;  %v11756_v30 = vrot.slane %v11746_v62, %v16478_v7  ;;  %v11763_v53 = vrot.slane %v11747_v11, %v16478_v7  ;;  %v20095_v43 = vadd.f32 %v11517_v44, %v21296_v9 }
0x1efb   :  { %v20098_v56 = vadd.f32 %v11519_v8, %v21297_v38  ;;  %v11796_v23 = vcombine.low %v20074_v12, %v20082_v63  ;;  %v11797_v4 = vcombine.low %v20077_v41, %v20085_v24  ;;  %15357 = vmatprep.mubr.msk.f32.mxu0 %vm16244_vm0, %v21258_v42  ;;  %v11770_v62 = vrot.slane %v11748_v28, %v16478_v7 }
0x1efc   :  { %v11745_v18 = vcombine.low %v11737_v10, %v11744_v32  ;;  %v11777_v11 = vrot.slane %v11749_v58, %v16478_v7  ;;  %v11778_v29 = vcombine.low %v11756_v30, %v11763_v53  ;;  %v11805_v1 = vrot.slane %v11795_v3, %v16478_v7 }
0x1efd   :  { %v11798_v46 = vcombine.low %v20095_v43, %v20098_v56  ;;  %v11812_v55 = vrot.slane %v11796_v23, %v16478_v7  ;;  %v11819_v16 = vrot.slane %v11797_v4, %v16478_v7  ;;  %v21298_v23 = vld [vmem:[#allocation21_spill] sm:$0xff] }
0x1efe   :  { %v11913_v34 = vsel %vm1388_vm2, %v11745_v18, 0.0  ;;  %v11779_v25 = vcombine.low %v11770_v62, %v11777_v11  ;;  %v11786_v28 = vrot.slane %v11778_v29, %v16478_v7  ;;  %v21299_v18 = vld [vmem:[#allocation24_spill] sm:$0xff]  ;;  %v21300_v11 = vld [vmem:[#allocation22_spill] sm:$0xff] }
0x1eff   :  { %11914 = vadd.xlane.f32.xlu0 %v11913_v34  ;;  %v11826_v44 = vrot.slane %v11798_v46, %v16478_v7  ;;  %v11827_v60 = vcombine.low %v11805_v1, %v11812_v55  ;;  %v21301_v46 = vld [vmem:[#allocation23_spill] sm:$0xff]  ;;  %v21302_v55 = vld [vmem:[#allocation25_spill] sm:$0xff] }
0x1f00   :  { %v11793_v35 = vrot.slane %v11779_v25, %v16478_v7  ;;  %v21303_v25 = vld [vmem:[#allocation26_spill] sm:$0xff] }
0x1f01   :  { %v11828_v58 = vcombine.low %v11819_v16, %v11826_v44  ;;  %v11835_v10 = vrot.slane %v11827_v60, %v16478_v7  ;;  %v21304_v44 = vld [vmem:[#allocation27_spill] sm:$0xff] }
0x1f02   :  { %v11794_v8 = vcombine.low %v11786_v28, %v11793_v35 }
0x1f03   :  { %v11842_v3 = vrot.slane %v11828_v58, %v16478_v7 }
0x1f04   :  { %v11916_v32 = vsel %vm1388_vm2, %v11794_v8, 0.0 }
0x1f05   :  { %11917 = vadd.xlane.f32.xlu1 %v11916_v32  ;;  %v11843_v30 = vcombine.low %v11835_v10, %v11842_v3 }
0x1f07   :  { %v11919_v53 = vsel %vm1388_vm2, %v11843_v30, 0.0 }
0x1f08   :  { %11920 = vadd.xlane.f32.xlu0 %v11919_v53 }
0x1f8c   :  { %v11915_v9 = vpop.xlane.xlu0 %11914 }
0x1f8d   :  { %v11928_v38 = vmul.f32 0.03125, %v11915_v9 }
0x1f8f   :  { %v11941_v4 = vrot.slane %v11928_v38, %v21298_v23  ;;  %v11945_v62 = vrot.slane %v11928_v38, %v21299_v18  ;;  %v11949_v29 = vrot.slane %v11928_v38, %v21300_v11  ;;  %v11953_v1 = vrot.slane %v11928_v38, %v21301_v46 }
0x1f90   :  { %v11957_v34 = vrot.slane %v11928_v38, %v21302_v55  ;;  %v11961_v16 = vrot.slane %v11928_v38, %v21303_v25  ;;  %v11965_v60 = vrot.slane %v11928_v38, %v21304_v44  ;;  %v11969_v28 = vrot.slane %v11928_v38, %v21237_v14 }
0x1f91   :  { %v20130_v35 = vsub.f32 %v19989_v20, %v11941_v4  ;;  %v20133_v58 = vsub.f32 %v19986_v0, %v11945_v62  ;;  %v20136_v8 = vsub.f32 %v19992_v6, %v11949_v29  ;;  %v20139_v10 = vsub.f32 %v19996_v45, %v11953_v1 }
0x1f92   :  { %v11918_v3 = vpop.xlane.xlu1 %11917  ;;  %v20142_v32 = vsub.f32 %v19999_v47, %v11957_v34  ;;  %v20145_v30 = vsub.f32 %v20002_v13, %v11961_v16  ;;  %v20148_v53 = vsub.f32 %v20005_v31, %v11965_v60  ;;  %v20151_v20 = vsub.f32 %v20010_v5, %v11969_v28 }
0x1f93   :  { %v11929_v0 = vmul.f32 0.03125, %v11918_v3  ;;  %v12142_v6 = vmul.f32 %v20130_v35, %v20130_v35  ;;  %v12143_v45 = vmul.f32 %v20133_v58, %v20133_v58  ;;  %v12144_v47 = vmul.f32 %v20136_v8, %v20136_v8 }
0x1f94   :  { %v12145_v13 = vmul.f32 %v20139_v10, %v20139_v10  ;;  %v12146_v31 = vmul.f32 %v20142_v32, %v20142_v32  ;;  %v12147_v5 = vmul.f32 %v20145_v30, %v20145_v30  ;;  %v12148_v9 = vmul.f32 %v20148_v53, %v20148_v53 }
0x1f95   :  { %v12149_v38 = vmul.f32 %v20151_v20, %v20151_v20  ;;  %v12210_v4 = vcombine.low %v12142_v6, %v12143_v45  ;;  %v11973_v62 = vrot.slane %v11929_v0, %v21298_v23  ;;  %v11977_v29 = vrot.slane %v11929_v0, %v21299_v18 }
0x1f96   :  { %v12211_v1 = vcombine.low %v12144_v47, %v12145_v13  ;;  %v12212_v34 = vcombine.low %v12146_v31, %v12147_v5  ;;  %v11981_v16 = vrot.slane %v11929_v0, %v21300_v11  ;;  %v11985_v3 = vrot.slane %v11929_v0, %v21301_v46 }
0x1f97   :  { %v12213_v60 = vcombine.low %v12148_v9, %v12149_v38  ;;  %v12220_v28 = vrot.slane %v12210_v4, %v16478_v7  ;;  %v11989_v33 = vrot.slane %v11929_v0, %v21302_v55  ;;  %v11993_v6 = vrot.slane %v11929_v0, %v21303_v25 }
0x1f98   :  { %v12227_v21 = vrot.slane %v12211_v1, %v16478_v7  ;;  %v12234_v37 = vrot.slane %v12212_v34, %v16478_v7  ;;  %v11997_v45 = vrot.slane %v11929_v0, %v21304_v44  ;;  %v12001_v13 = vrot.slane %v11929_v0, %v21237_v14 }
0x1f99   :  { %v12241_v47 = vrot.slane %v12213_v60, %v16478_v7  ;;  %v20182_v31 = vsub.f32 %v20021_v15, %v11973_v62  ;;  %v20185_v5 = vsub.f32 %v20024_v51, %v11977_v29  ;;  %v20188_v38 = vsub.f32 %v20027_v39, %v11981_v16 }
0x1f9a   :  { %v12242_v9 = vcombine.low %v12220_v28, %v12227_v21  ;;  %v20191_v4 = vsub.f32 %v20036_v27, %v11985_v3  ;;  %v20194_v1 = vsub.f32 %v20030_v26, %v11989_v33  ;;  %v20197_v60 = vsub.f32 %v20033_v2, %v11993_v6 }
0x1f9b   :  { %v12243_v34 = vcombine.low %v12234_v37, %v12241_v47  ;;  %v20200_v15 = vsub.f32 %v20039_v57, %v11997_v45  ;;  %v20203_v51 = vsub.f32 %v20043_v49, %v12001_v13  ;;  %v12150_v39 = vmul.f32 %v20182_v31, %v20182_v31 }
0x1f9c   :  { %v12250_v21 = vrot.slane %v12242_v9, %v16478_v7  ;;  %v12151_v27 = vmul.f32 %v20185_v5, %v20185_v5  ;;  %v12152_v37 = vmul.f32 %v20188_v38, %v20188_v38  ;;  %v12153_v26 = vmul.f32 %v20191_v4, %v20191_v4 }
0x1f9d   :  { %v12257_v33 = vrot.slane %v12243_v34, %v16478_v7  ;;  %v12154_v2 = vmul.f32 %v20194_v1, %v20194_v1  ;;  %v12155_v57 = vmul.f32 %v20197_v60, %v20197_v60  ;;  %v12156_v49 = vmul.f32 %v20200_v15, %v20200_v15 }
0x1f9e   :  { %v12157_v0 = vmul.f32 %v20203_v51, %v20203_v51  ;;  %v12259_v62 = vcombine.low %v12150_v39, %v12151_v27  ;;  %v12260_v16 = vcombine.low %v12152_v37, %v12153_v26  ;;  %v11921_v37 = vpop.xlane.xlu0 %11920 }
0x1f9f   :  { %v12258_v29 = vcombine.low %v12250_v21, %v12257_v33  ;;  %v12261_v28 = vcombine.low %v12154_v2, %v12155_v57  ;;  %v11930_v33 = vmul.f32 0.03125, %v11921_v37  ;;  %v14402_v37 = vld [vmem:[%s20995_s9 + $0x30] sm:$0xff] }
0x1fa0   :  { %v12262_v3 = vcombine.low %v12156_v49, %v12157_v0  ;;  %v12269_v6 = vrot.slane %v12259_v62, %v16478_v7  ;;  %v12276_v47 = vrot.slane %v12260_v16, %v16478_v7 }
0x1fa1   :  { %v12426_v45 = vsel %vm1388_vm2, %v12258_v29, 0.0  ;;  %v12283_v13 = vrot.slane %v12261_v28, %v16478_v7  ;;  %v12005_v26 = vrot.slane %v11930_v33, %v21298_v23  ;;  %v12009_v2 = vrot.slane %v11930_v33, %v21299_v18 }
0x1fa2   :  { %12427 = vadd.xlane.f32.xlu1 %v12426_v45  ;;  %v12290_v9 = vrot.slane %v12262_v3, %v16478_v7  ;;  %v12291_v34 = vcombine.low %v12269_v6, %v12276_v47  ;;  %v12013_v57 = vrot.slane %v11930_v33, %v21300_v11  ;;  %v12017_v49 = vrot.slane %v11930_v33, %v21301_v46 }
0x1fa3   :  { %v12021_v0 = vrot.slane %v11930_v33, %v21302_v55  ;;  %v12033_v62 = vrot.slane %v11930_v33, %v21237_v14  ;;  %v20242_v29 = vsub.f32 %v20062_v36, %v12005_v26 }
0x1fa4   :  { %v12292_v22 = vcombine.low %v12283_v13, %v12290_v9  ;;  %v12299_v50 = vrot.slane %v12291_v34, %v16478_v7  ;;  %v20248_v16 = vsub.f32 %v20074_v12, %v12013_v57  ;;  %v20251_v28 = vsub.f32 %v20082_v63, %v12017_v49 }
0x1fa5   :  { %v20254_v3 = vsub.f32 %v20077_v41, %v12021_v0  ;;  %v20263_v36 = vsub.f32 %v20098_v56, %v12033_v62 }
0x1fa6   :  { %v12306_v21 = vrot.slane %v12292_v22, %v16478_v7  ;;  %v12025_v22 = vrot.slane %v11930_v33, %v21303_v25  ;;  %v12160_v63 = vmul.f32 %v20248_v16, %v20248_v16  ;;  %v12161_v41 = vmul.f32 %v20251_v28, %v20251_v28 }
0x1fa7   :  { %21305 = vst [vmem:[#allocation44_spill] sm:$0xff] %v20254_v3  ;;  %21308 = vst [vmem:[#allocation47_spill] sm:$0xff] %v20263_v36  ;;  %v12165_v47 = vmul.f32 %v20263_v36, %v20263_v36 }
0x1fa8   :  { %v12307_v39 = vcombine.low %v12299_v50, %v12306_v21  ;;  %v12029_v50 = vrot.slane %v11930_v33, %v21304_v44  ;;  %v20257_v6 = vsub.f32 %v20085_v24, %v12025_v22  ;;  %v12162_v24 = vmul.f32 %v20254_v3, %v20254_v3  ;;  %v14403_v33 = vld [vmem:[%s20995_s9 + $0x38] sm:$0xff] }
0x1fa9   :  { %v12309_v9 = vcombine.low %v12160_v63, %v12161_v41  ;;  %v15567_v0 = vpack.c.bf16 %v14403_v33, %v14402_v37 }
0x1faa   :  { %v12429_v27 = vsel %vm1388_vm2, %v12307_v39, 0.0  ;;  %21306 = vst [vmem:[#allocation46_spill] sm:$0xff] %v20257_v6  ;;  %v20260_v45 = vsub.f32 %v20095_v43, %v12029_v50  ;;  %v12163_v43 = vmul.f32 %v20257_v6, %v20257_v6  ;;  %v14400_v39 = vld [vmem:[%s20995_s9 + $0x20] sm:$0xff] }
0x1fab   :  { %12430 = vadd.xlane.f32.xlu0 %v12429_v27  ;;  %v14401_v27 = vld [vmem:[%s20995_s9 + $0x28] sm:$0xff] }
0x1fac   :  { %21307 = vst [vmem:[#allocation36_spill] sm:$0xff] %v20260_v45  ;;  %v12164_v56 = vmul.f32 %v20260_v45, %v20260_v45  ;;  %v12310_v34 = vcombine.low %v12162_v24, %v12163_v43 }
0x1fae   :  { %v12311_v21 = vcombine.low %v12164_v56, %v12165_v47  ;;  %v12332_v57 = vrot.slane %v12310_v34, %v16478_v7  ;;  %v14398_v56 = vld [vmem:[#allocation8 + $0x1] ss:$0 sm:$0xff]  ;;  %v14399_v47 = vld [vmem:[#allocation10 + $0x1] ss:$0 sm:$0xff] }
0x1fb0   :  { %v12339_v49 = vrot.slane %v12311_v21, %v16478_v7  ;;  %v12677_v21 = vrot.slane %v14398_v56, %v16478_v7 }
0x1fb2   :  { %v12341_v62 = vcombine.low %v12332_v57, %v12339_v49  ;;  %v12685_v33 = vcombine.high %v12677_v21, %v12677_v21  ;;  %v20315_v49 = vrot.slane %v12677_v21, %v16478_v7 }
0x1fb3   :  { %10762 = vrot.lane.b32.xlu1 %v19813_v40, %s16233_s1  ;;  %v20245_v40 = vsub.f32 %v20069_v54, %v12009_v2  ;;  %v12158_v54 = vmul.f32 %v20242_v29, %v20242_v29  ;;  %v12325_v2 = vrot.slane %v12309_v9, %v16478_v7 }
0x1fb4   :  { %v12355_v41 = vrot.slane %v12341_v62, %v16478_v7 }
0x1fb5   :  { %v12159_v12 = vmul.f32 %v20245_v40, %v20245_v40 }
0x1fb7   :  { %v12308_v13 = vcombine.low %v12158_v54, %v12159_v12 }
0x1fb9   :  { %v12318_v26 = vrot.slane %v12308_v13, %v16478_v7  ;;  %v12670_v13 = vcombine.high %v14398_v56, %v14398_v56 }
0x1fbb   :  { %v12684_v37 = vrot.slane %v12670_v13, %v16478_v7 }
0x1fc1   :  { %10738 = vrot.lane.b32.xlu0 %v19697_v48, %s16239_s4  ;;  %v15564_v48 = vpack.c.bf16 %v14401_v27, %v14400_v39  ;;  %v12766_v39 = vcombine.high %v14399_v47, %v14399_v47 }
0x1fc3   :  { %15565 = vmatpush3.bf16.msra.mxu0 %v15564_v48  ;;  %v12773_v48 = vrot.slane %v14399_v47, %v16478_v7 }
0x1fc4   :  { %15566 = vmatprep.subr.bf16.mxu0 %v21288_v52 }
0x1fc5   :  { %10740 = vrot.lane.b32.xlu0 %v19699_v61, %s16239_s4  ;;  %v12340_v61 = vcombine.low %v12318_v26, %v12325_v2  ;;  %v12780_v26 = vrot.slane %v12766_v39, %v16478_v7  ;;  %v12686_v2 = vcombine.high %v12684_v37, %v12684_v37  ;;  %v12781_v57 = vcombine.high %v12773_v48, %v12773_v48 }
0x1fc7   :  { %15568 = vmatpush3.bf16.msra.mxu0 %v15567_v0  ;;  %v12348_v63 = vrot.slane %v12340_v61, %v16478_v7  ;;  %v12782_v61 = vcombine.high %v12780_v26, %v12780_v26  ;;  %v20324_v62 = vrot.slane %v12686_v2, %v16478_v7 }
0x1fc8   :  { %15575 = vmatprep.subr.bf16.mxu0 %v21288_v52 }
0x1fc9   :  { %v10715_v22 = vpop.f32.mrb[124].mxu0  ;;  %v12356_v24 = vcombine.low %v12348_v63, %v12355_v41  ;;  %v20333_v63 = vrot.slane %v12781_v57, %v16478_v7  ;;  %v20348_v47 = vrot.slane %v12782_v61, %v16478_v7 }
0x1fca   :  { %v15322_v50 = vpop.f32.mrb[125].mxu0 }
0x1fcb   :  { %v12432_v43 = vsel %vm1388_vm2, %v12356_v24, 0.0  ;;  %v20321_v50 = vrot.slane %v12685_v33, %v16478_v7  ;;  %v20337_v24 = vcombine.high %v20315_v49, %v20315_v49  ;;  %21310 = vst [vmem:[#allocation32_spill] sm:$0xff] %v20348_v47  ;;  %v20364_v39 = vcombine.high %v20333_v63, %v20333_v63 }
0x1fcc   :  { %v20379_v52 = vcombine.high %v20348_v47, %v20348_v47 }
0x1fcd   :  { %v10720_v54 = vpop.f32.mrb[126].mxu0  ;;  %v20345_v56 = vcombine.high %v20321_v50, %v20321_v50 }
0x1fce   :  { %10788 = vrot.lane.b32.xlu0 %v10720_v54, %s16258_s30  ;;  %v15325_v12 = vpop.f32.mrb[127].mxu0  ;;  %v20327_v54 = vrot.slane %v12773_v48, %v16478_v7  ;;  %21312 = vst [vmem:[#allocation48_spill] sm:$0xff] %v20379_v52 }
0x1fcf   :  { %v20330_v12 = vrot.slane %v12780_v26, %v16478_v7 }
0x1fd1   :  { %21309 = vst [vmem:[#allocation31_spill] sm:$0xff] %v20330_v12  ;;  %v20360_v21 = vcombine.high %v20330_v12, %v20330_v12 }
0x1fd3   :  { %21311 = vst [vmem:[#allocation29_spill] sm:$0xff] %v20360_v21 }
0x1fd7   :  { %12433 = vadd.xlane.f32.xlu1 %v12432_v43 }
0x1fe8   :  { %10786 = vrot.lane.b32.xlu1 %v10715_v22, %s16258_s30  ;;  %v20318_v22 = vrot.slane %v12684_v37, %v16478_v7 }
0x1fea   :  { %v20341_v43 = vcombine.high %v20318_v22, %v20318_v22 }
0x1fec   :  { %10764 = vrot.lane.b32.xlu1 %v19816_v59, %s16233_s1 }
0x202f   :  { %v12428_v9 = vpop.xlane.xlu1 %12427 }
0x2030   :  { %v12441_v34 = vmul.f32 0.03125, %v12428_v9  ;;  %v20352_v9 = vcombine.high %v20324_v62, %v20324_v62 }
0x2032   :  { %v12446_v27 = vadd.f32 1e-05, %v12441_v34  ;;  %v20356_v34 = vcombine.high %v20327_v54, %v20327_v54 }
0x2034   :  { %16011 = vrsqrt.f32 %v12446_v27 }
0x2038   :  { %v12431_v59 = vpop.xlane.xlu0 %12430 }
0x2039   :  { %v12442_v0 = vmul.f32 0.03125, %v12431_v59 }
0x203b   :  { %v12447_v41 = vadd.f32 1e-05, %v12442_v0 }
0x203d   :  { %16013 = vrsqrt.f32 %v12447_v41 }
0x203e   :  { %v16012_v13 = vpop.eup %16011 }
0x203f   :  { %v12464_v27 = vrot.slane %v16012_v13, %v21298_v23  ;;  %v12468_v37 = vrot.slane %v16012_v13, %v21299_v18  ;;  %v12472_v48 = vrot.slane %v16012_v13, %v21300_v11  ;;  %v12476_v33 = vrot.slane %v16012_v13, %v21301_v46 }
0x2040   :  { %v12480_v26 = vrot.slane %v16012_v13, %v21302_v55  ;;  %v12484_v2 = vrot.slane %v16012_v13, %v21303_v25  ;;  %v12488_v57 = vrot.slane %v16012_v13, %v21304_v44  ;;  %v12492_v59 = vrot.slane %v16012_v13, %v21237_v14 }
0x2041   :  { %v12631_v0 = vmul.f32 %v12464_v27, %v20130_v35  ;;  %v12632_v61 = vmul.f32 %v12468_v37, %v20133_v58  ;;  %v12633_v41 = vmul.f32 %v12472_v48, %v20136_v8  ;;  %v12634_v36 = vmul.f32 %v12476_v33, %v20139_v10 }
0x2042   :  { %v12635_v45 = vmul.f32 %v12480_v26, %v20142_v32  ;;  %v12636_v6 = vmul.f32 %v12484_v2, %v20145_v30  ;;  %v12637_v3 = vmul.f32 %v12488_v57, %v20148_v53  ;;  %v12638_v13 = vmul.f32 %v12492_v59, %v20151_v20 }
0x2043   :  { %v12727_v35 = vmul.f32 %v20315_v49, %v12631_v0  ;;  %v12728_v58 = vmul.f32 %v20321_v50, %v12632_v61  ;;  %v12729_v8 = vmul.f32 %v20337_v24, %v12633_v41  ;;  %v12730_v27 = vmul.f32 %v20345_v56, %v12634_v36 }
0x2044   :  { %v12731_v37 = vmul.f32 %v20318_v22, %v12635_v45  ;;  %v12732_v10 = vmul.f32 %v20324_v62, %v12636_v6  ;;  %v12733_v32 = vmul.f32 %v20341_v43, %v12637_v3  ;;  %v12734_v30 = vmul.f32 %v20352_v9, %v12638_v13 }
0x2045   :  { %v20395_v53 = vadd.f32 %v20327_v54, %v12727_v35  ;;  %v20398_v20 = vadd.f32 %v20333_v63, %v12728_v58  ;;  %v20401_v48 = vadd.f32 %v20356_v34, %v12729_v8  ;;  %v20404_v33 = vadd.f32 %v20364_v39, %v12730_v27 }
0x2046   :  { %v20407_v45 = vadd.f32 %v20330_v12, %v12731_v37  ;;  %v20410_v6 = vadd.f32 %v20348_v47, %v12732_v10  ;;  %v20413_v3 = vadd.f32 %v20360_v21, %v12733_v32  ;;  %v20416_v26 = vadd.f32 %v20379_v52, %v12734_v30 }
0x2047   :  { %21313 = vst [vmem:[#allocation30_spill] sm:$0xff] %v20395_v53  ;;  %21314 = vst [vmem:[#allocation33_spill] sm:$0xff] %v20401_v48  ;;  %v16014_v36 = vpop.eup %16013  ;;  %v12904_v2 = vcombine.low %v20395_v53, %v20398_v20  ;;  %v12905_v57 = vcombine.low %v20401_v48, %v20404_v33 }
0x2048   :  { %21315 = vst [vmem:[#allocation34_spill] sm:$0xff] %v20404_v33  ;;  %21316 = vst [vmem:[#allocation21_spill] sm:$0xff] %v20407_v45  ;;  %v12906_v59 = vcombine.low %v20407_v45, %v20410_v6  ;;  %v12496_v0 = vrot.slane %v16014_v36, %v21298_v23  ;;  %v12500_v61 = vrot.slane %v16014_v36, %v21299_v18 }
0x2049   :  { %21317 = vst [vmem:[#allocation24_spill] sm:$0xff] %v20410_v6  ;;  %21318 = vst [vmem:[#allocation22_spill] sm:$0xff] %v20413_v3  ;;  %v12907_v41 = vcombine.low %v20413_v3, %v20416_v26  ;;  %v12914_v13 = vrot.slane %v12904_v2, %v16478_v7  ;;  %v12504_v35 = vrot.slane %v16014_v36, %v21300_v11 }
0x204a   :  { %21319 = vst [vmem:[#allocation23_spill] sm:$0xff] %v20416_v26  ;;  %v12508_v58 = vrot.slane %v16014_v36, %v21301_v46  ;;  %v12921_v8 = vrot.slane %v12905_v57, %v16478_v7  ;;  %v12928_v27 = vrot.slane %v12906_v59, %v16478_v7  ;;  %v12512_v37 = vrot.slane %v16014_v36, %v21302_v55 }
0x204b   :  { %v12516_v10 = vrot.slane %v16014_v36, %v21303_v25  ;;  %v12935_v32 = vrot.slane %v12907_v41, %v16478_v7  ;;  %v12520_v30 = vrot.slane %v16014_v36, %v21304_v44  ;;  %v12524_v26 = vrot.slane %v16014_v36, %v21237_v14 }
0x204c   :  { %v12639_v2 = vmul.f32 %v12496_v0, %v20182_v31  ;;  %v12936_v3 = vcombine.low %v12914_v13, %v12921_v8  ;;  %v12640_v6 = vmul.f32 %v12500_v61, %v20185_v5  ;;  %v12641_v45 = vmul.f32 %v12504_v35, %v20188_v38 }
0x204d   :  { %v12642_v57 = vmul.f32 %v12508_v58, %v20191_v4  ;;  %v12937_v59 = vcombine.low %v12928_v27, %v12935_v32  ;;  %v12643_v33 = vmul.f32 %v12512_v37, %v20194_v1  ;;  %v12644_v48 = vmul.f32 %v12516_v10, %v20197_v60 }
0x204e   :  { %v12645_v41 = vmul.f32 %v12520_v30, %v20200_v15  ;;  %v12944_v53 = vrot.slane %v12936_v3, %v16478_v7  ;;  %v12646_v36 = vmul.f32 %v12524_v26, %v20203_v51  ;;  %v12735_v31 = vmul.f32 %v20315_v49, %v12639_v2 }
0x204f   :  { %v12736_v0 = vmul.f32 %v20321_v50, %v12640_v6  ;;  %v12951_v5 = vrot.slane %v12937_v59, %v16478_v7  ;;  %v12737_v38 = vmul.f32 %v20337_v24, %v12641_v45  ;;  %v12738_v4 = vmul.f32 %v20345_v56, %v12642_v57 }
0x2050   :  { %v12739_v1 = vmul.f32 %v20318_v22, %v12643_v33  ;;  %v12740_v60 = vmul.f32 %v20324_v62, %v12644_v48  ;;  %v12741_v15 = vmul.f32 %v20341_v43, %v12645_v41  ;;  %v12742_v3 = vmul.f32 %v20352_v9, %v12646_v36 }
0x2051   :  { %v12831_v51 = vadd.f32 %v20327_v54, %v12735_v31  ;;  %v12952_v26 = vcombine.low %v12944_v53, %v12951_v5  ;;  %v12832_v61 = vadd.f32 %v20333_v63, %v12736_v0  ;;  %v12833_v6 = vadd.f32 %v20356_v34, %v12737_v38  ;;  %v10763_v31 = vpop.permute.xlu1 %10762  ;;  %v10739_v0 = vpop.permute.xlu0 %10738 }
0x2052   :  { %v12834_v13 = vadd.f32 %v20364_v39, %v12738_v4  ;;  %v12835_v45 = vadd.f32 %v20330_v12, %v12739_v1  ;;  %v12836_v35 = vadd.f32 %v20348_v47, %v12740_v60  ;;  %v12837_v33 = vadd.f32 %v20360_v21, %v12741_v15 }
0x2053   :  { %v12838_v48 = vadd.f32 %v20379_v52, %v12742_v3  ;;  %15358 = vmatmul.mubr.msk.f32.vlgmr.msra.gmra.mrb[128].mxu0 %vm1388_vm2, %v12952_v26  ;;  %v12953_v58 = vcombine.low %v12831_v51, %v12832_v61  ;;  %v10800_v38 = vsel %vm1830_vm3, %v19569_v19, %v10739_v0 }
0x2054   :  { %v12954_v8 = vcombine.low %v12833_v6, %v12834_v13  ;;  %15360 = vmatprep.mubr.msk.f32.mxu0 %vm16244_vm0, %v21258_v42  ;;  %v12955_v53 = vcombine.low %v12835_v45, %v12836_v35  ;;  %v10806_v60 = vsel %vm3894_vm8, %v10800_v38, %v10763_v31 }
0x2055   :  { %v12956_v27 = vcombine.low %v12837_v33, %v12838_v48  ;;  %v12963_v37 = vrot.slane %v12953_v58, %v16478_v7  ;;  %v10741_v3 = vpop.permute.xlu0 %10740  ;;  %v21320_v33 = vld [vmem:[#allocation28_spill] sm:$0xff] }
0x2056   :  { %v12970_v10 = vrot.slane %v12954_v8, %v16478_v7  ;;  %v12977_v32 = vrot.slane %v12955_v53, %v16478_v7  ;;  %v10801_v6 = vsel %vm1830_vm3, %v19571_v17, %v10741_v3  ;;  %v10980_v48 = vcombine.high %v21320_v33, %v21320_v33 }
0x2057   :  { %v12984_v30 = vrot.slane %v12956_v27, %v16478_v7 }
0x2058   :  { %v12985_v2 = vcombine.low %v12963_v37, %v12970_v10 }
0x2059   :  { %v12986_v57 = vcombine.low %v12977_v32, %v12984_v30  ;;  %v10789_v8 = vpop.permute.xlu0 %10788 }
0x205a   :  { %v12993_v59 = vrot.slane %v12985_v2, %v16478_v7 }
0x205b   :  { %v13000_v41 = vrot.slane %v12986_v57, %v16478_v7 }
0x205d   :  { %v13001_v36 = vcombine.low %v12993_v59, %v13000_v41 }
0x205f   :  { %15361 = vmatmul.mubr.msk.f32.gmra.mrb[130].mxu0 %vm1388_vm2, %v13001_v36 }
0x2060   :  { %15363 = vmatprep.mubr.msk.f32.mxu0 %vm16244_vm0, %v21258_v42 }
0x2064   :  { %v12434_v5 = vpop.xlane.xlu1 %12433 }
0x2065   :  { %v12443_v4 = vmul.f32 0.03125, %v12434_v5 }
0x2067   :  { %v12448_v1 = vadd.f32 1e-05, %v12443_v4 }
0x2068   :  { %v10787_v15 = vpop.permute.xlu1 %10786 }
0x2069   :  { %16015 = vrsqrt.f32 %v12448_v1  ;;  %v10812_v51 = vsel %vm3901_vm9, %v10806_v60, %v10787_v15 }
0x206a   :  { %v10981_v26 = vcombine.high %v10812_v51, %v10812_v51  ;;  %v10988_v61 = vrot.slane %v10812_v51, %v16478_v7 }
0x206c   :  { %v10995_v13 = vrot.slane %v10981_v26, %v16478_v7  ;;  %v10996_v45 = vcombine.high %v10988_v61, %v10988_v61  ;;  %v11004_v19 = vrot.slane %v10988_v61, %v16478_v7  ;;  %v10765_v35 = vpop.permute.xlu1 %10764 }
0x206d   :  { %v10807_v58 = vsel %vm3894_vm8, %v10801_v6, %v10765_v35 }
0x206e   :  { %v10997_v53 = vcombine.high %v10995_v13, %v10995_v13  ;;  %v11011_v27 = vrot.slane %v10995_v13, %v16478_v7  ;;  %v11018_v37 = vrot.slane %v10996_v45, %v16478_v7  ;;  %v11026_v10 = vcombine.high %v11004_v19, %v11004_v19 }
0x206f   :  { %v11204_v32 = vcombine.low %v10980_v48, %v11004_v19  ;;  %v10813_v17 = vsel %vm3901_vm9, %v10807_v58, %v10789_v8 }
0x2070   :  { %v11025_v30 = vrot.slane %v10997_v53, %v16478_v7  ;;  %v11027_v2 = vcombine.high %v11011_v27, %v11011_v27  ;;  %v11028_v57 = vcombine.high %v11018_v37, %v11018_v37  ;;  %v11205_v59 = vcombine.low %v11018_v37, %v11026_v10 }
0x2071   :  { %v11214_v41 = vrot.slane %v11204_v32, %v16478_v7  ;;  %v11036_v36 = vrot.slane %v10813_v17, %v16478_v7  ;;  %v21321_v17 = vld [vmem:[#allocation44_spill] sm:$0xff] }
0x2072   :  { %v11029_v31 = vcombine.high %v11025_v30, %v11025_v30  ;;  %v11206_v0 = vcombine.low %v11028_v57, %v11011_v27  ;;  %v11207_v5 = vcombine.low %v11025_v30, %v11027_v2  ;;  %v11221_v38 = vrot.slane %v11205_v59, %v16478_v7  ;;  %v21322_v2 = vld [vmem:[#allocation46_spill] sm:$0xff]  ;;  %v21323_v59 = vld [vmem:[#allocation36_spill] sm:$0xff] }
0x2073   :  { %v16016_v4 = vpop.eup %16015  ;;  %v11043_v1 = vrot.slane %v11036_v36, %v16478_v7 }
0x2074   :  { %v11228_v60 = vrot.slane %v11206_v0, %v16478_v7  ;;  %v11235_v15 = vrot.slane %v11207_v5, %v16478_v7  ;;  %v11236_v3 = vcombine.low %v11214_v41, %v11221_v38  ;;  %v12528_v51 = vrot.slane %v16016_v4, %v21298_v23 }
0x2075   :  { %v11253_v26 = vcombine.low %v11029_v31, %v11043_v1  ;;  %v12532_v61 = vrot.slane %v16016_v4, %v21299_v18  ;;  %v12536_v6 = vrot.slane %v16016_v4, %v21300_v11  ;;  %v12540_v13 = vrot.slane %v16016_v4, %v21301_v46  ;;  %v21324_v31 = vld [vmem:[#allocation47_spill] sm:$0xff] }
0x2076   :  { %v11237_v45 = vcombine.low %v11228_v60, %v11235_v15  ;;  %v12544_v19 = vrot.slane %v16016_v4, %v21302_v55  ;;  %v12548_v35 = vrot.slane %v16016_v4, %v21303_v25  ;;  %v11244_v33 = vrot.slane %v11236_v3, %v16478_v7 }
0x2077   :  { %v12552_v48 = vrot.slane %v16016_v4, %v21304_v44  ;;  %v12556_v58 = vrot.slane %v16016_v4, %v21237_v14  ;;  %v12647_v8 = vmul.f32 %v12528_v51, %v20242_v29  ;;  %v12648_v27 = vmul.f32 %v12532_v61, %v20245_v40 }
0x2078   :  { %v11251_v53 = vrot.slane %v11237_v45, %v16478_v7  ;;  %v12649_v37 = vmul.f32 %v12536_v6, %v20248_v16  ;;  %v12650_v10 = vmul.f32 %v12540_v13, %v20251_v28  ;;  %v11260_v32 = vrot.slane %v11253_v26, %v16478_v7 }
0x2079   :  { %v12651_v30 = vmul.f32 %v12544_v19, %v21321_v17  ;;  %v12652_v57 = vmul.f32 %v12548_v35, %v21322_v2  ;;  %v12653_v41 = vmul.f32 %v12552_v48, %v21323_v59  ;;  %v12654_v0 = vmul.f32 %v12556_v58, %v21324_v31  ;;  %v13351_v2 = vld [vmem:[#allocation11 + $0x20] sm:$0xff]  ;;  %v13354_v31 = vld [vmem:[#allocation11 + $0x38] sm:$0xff] }
0x207a   :  { %v11252_v36 = vcombine.low %v11244_v33, %v11251_v53  ;;  %v12743_v29 = vmul.f32 %v20315_v49, %v12647_v8  ;;  %v12744_v5 = vmul.f32 %v20321_v50, %v12648_v27  ;;  %v12745_v40 = vmul.f32 %v20337_v24, %v12649_v37 }
0x207b   :  { %v12746_v16 = vmul.f32 %v20345_v56, %v12650_v10  ;;  %v12747_v28 = vmul.f32 %v20318_v22, %v12651_v30  ;;  %v12748_v38 = vmul.f32 %v20324_v62, %v12652_v57  ;;  %v12749_v4 = vmul.f32 %v20341_v43, %v12653_v41  ;;  %v13352_v57 = vld [vmem:[#allocation11 + $0x28] sm:$0xff] }
0x207c   :  { %15344 = vmatmul.mubr.msk.f32.gmra.mrb[130].mxu1 %vm1388_vm2, %v11252_v36  ;;  %v12750_v1 = vmul.f32 %v20352_v9, %v12654_v0  ;;  %v20527_v60 = vadd.f32 %v20327_v54, %v12743_v29  ;;  %v20530_v15 = vadd.f32 %v20333_v63, %v12744_v5  ;;  %v20535_v3 = vadd.f32 %v20356_v34, %v12745_v40  ;;  %v13353_v36 = vld [vmem:[#allocation11 + $0x30] sm:$0xff] }
0x207d   :  { %15346 = vmatprep.mubr.msk.f32.mxu1 %vm16244_vm0, %v21258_v42  ;;  %v20538_v51 = vadd.f32 %v20364_v39, %v12746_v16  ;;  %v20541_v26 = vadd.f32 %v20330_v12, %v12747_v28  ;;  %v20544_v61 = vadd.f32 %v20348_v47, %v12748_v38  ;;  %v11267_v6 = vrot.slane %v11260_v32, %v16478_v7  ;;  %v20577_v29 = vld [vmem:[%s20996_s10 + $0x1] ss:$0 sm:$0xff] }
0x207e   :  { %v20548_v13 = vadd.f32 %v20360_v21, %v12749_v4  ;;  %v20551_v45 = vadd.f32 %v20379_v52, %v12750_v1  ;;  %v13002_v19 = vcombine.low %v20527_v60, %v20530_v15  ;;  %v15570_v59 = vpack.c.bf16 %v13352_v57, %v13351_v2  ;;  %21326 = vst [vmem:[#allocation25_spill] sm:$0xff] %v20577_v29 }
0x207f   :  { %v13003_v35 = vcombine.low %v20535_v3, %v20538_v51  ;;  %v13004_v33 = vcombine.low %v20541_v26, %v20544_v61  ;;  %v21325_v41 = vmov 0.0|0.0   ;;  %v15573_v0 = vpack.c.bf16 %v13354_v31, %v13353_v36 }
0x2080   :  { %15347 = vmatmul.mubr.msk.f32.gmra.mrb[132].mxu1 %vm1388_vm2, %v11267_v6  ;;  %v13005_v48 = vcombine.low %v20548_v13, %v20551_v45  ;;  %v13012_v58 = vrot.slane %v13002_v19, %v16478_v7 }
0x2081   :  { %v13019_v8 = vrot.slane %v13003_v35, %v16478_v7  ;;  %v13026_v53 = vrot.slane %v13004_v33, %v16478_v7  ;;  %15380 = vmatprep.mubr.msk.f32.mxu1 %vm16244_vm0, %v21258_v42  ;;  %15571 = vmatpush3.bf16.msra.mxu1 %v15570_v59 }
0x2082   :  { %v13033_v27 = vrot.slane %v13005_v48, %v16478_v7  ;;  %15572 = vmatprep.subr.bf16.mxu1 %v21325_v41 }
0x2083   :  { %v13034_v37 = vcombine.low %v13012_v58, %v13019_v8 }
0x2084   :  { %v13035_v10 = vcombine.low %v13026_v53, %v13033_v27 }
0x2085   :  { %v13042_v32 = vrot.slane %v13034_v37, %v16478_v7  ;;  %15574 = vmatpush3.bf16.msra.mxu1 %v15573_v0 }
0x2086   :  { %v13049_v17 = vrot.slane %v13035_v10, %v16478_v7 }
0x2088   :  { %v13050_v30 = vcombine.low %v13042_v32, %v13049_v17 }
0x208a   :  { %15364 = vmatmul.mubr.msk.f32.gmra.mrb[132].mxu0 %vm1388_vm2, %v13050_v30 }
0x208b   :  { %15366 = vmatprep.mubr.msk.f32.mxu0 %vm16244_vm0, %v21258_v42 }
0x2126   :  { %v13191_v5 = vpop.f32.mrb[128].mxu0 }
0x2127   :  { %v13192_v40 = vadd.f32 %v20577_v29, %v13191_v5  ;;  %v15359_v16 = vpop.f32.mrb[129].mxu0 }
0x2129   :  { %v13215_v28 = vmul.f32 0.70710677, %v13192_v40 }
0x212b   :  { %v13220_v38 = vand.u32 2147483647, %v13215_v28  ;;  %vm13320_vm1 = vcmp.ge.f32.partialorder %v13215_v28, 0.0 }
0x212d   :  { %v13225_v4 = vmul.f32 0.3275911, %v13220_v38  ;;  %v13290_v58 = vsub.f32 0.0, %v13220_v38 }
0x212f   :  { %v13230_v1 = vadd.f32 1.0, %v13225_v4  ;;  %v13295_v37 = vmul.f32 %v13290_v58, %v13220_v38 }
0x2131   :  { %16017 = vrcp.f32 %v13230_v1  ;;  %v13300_v17 = vmul.f32 1.442695, %v13295_v37 }
0x2132   :  { %v13196_v6 = vpop.f32.mrb[130].mxu0 }
0x2133   :  { %v20581_v19 = vadd.f32 %v20577_v29, %v13196_v6  ;;  %v15362_v35 = vpop.f32.mrb[131].mxu0 }
0x2135   :  { %v20584_v33 = vmul.f32 0.70710677, %v20581_v19 }
0x2137   :  { %v13221_v48 = vand.u32 2147483647, %v20584_v33  ;;  %vm13321_vm3 = vcmp.ge.f32.partialorder %v20584_v33, 0.0 }
0x2139   :  { %v13226_v8 = vmul.f32 0.3275911, %v13221_v48  ;;  %v13291_v57 = vsub.f32 0.0, %v13221_v48 }
0x213b   :  { %v13231_v53 = vadd.f32 1.0, %v13226_v8  ;;  %v16018_v27 = vpop.eup %16017  ;;  %v13296_v0 = vmul.f32 %v13291_v57, %v13221_v48 }
0x213c   :  { %v13245_v10 = vmul.f32 1.0614054, %v16018_v27 }
0x213d   :  { %16019 = vrcp.f32 %v13231_v53  ;;  %v13302_v6 = vmul.f32 1.442695, %v13296_v0 }
0x213e   :  { %v13250_v32 = vadd.f32 -1.4531521, %v13245_v10  ;;  %16021 = vpow2.f32 %v13300_v17 }
0x213f   :  { %16023 = vpow2.f32 %v13302_v6  ;;  %v13335_v6 = vmul.f32 0.5, %v13192_v40 }
0x2140   :  { %v13255_v30 = vmul.f32 %v16018_v27, %v13250_v32 }
0x2142   :  { %v13260_v2 = vadd.f32 1.4214138, %v13255_v30  ;;  %v16045_v30 = vld [vmem:[#allocation7 + $0x1] ss:$0 sm:$0xff] }
0x2144   :  { %v13265_v59 = vmul.f32 %v16018_v27, %v13260_v2 }
0x2146   :  { %v13270_v31 = vadd.f32 -0.28449672, %v13265_v59 }
0x2147   :  { %v16020_v36 = vpop.eup %16019 }
0x2148   :  { %v13246_v5 = vmul.f32 1.0614054, %v16020_v36  ;;  %v13275_v16 = vmul.f32 %v16018_v27, %v13270_v31  ;;  %v16022_v38 = vpop.eup %16021 }
0x214a   :  { %v13251_v4 = vadd.f32 -1.4531521, %v13246_v5  ;;  %v13280_v1 = vadd.f32 0.2548296, %v13275_v16 }
0x214c   :  { %v13256_v35 = vmul.f32 %v16020_v36, %v13251_v4  ;;  %v13285_v8 = vmul.f32 %v16018_v27, %v13280_v1 }
0x214e   :  { %v13261_v58 = vadd.f32 1.4214138, %v13256_v35  ;;  %v13310_v53 = vmul.f32 %v16022_v38, %v13285_v8 }
0x214f   :  { %v11359_v10 = vpop.f32.mrb[130].mxu1 }
0x2150   :  { %v13266_v37 = vmul.f32 %v16020_v36, %v13261_v58  ;;  %v13315_v32 = vsub.f32 1.0, %v13310_v53  ;;  %v11360_v17 = vadd.f32 %v16045_v30, %v11359_v10  ;;  %v15345_v2 = vpop.f32.mrb[131].mxu1 }
0x2152   :  { %v13271_v41 = vadd.f32 -0.28449672, %v13266_v37  ;;  %v13325_v59 = vsub.f32 0.0, %v13315_v32  ;;  %v11520_v48 = vcombine.high %v11360_v17, %v11360_v17  ;;  %v11527_v57 = vrot.slane %v11360_v17, %v16478_v7  ;;  %v16024_v17 = vpop.eup %16023 }
0x2153   :  { %v11364_v0 = vpop.f32.mrb[132].mxu1 }
0x2154   :  { %v13276_v31 = vmul.f32 %v16020_v36, %v13271_v41  ;;  %v13330_v5 = vsel %vm13320_vm1, %v13315_v32, %v13325_v59  ;;  %v11534_v27 = vrot.slane %v11520_v48, %v16478_v7  ;;  %v11535_v16 = vcombine.high %v11527_v57, %v11527_v57  ;;  %v15348_v1 = vpop.f32.mrb[133].mxu1 }
0x2155   :  { %v11543_v4 = vrot.slane %v11527_v57, %v16478_v7  ;;  %v13340_v35 = vadd.f32 1.0, %v13330_v5  ;;  %v11365_v38 = vadd.f32 %v16045_v30, %v11364_v0  ;;  %v21327_v57 = vld [vmem:[#allocation20_spill] sm:$0xff]  ;;  %v21328_v30 = vld [vmem:[#allocation35_spill] sm:$0xff]  ;;  %v21329_v5 = vld [vmem:[#allocation37_spill] sm:$0xff] }
0x2156   :  { %v13281_v8 = vadd.f32 0.2548296, %v13276_v31  ;;  %v11536_v58 = vcombine.high %v11534_v27, %v11534_v27  ;;  %v11550_v53 = vrot.slane %v11534_v27, %v16478_v7  ;;  %v11557_v37 = vrot.slane %v11535_v16, %v16478_v7  ;;  %v21330_v1 = vld [vmem:[#allocation43_spill] sm:$0xff] }
0x2157   :  { %v11565_v10 = vcombine.high %v11543_v4, %v11543_v4  ;;  %v13345_v28 = vmul.f32 %v13340_v35, %v13335_v6  ;;  %v11575_v32 = vrot.slane %v11365_v38, %v16478_v7  ;;  %v20598_v0 = vadd.f32 %v11543_v4, %v21328_v30  ;;  %v21331_v35 = vld [vmem:[#allocation45_spill] sm:$0xff]  ;;  %v21332_v38 = vld [vmem:[#allocation38_spill] sm:$0xff] }
0x2158   :  { %v13286_v41 = vmul.f32 %v16020_v36, %v13281_v8  ;;  %v11564_v2 = vrot.slane %v11536_v58, %v16478_v7  ;;  %v11566_v59 = vcombine.high %v11550_v53, %v11550_v53  ;;  %v11567_v48 = vcombine.high %v11557_v37, %v11557_v37  ;;  %v21335_v30 = vld [vmem:[#allocation41_spill] sm:$0xff] }
0x2159   :  { %v20595_v40 = vadd.f32 %v11557_v37, %v21327_v57  ;;  %v20601_v27 = vadd.f32 %v11565_v10, %v21329_v5  ;;  %v11576_v16 = vcombine.high %v11575_v32, %v11575_v32  ;;  %15381 = vmatmul.mubr.msk.f32.vlgmr.msra.gmra.mrb[134].mxu1 %vm1388_vm2, %v13345_v28  ;;  %v20608_v8 = vadd.f32 %v11550_v53, %v21331_v35 }
0x215a   :  { %v13311_v31 = vmul.f32 %v16024_v17, %v13286_v41  ;;  %v11568_v36 = vcombine.high %v11564_v2, %v11564_v2  ;;  %v20605_v6 = vadd.f32 %v11567_v48, %v21330_v1  ;;  %v20611_v58 = vadd.f32 %v11564_v2, %v21332_v38  ;;  %15383 = vmatprep.mubr.msk.f32.mxu1 %vm16244_vm0, %v21258_v42  ;;  %v21333_v41 = vld [vmem:[#allocation39_spill] sm:$0xff]  ;;  %v21334_v48 = vld [vmem:[#allocation40_spill] sm:$0xff]  ;;  %v21336_v1 = vld [vmem:[#allocation42_spill] sm:$0xff] }
0x215b   :  { %v11844_v37 = vcombine.low %v20598_v0, %v20595_v40  ;;  %v11583_v10 = vrot.slane %v11575_v32, %v16478_v7  ;;  %v11590_v28 = vrot.slane %v11576_v16, %v16478_v7  ;;  %v20620_v17 = vadd.f32 %v11566_v59, %v21333_v41 }
0x215c   :  { %v13316_v4 = vsub.f32 1.0, %v13311_v31  ;;  %v20623_v53 = vadd.f32 %v11568_v36, %v21334_v48  ;;  %v11845_v2 = vcombine.low %v20601_v27, %v20605_v6  ;;  %v11846_v57 = vcombine.low %v20608_v8, %v20611_v58 }
0x215d   :  { %v20630_v5 = vadd.f32 %v11583_v10, %v21335_v30  ;;  %v20633_v32 = vadd.f32 %v11590_v28, %v21336_v1  ;;  %v13201_v16 = vpop.f32.mrb[132].mxu0  ;;  %v13336_v48 = vmul.f32 0.5, %v20581_v19  ;;  %v11854_v28 = vrot.slane %v11844_v37, %v16478_v7 }
0x215e   :  { %v13326_v31 = vsub.f32 0.0, %v13316_v4  ;;  %v13202_v59 = vadd.f32 %v20577_v29, %v13201_v16  ;;  %v15365_v36 = vpop.f32.mrb[133].mxu0  ;;  %v11847_v35 = vcombine.low %v20620_v17, %v20623_v53  ;;  %v11861_v38 = vrot.slane %v11845_v2, %v16478_v7 }
0x215f   :  { %v11893_v10 = vcombine.low %v20630_v5, %v20633_v32  ;;  %v11868_v33 = vrot.slane %v11846_v57, %v16478_v7 }
0x2160   :  { %v13331_v41 = vsel %vm13321_vm3, %v13316_v4, %v13326_v31  ;;  %v13217_v1 = vmul.f32 0.70710677, %v13202_v59  ;;  %v11875_v16 = vrot.slane %v11847_v35, %v16478_v7  ;;  %v11876_v29 = vcombine.low %v11854_v28, %v11861_v38 }
0x2161   :  { %v13341_v30 = vadd.f32 1.0, %v13331_v41  ;;  %v11900_v36 = vrot.slane %v11893_v10, %v16478_v7 }
0x2162   :  { %v13222_v21 = vand.u32 2147483647, %v13217_v1  ;;  %v11877_v2 = vcombine.low %v11868_v33, %v11875_v16  ;;  %v11884_v31 = vrot.slane %v11876_v29, %v16478_v7  ;;  %vm13322_vm4 = vcmp.ge.f32.partialorder %v13217_v1, 0.0 }
0x2163   :  { %v13346_v52 = vmul.f32 %v13341_v30, %v13336_v48  ;;  %v11907_v4 = vrot.slane %v11900_v36, %v16478_v7 }
0x2164   :  { %v13227_v19 = vmul.f32 0.3275911, %v13222_v21  ;;  %v11891_v37 = vrot.slane %v11877_v2, %v16478_v7  ;;  %v13292_v48 = vsub.f32 0.0, %v13222_v21 }
0x2165   :  { %15384 = vmatmul.mubr.msk.f32.gmra.mrb[136].mxu1 %vm1388_vm2, %v13346_v52  ;;  %v11925_v41 = vsel %vm5015_vm10, %v11907_v4, 0.0 }
0x2166   :  { %15386 = vmatprep.mubr.msk.f32.mxu1 %vm16244_vm0, %v21258_v42  ;;  %v13232_v57 = vadd.f32 1.0, %v13227_v19  ;;  %11926 = vadd.xlane.f32.xlu0 %v11925_v41  ;;  %v11892_v35 = vcombine.low %v11884_v31, %v11891_v37  ;;  %v13297_v28 = vmul.f32 %v13292_v48, %v13222_v21 }
0x2168   :  { %16025 = vrcp.f32 %v13232_v57  ;;  %v11922_v38 = vsel %vm1388_vm2, %v11892_v35, 0.0  ;;  %v13304_v29 = vmul.f32 1.442695, %v13297_v28 }
0x2169   :  { %11923 = vadd.xlane.f32.xlu1 %v11922_v38  ;;  %v13337_v38 = vmul.f32 0.5, %v13202_v59 }
0x216a   :  { %16027 = vpow2.f32 %v13304_v29 }
0x2172   :  { %v16026_v10 = vpop.eup %16025 }
0x2173   :  { %v13247_v52 = vmul.f32 1.0614054, %v16026_v10 }
0x2174   :  { %v16028_v41 = vpop.eup %16027 }
0x2175   :  { %v13252_v30 = vadd.f32 -1.4531521, %v13247_v52 }
0x2177   :  { %v13257_v33 = vmul.f32 %v16026_v10, %v13252_v30 }
0x2179   :  { %v13262_v16 = vadd.f32 1.4214138, %v13257_v33 }
0x217b   :  { %v13267_v36 = vmul.f32 %v16026_v10, %v13262_v16 }
0x217d   :  { %v13272_v2 = vadd.f32 -0.28449672, %v13267_v36 }
0x217f   :  { %v13277_v4 = vmul.f32 %v16026_v10, %v13272_v2 }
0x2181   :  { %v13282_v47 = vadd.f32 0.2548296, %v13277_v4 }
0x2183   :  { %v13287_v19 = vmul.f32 %v16026_v10, %v13282_v47 }
0x2185   :  { %v13312_v31 = vmul.f32 %v16028_v41, %v13287_v19 }
0x2187   :  { %v13317_v37 = vsub.f32 1.0, %v13312_v31 }
0x2189   :  { %v13327_v57 = vsub.f32 0.0, %v13317_v37 }
0x218b   :  { %v13332_v35 = vsel %vm13322_vm4, %v13317_v37, %v13327_v57 }
0x218c   :  { %v13342_v12 = vadd.f32 1.0, %v13332_v35 }
0x218e   :  { %v13347_v21 = vmul.f32 %v13342_v12, %v13337_v38 }
0x2190   :  { %15387 = vmatmul.mubr.msk.f32.gmra.mrb[138].mxu1 %vm1388_vm2, %v13347_v21 }
0x2191   :  { %15389 = vmatprep.mubr.msk.f32.mxu1 %vm16244_vm0, %v21258_v42 }
0x21f3   :  { %v11927_v48 = vpop.xlane.xlu0 %11926 }
0x21f4   :  { %v11932_v28 = vmul.f32 0.03125, %v11927_v48 }
0x21f6   :  { %v12069_v52 = vrot.slane %v11932_v28, %v21298_v23  ;;  %v12073_v47 = vrot.slane %v11932_v28, %v21299_v18  ;;  %v11924_v10 = vpop.xlane.xlu1 %11923 }
0x21f7   :  { %v11931_v30 = vmul.f32 0.03125, %v11924_v10 }
0x21f8   :  { %v20661_v29 = vsub.f32 %v20630_v5, %v12069_v52  ;;  %v20664_v59 = vsub.f32 %v20633_v32, %v12073_v47 }
0x21f9   :  { %v12037_v12 = vrot.slane %v11931_v30, %v21298_v23  ;;  %v12041_v1 = vrot.slane %v11931_v30, %v21299_v18  ;;  %v12045_v33 = vrot.slane %v11931_v30, %v21300_v11  ;;  %v12049_v16 = vrot.slane %v11931_v30, %v21301_v46 }
0x21fa   :  { %v12174_v36 = vmul.f32 %v20661_v29, %v20661_v29  ;;  %v12175_v2 = vmul.f32 %v20664_v59, %v20664_v59  ;;  %v12053_v5 = vrot.slane %v11931_v30, %v21302_v55  ;;  %v12057_v4 = vrot.slane %v11931_v30, %v21303_v25 }
0x21fb   :  { %v12061_v32 = vrot.slane %v11931_v30, %v21304_v44  ;;  %v12065_v19 = vrot.slane %v11931_v30, %v21237_v14  ;;  %v20679_v41 = vsub.f32 %v20598_v0, %v12037_v12  ;;  %v20682_v31 = vsub.f32 %v20595_v40, %v12041_v1 }
0x21fc   :  { %v12406_v37 = vcombine.low %v12174_v36, %v12175_v2  ;;  %v20685_v57 = vsub.f32 %v20601_v27, %v12045_v33  ;;  %v20688_v35 = vsub.f32 %v20605_v6, %v12049_v16  ;;  %v20691_v38 = vsub.f32 %v20608_v8, %v12053_v5 }
0x21fd   :  { %v20694_v21 = vsub.f32 %v20611_v58, %v12057_v4  ;;  %v20697_v48 = vsub.f32 %v20620_v17, %v12061_v32  ;;  %v20700_v0 = vsub.f32 %v20623_v53, %v12065_v19  ;;  %v12166_v40 = vmul.f32 %v20679_v41, %v20679_v41 }
0x21fe   :  { %v12413_v27 = vrot.slane %v12406_v37, %v16478_v7  ;;  %v12167_v6 = vmul.f32 %v20682_v31, %v20682_v31  ;;  %v12168_v8 = vmul.f32 %v20685_v57, %v20685_v57  ;;  %v12169_v58 = vmul.f32 %v20688_v35, %v20688_v35 }
0x21ff   :  { %v12170_v17 = vmul.f32 %v20691_v38, %v20691_v38  ;;  %v12171_v53 = vmul.f32 %v20694_v21, %v20694_v21  ;;  %v12172_v28 = vmul.f32 %v20697_v48, %v20697_v48  ;;  %v12173_v52 = vmul.f32 %v20700_v0, %v20700_v0 }
0x2200   :  { %v12420_v47 = vrot.slane %v12413_v27, %v16478_v7  ;;  %v12357_v10 = vcombine.low %v12166_v40, %v12167_v6  ;;  %v12358_v30 = vcombine.low %v12168_v8, %v12169_v58  ;;  %v14412_v6 = vld [vmem:[%s20998_s12 + $0x1] ss:$0 sm:$0xff] }
0x2201   :  { %v12359_v12 = vcombine.low %v12170_v17, %v12171_v53  ;;  %v12360_v1 = vcombine.low %v12172_v28, %v12173_v52 }
0x2202   :  { %v12438_v33 = vsel %vm5015_vm10, %v12420_v47, 0.0  ;;  %v12367_v16 = vrot.slane %v12357_v10, %v16478_v7  ;;  %v12374_v36 = vrot.slane %v12358_v30, %v16478_v7 }
0x2203   :  { %12439 = vadd.xlane.f32.xlu1 %v12438_v33  ;;  %v12381_v2 = vrot.slane %v12359_v12, %v16478_v7  ;;  %v12388_v5 = vrot.slane %v12360_v1, %v16478_v7 }
0x2204   :  { %v12389_v4 = vcombine.low %v12367_v16, %v12374_v36 }
0x2205   :  { %v12390_v32 = vcombine.low %v12381_v2, %v12388_v5 }
0x2206   :  { %v12397_v19 = vrot.slane %v12389_v4, %v16478_v7  ;;  %v21337_v4 = vld [vmem:[#allocation30_spill] sm:$0xff] }
0x2207   :  { %v12404_v37 = vrot.slane %v12390_v32, %v16478_v7 }
0x2209   :  { %v12405_v40 = vcombine.low %v12397_v19, %v12404_v37  ;;  %v21338_v19 = vld [vmem:[#allocation33_spill] sm:$0xff] }
0x220b   :  { %v12435_v27 = vsel %vm1388_vm2, %v12405_v40, 0.0 }
0x220c   :  { %12436 = vadd.xlane.f32.xlu0 %v12435_v27  ;;  %v21339_v27 = vld [vmem:[#allocation34_spill] sm:$0xff] }
0x222c   :  { %v13444_v8 = vpop.f32.mrb[134].mxu1 }
0x222d   :  { %v13445_v58 = vadd.f32 %v14412_v6, %v13444_v8  ;;  %v15382_v17 = vpop.f32.mrb[135].mxu1 }
0x222f   :  { %v13467_v53 = vcombine.high %v13445_v58, %v13445_v58  ;;  %v13474_v28 = vrot.slane %v13445_v58, %v16478_v7  ;;  %v21340_v58 = vld [vmem:[#allocation21_spill] sm:$0xff] }
0x2231   :  { %v13481_v52 = vrot.slane %v13467_v53, %v16478_v7  ;;  %v13482_v47 = vcombine.high %v13474_v28, %v13474_v28  ;;  %v13490_v10 = vrot.slane %v13474_v28, %v16478_v7  ;;  %v21341_v53 = vld [vmem:[#allocation24_spill] sm:$0xff] }
0x2233   :  { %v13483_v30 = vcombine.high %v13481_v52, %v13481_v52  ;;  %v13497_v12 = vrot.slane %v13481_v52, %v16478_v7  ;;  %v13504_v1 = vrot.slane %v13482_v47, %v16478_v7  ;;  %v13512_v33 = vcombine.high %v13490_v10, %v13490_v10 }
0x2234   :  { %v20741_v32 = vadd.f32 %v13490_v10, %v21337_v4  ;;  %v21343_v10 = vld [vmem:[#allocation22_spill] sm:$0xff] }
0x2235   :  { %v13511_v16 = vrot.slane %v13483_v30, %v16478_v7  ;;  %v13513_v36 = vcombine.high %v13497_v12, %v13497_v12  ;;  %v13514_v2 = vcombine.high %v13504_v1, %v13504_v1  ;;  %v20738_v5 = vadd.f32 %v13504_v1, %v20398_v20  ;;  %v21345_v1 = vld [vmem:[#allocation23_spill] sm:$0xff] }
0x2236   :  { %v20744_v37 = vadd.f32 %v13512_v33, %v21338_v19  ;;  %v20750_v17 = vadd.f32 %v13497_v12, %v21340_v58 }
0x2237   :  { %v13515_v40 = vcombine.high %v13511_v16, %v13511_v16  ;;  %v20747_v8 = vadd.f32 %v13514_v2, %v21339_v27  ;;  %v20753_v28 = vadd.f32 %v13511_v16, %v21341_v53  ;;  %v13617_v20 = vcombine.low %v20741_v32, %v20738_v5 }
0x2238   :  { %v13449_v52 = vpop.f32.mrb[136].mxu1  ;;  %v20758_v30 = vadd.f32 %v13513_v36, %v21343_v10 }
0x2239   :  { %21342 = vst [vmem:[#allocation26_spill] sm:$0xff] %v20753_v28  ;;  %v15385_v47 = vpop.f32.mrb[137].mxu1  ;;  %v20761_v33 = vadd.f32 %v13515_v40, %v21345_v1  ;;  %v13618_v2 = vcombine.low %v20744_v37, %v20747_v8  ;;  %v13619_v12 = vcombine.low %v20750_v17, %v20753_v28  ;;  %v13627_v4 = vrot.slane %v13617_v20, %v16478_v7 }
0x223a   :  { %21344 = vst [vmem:[#allocation27_spill] sm:$0xff] %v20758_v30 }
0x223b   :  { %21346 = vst [vmem:[#allocation28_spill] sm:$0xff] %v20761_v33  ;;  %v13620_v16 = vcombine.low %v20758_v30, %v20761_v33  ;;  %v13634_v19 = vrot.slane %v13618_v2, %v16478_v7  ;;  %v13641_v27 = vrot.slane %v13619_v12, %v16478_v7 }
0x223d   :  { %v13648_v36 = vrot.slane %v13620_v16, %v16478_v7  ;;  %v13649_v58 = vcombine.low %v13627_v4, %v13634_v19 }
0x223f   :  { %v13650_v40 = vcombine.low %v13641_v27, %v13648_v36  ;;  %v13657_v53 = vrot.slane %v13649_v58, %v16478_v7 }
0x2241   :  { %v13664_v52 = vrot.slane %v13650_v40, %v16478_v7 }
0x2243   :  { %v13665_v47 = vcombine.low %v13657_v53, %v13664_v52 }
0x2245   :  { %v13717_v10 = vsel %vm1388_vm2, %v13665_v47, 0.0 }
0x2246   :  { %13718 = vadd.xlane.f32.xlu0 %v13717_v10 }
0x2263   :  { %v13453_v1 = vpop.f32.mrb[138].mxu1 }
0x2264   :  { %v13454_v33 = vadd.f32 %v14412_v6, %v13453_v1  ;;  %v15388_v30 = vpop.f32.mrb[139].mxu1 }
0x2266   :  { %v13516_v20 = vcombine.high %v13454_v33, %v13454_v33  ;;  %v13523_v2 = vrot.slane %v13454_v33, %v16478_v7 }
0x2268   :  { %v13530_v12 = vrot.slane %v13516_v20, %v16478_v7  ;;  %v13531_v28 = vcombine.high %v13523_v2, %v13523_v2  ;;  %v13539_v16 = vrot.slane %v13523_v2, %v16478_v7 }
0x226a   :  { %v13532_v4 = vcombine.high %v13530_v12, %v13530_v12  ;;  %v13546_v19 = vrot.slane %v13530_v12, %v16478_v7  ;;  %v13553_v27 = vrot.slane %v13531_v28, %v16478_v7  ;;  %v13561_v36 = vcombine.high %v13539_v16, %v13539_v16 }
0x226b   :  { %v20786_v30 = vadd.f32 %v13539_v16, %v20527_v60 }
0x226c   :  { %v13560_v58 = vrot.slane %v13532_v4, %v16478_v7  ;;  %v13562_v40 = vcombine.high %v13546_v19, %v13546_v19  ;;  %v13563_v53 = vcombine.high %v13553_v27, %v13553_v27  ;;  %v20783_v6 = vadd.f32 %v13553_v27, %v20530_v15 }
0x226d   :  { %v20789_v33 = vadd.f32 %v13561_v36, %v20535_v3  ;;  %v20795_v28 = vadd.f32 %v13546_v19, %v20541_v26 }
0x226e   :  { %v13564_v52 = vcombine.high %v13560_v58, %v13560_v58  ;;  %v20792_v47 = vadd.f32 %v13563_v53, %v20538_v51  ;;  %v20798_v10 = vadd.f32 %v13560_v58, %v20544_v61  ;;  %v13666_v15 = vcombine.low %v20786_v30, %v20783_v6 }
0x226f   :  { %v20803_v1 = vadd.f32 %v13562_v40, %v20548_v13 }
0x2270   :  { %v20806_v60 = vadd.f32 %v13564_v52, %v20551_v45  ;;  %v13667_v3 = vcombine.low %v20789_v33, %v20792_v47  ;;  %v13668_v51 = vcombine.low %v20795_v28, %v20798_v10  ;;  %v13676_v61 = vrot.slane %v13666_v15, %v16478_v7 }
0x2272   :  { %v13669_v26 = vcombine.low %v20803_v1, %v20806_v60  ;;  %v13683_v20 = vrot.slane %v13667_v3, %v16478_v7  ;;  %v13690_v2 = vrot.slane %v13668_v51, %v16478_v7 }
0x2274   :  { %v13697_v13 = vrot.slane %v13669_v26, %v16478_v7  ;;  %v13698_v12 = vcombine.low %v13676_v61, %v13683_v20 }
0x2276   :  { %v13699_v45 = vcombine.low %v13690_v2, %v13697_v13  ;;  %v13706_v16 = vrot.slane %v13698_v12, %v16478_v7 }
0x2278   :  { %v13713_v4 = vrot.slane %v13699_v45, %v16478_v7 }
0x227a   :  { %v13714_v19 = vcombine.low %v13706_v16, %v13713_v4 }
0x227c   :  { %v13720_v27 = vsel %vm1388_vm2, %v13714_v19, 0.0 }
0x227d   :  { %13721 = vadd.xlane.f32.xlu1 %v13720_v27 }
0x2290   :  { %v12440_v36 = vpop.xlane.xlu1 %12439 }
0x2291   :  { %v12445_v58 = vmul.f32 0.03125, %v12440_v36 }
0x2293   :  { %v12450_v40 = vadd.f32 1e-05, %v12445_v58 }
0x2295   :  { %16029 = vrsqrt.f32 %v12450_v40 }
0x2299   :  { %v12437_v53 = vpop.xlane.xlu0 %12436 }
0x229a   :  { %v12444_v52 = vmul.f32 0.03125, %v12437_v53 }
0x229c   :  { %v12449_v15 = vadd.f32 1e-05, %v12444_v52 }
0x229e   :  { %16031 = vrsqrt.f32 %v12449_v15 }
0x229f   :  { %v16030_v3 = vpop.eup %16029 }
0x22a0   :  { %v12592_v51 = vrot.slane %v16030_v3, %v21298_v23  ;;  %v12596_v26 = vrot.slane %v16030_v3, %v21299_v18 }
0x22a2   :  { %v12663_v61 = vmul.f32 %v12592_v51, %v20661_v29  ;;  %v12664_v20 = vmul.f32 %v12596_v26, %v20664_v59 }
0x22a4   :  { %v12759_v13 = vmul.f32 %v20315_v49, %v12663_v61  ;;  %v12760_v12 = vmul.f32 %v20321_v50, %v12664_v20 }
0x22a8   :  { %v16032_v2 = vpop.eup %16031 }
0x22a9   :  { %v12560_v45 = vrot.slane %v16032_v2, %v21298_v23  ;;  %v12564_v16 = vrot.slane %v16032_v2, %v21299_v18  ;;  %v12568_v4 = vrot.slane %v16032_v2, %v21300_v11  ;;  %v12572_v19 = vrot.slane %v16032_v2, %v21301_v46 }
0x22aa   :  { %v12576_v27 = vrot.slane %v16032_v2, %v21302_v55  ;;  %v12580_v36 = vrot.slane %v16032_v2, %v21303_v25  ;;  %v12584_v29 = vrot.slane %v16032_v2, %v21304_v44  ;;  %v12588_v59 = vrot.slane %v16032_v2, %v21237_v14  ;;  %v21347_v2 = vld [vmem:[#allocation31_spill] sm:$0xff] }
0x22ab   :  { %v12655_v58 = vmul.f32 %v12560_v45, %v20679_v41  ;;  %v12656_v40 = vmul.f32 %v12564_v16, %v20682_v31  ;;  %v12657_v53 = vmul.f32 %v12568_v4, %v20685_v57  ;;  %v12658_v52 = vmul.f32 %v12572_v19, %v20688_v35  ;;  %v21348_v45 = vld [vmem:[#allocation32_spill] sm:$0xff]  ;;  %v21349_v16 = vld [vmem:[#allocation29_spill] sm:$0xff] }
0x22ac   :  { %v12659_v15 = vmul.f32 %v12576_v27, %v20691_v38  ;;  %v12660_v3 = vmul.f32 %v12580_v36, %v20694_v21  ;;  %v12661_v51 = vmul.f32 %v12584_v29, %v20697_v48  ;;  %v12662_v26 = vmul.f32 %v12588_v59, %v20700_v0  ;;  %v21350_v4 = vld [vmem:[#allocation48_spill] sm:$0xff] }
0x22ad   :  { %v12751_v61 = vmul.f32 %v20315_v49, %v12655_v58  ;;  %v12752_v20 = vmul.f32 %v20321_v50, %v12656_v40  ;;  %v12753_v41 = vmul.f32 %v20337_v24, %v12657_v53  ;;  %v12754_v31 = vmul.f32 %v20345_v56, %v12658_v52 }
0x22ae   :  { %v12755_v57 = vmul.f32 %v20318_v22, %v12659_v15  ;;  %v12756_v35 = vmul.f32 %v20324_v62, %v12660_v3  ;;  %v12757_v38 = vmul.f32 %v20341_v43, %v12661_v51  ;;  %v12758_v21 = vmul.f32 %v20352_v9, %v12662_v26 }
0x22af   :  { %v12847_v48 = vadd.f32 %v20327_v54, %v12751_v61  ;;  %v12848_v0 = vadd.f32 %v20333_v63, %v12752_v20  ;;  %v12849_v49 = vadd.f32 %v20356_v34, %v12753_v41  ;;  %v12850_v50 = vadd.f32 %v20364_v39, %v12754_v31 }
0x22b0   :  { %v12851_v24 = vadd.f32 %v21347_v2, %v12755_v57  ;;  %v12852_v56 = vadd.f32 %v21348_v45, %v12756_v35  ;;  %v12853_v22 = vadd.f32 %v21349_v16, %v12757_v38  ;;  %v12854_v62 = vadd.f32 %v21350_v4, %v12758_v21  ;;  %v21351_v2 = vld [vmem:[#allocation26_spill] sm:$0xff]  ;;  %v21352_v45 = vld [vmem:[#allocation27_spill] sm:$0xff]  ;;  %v21353_v16 = vld [vmem:[#allocation28_spill] sm:$0xff] }
0x22b1   :  { %v13051_v19 = vcombine.low %v12847_v48, %v12848_v0  ;;  %v13052_v43 = vcombine.low %v12849_v49, %v12850_v50  ;;  %v12855_v36 = vadd.f32 %v20327_v54, %v12759_v13  ;;  %v12856_v29 = vadd.f32 %v20333_v63, %v12760_v12 }
0x22b2   :  { %v13053_v27 = vcombine.low %v12851_v24, %v12852_v56  ;;  %v13054_v9 = vcombine.low %v12853_v22, %v12854_v62 }
0x22b3   :  { %v13061_v34 = vrot.slane %v13051_v19, %v16478_v7  ;;  %v13068_v39 = vrot.slane %v13052_v43, %v16478_v7  ;;  %v13100_v52 = vcombine.low %v12855_v36, %v12856_v29 }
0x22b4   :  { %v13075_v59 = vrot.slane %v13053_v27, %v16478_v7  ;;  %v13082_v58 = vrot.slane %v13054_v9, %v16478_v7 }
0x22b5   :  { %v13083_v40 = vcombine.low %v13061_v34, %v13068_v39  ;;  %v13107_v54 = vrot.slane %v13100_v52, %v16478_v7 }
0x22b6   :  { %v13084_v53 = vcombine.low %v13075_v59, %v13082_v58 }
0x22b7   :  { %v13091_v15 = vrot.slane %v13083_v40, %v16478_v7  ;;  %v13114_v63 = vrot.slane %v13107_v54, %v16478_v7 }
0x22b8   :  { %v13098_v3 = vrot.slane %v13084_v53, %v16478_v7 }
0x22ba   :  { %v13099_v51 = vcombine.low %v13091_v15, %v13098_v3 }
0x22bc   :  { %15367 = vmatmul.mubr.msk.f32.gmra.mrb[134].mxu0 %vm1388_vm2, %v13099_v51 }
0x22bd   :  { %15369 = vmatprep.mubr.msk.f32.mxu0 %vm16244_vm0, %v21258_v42 }
0x22c0   :  { %15370 = vmatmul.mubr.msk.f32.gmra.mrb[136].mxu0 %vm1388_vm2, %v13114_v63 }
0x22c1   :  { %15403 = vmatprep.mubr.msk.f32.mxu0 %vm16244_vm0, %v21258_v42 }
0x22d3   :  { %v13719_v13 = vpop.xlane.xlu0 %13718 }
0x22d4   :  { %v13723_v12 = vmul.f32 0.03125, %v13719_v13 }
0x22d6   :  { %v13730_v26 = vrot.slane %v13723_v12, %v21298_v23  ;;  %v13734_v61 = vrot.slane %v13723_v12, %v21299_v18  ;;  %v13738_v20 = vrot.slane %v13723_v12, %v21300_v11  ;;  %v13742_v41 = vrot.slane %v13723_v12, %v21301_v46 }
0x22d7   :  { %v13746_v31 = vrot.slane %v13723_v12, %v21302_v55  ;;  %v13750_v57 = vrot.slane %v13723_v12, %v21303_v25  ;;  %v13754_v35 = vrot.slane %v13723_v12, %v21304_v44  ;;  %v13758_v38 = vrot.slane %v13723_v12, %v21237_v14 }
0x22d8   :  { %v20884_v21 = vsub.f32 %v20741_v32, %v13730_v26  ;;  %v13808_v48 = vsub.f32 %v20738_v5, %v13734_v61  ;;  %v13809_v0 = vsub.f32 %v20744_v37, %v13738_v20  ;;  %v13810_v49 = vsub.f32 %v20747_v8, %v13742_v41 }
0x22d9   :  { %v13811_v50 = vsub.f32 %v20750_v17, %v13746_v31  ;;  %v13812_v24 = vsub.f32 %v21351_v2, %v13750_v57  ;;  %v13813_v56 = vsub.f32 %v21352_v45, %v13754_v35  ;;  %v13814_v22 = vsub.f32 %v21353_v16, %v13758_v38 }
0x22da   :  { %v13823_v4 = vmul.f32 %v20884_v21, %v20884_v21  ;;  %v13824_v62 = vmul.f32 %v13808_v48, %v13808_v48  ;;  %v13825_v32 = vmul.f32 %v13809_v0, %v13809_v0  ;;  %v13826_v19 = vmul.f32 %v13810_v49, %v13810_v49 }
0x22db   :  { %v13827_v43 = vmul.f32 %v13811_v50, %v13811_v50  ;;  %v13828_v5 = vmul.f32 %v13812_v24, %v13812_v24  ;;  %v13829_v27 = vmul.f32 %v13813_v56, %v13813_v56  ;;  %v13830_v37 = vmul.f32 %v13814_v22, %v13814_v22 }
0x22dc   :  { %v13855_v9 = vcombine.low %v13823_v4, %v13824_v62  ;;  %v13856_v8 = vcombine.low %v13825_v32, %v13826_v19  ;;  %v14043_v19 = vld [vmem:[#allocation13] sm:$0xff] }
0x22dd   :  { %v13857_v36 = vcombine.low %v13827_v43, %v13828_v5  ;;  %v13858_v17 = vcombine.low %v13829_v27, %v13830_v37  ;;  %v14044_v43 = vld [vmem:[#allocation13 + $0x8] sm:$0xff]  ;;  %v14045_v5 = vld [vmem:[#allocation13 + $0x10] sm:$0xff]  ;;  %v14046_v37 = vld [vmem:[#allocation13 + $0x18] sm:$0xff] }
0x22de   :  { %v13865_v29 = vrot.slane %v13855_v9, %v16478_v7  ;;  %v13872_v34 = vrot.slane %v13856_v8, %v16478_v7  ;;  %v15576_v27 = vpack.c.bf16 %v14044_v43, %v14043_v19  ;;  %v15579_v9 = vpack.c.bf16 %v14046_v37, %v14045_v5 }
0x22df   :  { %v13879_v39 = vrot.slane %v13857_v36, %v16478_v7  ;;  %v13886_v59 = vrot.slane %v13858_v17, %v16478_v7  ;;  %v21354_v8 = vmov 0.0|0.0   ;;  %v21355_v17 = vld [vmem:[#allocation25_spill] sm:$0xff] }
0x22e0   :  { %v13887_v58 = vcombine.low %v13865_v29, %v13872_v34  ;;  %15577 = vmatpush3.bf16.msra.mxu0 %v15576_v27 }
0x22e1   :  { %v13888_v40 = vcombine.low %v13879_v39, %v13886_v59  ;;  %15578 = vmatprep.subr.bf16.mxu0 %v21354_v8 }
0x22e2   :  { %v13895_v53 = vrot.slane %v13887_v58, %v16478_v7 }
0x22e3   :  { %v13902_v52 = vrot.slane %v13888_v40, %v16478_v7 }
0x22e4   :  { %15580 = vmatpush3.bf16.msra.mxu0 %v15579_v9 }
0x22e5   :  { %v13903_v15 = vcombine.low %v13895_v53, %v13902_v52 }
0x22e7   :  { %v13955_v3 = vsel %vm1388_vm2, %v13903_v15, 0.0 }
0x22e8   :  { %13956 = vadd.xlane.f32.xlu0 %v13955_v3 }
0x230a   :  { %v13722_v51 = vpop.xlane.xlu1 %13721 }
0x230b   :  { %v13724_v54 = vmul.f32 0.03125, %v13722_v51 }
0x230d   :  { %v13762_v63 = vrot.slane %v13724_v54, %v21298_v23  ;;  %v13766_v13 = vrot.slane %v13724_v54, %v21299_v18  ;;  %v13770_v12 = vrot.slane %v13724_v54, %v21300_v11  ;;  %v13774_v26 = vrot.slane %v13724_v54, %v21301_v46 }
0x230e   :  { %v13778_v61 = vrot.slane %v13724_v54, %v21302_v55  ;;  %v13782_v20 = vrot.slane %v13724_v54, %v21303_v25  ;;  %v13786_v41 = vrot.slane %v13724_v54, %v21304_v44  ;;  %v13790_v31 = vrot.slane %v13724_v54, %v21237_v14 }
0x230f   :  { %v13815_v57 = vsub.f32 %v20786_v30, %v13762_v63  ;;  %v20912_v35 = vsub.f32 %v20783_v6, %v13766_v13  ;;  %v13817_v38 = vsub.f32 %v20789_v33, %v13770_v12  ;;  %v13818_v48 = vsub.f32 %v20792_v47, %v13774_v26 }
0x2310   :  { %v13819_v11 = vsub.f32 %v20795_v28, %v13778_v61  ;;  %v13820_v46 = vsub.f32 %v20798_v10, %v13782_v20  ;;  %v13821_v55 = vsub.f32 %v20803_v1, %v13786_v41  ;;  %v13822_v25 = vsub.f32 %v20806_v60, %v13790_v31 }
0x2311   :  { %v13831_v44 = vmul.f32 %v13815_v57, %v13815_v57  ;;  %v13832_v14 = vmul.f32 %v20912_v35, %v20912_v35  ;;  %v13833_v30 = vmul.f32 %v13817_v38, %v13817_v38  ;;  %v13834_v0 = vmul.f32 %v13818_v48, %v13818_v48 }
0x2312   :  { %v13835_v6 = vmul.f32 %v13819_v11, %v13819_v11  ;;  %v13836_v49 = vmul.f32 %v13820_v46, %v13820_v46  ;;  %v13837_v50 = vmul.f32 %v13821_v55, %v13821_v55  ;;  %v13838_v33 = vmul.f32 %v13822_v25, %v13822_v25 }
0x2313   :  { %v13904_v2 = vcombine.low %v13831_v44, %v13832_v14  ;;  %v13905_v47 = vcombine.low %v13833_v30, %v13834_v0 }
0x2314   :  { %v13906_v24 = vcombine.low %v13835_v6, %v13836_v49  ;;  %v13907_v28 = vcombine.low %v13837_v50, %v13838_v33 }
0x2315   :  { %v13914_v10 = vrot.slane %v13904_v2, %v16478_v7  ;;  %v13921_v1 = vrot.slane %v13905_v47, %v16478_v7 }
0x2316   :  { %v13928_v60 = vrot.slane %v13906_v24, %v16478_v7  ;;  %v13935_v45 = vrot.slane %v13907_v28, %v16478_v7 }
0x2317   :  { %v13936_v56 = vcombine.low %v13914_v10, %v13921_v1  ;;  %v14420_v1 = vld [vmem:[%s20999_s13 + $0x1] ss:$0 sm:$0xff] }
0x2318   :  { %v13937_v16 = vcombine.low %v13928_v60, %v13935_v45 }
0x2319   :  { %v13944_v22 = vrot.slane %v13936_v56, %v16478_v7  ;;  %v14421_v56 = vld [vmem:[%s21000_s14 + $0x1] ss:$0 sm:$0xff] }
0x231a   :  { %v13951_v4 = vrot.slane %v13937_v16, %v16478_v7  ;;  %v14023_v19 = vrot.slane %v14421_v56, %v16478_v7 }
0x231c   :  { %v13952_v62 = vcombine.low %v13944_v22, %v13951_v4  ;;  %v14031_v8 = vcombine.high %v14023_v19, %v14023_v19 }
0x231e   :  { %v13958_v32 = vsel %vm1388_vm2, %v13952_v62, 0.0  ;;  %v13992_v62 = vrot.slane %v14420_v1, %v16478_v7 }
0x231f   :  { %13959 = vadd.xlane.f32.xlu1 %v13958_v32 }
0x2320   :  { %v14000_v27 = vcombine.high %v13992_v62, %v13992_v62 }
0x2375   :  { %v13957_v13 = vpop.xlane.xlu0 %13956 }
0x2376   :  { %v13961_v26 = vmul.f32 0.03125, %v13957_v13 }
0x2378   :  { %v13963_v31 = vadd.f32 1e-05, %v13961_v26 }
0x238f   :  { %v13206_v36 = vpop.f32.mrb[134].mxu0 }
0x2390   :  { %v20931_v29 = vadd.f32 %v21355_v17, %v13206_v36  ;;  %v15368_v34 = vpop.f32.mrb[135].mxu0 }
0x2392   :  { %v20934_v39 = vmul.f32 0.70710677, %v20931_v29 }
0x2393   :  { %v13211_v59 = vpop.f32.mrb[136].mxu0 }
0x2394   :  { %v13223_v58 = vand.u32 2147483647, %v20934_v39  ;;  %v20938_v40 = vadd.f32 %v21355_v17, %v13211_v59  ;;  %v15371_v53 = vpop.f32.mrb[137].mxu0  ;;  %v13999_v17 = vrot.slane %v13992_v62, %v16478_v7  ;;  %vm13323_vm5 = vcmp.ge.f32.partialorder %v20934_v39, 0.0 }
0x2396   :  { %v13228_v52 = vmul.f32 0.3275911, %v13223_v58  ;;  %v20941_v15 = vmul.f32 0.70710677, %v20938_v40  ;;  %v13293_v12 = vsub.f32 0.0, %v13223_v58 }
0x2398   :  { %v13233_v3 = vadd.f32 1.0, %v13228_v52  ;;  %v13224_v51 = vand.u32 2147483647, %v20941_v15  ;;  %v13298_v20 = vmul.f32 %v13293_v12, %v13223_v58  ;;  %v13338_v12 = vmul.f32 0.5, %v20931_v29 }
0x2399   :  { %vm13324_vm6 = vcmp.ge.f32.partialorder %v20941_v15, 0.0 }
0x239a   :  { %16033 = vrcp.f32 %v13233_v3  ;;  %v13229_v54 = vmul.f32 0.3275911, %v13224_v51  ;;  %v13294_v41 = vsub.f32 0.0, %v13224_v51  ;;  %v13306_v11 = vmul.f32 1.442695, %v13298_v20 }
0x239b   :  { %v14030_v3 = vrot.slane %v14023_v19, %v16478_v7 }
0x239c   :  { %v13234_v63 = vadd.f32 1.0, %v13229_v54  ;;  %v13299_v46 = vmul.f32 %v13294_v41, %v13224_v51 }
0x239e   :  { %16035 = vrcp.f32 %v13234_v63  ;;  %v13308_v30 = vmul.f32 1.442695, %v13299_v46  ;;  %v14038_v63 = vrot.slane %v14031_v8, %v16478_v7 }
0x239f   :  { %16037 = vrsqrt.f32 %v13963_v31 }
0x23a0   :  { %16039 = vpow2.f32 %v13306_v11 }
0x23a1   :  { %16041 = vpow2.f32 %v13308_v30 }
0x23a4   :  { %v16034_v61 = vpop.eup %16033 }
0x23a5   :  { %v13248_v57 = vmul.f32 1.0614054, %v16034_v61 }
0x23a7   :  { %v13253_v38 = vadd.f32 -1.4531521, %v13248_v57 }
0x23a8   :  { %v16036_v48 = vpop.eup %16035 }
0x23a9   :  { %v13258_v55 = vmul.f32 %v16034_v61, %v13253_v38  ;;  %v13249_v25 = vmul.f32 1.0614054, %v16036_v48  ;;  %v16038_v10 = vpop.eup %16037 }
0x23aa   :  { %v16040_v4 = vpop.eup %16039  ;;  %v13972_v32 = vrot.slane %v16038_v10, %v21298_v23  ;;  %v14007_v23 = vrot.slane %v14000_v27, %v16478_v7 }
0x23ab   :  { %v13263_v44 = vadd.f32 1.4214138, %v13258_v55  ;;  %v13254_v14 = vadd.f32 -1.4531521, %v13249_v25  ;;  %v16042_v36 = vpop.eup %16041  ;;  %v14422_v25 = vld [vmem:[%s21002_s16] ss:$0 sm:$0xff] }
0x23ac   :  { %v13960_v0 = vpop.xlane.xlu1 %13959  ;;  %v13979_v34 = vmul.f32 %v13972_v32, %v20884_v21 }
0x23ad   :  { %v13268_v6 = vmul.f32 %v16034_v61, %v13263_v44  ;;  %v13259_v49 = vmul.f32 %v16036_v48, %v13254_v14  ;;  %v13962_v50 = vmul.f32 0.03125, %v13960_v0 }
0x23ae   :  { %v14010_v13 = vmul.f32 %v13999_v17, %v13979_v34 }
0x23af   :  { %v13273_v33 = vadd.f32 -0.28449672, %v13268_v6  ;;  %v13264_v2 = vadd.f32 1.4214138, %v13259_v49  ;;  %v13964_v47 = vadd.f32 1e-05, %v13962_v50 }
0x23b0   :  { %v14041_v31 = vadd.f32 %v14030_v3, %v14010_v13 }
0x23b1   :  { %v13278_v24 = vmul.f32 %v16034_v61, %v13273_v33  ;;  %v13269_v28 = vmul.f32 %v16036_v48, %v13264_v2  ;;  %16043 = vrsqrt.f32 %v13964_v47 }
0x23b3   :  { %v13283_v60 = vadd.f32 0.2548296, %v13278_v24  ;;  %v13274_v45 = vadd.f32 -0.28449672, %v13269_v28 }
0x23b5   :  { %v13288_v16 = vmul.f32 %v16034_v61, %v13283_v60  ;;  %v13279_v22 = vmul.f32 %v16036_v48, %v13274_v45 }
0x23b7   :  { %v13313_v43 = vmul.f32 %v16040_v4, %v13288_v16  ;;  %v13284_v5 = vadd.f32 0.2548296, %v13279_v22 }
0x23b9   :  { %v13318_v37 = vsub.f32 1.0, %v13313_v43  ;;  %v13289_v9 = vmul.f32 %v16036_v48, %v13284_v5 }
0x23bb   :  { %v16044_v59 = vpop.eup %16043  ;;  %v13328_v58 = vsub.f32 0.0, %v13318_v37  ;;  %v13314_v53 = vmul.f32 %v16042_v36, %v13289_v9 }
0x23bc   :  { %v13976_v52 = vrot.slane %v16044_v59, %v21299_v18  ;;  %v13339_v18 = vmul.f32 0.5, %v20938_v40 }
0x23bd   :  { %v13333_v51 = vsel %vm13323_vm5, %v13318_v37, %v13328_v58  ;;  %v13319_v54 = vsub.f32 1.0, %v13314_v53 }
0x23be   :  { %v13343_v26 = vadd.f32 1.0, %v13333_v51  ;;  %v13980_v21 = vmul.f32 %v13976_v52, %v20912_v35 }
0x23bf   :  { %v13329_v61 = vsub.f32 0.0, %v13319_v54 }
0x23c0   :  { %v13348_v20 = vmul.f32 %v13343_v26, %v13338_v12  ;;  %v14011_v39 = vmul.f32 %v14007_v23, %v13980_v21 }
0x23c1   :  { %v13334_v41 = vsel %vm13324_vm6, %v13319_v54, %v13329_v61 }
0x23c2   :  { %v13344_v57 = vadd.f32 1.0, %v13334_v41  ;;  %v14042_v38 = vadd.f32 %v14038_v63, %v14011_v39  ;;  %15390 = vmatmul.mubr.msk.f32.gmra.mrb[140].mxu1 %vm1388_vm2, %v13348_v20 }
0x23c3   :  { %15392 = vmatprep.mubr.msk.f32.mxu1 %vm16244_vm0, %v21258_v42 }
0x23c4   :  { %v13349_v29 = vmul.f32 %v13344_v57, %v13339_v18  ;;  %v14056_v48 = vcombine.low %v14041_v31, %v14042_v38 }
0x23c6   :  { %15393 = vmatmul.mubr.msk.f32.gmra.mrb[142].mxu1 %vm1388_vm2, %v13349_v29  ;;  %v14063_v35 = vrot.slane %v14056_v48, %v16478_v7 }
0x23c8   :  { %v14070_v15 = vrot.slane %v14063_v35, %v16478_v7 }
0x23ca   :  { %15404 = vmatmul.mubr.msk.f32.vlgmr.msra.gmra.mrb[138].mxu0 %vm1388_vm2, %v14070_v15 }
0x2495   :  { %v13458_v11 = vpop.f32.mrb[140].mxu1 }
0x2496   :  { %v15391_v46 = vpop.f32.mrb[141].mxu1 }
0x2499   :  { %v13462_v40 = vpop.f32.mrb[142].mxu1 }
0x249a   :  { %v15394_v55 = vpop.f32.mrb[143].mxu1 }
0x249d   :  { %v14139_v42 = vpop.f32.mrb[138].mxu0 }
0x249e   :  { %v14140_v44 = vadd.f32 %v14422_v25, %v14139_v42  ;;  %v15405_v14 = vpop.f32.mrb[139].mxu0 }
0x24a0   :  { %14143 = vst [vmem:[#allocation14] sm:$0x3] %v14140_v44 }
0x24a1   :  { %16211 = shalt.err (!%p16208_p4)
}
0x24a2   :  { %s16212_s27 = scalar_lea.hbm %s21003_s17, 32 }
0x24a3   :  { %p16213_p5 = scmp.ne.s32.totalorder %s21003_s17, %s16212_s27  ;;  %p16216_p6 = scmp.lt.u32.totalorder %s16212_s27, %s21003_s17 }
0x24a5   :  { %p16218_p7 = pnand %p16216_p6, %p16213_p5 }
0x24a7   :  { %16221 = shalt.err (!%p16218_p7)
}
0x24a8   :  { %14153 = dma.vmem_to_hbm [thread:$0]  %s14151_s26, 32, %s21003_s17, [#allocation4]  }
0x24a9   :  { %16230 = dma.done.wait [#allocation4], 32  }
0x24aa   :  { %16231 = vsyncadd [#allocation4], 4294967264 }
0x24ab   :  { %14157 = vsyncpa [#allocation3], 1 }
0x24ac   :  { %14158 = vsyncpa [#allocation6], 1 }
0x24ad   :  { %14159 = vsyncpa [#allocation9], 1 }
0x24ae   :  { %14160 = vsyncpa [#allocation12], 1 }
0x24af   :  { %14161 = vsyncpa [#allocation4], 1 }

</bundles_post_ra>
